<compile_context>
chip_gen: v5e
topology: v5e:2x2
jax: 0.10.0
libtpu: 0.0.40
codegen_flags: <defaults>
</compile_context>

<pallas_src>
import functools
import math

import jax
import jax.numpy as jnp
from jax.experimental import pallas as pl
from jax.experimental.pallas import tpu as pltpu

# ----------------------------- config (scaled down) -------------------------
BATCH = 2
TIMESTEPS = 20
INPUT_SIZE = 8                       # original 116
NUM_CHANNELS = [16] * 5              # original [64] * 5
KERNEL_SIZE = 3                      # original 15
N_HIDDEN = [16, 12, 8]               # original [64, 50, 10]
CENTR_SIZE = N_HIDDEN[-1]            # original 10
N_CLUSTERS = 4
ALPHA = 1.0
TCN_DILATIONS = [2 ** i for i in range(len(NUM_CHANNELS))]
DRNN_DILATIONS = [1, 4, 16]

_VMEM = pl.BlockSpec(memory_space=pltpu.MemorySpace.VMEM)


# ----------------------------- fused TemporalBlock kernel --------------------
def _tblock_kernel(x_ref, w1_ref, b1_ref, w2_ref, b2_ref, *rest,
                   k, dil, t, has_down):
    """One full TemporalBlock for one batch element.

    x_ref : (T + pad, Cin) causally left-padded input (channel-last).
    w1/w2 : (k, Cin, Cout) / (k, Cout, Cout); b1/b2/bd : (1, Cout).
    y_ref : (1, T, Cout) output;  h1_scr : (T + pad, Cout) VMEM scratch.
    Causal dilated conv = sum_j x[j*dil : j*dil+T] @ w[j]   (shifted matmuls).
    """
    if has_down:
        wd_ref, bd_ref, y_ref, h1_scr = rest
    else:
        y_ref, h1_scr = rest
        wd_ref = bd_ref = None

    pad = (k - 1) * dil
    cout = y_ref.shape[-1]
    x = x_ref[0]                                            # (T+pad, Cin)

    # ---- conv1 + bias + ReLU (dropout == identity at inference) ----
    acc = jnp.dot(x[0:t, :], w1_ref[0], preferred_element_type=jnp.float32)
    for j in range(1, k):
        acc = acc + jnp.dot(x[j * dil:j * dil + t, :], w1_ref[j],
                            preferred_element_type=jnp.float32)
    h1 = jnp.maximum(acc + b1_ref[...], 0.0)                # (T, Cout)
    # TODO(synk): nn.Dropout is treated as identity (inference semantics);
    #             weight_norm is folded into the effective conv weights.

    # stage conv1 output with its own causal left pad for conv2
    h1_scr[0:pad, :] = jnp.zeros((pad, cout), jnp.float32)
    h1_scr[pad:, :] = h1
    hp = h1_scr[...]                                        # (T+pad, Cout)

    # ---- conv2 + bias + ReLU ----
    acc2 = jnp.dot(hp[0:t, :], w2_ref[0], preferred_element_type=jnp.float32)
    for j in range(1, k):
        acc2 = acc2 + jnp.dot(hp[j * dil:j * dil + t, :], w2_ref[j],
                              preferred_element_type=jnp.float32)
    out = jnp.maximum(acc2 + b2_ref[...], 0.0)              # (T, Cout)

    # ---- residual (1x1 downsample when Cin != Cout) + final ReLU ----
    if has_down:
        res = jnp.dot(x[pad:, :], wd_ref[...],
                      preferred_element_type=jnp.float32) + bd_ref[...]
    else:
        res = x[pad:, :]
    y_ref[0] = jnp.maximum(out + res, 0.0)


def temporal_block(x_btc, blk, dilation):
    """x: (B, T, Cin) channel-last -> (B, T, Cout); single fused pallas_call."""
    bsz, t, cin = x_btc.shape
    k, _, cout = blk["w1"].shape
    pad = (k - 1) * dilation
    tp = t + pad
    xp = jnp.pad(x_btc, ((0, 0), (pad, 0), (0, 0)))         # causal left pad
    has_down = "wd" in blk

    inputs = [xp, blk["w1"], blk["b1"], blk["w2"], blk["b2"]]
    in_specs = [
        pl.BlockSpec((1, tp, cin), lambda b: (b, 0, 0)),
        pl.BlockSpec((k, cin, cout), lambda b: (0, 0, 0)),
        pl.BlockSpec((1, cout), lambda b: (0, 0)),
        pl.BlockSpec((k, cout, cout), lambda b: (0, 0, 0)),
        pl.BlockSpec((1, cout), lambda b: (0, 0)),
    ]
    if has_down:
        inputs += [blk["wd"], blk["bd"]]
        in_specs += [pl.BlockSpec((cin, cout), lambda b: (0, 0)),
                     pl.BlockSpec((1, cout), lambda b: (0, 0))]

    return pl.pallas_call(
        functools.partial(_tblock_kernel, k=k, dil=dilation, t=t,
                          has_down=has_down),
        out_shape=jax.ShapeDtypeStruct((bsz, t, cout), jnp.float32),
        grid=(bsz,),
        in_specs=in_specs,
        out_specs=pl.BlockSpec((1, t, cout), lambda b: (b, 0, 0)),
        scratch_shapes=[pltpu.VMEM((tp, cout), jnp.float32)],
        compiler_params=pltpu.CompilerParams(
            dimension_semantics=("parallel",)),
    )(*inputs)


# ----------------------------- fused GRU-layer kernel ------------------------
def _gru_layer_kernel(x_ref, wih_ref, whh_ref, bih_ref, bhh_ref, y_ref,
                      gi_scr, h_scr, *, t_steps, bc, hidden):
    """Full GRU sequence; PyTorch gate order (r, z, n); h0 = 0.

    x_ref : (T*Bc, In) flattened time-major input.
    wih   : (In, 3H) fused gate weights; whh : (H, 3H); biases (1, 3H).
    The input projection for ALL steps is ONE large matmul (hoisted off the
    serial recurrence); only the recurrent matmul stays in the time loop.
    """
    # Hoisted input-to-hidden projection: one big MXU matmul.
    gi = jnp.dot(x_ref[...], wih_ref[...],
                 preferred_element_type=jnp.float32) + bih_ref[...]   # (T*Bc,3H)
    # Scatter into (T, Bc, 3H) scratch for cheap per-step leading-dim access.
    for tt in range(t_steps):
        gi_scr[tt] = gi[tt * bc:(tt + 1) * bc, :]

    h_scr[...] = jnp.zeros_like(h_scr)

    def step(tt, carry):
        h = h_scr[...]                                               # (Bc, H)
        gh = jnp.dot(h, whh_ref[...],
                     preferred_element_type=jnp.float32) + bhh_ref[...]  # (Bc,3H)
        gi_t = gi_scr[tt]                                            # (Bc, 3H)
        r = jax.nn.sigmoid(gi_t[:, 0:hidden] + gh[:, 0:hidden])
        z = jax.nn.sigmoid(gi_t[:, hidden:2 * hidden] + gh[:, hidden:2 * hidden])
        n = jnp.tanh(gi_t[:, 2 * hidden:3 * hidden]
                     + r * gh[:, 2 * hidden:3 * hidden])
        h_new = (1.0 - z) * n + z * h
        h_scr[...] = h_new
        y_ref[tt] = h_new.astype(y_ref.dtype)
        return carry

    jax.lax.fori_loop(0, t_steps, step, 0)


def gru_layer(x_tbf, gp):
    """x_tbf: (T, Bc, In) time-major -> (T, Bc, H). Single fused pallas_call."""
    t, bc, n_in = x_tbf.shape
    hidden = gp["whh"].shape[0]
    x2d = x_tbf.reshape(t * bc, n_in)          # zero-cost relabel in XLA
    return pl.pallas_call(
        functools.partial(_gru_layer_kernel, t_steps=t, bc=bc, hidden=hidden),
        out_shape=jax.ShapeDtypeStruct((t, bc, hidden), jnp.float32),
        in_specs=[_VMEM] * 5,
        out_specs=_VMEM,
        scratch_shapes=[pltpu.VMEM((t, bc, 3 * hidden), jnp.float32),
                        pltpu.VMEM((bc, hidden), jnp.float32)],
    )(x2d, gp["wih"], gp["whh"], gp["bih"], gp["bhh"])


# ----------------------------- fused kmeans + Q/P kernel ----------------------
def _cluster_stats_kernel(h_ref, f_ref, c_ref, loss_ref, q_ref, p_ref,
                          *, alpha, eps):
    h = h_ref[...]                              # (N, D) embedding
    f = f_ref[...]                              # (N, K) cluster indicator
    c = c_ref[...]                              # (K, D) centroids

    # k-means loss: trace(h h^T) - trace(F^T h h^T F).  The trace identity
    # t1 - t2 = sum(h*h) - ||F^T h||_F^2 is exact for any F (orthonormality of
    # F is only needed for this to equal the true k-means objective).
    g = jax.lax.dot_general(f, h, (((0,), (0,)), ((), ())),
                            preferred_element_type=jnp.float32)      # (K, D)
    loss_ref[...] = jnp.sum(h * h, keepdims=True) - jnp.sum(g * g, keepdims=True)

    # cosine similarity (matches torch.nn.CosineSimilarity, eps-clamped denom)
    dots = jax.lax.dot_general(h, c, (((1,), (1,)), ((), ())),
                               preferred_element_type=jnp.float32)   # (N, K)
    hn = jnp.sqrt(jnp.sum(h * h, axis=1, keepdims=True))             # (N, 1)
    cn = jnp.sqrt(jnp.sum(c * c, axis=1, keepdims=True))             # (K, 1)
    denom = jax.lax.dot_general(hn, cn, (((1,), (1,)), ((), ())),
                                preferred_element_type=jnp.float32)  # (N, K)
    sim = dots / jnp.maximum(denom, eps)

    # Q = (1 + sim/alpha) ** (-(alpha+1)/2)  (matches the reference module
    # verbatim — it applies the student-t form to cosine similarity).
    expo = -(alpha + 1.0) / 2.0
    base = 1.0 + sim / alpha
    if expo == -1.0:                    # alpha == 1: exact reciprocal
        q = 1.0 / base
    else:                               # general alpha
        q = jnp.exp(expo * jnp.log(base))
    q = q / jnp.sum(q, axis=1, keepdims=True)
    p = (q * q) / jnp.sum(q, axis=0, keepdims=True)
    p = p / jnp.sum(p, axis=1, keepdims=True)
    q_ref[...] = q
    p_ref[...] = p


def cluster_stats(aa, f, centers):
    n = aa.shape[0]
    k = centers.shape[0]
    return pl.pallas_call(
        functools.partial(_cluster_stats_kernel, alpha=ALPHA, eps=1e-8),
        out_shape=(jax.ShapeDtypeStruct((1, 1), jnp.float32),
                   jax.ShapeDtypeStruct((n, k), jnp.float32),
                   jax.ShapeDtypeStruct((n, k), jnp.float32)),
        in_specs=[_VMEM, _VMEM, _VMEM],
        out_specs=(_VMEM, _VMEM, _VMEM),
    )(aa, f, centers)


# ----------------------------- model glue (plain JAX) ------------------------
def drnn_layer(x_tbc, rate, gp):
    """Dilated GRU layer mirroring DRNN.drnn_layer (pad / interleave), but the
    strided-slice gather + concat is replaced with equivalent zero-copy
    reshapes: dil[t, j*B + b] == x[t*rate + j, b]."""
    t, b, c = x_tbc.shape
    td = -(-t // rate)
    padlen = td * rate - t
    if padlen:
        x_tbc = jnp.concatenate(
            [x_tbc, jnp.zeros((padlen, b, c), jnp.float32)], axis=0)
    dil = x_tbc.reshape(td, rate * b, c)            # (Td, B*rate, C)
    y = gru_layer(dil, gp)                          # (Td, B*rate, H)
    h = y.shape[-1]
    inter = y.reshape(td * rate, b, h)              # inverse interleave
    return inter[:t]


def drnn_forward(feat_btc, drnn_params):
    x = jnp.transpose(feat_btc, (1, 0, 2))          # (T, B, C) time-major
    for gp, rate in zip(drnn_params, DRNN_DILATIONS):
        x = drnn_layer(x, rate, gp)
    return jnp.transpose(x, (1, 0, 2))              # (B, T, n_hidden[-1])


def decoder_forward(emb_bth, dec_params):
    x = jnp.transpose(emb_bth, (1, 0, 2))           # (T, B, H)
    for gp in dec_params:
        x = gru_layer(x, gp)
    return jnp.transpose(x, (1, 0, 2))              # (B, T, INPUT_SIZE)


def cluster_net_forward(params, x_btf):
    # TCN encoder (channel-last layout; mathematically identical to the NCT
    # Conv2d(1,k) stack of the reference, permutes folded away).
    feat = x_btf                                    # (B, T, INPUT_SIZE)
    for blk, dil in zip(params["tcn"], TCN_DILATIONS):
        feat = temporal_block(feat, blk, dil)       # (B, T, C)

    emb = drnn_forward(feat, params["drnn"])        # (B, T, CENTR_SIZE)
    aa = emb.reshape(-1, CENTR_SIZE)                # (B*T, CENTR_SIZE)
    x_recons = decoder_forward(emb, params["dec"])  # (B, T, INPUT_SIZE)
    loss, q, p = cluster_stats(aa, params["F"], params["centers"])
    return aa, x_recons, loss[0, 0], q, p


# ----------------------------- deterministic init ----------------------------
def init_params(key):
    keys = iter(jax.random.split(key, 128))

    def nrm(shape, scale):
        return scale * jax.random.normal(next(keys), shape, dtype=jnp.float32)

    # TCN temporal blocks (weights stored as (k, Cin, Cout) for shifted matmuls)
    blocks = []
    for i, cout in enumerate(NUM_CHANNELS):
        cin = INPUT_SIZE if i == 0 else NUM_CHANNELS[i - 1]
        blk = {
            "w1": nrm((KERNEL_SIZE, cin, cout), 0.01),
            "b1": nrm((1, cout), 0.01),
            "w2": nrm((KERNEL_SIZE, cout, cout), 0.01),
            "b2": nrm((1, cout), 0.01),
        }
        if cin != cout:                      # 1x1 Conv1d downsample
            blk["wd"] = nrm((cin, cout), 0.01)
            blk["bd"] = nrm((1, cout), 0.01)
        blocks.append(blk)

    def gru(inp, hid):
        # fused gate layout: columns [r | z | n] (PyTorch gate order)
        return {
            "wih": nrm((inp, 3 * hid), 0.1),
            "whh": nrm((hid, 3 * hid), 0.1),
            "bih": nrm((1, 3 * hid), 0.1),
            "bhh": nrm((1, 3 * hid), 0.1),
        }

    drnn = [gru(NUM_CHANNELS[-1], N_HIDDEN[0]),
            gru(N_HIDDEN[0], N_HIDDEN[1]),
            gru(N_HIDDEN[1], N_HIDDEN[2])]
    dec = [gru(N_HIDDEN[2], N_HIDDEN[1]),
           gru(N_HIDDEN[1], N_HIDDEN[0]),
           gru(N_HIDDEN[0], INPUT_SIZE)]

    # k-means cluster-indicator matrix F: orthonormal columns (stand-in for
    # torch orthogonal_ init / checkpoint's cluster_indicator_matrix).
    f0 = jax.random.normal(next(keys), (BATCH * TIMESTEPS, N_CLUSTERS),
                           dtype=jnp.float32)
    f_orth, _ = jnp.linalg.qr(f0)

    # cluster centers: xavier-uniform (K, CENTR_SIZE)
    bound = math.sqrt(6.0 / (N_CLUSTERS + CENTR_SIZE))
    centers = jax.random.uniform(next(keys), (N_CLUSTERS, CENTR_SIZE),
                                 minval=-bound, maxval=bound, dtype=jnp.float32)

    return {"tcn": blocks, "drnn": drnn, "dec": dec,
            "F": f_orth, "centers": centers}


# ----------------------------- main ------------------------------------------
if __name__ == "__main__":
    key = jax.random.PRNGKey(0)
    kx, kp = jax.random.split(key)
    x = jax.random.normal(kx, (BATCH, TIMESTEPS, INPUT_SIZE), dtype=jnp.float32)
    params = init_params(kp)

    fwd = jax.jit(cluster_net_forward)
    aa, x_recons, km, q, p = fwd(params, x)
    jax.block_until_ready((aa, x_recons, km, q, p))

    assert aa.shape == (BATCH * TIMESTEPS, CENTR_SIZE)
    assert x_recons.shape == (BATCH, TIMESTEPS, INPUT_SIZE)
    assert km.shape == ()
    assert q.shape == (BATCH * TIMESTEPS, N_CLUSTERS)
    assert p.shape == (BATCH * TIMESTEPS, N_CLUSTERS)
    print("KERNEL_OK")
</pallas_src>

<mosaic_0001>
module attributes {stable_mosaic.version = 11 : i64} {
  func.func @_tblock_kernel(%arg0: i32, %arg1: memref<1x22x8xf32, #tpu.memory_space<vmem>>, %arg2: memref<3x8x16xf32, #tpu.memory_space<vmem>>, %arg3: memref<1x16xf32, #tpu.memory_space<vmem>>, %arg4: memref<3x16x16xf32, #tpu.memory_space<vmem>>, %arg5: memref<1x16xf32, #tpu.memory_space<vmem>>, %arg6: memref<8x16xf32, #tpu.memory_space<vmem>>, %arg7: memref<1x16xf32, #tpu.memory_space<vmem>>, %arg8: memref<1x20x16xf32, #tpu.memory_space<vmem>>, %arg9: memref<22x16xf32, #tpu.memory_space<vmem>>) attributes {dimension_semantics = [#tpu.dimension_semantics<parallel>], iteration_bounds = array<i64: 2>, scalar_prefetch = 0 : i64, scratch_operands = 1 : i64, tpu.core_type = #tpu.core_type<tc>, window_params = [{transform_indices = @transform_0, window_bounds = array<i64: 1, 22, 8>}, {pipeline_mode = #tpu.pipeline_mode<synchronous>, transform_indices = @transform_1, window_bounds = array<i64: 3, 8, 16>}, {pipeline_mode = #tpu.pipeline_mode<synchronous>, transform_indices = @transform_2, window_bounds = array<i64: 1, 16>}, {pipeline_mode = #tpu.pipeline_mode<synchronous>, transform_indices = @transform_3, window_bounds = array<i64: 3, 16, 16>}, {pipeline_mode = #tpu.pipeline_mode<synchronous>, transform_indices = @transform_4, window_bounds = array<i64: 1, 16>}, {pipeline_mode = #tpu.pipeline_mode<synchronous>, transform_indices = @transform_5, window_bounds = array<i64: 8, 16>}, {pipeline_mode = #tpu.pipeline_mode<synchronous>, transform_indices = @transform_6, window_bounds = array<i64: 1, 16>}, {transform_indices = @transform_7, window_bounds = array<i64: 1, 20, 16>}]} {
    %c0 = arith.constant 0 : index
    %c0_0 = arith.constant 0 : index
    %c0_1 = arith.constant 0 : index
    %0 = vector.load %arg1[%c0, %c0_0, %c0_1] : memref<1x22x8xf32, #tpu.memory_space<vmem>>, vector<1x22x8xf32>
    %1 = vector.shape_cast %0 : vector<1x22x8xf32> to vector<22x8xf32>
    %2 = vector.extract_strided_slice %1 {offsets = [0, 0], sizes = [20, 8], strides = [1, 1]} : vector<22x8xf32> to vector<20x8xf32>
    %c0_2 = arith.constant 0 : index
    %c0_3 = arith.constant 0 : index
    %c0_4 = arith.constant 0 : index
    %3 = vector.load %arg2[%c0_2, %c0_3, %c0_4] : memref<3x8x16xf32, #tpu.memory_space<vmem>>, vector<1x8x16xf32>
    %4 = vector.shape_cast %3 : vector<1x8x16xf32> to vector<8x16xf32>
    %cst = arith.constant dense<0.000000e+00> : vector<20x16xf32>
    %5 = tpu.matmul %2, %4, %cst {dimension_numbers = #tpu.dot_dimension_numbers<[1], [0], [0], [1], [0, 0, 1, 1], [], []>} : vector<20x8xf32>, vector<8x16xf32>, vector<20x16xf32> -> vector<20x16xf32>
    %6 = vector.extract_strided_slice %1 {offsets = [1, 0], sizes = [20, 8], strides = [1, 1]} : vector<22x8xf32> to vector<20x8xf32>
    %c1 = arith.constant 1 : index
    %c0_5 = arith.constant 0 : index
    %c0_6 = arith.constant 0 : index
    %7 = vector.load %arg2[%c1, %c0_5, %c0_6] : memref<3x8x16xf32, #tpu.memory_space<vmem>>, vector<1x8x16xf32>
    %8 = vector.shape_cast %7 : vector<1x8x16xf32> to vector<8x16xf32>
    %cst_7 = arith.constant dense<0.000000e+00> : vector<20x16xf32>
    %9 = tpu.matmul %6, %8, %cst_7 {dimension_numbers = #tpu.dot_dimension_numbers<[1], [0], [0], [1], [0, 0, 1, 1], [], []>} : vector<20x8xf32>, vector<8x16xf32>, vector<20x16xf32> -> vector<20x16xf32>
    %10 = arith.addf %5, %9 : vector<20x16xf32>
    %11 = vector.extract_strided_slice %1 {offsets = [2, 0], sizes = [20, 8], strides = [1, 1]} : vector<22x8xf32> to vector<20x8xf32>
    %c2 = arith.constant 2 : index
    %c0_8 = arith.constant 0 : index
    %c0_9 = arith.constant 0 : index
    %12 = vector.load %arg2[%c2, %c0_8, %c0_9] : memref<3x8x16xf32, #tpu.memory_space<vmem>>, vector<1x8x16xf32>
    %13 = vector.shape_cast %12 : vector<1x8x16xf32> to vector<8x16xf32>
    %cst_10 = arith.constant dense<0.000000e+00> : vector<20x16xf32>
    %14 = tpu.matmul %11, %13, %cst_10 {dimension_numbers = #tpu.dot_dimension_numbers<[1], [0], [0], [1], [0, 0, 1, 1], [], []>} : vector<20x8xf32>, vector<8x16xf32>, vector<20x16xf32> -> vector<20x16xf32>
    %15 = arith.addf %10, %14 : vector<20x16xf32>
    %c0_11 = arith.constant 0 : index
    %c0_12 = arith.constant 0 : index
    %16 = vector.load %arg3[%c0_11, %c0_12] : memref<1x16xf32, #tpu.memory_space<vmem>>, vector<1x16xf32>
    %17 = vector.broadcast %16 : vector<1x16xf32> to vector<20x16xf32>
    %18 = arith.addf %15, %17 : vector<20x16xf32>
    %cst_13 = arith.constant 0.000000e+00 : f32
    %19 = vector.broadcast %cst_13 : f32 to vector<20x16xf32>
    %20 = arith.maximumf %18, %19 : vector<20x16xf32>
    %cst_14 = arith.constant 0.000000e+00 : f32
    %21 = vector.broadcast %cst_14 : f32 to vector<2x16xf32>
    %c0_15 = arith.constant 0 : index
    %c0_16 = arith.constant 0 : index
    %22 = vector.load %arg9[%c0_15, %c0_16] : memref<22x16xf32, #tpu.memory_space<vmem>>, vector<2x16xf32>
    tpu.vector_store %arg9[%c0_15, %c0_16], %21 {strides = array<i32>} : memref<22x16xf32, #tpu.memory_space<vmem>>, vector<2x16xf32>,
    %c2_17 = arith.constant 2 : index
    %c0_18 = arith.constant 0 : index
    %23 = vector.load %arg9[%c2_17, %c0_18] : memref<22x16xf32, #tpu.memory_space<vmem>>, vector<20x16xf32>
    tpu.vector_store %arg9[%c2_17, %c0_18], %20 {strides = array<i32>} : memref<22x16xf32, #tpu.memory_space<vmem>>, vector<20x16xf32>,
    %c0_19 = arith.constant 0 : index
    %c0_20 = arith.constant 0 : index
    %24 = vector.load %arg9[%c0_19, %c0_20] : memref<22x16xf32, #tpu.memory_space<vmem>>, vector<22x16xf32>
    %25 = vector.extract_strided_slice %24 {offsets = [0, 0], sizes = [20, 16], strides = [1, 1]} : vector<22x16xf32> to vector<20x16xf32>
    %c0_21 = arith.constant 0 : index
    %c0_22 = arith.constant 0 : index
    %c0_23 = arith.constant 0 : index
    %26 = vector.load %arg4[%c0_21, %c0_22, %c0_23] : memref<3x16x16xf32, #tpu.memory_space<vmem>>, vector<1x16x16xf32>
    %27 = vector.shape_cast %26 : vector<1x16x16xf32> to vector<16x16xf32>
    %cst_24 = arith.constant dense<0.000000e+00> : vector<20x16xf32>
    %28 = tpu.matmul %25, %27, %cst_24 {dimension_numbers = #tpu.dot_dimension_numbers<[1], [0], [0], [1], [0, 0, 1, 1], [], []>} : vector<20x16xf32>, vector<16x16xf32>, vector<20x16xf32> -> vector<20x16xf32>
    %29 = vector.extract_strided_slice %24 {offsets = [1, 0], sizes = [20, 16], strides = [1, 1]} : vector<22x16xf32> to vector<20x16xf32>
    %c1_25 = arith.constant 1 : index
    %c0_26 = arith.constant 0 : index
    %c0_27 = arith.constant 0 : index
    %30 = vector.load %arg4[%c1_25, %c0_26, %c0_27] : memref<3x16x16xf32, #tpu.memory_space<vmem>>, vector<1x16x16xf32>
    %31 = vector.shape_cast %30 : vector<1x16x16xf32> to vector<16x16xf32>
    %cst_28 = arith.constant dense<0.000000e+00> : vector<20x16xf32>
    %32 = tpu.matmul %29, %31, %cst_28 {dimension_numbers = #tpu.dot_dimension_numbers<[1], [0], [0], [1], [0, 0, 1, 1], [], []>} : vector<20x16xf32>, vector<16x16xf32>, vector<20x16xf32> -> vector<20x16xf32>
    %33 = arith.addf %28, %32 : vector<20x16xf32>
    %34 = vector.extract_strided_slice %24 {offsets = [2, 0], sizes = [20, 16], strides = [1, 1]} : vector<22x16xf32> to vector<20x16xf32>
    %c2_29 = arith.constant 2 : index
    %c0_30 = arith.constant 0 : index
    %c0_31 = arith.constant 0 : index
    %35 = vector.load %arg4[%c2_29, %c0_30, %c0_31] : memref<3x16x16xf32, #tpu.memory_space<vmem>>, vector<1x16x16xf32>
    %36 = vector.shape_cast %35 : vector<1x16x16xf32> to vector<16x16xf32>
    %cst_32 = arith.constant dense<0.000000e+00> : vector<20x16xf32>
    %37 = tpu.matmul %34, %36, %cst_32 {dimension_numbers = #tpu.dot_dimension_numbers<[1], [0], [0], [1], [0, 0, 1, 1], [], []>} : vector<20x16xf32>, vector<16x16xf32>, vector<20x16xf32> -> vector<20x16xf32>
    %38 = arith.addf %33, %37 : vector<20x16xf32>
    %c0_33 = arith.constant 0 : index
    %c0_34 = arith.constant 0 : index
    %39 = vector.load %arg5[%c0_33, %c0_34] : memref<1x16xf32, #tpu.memory_space<vmem>>, vector<1x16xf32>
    %40 = vector.broadcast %39 : vector<1x16xf32> to vector<20x16xf32>
    %41 = arith.addf %38, %40 : vector<20x16xf32>
    %cst_35 = arith.constant 0.000000e+00 : f32
    %42 = vector.broadcast %cst_35 : f32 to vector<20x16xf32>
    %43 = arith.maximumf %41, %42 : vector<20x16xf32>
    %44 = vector.extract_strided_slice %1 {offsets = [2, 0], sizes = [20, 8], strides = [1, 1]} : vector<22x8xf32> to vector<20x8xf32>
    %c0_36 = arith.constant 0 : index
    %c0_37 = arith.constant 0 : index
    %45 = vector.load %arg6[%c0_36, %c0_37] : memref<8x16xf32, #tpu.memory_space<vmem>>, vector<8x16xf32>
    %cst_38 = arith.constant dense<0.000000e+00> : vector<20x16xf32>
    %46 = tpu.matmul %44, %45, %cst_38 {dimension_numbers = #tpu.dot_dimension_numbers<[1], [0], [0], [1], [0, 0, 1, 1], [], []>} : vector<20x8xf32>, vector<8x16xf32>, vector<20x16xf32> -> vector<20x16xf32>
    %c0_39 = arith.constant 0 : index
    %c0_40 = arith.constant 0 : index
    %47 = vector.load %arg7[%c0_39, %c0_40] : memref<1x16xf32, #tpu.memory_space<vmem>>, vector<1x16xf32>
    %48 = vector.broadcast %47 : vector<1x16xf32> to vector<20x16xf32>
    %49 = arith.addf %46, %48 : vector<20x16xf32>
    %50 = arith.addf %43, %49 : vector<20x16xf32>
    %cst_41 = arith.constant 0.000000e+00 : f32
    %51 = vector.broadcast %cst_41 : f32 to vector<20x16xf32>
    %52 = arith.maximumf %50, %51 : vector<20x16xf32>
    %c0_42 = arith.constant 0 : index
    %c0_43 = arith.constant 0 : index
    %c0_44 = arith.constant 0 : index
    %53 = vector.load %arg8[%c0_42, %c0_43, %c0_44] : memref<1x20x16xf32, #tpu.memory_space<vmem>>, vector<1x20x16xf32>
    %54 = vector.shape_cast %53 : vector<1x20x16xf32> to vector<20x16xf32>
    %55 = vector.shape_cast %52 : vector<20x16xf32> to vector<1x20x16xf32>
    tpu.vector_store %arg8[%c0_42, %c0_43, %c0_44], %55 {strides = array<i32>} : memref<1x20x16xf32, #tpu.memory_space<vmem>>, vector<1x20x16xf32>,
    return
  }
  func.func @transform_0(%arg0: i32) -> (i32, i32, i32) {
    %c0_i32 = arith.constant 0 : i32
    %c0_i32_0 = arith.constant 0 : i32
    %c0_i32_1 = arith.constant 0 : i32
    return %arg0, %c0_i32, %c0_i32_0 : i32, i32, i32
  }
  func.func @transform_1(%arg0: i32) -> (i32, i32, i32) {
    %c0_i32 = arith.constant 0 : i32
    %c0_i32_0 = arith.constant 0 : i32
    %c0_i32_1 = arith.constant 0 : i32
    %c0_i32_2 = arith.constant 0 : i32
    return %c0_i32, %c0_i32_0, %c0_i32_1 : i32, i32, i32
  }
  func.func @transform_2(%arg0: i32) -> (i32, i32) {
    %c0_i32 = arith.constant 0 : i32
    %c0_i32_0 = arith.constant 0 : i32
    %c0_i32_1 = arith.constant 0 : i32
    return %c0_i32, %c0_i32_0 : i32, i32
  }
  func.func @transform_3(%arg0: i32) -> (i32, i32, i32) {
    %c0_i32 = arith.constant 0 : i32
    %c0_i32_0 = arith.constant 0 : i32
    %c0_i32_1 = arith.constant 0 : i32
    %c0_i32_2 = arith.constant 0 : i32
    return %c0_i32, %c0_i32_0, %c0_i32_1 : i32, i32, i32
  }
  func.func @transform_4(%arg0: i32) -> (i32, i32) {
    %c0_i32 = arith.constant 0 : i32
    %c0_i32_0 = arith.constant 0 : i32
    %c0_i32_1 = arith.constant 0 : i32
    return %c0_i32, %c0_i32_0 : i32, i32
  }
  func.func @transform_5(%arg0: i32) -> (i32, i32) {
    %c0_i32 = arith.constant 0 : i32
    %c0_i32_0 = arith.constant 0 : i32
    %c0_i32_1 = arith.constant 0 : i32
    return %c0_i32, %c0_i32_0 : i32, i32
  }
  func.func @transform_6(%arg0: i32) -> (i32, i32) {
    %c0_i32 = arith.constant 0 : i32
    %c0_i32_0 = arith.constant 0 : i32
    %c0_i32_1 = arith.constant 0 : i32
    return %c0_i32, %c0_i32_0 : i32, i32
  }
  func.func @transform_7(%arg0: i32) -> (i32, i32, i32) {
    %c0_i32 = arith.constant 0 : i32
    %c0_i32_0 = arith.constant 0 : i32
    %c0_i32_1 = arith.constant 0 : i32
    return %arg0, %c0_i32, %c0_i32_0 : i32, i32, i32
  }
}

module attributes {stable_mosaic.version = 11 : i64} {
  func.func @_tblock_kernel(%arg0: i32, %arg1: memref<1x28x16xf32, #tpu.memory_space<vmem>>, %arg2: memref<3x16x16xf32, #tpu.memory_space<vmem>>, %arg3: memref<1x16xf32, #tpu.memory_space<vmem>>, %arg4: memref<3x16x16xf32, #tpu.memory_space<vmem>>, %arg5: memref<1x16xf32, #tpu.memory_space<vmem>>, %arg6: memref<1x20x16xf32, #tpu.memory_space<vmem>>, %arg7: memref<28x16xf32, #tpu.memory_space<vmem>>) attributes {dimension_semantics = [#tpu.dimension_semantics<parallel>], iteration_bounds = array<i64: 2>, scalar_prefetch = 0 : i64, scratch_operands = 1 : i64, tpu.core_type = #tpu.core_type<tc>, window_params = [{transform_indices = @transform_0, window_bounds = array<i64: 1, 28, 16>}, {pipeline_mode = #tpu.pipeline_mode<synchronous>, transform_indices = @transform_1, window_bounds = array<i64: 3, 16, 16>}, {pipeline_mode = #tpu.pipeline_mode<synchronous>, transform_indices = @transform_2, window_bounds = array<i64: 1, 16>}, {pipeline_mode = #tpu.pipeline_mode<synchronous>, transform_indices = @transform_3, window_bounds = array<i64: 3, 16, 16>}, {pipeline_mode = #tpu.pipeline_mode<synchronous>, transform_indices = @transform_4, window_bounds = array<i64: 1, 16>}, {transform_indices = @transform_5, window_bounds = array<i64: 1, 20, 16>}]} {
    %c0 = arith.constant 0 : index
    %c0_0 = arith.constant 0 : index
    %c0_1 = arith.constant 0 : index
    %0 = vector.load %arg1[%c0, %c0_0, %c0_1] : memref<1x28x16xf32, #tpu.memory_space<vmem>>, vector<1x28x16xf32>
    %1 = vector.shape_cast %0 : vector<1x28x16xf32> to vector<28x16xf32>
    %2 = vector.extract_strided_slice %1 {offsets = [0, 0], sizes = [20, 16], strides = [1, 1]} : vector<28x16xf32> to vector<20x16xf32>
    %c0_2 = arith.constant 0 : index
    %c0_3 = arith.constant 0 : index
    %c0_4 = arith.constant 0 : index
    %3 = vector.load %arg2[%c0_2, %c0_3, %c0_4] : memref<3x16x16xf32, #tpu.memory_space<vmem>>, vector<1x16x16xf32>
    %4 = vector.shape_cast %3 : vector<1x16x16xf32> to vector<16x16xf32>
    %cst = arith.constant dense<0.000000e+00> : vector<20x16xf32>
    %5 = tpu.matmul %2, %4, %cst {dimension_numbers = #tpu.dot_dimension_numbers<[1], [0], [0], [1], [0, 0, 1, 1], [], []>} : vector<20x16xf32>, vector<16x16xf32>, vector<20x16xf32> -> vector<20x16xf32>
    %6 = vector.extract_strided_slice %1 {offsets = [4, 0], sizes = [20, 16], strides = [1, 1]} : vector<28x16xf32> to vector<20x16xf32>
    %c1 = arith.constant 1 : index
    %c0_5 = arith.constant 0 : index
    %c0_6 = arith.constant 0 : index
    %7 = vector.load %arg2[%c1, %c0_5, %c0_6] : memref<3x16x16xf32, #tpu.memory_space<vmem>>, vector<1x16x16xf32>
    %8 = vector.shape_cast %7 : vector<1x16x16xf32> to vector<16x16xf32>
    %cst_7 = arith.constant dense<0.000000e+00> : vector<20x16xf32>
    %9 = tpu.matmul %6, %8, %cst_7 {dimension_numbers = #tpu.dot_dimension_numbers<[1], [0], [0], [1], [0, 0, 1, 1], [], []>} : vector<20x16xf32>, vector<16x16xf32>, vector<20x16xf32> -> vector<20x16xf32>
    %10 = arith.addf %5, %9 : vector<20x16xf32>
    %11 = vector.extract_strided_slice %1 {offsets = [8, 0], sizes = [20, 16], strides = [1, 1]} : vector<28x16xf32> to vector<20x16xf32>
    %c2 = arith.constant 2 : index
    %c0_8 = arith.constant 0 : index
    %c0_9 = arith.constant 0 : index
    %12 = vector.load %arg2[%c2, %c0_8, %c0_9] : memref<3x16x16xf32, #tpu.memory_space<vmem>>, vector<1x16x16xf32>
    %13 = vector.shape_cast %12 : vector<1x16x16xf32> to vector<16x16xf32>
    %cst_10 = arith.constant dense<0.000000e+00> : vector<20x16xf32>
    %14 = tpu.matmul %11, %13, %cst_10 {dimension_numbers = #tpu.dot_dimension_numbers<[1], [0], [0], [1], [0, 0, 1, 1], [], []>} : vector<20x16xf32>, vector<16x16xf32>, vector<20x16xf32> -> vector<20x16xf32>
    %15 = arith.addf %10, %14 : vector<20x16xf32>
    %c0_11 = arith.constant 0 : index
    %c0_12 = arith.constant 0 : index
    %16 = vector.load %arg3[%c0_11, %c0_12] : memref<1x16xf32, #tpu.memory_space<vmem>>, vector<1x16xf32>
    %17 = vector.broadcast %16 : vector<1x16xf32> to vector<20x16xf32>
    %18 = arith.addf %15, %17 : vector<20x16xf32>
    %cst_13 = arith.constant 0.000000e+00 : f32
    %19 = vector.broadcast %cst_13 : f32 to vector<20x16xf32>
    %20 = arith.maximumf %18, %19 : vector<20x16xf32>
    %cst_14 = arith.constant 0.000000e+00 : f32
    %21 = vector.broadcast %cst_14 : f32 to vector<8x16xf32>
    %c0_15 = arith.constant 0 : index
    %c0_16 = arith.constant 0 : index
    %22 = vector.load %arg7[%c0_15, %c0_16] : memref<28x16xf32, #tpu.memory_space<vmem>>, vector<8x16xf32>
    tpu.vector_store %arg7[%c0_15, %c0_16], %21 {strides = array<i32>} : memref<28x16xf32, #tpu.memory_space<vmem>>, vector<8x16xf32>,
    %c8 = arith.constant 8 : index
    %c0_17 = arith.constant 0 : index
    %23 = vector.load %arg7[%c8, %c0_17] : memref<28x16xf32, #tpu.memory_space<vmem>>, vector<20x16xf32>
    tpu.vector_store %arg7[%c8, %c0_17], %20 {strides = array<i32>} : memref<28x16xf32, #tpu.memory_space<vmem>>, vector<20x16xf32>,
    %c0_18 = arith.constant 0 : index
    %c0_19 = arith.constant 0 : index
    %24 = vector.load %arg7[%c0_18, %c0_19] : memref<28x16xf32, #tpu.memory_space<vmem>>, vector<28x16xf32>
    %25 = vector.extract_strided_slice %24 {offsets = [0, 0], sizes = [20, 16], strides = [1, 1]} : vector<28x16xf32> to vector<20x16xf32>
    %c0_20 = arith.constant 0 : index
    %c0_21 = arith.constant 0 : index
    %c0_22 = arith.constant 0 : index
    %26 = vector.load %arg4[%c0_20, %c0_21, %c0_22] : memref<3x16x16xf32, #tpu.memory_space<vmem>>, vector<1x16x16xf32>
    %27 = vector.shape_cast %26 : vector<1x16x16xf32> to vector<16x16xf32>
    %cst_23 = arith.constant dense<0.000000e+00> : vector<20x16xf32>
    %28 = tpu.matmul %25, %27, %cst_23 {dimension_numbers = #tpu.dot_dimension_numbers<[1], [0], [0], [1], [0, 0, 1, 1], [], []>} : vector<20x16xf32>, vector<16x16xf32>, vector<20x16xf32> -> vector<20x16xf32>
    %29 = vector.extract_strided_slice %24 {offsets = [4, 0], sizes = [20, 16], strides = [1, 1]} : vector<28x16xf32> to vector<20x16xf32>
    %c1_24 = arith.constant 1 : index
    %c0_25 = arith.constant 0 : index
    %c0_26 = arith.constant 0 : index
    %30 = vector.load %arg4[%c1_24, %c0_25, %c0_26] : memref<3x16x16xf32, #tpu.memory_space<vmem>>, vector<1x16x16xf32>
    %31 = vector.shape_cast %30 : vector<1x16x16xf32> to vector<16x16xf32>
    %cst_27 = arith.constant dense<0.000000e+00> : vector<20x16xf32>
    %32 = tpu.matmul %29, %31, %cst_27 {dimension_numbers = #tpu.dot_dimension_numbers<[1], [0], [0], [1], [0, 0, 1, 1], [], []>} : vector<20x16xf32>, vector<16x16xf32>, vector<20x16xf32> -> vector<20x16xf32>
    %33 = arith.addf %28, %32 : vector<20x16xf32>
    %34 = vector.extract_strided_slice %24 {offsets = [8, 0], sizes = [20, 16], strides = [1, 1]} : vector<28x16xf32> to vector<20x16xf32>
    %c2_28 = arith.constant 2 : index
    %c0_29 = arith.constant 0 : index
    %c0_30 = arith.constant 0 : index
    %35 = vector.load %arg4[%c2_28, %c0_29, %c0_30] : memref<3x16x16xf32, #tpu.memory_space<vmem>>, vector<1x16x16xf32>
    %36 = vector.shape_cast %35 : vector<1x16x16xf32> to vector<16x16xf32>
    %cst_31 = arith.constant dense<0.000000e+00> : vector<20x16xf32>
    %37 = tpu.matmul %34, %36, %cst_31 {dimension_numbers = #tpu.dot_dimension_numbers<[1], [0], [0], [1], [0, 0, 1, 1], [], []>} : vector<20x16xf32>, vector<16x16xf32>, vector<20x16xf32> -> vector<20x16xf32>
    %38 = arith.addf %33, %37 : vector<20x16xf32>
    %c0_32 = arith.constant 0 : index
    %c0_33 = arith.constant 0 : index
    %39 = vector.load %arg5[%c0_32, %c0_33] : memref<1x16xf32, #tpu.memory_space<vmem>>, vector<1x16xf32>
    %40 = vector.broadcast %39 : vector<1x16xf32> to vector<20x16xf32>
    %41 = arith.addf %38, %40 : vector<20x16xf32>
    %cst_34 = arith.constant 0.000000e+00 : f32
    %42 = vector.broadcast %cst_34 : f32 to vector<20x16xf32>
    %43 = arith.maximumf %41, %42 : vector<20x16xf32>
    %44 = vector.extract_strided_slice %1 {offsets = [8, 0], sizes = [20, 16], strides = [1, 1]} : vector<28x16xf32> to vector<20x16xf32>
    %45 = arith.addf %43, %44 : vector<20x16xf32>
    %cst_35 = arith.constant 0.000000e+00 : f32
    %46 = vector.broadcast %cst_35 : f32 to vector<20x16xf32>
    %47 = arith.maximumf %45, %46 : vector<20x16xf32>
    %c0_36 = arith.constant 0 : index
    %c0_37 = arith.constant 0 : index
    %c0_38 = arith.constant 0 : index
    %48 = vector.load %arg6[%c0_36, %c0_37, %c0_38] : memref<1x20x16xf32, #tpu.memory_space<vmem>>, vector<1x20x16xf32>
    %49 = vector.shape_cast %48 : vector<1x20x16xf32> to vector<20x16xf32>
    %50 = vector.shape_cast %47 : vector<20x16xf32> to vector<1x20x16xf32>
    tpu.vector_store %arg6[%c0_36, %c0_37, %c0_38], %50 {strides = array<i32>} : memref<1x20x16xf32, #tpu.memory_space<vmem>>, vector<1x20x16xf32>,
    return
  }
  func.func @transform_0(%arg0: i32) -> (i32, i32, i32) {
    %c0_i32 = arith.constant 0 : i32
    %c0_i32_0 = arith.constant 0 : i32
    %c0_i32_1 = arith.constant 0 : i32
    return %arg0, %c0_i32, %c0_i32_0 : i32, i32, i32
  }
  func.func @transform_1(%arg0: i32) -> (i32, i32, i32) {
    %c0_i32 = arith.constant 0 : i32
    %c0_i32_0 = arith.constant 0 : i32
    %c0_i32_1 = arith.constant 0 : i32
    %c0_i32_2 = arith.constant 0 : i32
    return %c0_i32, %c0_i32_0, %c0_i32_1 : i32, i32, i32
  }
  func.func @transform_2(%arg0: i32) -> (i32, i32) {
    %c0_i32 = arith.constant 0 : i32
    %c0_i32_0 = arith.constant 0 : i32
    %c0_i32_1 = arith.constant 0 : i32
    return %c0_i32, %c0_i32_0 : i32, i32
  }
  func.func @transform_3(%arg0: i32) -> (i32, i32, i32) {
    %c0_i32 = arith.constant 0 : i32
    %c0_i32_0 = arith.constant 0 : i32
    %c0_i32_1 = arith.constant 0 : i32
    %c0_i32_2 = arith.constant 0 : i32
    return %c0_i32, %c0_i32_0, %c0_i32_1 : i32, i32, i32
  }
  func.func @transform_4(%arg0: i32) -> (i32, i32) {
    %c0_i32 = arith.constant 0 : i32
    %c0_i32_0 = arith.constant 0 : i32
    %c0_i32_1 = arith.constant 0 : i32
    return %c0_i32, %c0_i32_0 : i32, i32
  }
  func.func @transform_5(%arg0: i32) -> (i32, i32, i32) {
    %c0_i32 = arith.constant 0 : i32
    %c0_i32_0 = arith.constant 0 : i32
    %c0_i32_1 = arith.constant 0 : i32
    return %arg0, %c0_i32, %c0_i32_0 : i32, i32, i32
  }
}

module attributes {stable_mosaic.version = 11 : i64} {
  func.func @_tblock_kernel(%arg0: i32, %arg1: memref<1x24x16xf32, #tpu.memory_space<vmem>>, %arg2: memref<3x16x16xf32, #tpu.memory_space<vmem>>, %arg3: memref<1x16xf32, #tpu.memory_space<vmem>>, %arg4: memref<3x16x16xf32, #tpu.memory_space<vmem>>, %arg5: memref<1x16xf32, #tpu.memory_space<vmem>>, %arg6: memref<1x20x16xf32, #tpu.memory_space<vmem>>, %arg7: memref<24x16xf32, #tpu.memory_space<vmem>>) attributes {dimension_semantics = [#tpu.dimension_semantics<parallel>], iteration_bounds = array<i64: 2>, scalar_prefetch = 0 : i64, scratch_operands = 1 : i64, tpu.core_type = #tpu.core_type<tc>, window_params = [{transform_indices = @transform_0, window_bounds = array<i64: 1, 24, 16>}, {pipeline_mode = #tpu.pipeline_mode<synchronous>, transform_indices = @transform_1, window_bounds = array<i64: 3, 16, 16>}, {pipeline_mode = #tpu.pipeline_mode<synchronous>, transform_indices = @transform_2, window_bounds = array<i64: 1, 16>}, {pipeline_mode = #tpu.pipeline_mode<synchronous>, transform_indices = @transform_3, window_bounds = array<i64: 3, 16, 16>}, {pipeline_mode = #tpu.pipeline_mode<synchronous>, transform_indices = @transform_4, window_bounds = array<i64: 1, 16>}, {transform_indices = @transform_5, window_bounds = array<i64: 1, 20, 16>}]} {
    %c0 = arith.constant 0 : index
    %c0_0 = arith.constant 0 : index
    %c0_1 = arith.constant 0 : index
    %0 = vector.load %arg1[%c0, %c0_0, %c0_1] : memref<1x24x16xf32, #tpu.memory_space<vmem>>, vector<1x24x16xf32>
    %1 = vector.shape_cast %0 : vector<1x24x16xf32> to vector<24x16xf32>
    %2 = vector.extract_strided_slice %1 {offsets = [0, 0], sizes = [20, 16], strides = [1, 1]} : vector<24x16xf32> to vector<20x16xf32>
    %c0_2 = arith.constant 0 : index
    %c0_3 = arith.constant 0 : index
    %c0_4 = arith.constant 0 : index
    %3 = vector.load %arg2[%c0_2, %c0_3, %c0_4] : memref<3x16x16xf32, #tpu.memory_space<vmem>>, vector<1x16x16xf32>
    %4 = vector.shape_cast %3 : vector<1x16x16xf32> to vector<16x16xf32>
    %cst = arith.constant dense<0.000000e+00> : vector<20x16xf32>
    %5 = tpu.matmul %2, %4, %cst {dimension_numbers = #tpu.dot_dimension_numbers<[1], [0], [0], [1], [0, 0, 1, 1], [], []>} : vector<20x16xf32>, vector<16x16xf32>, vector<20x16xf32> -> vector<20x16xf32>
    %6 = vector.extract_strided_slice %1 {offsets = [2, 0], sizes = [20, 16], strides = [1, 1]} : vector<24x16xf32> to vector<20x16xf32>
    %c1 = arith.constant 1 : index
    %c0_5 = arith.constant 0 : index
    %c0_6 = arith.constant 0 : index
    %7 = vector.load %arg2[%c1, %c0_5, %c0_6] : memref<3x16x16xf32, #tpu.memory_space<vmem>>, vector<1x16x16xf32>
    %8 = vector.shape_cast %7 : vector<1x16x16xf32> to vector<16x16xf32>
    %cst_7 = arith.constant dense<0.000000e+00> : vector<20x16xf32>
    %9 = tpu.matmul %6, %8, %cst_7 {dimension_numbers = #tpu.dot_dimension_numbers<[1], [0], [0], [1], [0, 0, 1, 1], [], []>} : vector<20x16xf32>, vector<16x16xf32>, vector<20x16xf32> -> vector<20x16xf32>
    %10 = arith.addf %5, %9 : vector<20x16xf32>
    %11 = vector.extract_strided_slice %1 {offsets = [4, 0], sizes = [20, 16], strides = [1, 1]} : vector<24x16xf32> to vector<20x16xf32>
    %c2 = arith.constant 2 : index
    %c0_8 = arith.constant 0 : index
    %c0_9 = arith.constant 0 : index
    %12 = vector.load %arg2[%c2, %c0_8, %c0_9] : memref<3x16x16xf32, #tpu.memory_space<vmem>>, vector<1x16x16xf32>
    %13 = vector.shape_cast %12 : vector<1x16x16xf32> to vector<16x16xf32>
    %cst_10 = arith.constant dense<0.000000e+00> : vector<20x16xf32>
    %14 = tpu.matmul %11, %13, %cst_10 {dimension_numbers = #tpu.dot_dimension_numbers<[1], [0], [0], [1], [0, 0, 1, 1], [], []>} : vector<20x16xf32>, vector<16x16xf32>, vector<20x16xf32> -> vector<20x16xf32>
    %15 = arith.addf %10, %14 : vector<20x16xf32>
    %c0_11 = arith.constant 0 : index
    %c0_12 = arith.constant 0 : index
    %16 = vector.load %arg3[%c0_11, %c0_12] : memref<1x16xf32, #tpu.memory_space<vmem>>, vector<1x16xf32>
    %17 = vector.broadcast %16 : vector<1x16xf32> to vector<20x16xf32>
    %18 = arith.addf %15, %17 : vector<20x16xf32>
    %cst_13 = arith.constant 0.000000e+00 : f32
    %19 = vector.broadcast %cst_13 : f32 to vector<20x16xf32>
    %20 = arith.maximumf %18, %19 : vector<20x16xf32>
    %cst_14 = arith.constant 0.000000e+00 : f32
    %21 = vector.broadcast %cst_14 : f32 to vector<4x16xf32>
    %c0_15 = arith.constant 0 : index
    %c0_16 = arith.constant 0 : index
    %22 = vector.load %arg7[%c0_15, %c0_16] : memref<24x16xf32, #tpu.memory_space<vmem>>, vector<4x16xf32>
    tpu.vector_store %arg7[%c0_15, %c0_16], %21 {strides = array<i32>} : memref<24x16xf32, #tpu.memory_space<vmem>>, vector<4x16xf32>,
    %c4 = arith.constant 4 : index
    %c0_17 = arith.constant 0 : index
    %23 = vector.load %arg7[%c4, %c0_17] : memref<24x16xf32, #tpu.memory_space<vmem>>, vector<20x16xf32>
    tpu.vector_store %arg7[%c4, %c0_17], %20 {strides = array<i32>} : memref<24x16xf32, #tpu.memory_space<vmem>>, vector<20x16xf32>,
    %c0_18 = arith.constant 0 : index
    %c0_19 = arith.constant 0 : index
    %24 = vector.load %arg7[%c0_18, %c0_19] : memref<24x16xf32, #tpu.memory_space<vmem>>, vector<24x16xf32>
    %25 = vector.extract_strided_slice %24 {offsets = [0, 0], sizes = [20, 16], strides = [1, 1]} : vector<24x16xf32> to vector<20x16xf32>
    %c0_20 = arith.constant 0 : index
    %c0_21 = arith.constant 0 : index
    %c0_22 = arith.constant 0 : index
    %26 = vector.load %arg4[%c0_20, %c0_21, %c0_22] : memref<3x16x16xf32, #tpu.memory_space<vmem>>, vector<1x16x16xf32>
    %27 = vector.shape_cast %26 : vector<1x16x16xf32> to vector<16x16xf32>
    %cst_23 = arith.constant dense<0.000000e+00> : vector<20x16xf32>
    %28 = tpu.matmul %25, %27, %cst_23 {dimension_numbers = #tpu.dot_dimension_numbers<[1], [0], [0], [1], [0, 0, 1, 1], [], []>} : vector<20x16xf32>, vector<16x16xf32>, vector<20x16xf32> -> vector<20x16xf32>
    %29 = vector.extract_strided_slice %24 {offsets = [2, 0], sizes = [20, 16], strides = [1, 1]} : vector<24x16xf32> to vector<20x16xf32>
    %c1_24 = arith.constant 1 : index
    %c0_25 = arith.constant 0 : index
    %c0_26 = arith.constant 0 : index
    %30 = vector.load %arg4[%c1_24, %c0_25, %c0_26] : memref<3x16x16xf32, #tpu.memory_space<vmem>>, vector<1x16x16xf32>
    %31 = vector.shape_cast %30 : vector<1x16x16xf32> to vector<16x16xf32>
    %cst_27 = arith.constant dense<0.000000e+00> : vector<20x16xf32>
    %32 = tpu.matmul %29, %31, %cst_27 {dimension_numbers = #tpu.dot_dimension_numbers<[1], [0], [0], [1], [0, 0, 1, 1], [], []>} : vector<20x16xf32>, vector<16x16xf32>, vector<20x16xf32> -> vector<20x16xf32>
    %33 = arith.addf %28, %32 : vector<20x16xf32>
    %34 = vector.extract_strided_slice %24 {offsets = [4, 0], sizes = [20, 16], strides = [1, 1]} : vector<24x16xf32> to vector<20x16xf32>
    %c2_28 = arith.constant 2 : index
    %c0_29 = arith.constant 0 : index
    %c0_30 = arith.constant 0 : index
    %35 = vector.load %arg4[%c2_28, %c0_29, %c0_30] : memref<3x16x16xf32, #tpu.memory_space<vmem>>, vector<1x16x16xf32>
    %36 = vector.shape_cast %35 : vector<1x16x16xf32> to vector<16x16xf32>
    %cst_31 = arith.constant dense<0.000000e+00> : vector<20x16xf32>
    %37 = tpu.matmul %34, %36, %cst_31 {dimension_numbers = #tpu.dot_dimension_numbers<[1], [0], [0], [1], [0, 0, 1, 1], [], []>} : vector<20x16xf32>, vector<16x16xf32>, vector<20x16xf32> -> vector<20x16xf32>
    %38 = arith.addf %33, %37 : vector<20x16xf32>
    %c0_32 = arith.constant 0 : index
    %c0_33 = arith.constant 0 : index
    %39 = vector.load %arg5[%c0_32, %c0_33] : memref<1x16xf32, #tpu.memory_space<vmem>>, vector<1x16xf32>
    %40 = vector.broadcast %39 : vector<1x16xf32> to vector<20x16xf32>
    %41 = arith.addf %38, %40 : vector<20x16xf32>
    %cst_34 = arith.constant 0.000000e+00 : f32
    %42 = vector.broadcast %cst_34 : f32 to vector<20x16xf32>
    %43 = arith.maximumf %41, %42 : vector<20x16xf32>
    %44 = vector.extract_strided_slice %1 {offsets = [4, 0], sizes = [20, 16], strides = [1, 1]} : vector<24x16xf32> to vector<20x16xf32>
    %45 = arith.addf %43, %44 : vector<20x16xf32>
    %cst_35 = arith.constant 0.000000e+00 : f32
    %46 = vector.broadcast %cst_35 : f32 to vector<20x16xf32>
    %47 = arith.maximumf %45, %46 : vector<20x16xf32>
    %c0_36 = arith.constant 0 : index
    %c0_37 = arith.constant 0 : index
    %c0_38 = arith.constant 0 : index
    %48 = vector.load %arg6[%c0_36, %c0_37, %c0_38] : memref<1x20x16xf32, #tpu.memory_space<vmem>>, vector<1x20x16xf32>
    %49 = vector.shape_cast %48 : vector<1x20x16xf32> to vector<20x16xf32>
    %50 = vector.shape_cast %47 : vector<20x16xf32> to vector<1x20x16xf32>
    tpu.vector_store %arg6[%c0_36, %c0_37, %c0_38], %50 {strides = array<i32>} : memref<1x20x16xf32, #tpu.memory_space<vmem>>, vector<1x20x16xf32>,
    return
  }
  func.func @transform_0(%arg0: i32) -> (i32, i32, i32) {
    %c0_i32 = arith.constant 0 : i32
    %c0_i32_0 = arith.constant 0 : i32
    %c0_i32_1 = arith.constant 0 : i32
    return %arg0, %c0_i32, %c0_i32_0 : i32, i32, i32
  }
  func.func @transform_1(%arg0: i32) -> (i32, i32, i32) {
    %c0_i32 = arith.constant 0 : i32
    %c0_i32_0 = arith.constant 0 : i32
    %c0_i32_1 = arith.constant 0 : i32
    %c0_i32_2 = arith.constant 0 : i32
    return %c0_i32, %c0_i32_0, %c0_i32_1 : i32, i32, i32
  }
  func.func @transform_2(%arg0: i32) -> (i32, i32) {
    %c0_i32 = arith.constant 0 : i32
    %c0_i32_0 = arith.constant 0 : i32
    %c0_i32_1 = arith.constant 0 : i32
    return %c0_i32, %c0_i32_0 : i32, i32
  }
  func.func @transform_3(%arg0: i32) -> (i32, i32, i32) {
    %c0_i32 = arith.constant 0 : i32
    %c0_i32_0 = arith.constant 0 : i32
    %c0_i32_1 = arith.constant 0 : i32
    %c0_i32_2 = arith.constant 0 : i32
    return %c0_i32, %c0_i32_0, %c0_i32_1 : i32, i32, i32
  }
  func.func @transform_4(%arg0: i32) -> (i32, i32) {
    %c0_i32 = arith.constant 0 : i32
    %c0_i32_0 = arith.constant 0 : i32
    %c0_i32_1 = arith.constant 0 : i32
    return %c0_i32, %c0_i32_0 : i32, i32
  }
  func.func @transform_5(%arg0: i32) -> (i32, i32, i32) {
    %c0_i32 = arith.constant 0 : i32
    %c0_i32_0 = arith.constant 0 : i32
    %c0_i32_1 = arith.constant 0 : i32
    return %arg0, %c0_i32, %c0_i32_0 : i32, i32, i32
  }
}

module attributes {stable_mosaic.version = 11 : i64} {
  func.func @_tblock_kernel(%arg0: i32, %arg1: memref<1x36x16xf32, #tpu.memory_space<vmem>>, %arg2: memref<3x16x16xf32, #tpu.memory_space<vmem>>, %arg3: memref<1x16xf32, #tpu.memory_space<vmem>>, %arg4: memref<3x16x16xf32, #tpu.memory_space<vmem>>, %arg5: memref<1x16xf32, #tpu.memory_space<vmem>>, %arg6: memref<1x20x16xf32, #tpu.memory_space<vmem>>, %arg7: memref<36x16xf32, #tpu.memory_space<vmem>>) attributes {dimension_semantics = [#tpu.dimension_semantics<parallel>], iteration_bounds = array<i64: 2>, scalar_prefetch = 0 : i64, scratch_operands = 1 : i64, tpu.core_type = #tpu.core_type<tc>, window_params = [{transform_indices = @transform_0, window_bounds = array<i64: 1, 36, 16>}, {pipeline_mode = #tpu.pipeline_mode<synchronous>, transform_indices = @transform_1, window_bounds = array<i64: 3, 16, 16>}, {pipeline_mode = #tpu.pipeline_mode<synchronous>, transform_indices = @transform_2, window_bounds = array<i64: 1, 16>}, {pipeline_mode = #tpu.pipeline_mode<synchronous>, transform_indices = @transform_3, window_bounds = array<i64: 3, 16, 16>}, {pipeline_mode = #tpu.pipeline_mode<synchronous>, transform_indices = @transform_4, window_bounds = array<i64: 1, 16>}, {transform_indices = @transform_5, window_bounds = array<i64: 1, 20, 16>}]} {
    %c0 = arith.constant 0 : index
    %c0_0 = arith.constant 0 : index
    %c0_1 = arith.constant 0 : index
    %0 = vector.load %arg1[%c0, %c0_0, %c0_1] : memref<1x36x16xf32, #tpu.memory_space<vmem>>, vector<1x36x16xf32>
    %1 = vector.shape_cast %0 : vector<1x36x16xf32> to vector<36x16xf32>
    %2 = vector.extract_strided_slice %1 {offsets = [0, 0], sizes = [20, 16], strides = [1, 1]} : vector<36x16xf32> to vector<20x16xf32>
    %c0_2 = arith.constant 0 : index
    %c0_3 = arith.constant 0 : index
    %c0_4 = arith.constant 0 : index
    %3 = vector.load %arg2[%c0_2, %c0_3, %c0_4] : memref<3x16x16xf32, #tpu.memory_space<vmem>>, vector<1x16x16xf32>
    %4 = vector.shape_cast %3 : vector<1x16x16xf32> to vector<16x16xf32>
    %cst = arith.constant dense<0.000000e+00> : vector<20x16xf32>
    %5 = tpu.matmul %2, %4, %cst {dimension_numbers = #tpu.dot_dimension_numbers<[1], [0], [0], [1], [0, 0, 1, 1], [], []>} : vector<20x16xf32>, vector<16x16xf32>, vector<20x16xf32> -> vector<20x16xf32>
    %6 = vector.extract_strided_slice %1 {offsets = [8, 0], sizes = [20, 16], strides = [1, 1]} : vector<36x16xf32> to vector<20x16xf32>
    %c1 = arith.constant 1 : index
    %c0_5 = arith.constant 0 : index
    %c0_6 = arith.constant 0 : index
    %7 = vector.load %arg2[%c1, %c0_5, %c0_6] : memref<3x16x16xf32, #tpu.memory_space<vmem>>, vector<1x16x16xf32>
    %8 = vector.shape_cast %7 : vector<1x16x16xf32> to vector<16x16xf32>
    %cst_7 = arith.constant dense<0.000000e+00> : vector<20x16xf32>
    %9 = tpu.matmul %6, %8, %cst_7 {dimension_numbers = #tpu.dot_dimension_numbers<[1], [0], [0], [1], [0, 0, 1, 1], [], []>} : vector<20x16xf32>, vector<16x16xf32>, vector<20x16xf32> -> vector<20x16xf32>
    %10 = arith.addf %5, %9 : vector<20x16xf32>
    %11 = vector.extract_strided_slice %1 {offsets = [16, 0], sizes = [20, 16], strides = [1, 1]} : vector<36x16xf32> to vector<20x16xf32>
    %c2 = arith.constant 2 : index
    %c0_8 = arith.constant 0 : index
    %c0_9 = arith.constant 0 : index
    %12 = vector.load %arg2[%c2, %c0_8, %c0_9] : memref<3x16x16xf32, #tpu.memory_space<vmem>>, vector<1x16x16xf32>
    %13 = vector.shape_cast %12 : vector<1x16x16xf32> to vector<16x16xf32>
    %cst_10 = arith.constant dense<0.000000e+00> : vector<20x16xf32>
    %14 = tpu.matmul %11, %13, %cst_10 {dimension_numbers = #tpu.dot_dimension_numbers<[1], [0], [0], [1], [0, 0, 1, 1], [], []>} : vector<20x16xf32>, vector<16x16xf32>, vector<20x16xf32> -> vector<20x16xf32>
    %15 = arith.addf %10, %14 : vector<20x16xf32>
    %c0_11 = arith.constant 0 : index
    %c0_12 = arith.constant 0 : index
    %16 = vector.load %arg3[%c0_11, %c0_12] : memref<1x16xf32, #tpu.memory_space<vmem>>, vector<1x16xf32>
    %17 = vector.broadcast %16 : vector<1x16xf32> to vector<20x16xf32>
    %18 = arith.addf %15, %17 : vector<20x16xf32>
    %cst_13 = arith.constant 0.000000e+00 : f32
    %19 = vector.broadcast %cst_13 : f32 to vector<20x16xf32>
    %20 = arith.maximumf %18, %19 : vector<20x16xf32>
    %cst_14 = arith.constant 0.000000e+00 : f32
    %21 = vector.broadcast %cst_14 : f32 to vector<16x16xf32>
    %c0_15 = arith.constant 0 : index
    %c0_16 = arith.constant 0 : index
    %22 = vector.load %arg7[%c0_15, %c0_16] : memref<36x16xf32, #tpu.memory_space<vmem>>, vector<16x16xf32>
    tpu.vector_store %arg7[%c0_15, %c0_16], %21 {strides = array<i32>} : memref<36x16xf32, #tpu.memory_space<vmem>>, vector<16x16xf32>,
    %c16 = arith.constant 16 : index
    %c0_17 = arith.constant 0 : index
    %23 = vector.load %arg7[%c16, %c0_17] : memref<36x16xf32, #tpu.memory_space<vmem>>, vector<20x16xf32>
    tpu.vector_store %arg7[%c16, %c0_17], %20 {strides = array<i32>} : memref<36x16xf32, #tpu.memory_space<vmem>>, vector<20x16xf32>,
    %c0_18 = arith.constant 0 : index
    %c0_19 = arith.constant 0 : index
    %24 = vector.load %arg7[%c0_18, %c0_19] : memref<36x16xf32, #tpu.memory_space<vmem>>, vector<36x16xf32>
    %25 = vector.extract_strided_slice %24 {offsets = [0, 0], sizes = [20, 16], strides = [1, 1]} : vector<36x16xf32> to vector<20x16xf32>
    %c0_20 = arith.constant 0 : index
    %c0_21 = arith.constant 0 : index
    %c0_22 = arith.constant 0 : index
    %26 = vector.load %arg4[%c0_20, %c0_21, %c0_22] : memref<3x16x16xf32, #tpu.memory_space<vmem>>, vector<1x16x16xf32>
    %27 = vector.shape_cast %26 : vector<1x16x16xf32> to vector<16x16xf32>
    %cst_23 = arith.constant dense<0.000000e+00> : vector<20x16xf32>
    %28 = tpu.matmul %25, %27, %cst_23 {dimension_numbers = #tpu.dot_dimension_numbers<[1], [0], [0], [1], [0, 0, 1, 1], [], []>} : vector<20x16xf32>, vector<16x16xf32>, vector<20x16xf32> -> vector<20x16xf32>
    %29 = vector.extract_strided_slice %24 {offsets = [8, 0], sizes = [20, 16], strides = [1, 1]} : vector<36x16xf32> to vector<20x16xf32>
    %c1_24 = arith.constant 1 : index
    %c0_25 = arith.constant 0 : index
    %c0_26 = arith.constant 0 : index
    %30 = vector.load %arg4[%c1_24, %c0_25, %c0_26] : memref<3x16x16xf32, #tpu.memory_space<vmem>>, vector<1x16x16xf32>
    %31 = vector.shape_cast %30 : vector<1x16x16xf32> to vector<16x16xf32>
    %cst_27 = arith.constant dense<0.000000e+00> : vector<20x16xf32>
    %32 = tpu.matmul %29, %31, %cst_27 {dimension_numbers = #tpu.dot_dimension_numbers<[1], [0], [0], [1], [0, 0, 1, 1], [], []>} : vector<20x16xf32>, vector<16x16xf32>, vector<20x16xf32> -> vector<20x16xf32>
    %33 = arith.addf %28, %32 : vector<20x16xf32>
    %34 = vector.extract_strided_slice %24 {offsets = [16, 0], sizes = [20, 16], strides = [1, 1]} : vector<36x16xf32> to vector<20x16xf32>
    %c2_28 = arith.constant 2 : index
    %c0_29 = arith.constant 0 : index
    %c0_30 = arith.constant 0 : index
    %35 = vector.load %arg4[%c2_28, %c0_29, %c0_30] : memref<3x16x16xf32, #tpu.memory_space<vmem>>, vector<1x16x16xf32>
    %36 = vector.shape_cast %35 : vector<1x16x16xf32> to vector<16x16xf32>
    %cst_31 = arith.constant dense<0.000000e+00> : vector<20x16xf32>
    %37 = tpu.matmul %34, %36, %cst_31 {dimension_numbers = #tpu.dot_dimension_numbers<[1], [0], [0], [1], [0, 0, 1, 1], [], []>} : vector<20x16xf32>, vector<16x16xf32>, vector<20x16xf32> -> vector<20x16xf32>
    %38 = arith.addf %33, %37 : vector<20x16xf32>
    %c0_32 = arith.constant 0 : index
    %c0_33 = arith.constant 0 : index
    %39 = vector.load %arg5[%c0_32, %c0_33] : memref<1x16xf32, #tpu.memory_space<vmem>>, vector<1x16xf32>
    %40 = vector.broadcast %39 : vector<1x16xf32> to vector<20x16xf32>
    %41 = arith.addf %38, %40 : vector<20x16xf32>
    %cst_34 = arith.constant 0.000000e+00 : f32
    %42 = vector.broadcast %cst_34 : f32 to vector<20x16xf32>
    %43 = arith.maximumf %41, %42 : vector<20x16xf32>
    %44 = vector.extract_strided_slice %1 {offsets = [16, 0], sizes = [20, 16], strides = [1, 1]} : vector<36x16xf32> to vector<20x16xf32>
    %45 = arith.addf %43, %44 : vector<20x16xf32>
    %cst_35 = arith.constant 0.000000e+00 : f32
    %46 = vector.broadcast %cst_35 : f32 to vector<20x16xf32>
    %47 = arith.maximumf %45, %46 : vector<20x16xf32>
    %c0_36 = arith.constant 0 : index
    %c0_37 = arith.constant 0 : index
    %c0_38 = arith.constant 0 : index
    %48 = vector.load %arg6[%c0_36, %c0_37, %c0_38] : memref<1x20x16xf32, #tpu.memory_space<vmem>>, vector<1x20x16xf32>
    %49 = vector.shape_cast %48 : vector<1x20x16xf32> to vector<20x16xf32>
    %50 = vector.shape_cast %47 : vector<20x16xf32> to vector<1x20x16xf32>
    tpu.vector_store %arg6[%c0_36, %c0_37, %c0_38], %50 {strides = array<i32>} : memref<1x20x16xf32, #tpu.memory_space<vmem>>, vector<1x20x16xf32>,
    return
  }
  func.func @transform_0(%arg0: i32) -> (i32, i32, i32) {
    %c0_i32 = arith.constant 0 : i32
    %c0_i32_0 = arith.constant 0 : i32
    %c0_i32_1 = arith.constant 0 : i32
    return %arg0, %c0_i32, %c0_i32_0 : i32, i32, i32
  }
  func.func @transform_1(%arg0: i32) -> (i32, i32, i32) {
    %c0_i32 = arith.constant 0 : i32
    %c0_i32_0 = arith.constant 0 : i32
    %c0_i32_1 = arith.constant 0 : i32
    %c0_i32_2 = arith.constant 0 : i32
    return %c0_i32, %c0_i32_0, %c0_i32_1 : i32, i32, i32
  }
  func.func @transform_2(%arg0: i32) -> (i32, i32) {
    %c0_i32 = arith.constant 0 : i32
    %c0_i32_0 = arith.constant 0 : i32
    %c0_i32_1 = arith.constant 0 : i32
    return %c0_i32, %c0_i32_0 : i32, i32
  }
  func.func @transform_3(%arg0: i32) -> (i32, i32, i32) {
    %c0_i32 = arith.constant 0 : i32
    %c0_i32_0 = arith.constant 0 : i32
    %c0_i32_1 = arith.constant 0 : i32
    %c0_i32_2 = arith.constant 0 : i32
    return %c0_i32, %c0_i32_0, %c0_i32_1 : i32, i32, i32
  }
  func.func @transform_4(%arg0: i32) -> (i32, i32) {
    %c0_i32 = arith.constant 0 : i32
    %c0_i32_0 = arith.constant 0 : i32
    %c0_i32_1 = arith.constant 0 : i32
    return %c0_i32, %c0_i32_0 : i32, i32
  }
  func.func @transform_5(%arg0: i32) -> (i32, i32, i32) {
    %c0_i32 = arith.constant 0 : i32
    %c0_i32_0 = arith.constant 0 : i32
    %c0_i32_1 = arith.constant 0 : i32
    return %arg0, %c0_i32, %c0_i32_0 : i32, i32, i32
  }
}

module attributes {stable_mosaic.version = 11 : i64} {
  func.func @_tblock_kernel(%arg0: i32, %arg1: memref<1x52x16xf32, #tpu.memory_space<vmem>>, %arg2: memref<3x16x16xf32, #tpu.memory_space<vmem>>, %arg3: memref<1x16xf32, #tpu.memory_space<vmem>>, %arg4: memref<3x16x16xf32, #tpu.memory_space<vmem>>, %arg5: memref<1x16xf32, #tpu.memory_space<vmem>>, %arg6: memref<1x20x16xf32, #tpu.memory_space<vmem>>, %arg7: memref<52x16xf32, #tpu.memory_space<vmem>>) attributes {dimension_semantics = [#tpu.dimension_semantics<parallel>], iteration_bounds = array<i64: 2>, scalar_prefetch = 0 : i64, scratch_operands = 1 : i64, tpu.core_type = #tpu.core_type<tc>, window_params = [{transform_indices = @transform_0, window_bounds = array<i64: 1, 52, 16>}, {pipeline_mode = #tpu.pipeline_mode<synchronous>, transform_indices = @transform_1, window_bounds = array<i64: 3, 16, 16>}, {pipeline_mode = #tpu.pipeline_mode<synchronous>, transform_indices = @transform_2, window_bounds = array<i64: 1, 16>}, {pipeline_mode = #tpu.pipeline_mode<synchronous>, transform_indices = @transform_3, window_bounds = array<i64: 3, 16, 16>}, {pipeline_mode = #tpu.pipeline_mode<synchronous>, transform_indices = @transform_4, window_bounds = array<i64: 1, 16>}, {transform_indices = @transform_5, window_bounds = array<i64: 1, 20, 16>}]} {
    %c0 = arith.constant 0 : index
    %c0_0 = arith.constant 0 : index
    %c0_1 = arith.constant 0 : index
    %0 = vector.load %arg1[%c0, %c0_0, %c0_1] : memref<1x52x16xf32, #tpu.memory_space<vmem>>, vector<1x52x16xf32>
    %1 = vector.shape_cast %0 : vector<1x52x16xf32> to vector<52x16xf32>
    %2 = vector.extract_strided_slice %1 {offsets = [0, 0], sizes = [20, 16], strides = [1, 1]} : vector<52x16xf32> to vector<20x16xf32>
    %c0_2 = arith.constant 0 : index
    %c0_3 = arith.constant 0 : index
    %c0_4 = arith.constant 0 : index
    %3 = vector.load %arg2[%c0_2, %c0_3, %c0_4] : memref<3x16x16xf32, #tpu.memory_space<vmem>>, vector<1x16x16xf32>
    %4 = vector.shape_cast %3 : vector<1x16x16xf32> to vector<16x16xf32>
    %cst = arith.constant dense<0.000000e+00> : vector<20x16xf32>
    %5 = tpu.matmul %2, %4, %cst {dimension_numbers = #tpu.dot_dimension_numbers<[1], [0], [0], [1], [0, 0, 1, 1], [], []>} : vector<20x16xf32>, vector<16x16xf32>, vector<20x16xf32> -> vector<20x16xf32>
    %6 = vector.extract_strided_slice %1 {offsets = [16, 0], sizes = [20, 16], strides = [1, 1]} : vector<52x16xf32> to vector<20x16xf32>
    %c1 = arith.constant 1 : index
    %c0_5 = arith.constant 0 : index
    %c0_6 = arith.constant 0 : index
    %7 = vector.load %arg2[%c1, %c0_5, %c0_6] : memref<3x16x16xf32, #tpu.memory_space<vmem>>, vector<1x16x16xf32>
    %8 = vector.shape_cast %7 : vector<1x16x16xf32> to vector<16x16xf32>
    %cst_7 = arith.constant dense<0.000000e+00> : vector<20x16xf32>
    %9 = tpu.matmul %6, %8, %cst_7 {dimension_numbers = #tpu.dot_dimension_numbers<[1], [0], [0], [1], [0, 0, 1, 1], [], []>} : vector<20x16xf32>, vector<16x16xf32>, vector<20x16xf32> -> vector<20x16xf32>
    %10 = arith.addf %5, %9 : vector<20x16xf32>
    %11 = vector.extract_strided_slice %1 {offsets = [32, 0], sizes = [20, 16], strides = [1, 1]} : vector<52x16xf32> to vector<20x16xf32>
    %c2 = arith.constant 2 : index
    %c0_8 = arith.constant 0 : index
    %c0_9 = arith.constant 0 : index
    %12 = vector.load %arg2[%c2, %c0_8, %c0_9] : memref<3x16x16xf32, #tpu.memory_space<vmem>>, vector<1x16x16xf32>
    %13 = vector.shape_cast %12 : vector<1x16x16xf32> to vector<16x16xf32>
    %cst_10 = arith.constant dense<0.000000e+00> : vector<20x16xf32>
    %14 = tpu.matmul %11, %13, %cst_10 {dimension_numbers = #tpu.dot_dimension_numbers<[1], [0], [0], [1], [0, 0, 1, 1], [], []>} : vector<20x16xf32>, vector<16x16xf32>, vector<20x16xf32> -> vector<20x16xf32>
    %15 = arith.addf %10, %14 : vector<20x16xf32>
    %c0_11 = arith.constant 0 : index
    %c0_12 = arith.constant 0 : index
    %16 = vector.load %arg3[%c0_11, %c0_12] : memref<1x16xf32, #tpu.memory_space<vmem>>, vector<1x16xf32>
    %17 = vector.broadcast %16 : vector<1x16xf32> to vector<20x16xf32>
    %18 = arith.addf %15, %17 : vector<20x16xf32>
    %cst_13 = arith.constant 0.000000e+00 : f32
    %19 = vector.broadcast %cst_13 : f32 to vector<20x16xf32>
    %20 = arith.maximumf %18, %19 : vector<20x16xf32>
    %cst_14 = arith.constant 0.000000e+00 : f32
    %21 = vector.broadcast %cst_14 : f32 to vector<32x16xf32>
    %c0_15 = arith.constant 0 : index
    %c0_16 = arith.constant 0 : index
    %22 = vector.load %arg7[%c0_15, %c0_16] : memref<52x16xf32, #tpu.memory_space<vmem>>, vector<32x16xf32>
    tpu.vector_store %arg7[%c0_15, %c0_16], %21 {strides = array<i32>} : memref<52x16xf32, #tpu.memory_space<vmem>>, vector<32x16xf32>,
    %c32 = arith.constant 32 : index
    %c0_17 = arith.constant 0 : index
    %23 = vector.load %arg7[%c32, %c0_17] : memref<52x16xf32, #tpu.memory_space<vmem>>, vector<20x16xf32>
    tpu.vector_store %arg7[%c32, %c0_17], %20 {strides = array<i32>} : memref<52x16xf32, #tpu.memory_space<vmem>>, vector<20x16xf32>,
    %c0_18 = arith.constant 0 : index
    %c0_19 = arith.constant 0 : index
    %24 = vector.load %arg7[%c0_18, %c0_19] : memref<52x16xf32, #tpu.memory_space<vmem>>, vector<52x16xf32>
    %25 = vector.extract_strided_slice %24 {offsets = [0, 0], sizes = [20, 16], strides = [1, 1]} : vector<52x16xf32> to vector<20x16xf32>
    %c0_20 = arith.constant 0 : index
    %c0_21 = arith.constant 0 : index
    %c0_22 = arith.constant 0 : index
    %26 = vector.load %arg4[%c0_20, %c0_21, %c0_22] : memref<3x16x16xf32, #tpu.memory_space<vmem>>, vector<1x16x16xf32>
    %27 = vector.shape_cast %26 : vector<1x16x16xf32> to vector<16x16xf32>
    %cst_23 = arith.constant dense<0.000000e+00> : vector<20x16xf32>
    %28 = tpu.matmul %25, %27, %cst_23 {dimension_numbers = #tpu.dot_dimension_numbers<[1], [0], [0], [1], [0, 0, 1, 1], [], []>} : vector<20x16xf32>, vector<16x16xf32>, vector<20x16xf32> -> vector<20x16xf32>
    %29 = vector.extract_strided_slice %24 {offsets = [16, 0], sizes = [20, 16], strides = [1, 1]} : vector<52x16xf32> to vector<20x16xf32>
    %c1_24 = arith.constant 1 : index
    %c0_25 = arith.constant 0 : index
    %c0_26 = arith.constant 0 : index
    %30 = vector.load %arg4[%c1_24, %c0_25, %c0_26] : memref<3x16x16xf32, #tpu.memory_space<vmem>>, vector<1x16x16xf32>
    %31 = vector.shape_cast %30 : vector<1x16x16xf32> to vector<16x16xf32>
    %cst_27 = arith.constant dense<0.000000e+00> : vector<20x16xf32>
    %32 = tpu.matmul %29, %31, %cst_27 {dimension_numbers = #tpu.dot_dimension_numbers<[1], [0], [0], [1], [0, 0, 1, 1], [], []>} : vector<20x16xf32>, vector<16x16xf32>, vector<20x16xf32> -> vector<20x16xf32>
    %33 = arith.addf %28, %32 : vector<20x16xf32>
    %34 = vector.extract_strided_slice %24 {offsets = [32, 0], sizes = [20, 16], strides = [1, 1]} : vector<52x16xf32> to vector<20x16xf32>
    %c2_28 = arith.constant 2 : index
    %c0_29 = arith.constant 0 : index
    %c0_30 = arith.constant 0 : index
    %35 = vector.load %arg4[%c2_28, %c0_29, %c0_30] : memref<3x16x16xf32, #tpu.memory_space<vmem>>, vector<1x16x16xf32>
    %36 = vector.shape_cast %35 : vector<1x16x16xf32> to vector<16x16xf32>
    %cst_31 = arith.constant dense<0.000000e+00> : vector<20x16xf32>
    %37 = tpu.matmul %34, %36, %cst_31 {dimension_numbers = #tpu.dot_dimension_numbers<[1], [0], [0], [1], [0, 0, 1, 1], [], []>} : vector<20x16xf32>, vector<16x16xf32>, vector<20x16xf32> -> vector<20x16xf32>
    %38 = arith.addf %33, %37 : vector<20x16xf32>
    %c0_32 = arith.constant 0 : index
    %c0_33 = arith.constant 0 : index
    %39 = vector.load %arg5[%c0_32, %c0_33] : memref<1x16xf32, #tpu.memory_space<vmem>>, vector<1x16xf32>
    %40 = vector.broadcast %39 : vector<1x16xf32> to vector<20x16xf32>
    %41 = arith.addf %38, %40 : vector<20x16xf32>
    %cst_34 = arith.constant 0.000000e+00 : f32
    %42 = vector.broadcast %cst_34 : f32 to vector<20x16xf32>
    %43 = arith.maximumf %41, %42 : vector<20x16xf32>
    %44 = vector.extract_strided_slice %1 {offsets = [32, 0], sizes = [20, 16], strides = [1, 1]} : vector<52x16xf32> to vector<20x16xf32>
    %45 = arith.addf %43, %44 : vector<20x16xf32>
    %cst_35 = arith.constant 0.000000e+00 : f32
    %46 = vector.broadcast %cst_35 : f32 to vector<20x16xf32>
    %47 = arith.maximumf %45, %46 : vector<20x16xf32>
    %c0_36 = arith.constant 0 : index
    %c0_37 = arith.constant 0 : index
    %c0_38 = arith.constant 0 : index
    %48 = vector.load %arg6[%c0_36, %c0_37, %c0_38] : memref<1x20x16xf32, #tpu.memory_space<vmem>>, vector<1x20x16xf32>
    %49 = vector.shape_cast %48 : vector<1x20x16xf32> to vector<20x16xf32>
    %50 = vector.shape_cast %47 : vector<20x16xf32> to vector<1x20x16xf32>
    tpu.vector_store %arg6[%c0_36, %c0_37, %c0_38], %50 {strides = array<i32>} : memref<1x20x16xf32, #tpu.memory_space<vmem>>, vector<1x20x16xf32>,
    return
  }
  func.func @transform_0(%arg0: i32) -> (i32, i32, i32) {
    %c0_i32 = arith.constant 0 : i32
    %c0_i32_0 = arith.constant 0 : i32
    %c0_i32_1 = arith.constant 0 : i32
    return %arg0, %c0_i32, %c0_i32_0 : i32, i32, i32
  }
  func.func @transform_1(%arg0: i32) -> (i32, i32, i32) {
    %c0_i32 = arith.constant 0 : i32
    %c0_i32_0 = arith.constant 0 : i32
    %c0_i32_1 = arith.constant 0 : i32
    %c0_i32_2 = arith.constant 0 : i32
    return %c0_i32, %c0_i32_0, %c0_i32_1 : i32, i32, i32
  }
  func.func @transform_2(%arg0: i32) -> (i32, i32) {
    %c0_i32 = arith.constant 0 : i32
    %c0_i32_0 = arith.constant 0 : i32
    %c0_i32_1 = arith.constant 0 : i32
    return %c0_i32, %c0_i32_0 : i32, i32
  }
  func.func @transform_3(%arg0: i32) -> (i32, i32, i32) {
    %c0_i32 = arith.constant 0 : i32
    %c0_i32_0 = arith.constant 0 : i32
    %c0_i32_1 = arith.constant 0 : i32
    %c0_i32_2 = arith.constant 0 : i32
    return %c0_i32, %c0_i32_0, %c0_i32_1 : i32, i32, i32
  }
  func.func @transform_4(%arg0: i32) -> (i32, i32) {
    %c0_i32 = arith.constant 0 : i32
    %c0_i32_0 = arith.constant 0 : i32
    %c0_i32_1 = arith.constant 0 : i32
    return %c0_i32, %c0_i32_0 : i32, i32
  }
  func.func @transform_5(%arg0: i32) -> (i32, i32, i32) {
    %c0_i32 = arith.constant 0 : i32
    %c0_i32_0 = arith.constant 0 : i32
    %c0_i32_1 = arith.constant 0 : i32
    return %arg0, %c0_i32, %c0_i32_0 : i32, i32, i32
  }
}

module attributes {stable_mosaic.version = 11 : i64} {
  func.func @_gru_layer_kernel(%arg0: memref<40x16xf32, #tpu.memory_space<vmem>>, %arg1: memref<16x36xf32, #tpu.memory_space<vmem>>, %arg2: memref<12x36xf32, #tpu.memory_space<vmem>>, %arg3: memref<1x36xf32, #tpu.memory_space<vmem>>, %arg4: memref<1x36xf32, #tpu.memory_space<vmem>>, %arg5: memref<5x8x12xf32, #tpu.memory_space<vmem>>, %arg6: memref<5x8x36xf32, #tpu.memory_space<vmem>>, %arg7: memref<8x12xf32, #tpu.memory_space<vmem>>) attributes {dimension_semantics = [], scalar_prefetch = 0 : i64, scratch_operands = 2 : i64, tpu.core_type = #tpu.core_type<tc>} {
    %c0 = arith.constant 0 : index
    %c0_0 = arith.constant 0 : index
    %0 = vector.load %arg0[%c0, %c0_0] : memref<40x16xf32, #tpu.memory_space<vmem>>, vector<40x16xf32>
    %c0_1 = arith.constant 0 : index
    %c0_2 = arith.constant 0 : index
    %1 = vector.load %arg1[%c0_1, %c0_2] : memref<16x36xf32, #tpu.memory_space<vmem>>, vector<16x36xf32>
    %cst = arith.constant dense<0.000000e+00> : vector<40x36xf32>
    %2 = tpu.matmul %0, %1, %cst {dimension_numbers = #tpu.dot_dimension_numbers<[1], [0], [0], [1], [0, 0, 1, 1], [], []>} : vector<40x16xf32>, vector<16x36xf32>, vector<40x36xf32> -> vector<40x36xf32>
    %c0_3 = arith.constant 0 : index
    %c0_4 = arith.constant 0 : index
    %3 = vector.load %arg3[%c0_3, %c0_4] : memref<1x36xf32, #tpu.memory_space<vmem>>, vector<1x36xf32>
    %4 = vector.broadcast %3 : vector<1x36xf32> to vector<40x36xf32>
    %5 = arith.addf %2, %4 : vector<40x36xf32>
    %6 = vector.extract_strided_slice %5 {offsets = [0, 0], sizes = [8, 36], strides = [1, 1]} : vector<40x36xf32> to vector<8x36xf32>
    %c0_5 = arith.constant 0 : index
    %c0_6 = arith.constant 0 : index
    %c0_7 = arith.constant 0 : index
    %7 = vector.load %arg6[%c0_5, %c0_6, %c0_7] : memref<5x8x36xf32, #tpu.memory_space<vmem>>, vector<1x8x36xf32>
    %8 = vector.shape_cast %7 : vector<1x8x36xf32> to vector<8x36xf32>
    %9 = vector.shape_cast %6 : vector<8x36xf32> to vector<1x8x36xf32>
    tpu.vector_store %arg6[%c0_5, %c0_6, %c0_7], %9 {strides = array<i32>} : memref<5x8x36xf32, #tpu.memory_space<vmem>>, vector<1x8x36xf32>,
    %10 = vector.extract_strided_slice %5 {offsets = [8, 0], sizes = [8, 36], strides = [1, 1]} : vector<40x36xf32> to vector<8x36xf32>
    %c1 = arith.constant 1 : index
    %c0_8 = arith.constant 0 : index
    %c0_9 = arith.constant 0 : index
    %11 = vector.load %arg6[%c1, %c0_8, %c0_9] : memref<5x8x36xf32, #tpu.memory_space<vmem>>, vector<1x8x36xf32>
    %12 = vector.shape_cast %11 : vector<1x8x36xf32> to vector<8x36xf32>
    %13 = vector.shape_cast %10 : vector<8x36xf32> to vector<1x8x36xf32>
    tpu.vector_store %arg6[%c1, %c0_8, %c0_9], %13 {strides = array<i32>} : memref<5x8x36xf32, #tpu.memory_space<vmem>>, vector<1x8x36xf32>,
    %14 = vector.extract_strided_slice %5 {offsets = [16, 0], sizes = [8, 36], strides = [1, 1]} : vector<40x36xf32> to vector<8x36xf32>
    %c2 = arith.constant 2 : index
    %c0_10 = arith.constant 0 : index
    %c0_11 = arith.constant 0 : index
    %15 = vector.load %arg6[%c2, %c0_10, %c0_11] : memref<5x8x36xf32, #tpu.memory_space<vmem>>, vector<1x8x36xf32>
    %16 = vector.shape_cast %15 : vector<1x8x36xf32> to vector<8x36xf32>
    %17 = vector.shape_cast %14 : vector<8x36xf32> to vector<1x8x36xf32>
    tpu.vector_store %arg6[%c2, %c0_10, %c0_11], %17 {strides = array<i32>} : memref<5x8x36xf32, #tpu.memory_space<vmem>>, vector<1x8x36xf32>,
    %18 = vector.extract_strided_slice %5 {offsets = [24, 0], sizes = [8, 36], strides = [1, 1]} : vector<40x36xf32> to vector<8x36xf32>
    %c3 = arith.constant 3 : index
    %c0_12 = arith.constant 0 : index
    %c0_13 = arith.constant 0 : index
    %19 = vector.load %arg6[%c3, %c0_12, %c0_13] : memref<5x8x36xf32, #tpu.memory_space<vmem>>, vector<1x8x36xf32>
    %20 = vector.shape_cast %19 : vector<1x8x36xf32> to vector<8x36xf32>
    %21 = vector.shape_cast %18 : vector<8x36xf32> to vector<1x8x36xf32>
    tpu.vector_store %arg6[%c3, %c0_12, %c0_13], %21 {strides = array<i32>} : memref<5x8x36xf32, #tpu.memory_space<vmem>>, vector<1x8x36xf32>,
    %22 = vector.extract_strided_slice %5 {offsets = [32, 0], sizes = [8, 36], strides = [1, 1]} : vector<40x36xf32> to vector<8x36xf32>
    %c4 = arith.constant 4 : index
    %c0_14 = arith.constant 0 : index
    %c0_15 = arith.constant 0 : index
    %23 = vector.load %arg6[%c4, %c0_14, %c0_15] : memref<5x8x36xf32, #tpu.memory_space<vmem>>, vector<1x8x36xf32>
    %24 = vector.shape_cast %23 : vector<1x8x36xf32> to vector<8x36xf32>
    %25 = vector.shape_cast %22 : vector<8x36xf32> to vector<1x8x36xf32>
    tpu.vector_store %arg6[%c4, %c0_14, %c0_15], %25 {strides = array<i32>} : memref<5x8x36xf32, #tpu.memory_space<vmem>>, vector<1x8x36xf32>,
    %cst_16 = arith.constant 0.000000e+00 : f32
    %26 = vector.broadcast %cst_16 : f32 to vector<8x12xf32>
    %c0_17 = arith.constant 0 : index
    %c0_18 = arith.constant 0 : index
    %27 = vector.load %arg7[%c0_17, %c0_18] : memref<8x12xf32, #tpu.memory_space<vmem>>, vector<8x12xf32>
    tpu.vector_store %arg7[%c0_17, %c0_18], %26 {strides = array<i32>} : memref<8x12xf32, #tpu.memory_space<vmem>>, vector<8x12xf32>,
    %c0_i32 = arith.constant 0 : i32
    %c5_i32 = arith.constant 5 : i32
    %28 = arith.addi %c0_i32, %c5_i32 : i32
    %c1_i32 = arith.constant 1 : i32
    scf.for %arg8 = %c0_i32 to %28 step %c1_i32  : i32 {
      %c0_20 = arith.constant 0 : index
      %c0_21 = arith.constant 0 : index
      %29 = vector.load %arg7[%c0_20, %c0_21] : memref<8x12xf32, #tpu.memory_space<vmem>>, vector<8x12xf32>
      %c0_22 = arith.constant 0 : index
      %c0_23 = arith.constant 0 : index
      %30 = vector.load %arg2[%c0_22, %c0_23] : memref<12x36xf32, #tpu.memory_space<vmem>>, vector<12x36xf32>
      %cst_24 = arith.constant dense<0.000000e+00> : vector<8x36xf32>
      %31 = tpu.matmul %29, %30, %cst_24 {dimension_numbers = #tpu.dot_dimension_numbers<[1], [0], [0], [1], [0, 0, 1, 1], [], []>} : vector<8x12xf32>, vector<12x36xf32>, vector<8x36xf32> -> vector<8x36xf32>
      %c0_25 = arith.constant 0 : index
      %c0_26 = arith.constant 0 : index
      %32 = vector.load %arg4[%c0_25, %c0_26] : memref<1x36xf32, #tpu.memory_space<vmem>>, vector<1x36xf32>
      %33 = vector.broadcast %32 : vector<1x36xf32> to vector<8x36xf32>
      %34 = arith.addf %31, %33 : vector<8x36xf32>
      %35 = arith.index_cast %arg8 : i32 to index
      %c0_27 = arith.constant 0 : index
      %c0_28 = arith.constant 0 : index
      %36 = vector.load %arg6[%35, %c0_27, %c0_28] : memref<5x8x36xf32, #tpu.memory_space<vmem>>, vector<1x8x36xf32>
      %37 = vector.shape_cast %36 : vector<1x8x36xf32> to vector<8x36xf32>
      %38 = vector.extract_strided_slice %37 {offsets = [0, 0], sizes = [8, 12], strides = [1, 1]} : vector<8x36xf32> to vector<8x12xf32>
      %39 = vector.extract_strided_slice %34 {offsets = [0, 0], sizes = [8, 12], strides = [1, 1]} : vector<8x36xf32> to vector<8x12xf32>
      %40 = arith.addf %38, %39 : vector<8x12xf32>
      %41 = arith.negf %40 : vector<8x12xf32>
      %42 = math.exp %41 : vector<8x12xf32>
      %cst_29 = arith.constant 1.000000e+00 : f32
      %43 = vector.broadcast %cst_29 : f32 to vector<8x12xf32>
      %44 = arith.addf %43, %42 : vector<8x12xf32>
      %45 = arith.divf %43, %44 : vector<8x12xf32>
      %46 = vector.extract_strided_slice %37 {offsets = [0, 12], sizes = [8, 12], strides = [1, 1]} : vector<8x36xf32> to vector<8x12xf32>
      %47 = vector.extract_strided_slice %34 {offsets = [0, 12], sizes = [8, 12], strides = [1, 1]} : vector<8x36xf32> to vector<8x12xf32>
      %48 = arith.addf %46, %47 : vector<8x12xf32>
      %49 = arith.negf %48 : vector<8x12xf32>
      %50 = math.exp %49 : vector<8x12xf32>
      %cst_30 = arith.constant 1.000000e+00 : f32
      %51 = vector.broadcast %cst_30 : f32 to vector<8x12xf32>
      %52 = arith.addf %51, %50 : vector<8x12xf32>
      %53 = arith.divf %51, %52 : vector<8x12xf32>
      %54 = vector.extract_strided_slice %37 {offsets = [0, 24], sizes = [8, 12], strides = [1, 1]} : vector<8x36xf32> to vector<8x12xf32>
      %55 = vector.extract_strided_slice %34 {offsets = [0, 24], sizes = [8, 12], strides = [1, 1]} : vector<8x36xf32> to vector<8x12xf32>
      %56 = arith.mulf %45, %55 : vector<8x12xf32>
      %57 = arith.addf %54, %56 : vector<8x12xf32>
      %58 = math.tanh %57 : vector<8x12xf32>
      %cst_31 = arith.constant 1.000000e+00 : f32
      %59 = vector.broadcast %cst_31 : f32 to vector<8x12xf32>
      %60 = arith.subf %59, %53 : vector<8x12xf32>
      %61 = arith.mulf %60, %58 : vector<8x12xf32>
      %62 = arith.mulf %53, %29 : vector<8x12xf32>
      %63 = arith.addf %61, %62 : vector<8x12xf32>
      %c0_32 = arith.constant 0 : index
      %c0_33 = arith.constant 0 : index
      %64 = vector.load %arg7[%c0_32, %c0_33] : memref<8x12xf32, #tpu.memory_space<vmem>>, vector<8x12xf32>
      tpu.vector_store %arg7[%c0_32, %c0_33], %63 {strides = array<i32>} : memref<8x12xf32, #tpu.memory_space<vmem>>, vector<8x12xf32>,
      %65 = arith.index_cast %arg8 : i32 to index
      %c0_34 = arith.constant 0 : index
      %c0_35 = arith.constant 0 : index
      %66 = vector.load %arg5[%65, %c0_34, %c0_35] : memref<5x8x12xf32, #tpu.memory_space<vmem>>, vector<1x8x12xf32>
      %67 = vector.shape_cast %66 : vector<1x8x12xf32> to vector<8x12xf32>
      %68 = vector.shape_cast %63 : vector<8x12xf32> to vector<1x8x12xf32>
      tpu.vector_store %arg5[%65, %c0_34, %c0_35], %68 {strides = array<i32>} : memref<5x8x12xf32, #tpu.memory_space<vmem>>, vector<1x8x12xf32>,
    }
    %c5_i32_19 = arith.constant 5 : i32
    return
  }
}

module attributes {stable_mosaic.version = 11 : i64} {
  func.func @_gru_layer_kernel(%arg0: memref<40x16xf32, #tpu.memory_space<vmem>>, %arg1: memref<16x48xf32, #tpu.memory_space<vmem>>, %arg2: memref<16x48xf32, #tpu.memory_space<vmem>>, %arg3: memref<1x48xf32, #tpu.memory_space<vmem>>, %arg4: memref<1x48xf32, #tpu.memory_space<vmem>>, %arg5: memref<20x2x16xf32, #tpu.memory_space<vmem>>, %arg6: memref<20x2x48xf32, #tpu.memory_space<vmem>>, %arg7: memref<2x16xf32, #tpu.memory_space<vmem>>) attributes {dimension_semantics = [], scalar_prefetch = 0 : i64, scratch_operands = 2 : i64, tpu.core_type = #tpu.core_type<tc>} {
    %c0 = arith.constant 0 : index
    %c0_0 = arith.constant 0 : index
    %0 = vector.load %arg0[%c0, %c0_0] : memref<40x16xf32, #tpu.memory_space<vmem>>, vector<40x16xf32>
    %c0_1 = arith.constant 0 : index
    %c0_2 = arith.constant 0 : index
    %1 = vector.load %arg1[%c0_1, %c0_2] : memref<16x48xf32, #tpu.memory_space<vmem>>, vector<16x48xf32>
    %cst = arith.constant dense<0.000000e+00> : vector<40x48xf32>
    %2 = tpu.matmul %0, %1, %cst {dimension_numbers = #tpu.dot_dimension_numbers<[1], [0], [0], [1], [0, 0, 1, 1], [], []>} : vector<40x16xf32>, vector<16x48xf32>, vector<40x48xf32> -> vector<40x48xf32>
    %c0_3 = arith.constant 0 : index
    %c0_4 = arith.constant 0 : index
    %3 = vector.load %arg3[%c0_3, %c0_4] : memref<1x48xf32, #tpu.memory_space<vmem>>, vector<1x48xf32>
    %4 = vector.broadcast %3 : vector<1x48xf32> to vector<40x48xf32>
    %5 = arith.addf %2, %4 : vector<40x48xf32>
    %6 = vector.extract_strided_slice %5 {offsets = [0, 0], sizes = [2, 48], strides = [1, 1]} : vector<40x48xf32> to vector<2x48xf32>
    %c0_5 = arith.constant 0 : index
    %c0_6 = arith.constant 0 : index
    %c0_7 = arith.constant 0 : index
    %7 = vector.load %arg6[%c0_5, %c0_6, %c0_7] : memref<20x2x48xf32, #tpu.memory_space<vmem>>, vector<1x2x48xf32>
    %8 = vector.shape_cast %7 : vector<1x2x48xf32> to vector<2x48xf32>
    %9 = vector.shape_cast %6 : vector<2x48xf32> to vector<1x2x48xf32>
    tpu.vector_store %arg6[%c0_5, %c0_6, %c0_7], %9 {strides = array<i32>} : memref<20x2x48xf32, #tpu.memory_space<vmem>>, vector<1x2x48xf32>,
    %10 = vector.extract_strided_slice %5 {offsets = [2, 0], sizes = [2, 48], strides = [1, 1]} : vector<40x48xf32> to vector<2x48xf32>
    %c1 = arith.constant 1 : index
    %c0_8 = arith.constant 0 : index
    %c0_9 = arith.constant 0 : index
    %11 = vector.load %arg6[%c1, %c0_8, %c0_9] : memref<20x2x48xf32, #tpu.memory_space<vmem>>, vector<1x2x48xf32>
    %12 = vector.shape_cast %11 : vector<1x2x48xf32> to vector<2x48xf32>
    %13 = vector.shape_cast %10 : vector<2x48xf32> to vector<1x2x48xf32>
    tpu.vector_store %arg6[%c1, %c0_8, %c0_9], %13 {strides = array<i32>} : memref<20x2x48xf32, #tpu.memory_space<vmem>>, vector<1x2x48xf32>,
    %14 = vector.extract_strided_slice %5 {offsets = [4, 0], sizes = [2, 48], strides = [1, 1]} : vector<40x48xf32> to vector<2x48xf32>
    %c2 = arith.constant 2 : index
    %c0_10 = arith.constant 0 : index
    %c0_11 = arith.constant 0 : index
    %15 = vector.load %arg6[%c2, %c0_10, %c0_11] : memref<20x2x48xf32, #tpu.memory_space<vmem>>, vector<1x2x48xf32>
    %16 = vector.shape_cast %15 : vector<1x2x48xf32> to vector<2x48xf32>
    %17 = vector.shape_cast %14 : vector<2x48xf32> to vector<1x2x48xf32>
    tpu.vector_store %arg6[%c2, %c0_10, %c0_11], %17 {strides = array<i32>} : memref<20x2x48xf32, #tpu.memory_space<vmem>>, vector<1x2x48xf32>,
    %18 = vector.extract_strided_slice %5 {offsets = [6, 0], sizes = [2, 48], strides = [1, 1]} : vector<40x48xf32> to vector<2x48xf32>
    %c3 = arith.constant 3 : index
    %c0_12 = arith.constant 0 : index
    %c0_13 = arith.constant 0 : index
    %19 = vector.load %arg6[%c3, %c0_12, %c0_13] : memref<20x2x48xf32, #tpu.memory_space<vmem>>, vector<1x2x48xf32>
    %20 = vector.shape_cast %19 : vector<1x2x48xf32> to vector<2x48xf32>
    %21 = vector.shape_cast %18 : vector<2x48xf32> to vector<1x2x48xf32>
    tpu.vector_store %arg6[%c3, %c0_12, %c0_13], %21 {strides = array<i32>} : memref<20x2x48xf32, #tpu.memory_space<vmem>>, vector<1x2x48xf32>,
    %22 = vector.extract_strided_slice %5 {offsets = [8, 0], sizes = [2, 48], strides = [1, 1]} : vector<40x48xf32> to vector<2x48xf32>
    %c4 = arith.constant 4 : index
    %c0_14 = arith.constant 0 : index
    %c0_15 = arith.constant 0 : index
    %23 = vector.load %arg6[%c4, %c0_14, %c0_15] : memref<20x2x48xf32, #tpu.memory_space<vmem>>, vector<1x2x48xf32>
    %24 = vector.shape_cast %23 : vector<1x2x48xf32> to vector<2x48xf32>
    %25 = vector.shape_cast %22 : vector<2x48xf32> to vector<1x2x48xf32>
    tpu.vector_store %arg6[%c4, %c0_14, %c0_15], %25 {strides = array<i32>} : memref<20x2x48xf32, #tpu.memory_space<vmem>>, vector<1x2x48xf32>,
    %26 = vector.extract_strided_slice %5 {offsets = [10, 0], sizes = [2, 48], strides = [1, 1]} : vector<40x48xf32> to vector<2x48xf32>
    %c5 = arith.constant 5 : index
    %c0_16 = arith.constant 0 : index
    %c0_17 = arith.constant 0 : index
    %27 = vector.load %arg6[%c5, %c0_16, %c0_17] : memref<20x2x48xf32, #tpu.memory_space<vmem>>, vector<1x2x48xf32>
    %28 = vector.shape_cast %27 : vector<1x2x48xf32> to vector<2x48xf32>
    %29 = vector.shape_cast %26 : vector<2x48xf32> to vector<1x2x48xf32>
    tpu.vector_store %arg6[%c5, %c0_16, %c0_17], %29 {strides = array<i32>} : memref<20x2x48xf32, #tpu.memory_space<vmem>>, vector<1x2x48xf32>,
    %30 = vector.extract_strided_slice %5 {offsets = [12, 0], sizes = [2, 48], strides = [1, 1]} : vector<40x48xf32> to vector<2x48xf32>
    %c6 = arith.constant 6 : index
    %c0_18 = arith.constant 0 : index
    %c0_19 = arith.constant 0 : index
    %31 = vector.load %arg6[%c6, %c0_18, %c0_19] : memref<20x2x48xf32, #tpu.memory_space<vmem>>, vector<1x2x48xf32>
    %32 = vector.shape_cast %31 : vector<1x2x48xf32> to vector<2x48xf32>
    %33 = vector.shape_cast %30 : vector<2x48xf32> to vector<1x2x48xf32>
    tpu.vector_store %arg6[%c6, %c0_18, %c0_19], %33 {strides = array<i32>} : memref<20x2x48xf32, #tpu.memory_space<vmem>>, vector<1x2x48xf32>,
    %34 = vector.extract_strided_slice %5 {offsets = [14, 0], sizes = [2, 48], strides = [1, 1]} : vector<40x48xf32> to vector<2x48xf32>
    %c7 = arith.constant 7 : index
    %c0_20 = arith.constant 0 : index
    %c0_21 = arith.constant 0 : index
    %35 = vector.load %arg6[%c7, %c0_20, %c0_21] : memref<20x2x48xf32, #tpu.memory_space<vmem>>, vector<1x2x48xf32>
    %36 = vector.shape_cast %35 : vector<1x2x48xf32> to vector<2x48xf32>
    %37 = vector.shape_cast %34 : vector<2x48xf32> to vector<1x2x48xf32>
    tpu.vector_store %arg6[%c7, %c0_20, %c0_21], %37 {strides = array<i32>} : memref<20x2x48xf32, #tpu.memory_space<vmem>>, vector<1x2x48xf32>,
    %38 = vector.extract_strided_slice %5 {offsets = [16, 0], sizes = [2, 48], strides = [1, 1]} : vector<40x48xf32> to vector<2x48xf32>
    %c8 = arith.constant 8 : index
    %c0_22 = arith.constant 0 : index
    %c0_23 = arith.constant 0 : index
    %39 = vector.load %arg6[%c8, %c0_22, %c0_23] : memref<20x2x48xf32, #tpu.memory_space<vmem>>, vector<1x2x48xf32>
    %40 = vector.shape_cast %39 : vector<1x2x48xf32> to vector<2x48xf32>
    %41 = vector.shape_cast %38 : vector<2x48xf32> to vector<1x2x48xf32>
    tpu.vector_store %arg6[%c8, %c0_22, %c0_23], %41 {strides = array<i32>} : memref<20x2x48xf32, #tpu.memory_space<vmem>>, vector<1x2x48xf32>,
    %42 = vector.extract_strided_slice %5 {offsets = [18, 0], sizes = [2, 48], strides = [1, 1]} : vector<40x48xf32> to vector<2x48xf32>
    %c9 = arith.constant 9 : index
    %c0_24 = arith.constant 0 : index
    %c0_25 = arith.constant 0 : index
    %43 = vector.load %arg6[%c9, %c0_24, %c0_25] : memref<20x2x48xf32, #tpu.memory_space<vmem>>, vector<1x2x48xf32>
    %44 = vector.shape_cast %43 : vector<1x2x48xf32> to vector<2x48xf32>
    %45 = vector.shape_cast %42 : vector<2x48xf32> to vector<1x2x48xf32>
    tpu.vector_store %arg6[%c9, %c0_24, %c0_25], %45 {strides = array<i32>} : memref<20x2x48xf32, #tpu.memory_space<vmem>>, vector<1x2x48xf32>,
    %46 = vector.extract_strided_slice %5 {offsets = [20, 0], sizes = [2, 48], strides = [1, 1]} : vector<40x48xf32> to vector<2x48xf32>
    %c10 = arith.constant 10 : index
    %c0_26 = arith.constant 0 : index
    %c0_27 = arith.constant 0 : index
    %47 = vector.load %arg6[%c10, %c0_26, %c0_27] : memref<20x2x48xf32, #tpu.memory_space<vmem>>, vector<1x2x48xf32>
    %48 = vector.shape_cast %47 : vector<1x2x48xf32> to vector<2x48xf32>
    %49 = vector.shape_cast %46 : vector<2x48xf32> to vector<1x2x48xf32>
    tpu.vector_store %arg6[%c10, %c0_26, %c0_27], %49 {strides = array<i32>} : memref<20x2x48xf32, #tpu.memory_space<vmem>>, vector<1x2x48xf32>,
    %50 = vector.extract_strided_slice %5 {offsets = [22, 0], sizes = [2, 48], strides = [1, 1]} : vector<40x48xf32> to vector<2x48xf32>
    %c11 = arith.constant 11 : index
    %c0_28 = arith.constant 0 : index
    %c0_29 = arith.constant 0 : index
    %51 = vector.load %arg6[%c11, %c0_28, %c0_29] : memref<20x2x48xf32, #tpu.memory_space<vmem>>, vector<1x2x48xf32>
    %52 = vector.shape_cast %51 : vector<1x2x48xf32> to vector<2x48xf32>
    %53 = vector.shape_cast %50 : vector<2x48xf32> to vector<1x2x48xf32>
    tpu.vector_store %arg6[%c11, %c0_28, %c0_29], %53 {strides = array<i32>} : memref<20x2x48xf32, #tpu.memory_space<vmem>>, vector<1x2x48xf32>,
    %54 = vector.extract_strided_slice %5 {offsets = [24, 0], sizes = [2, 48], strides = [1, 1]} : vector<40x48xf32> to vector<2x48xf32>
    %c12 = arith.constant 12 : index
    %c0_30 = arith.constant 0 : index
    %c0_31 = arith.constant 0 : index
    %55 = vector.load %arg6[%c12, %c0_30, %c0_31] : memref<20x2x48xf32, #tpu.memory_space<vmem>>, vector<1x2x48xf32>
    %56 = vector.shape_cast %55 : vector<1x2x48xf32> to vector<2x48xf32>
    %57 = vector.shape_cast %54 : vector<2x48xf32> to vector<1x2x48xf32>
    tpu.vector_store %arg6[%c12, %c0_30, %c0_31], %57 {strides = array<i32>} : memref<20x2x48xf32, #tpu.memory_space<vmem>>, vector<1x2x48xf32>,
    %58 = vector.extract_strided_slice %5 {offsets = [26, 0], sizes = [2, 48], strides = [1, 1]} : vector<40x48xf32> to vector<2x48xf32>
    %c13 = arith.constant 13 : index
    %c0_32 = arith.constant 0 : index
    %c0_33 = arith.constant 0 : index
    %59 = vector.load %arg6[%c13, %c0_32, %c0_33] : memref<20x2x48xf32, #tpu.memory_space<vmem>>, vector<1x2x48xf32>
    %60 = vector.shape_cast %59 : vector<1x2x48xf32> to vector<2x48xf32>
    %61 = vector.shape_cast %58 : vector<2x48xf32> to vector<1x2x48xf32>
    tpu.vector_store %arg6[%c13, %c0_32, %c0_33], %61 {strides = array<i32>} : memref<20x2x48xf32, #tpu.memory_space<vmem>>, vector<1x2x48xf32>,
    %62 = vector.extract_strided_slice %5 {offsets = [28, 0], sizes = [2, 48], strides = [1, 1]} : vector<40x48xf32> to vector<2x48xf32>
    %c14 = arith.constant 14 : index
    %c0_34 = arith.constant 0 : index
    %c0_35 = arith.constant 0 : index
    %63 = vector.load %arg6[%c14, %c0_34, %c0_35] : memref<20x2x48xf32, #tpu.memory_space<vmem>>, vector<1x2x48xf32>
    %64 = vector.shape_cast %63 : vector<1x2x48xf32> to vector<2x48xf32>
    %65 = vector.shape_cast %62 : vector<2x48xf32> to vector<1x2x48xf32>
    tpu.vector_store %arg6[%c14, %c0_34, %c0_35], %65 {strides = array<i32>} : memref<20x2x48xf32, #tpu.memory_space<vmem>>, vector<1x2x48xf32>,
    %66 = vector.extract_strided_slice %5 {offsets = [30, 0], sizes = [2, 48], strides = [1, 1]} : vector<40x48xf32> to vector<2x48xf32>
    %c15 = arith.constant 15 : index
    %c0_36 = arith.constant 0 : index
    %c0_37 = arith.constant 0 : index
    %67 = vector.load %arg6[%c15, %c0_36, %c0_37] : memref<20x2x48xf32, #tpu.memory_space<vmem>>, vector<1x2x48xf32>
    %68 = vector.shape_cast %67 : vector<1x2x48xf32> to vector<2x48xf32>
    %69 = vector.shape_cast %66 : vector<2x48xf32> to vector<1x2x48xf32>
    tpu.vector_store %arg6[%c15, %c0_36, %c0_37], %69 {strides = array<i32>} : memref<20x2x48xf32, #tpu.memory_space<vmem>>, vector<1x2x48xf32>,
    %70 = vector.extract_strided_slice %5 {offsets = [32, 0], sizes = [2, 48], strides = [1, 1]} : vector<40x48xf32> to vector<2x48xf32>
    %c16 = arith.constant 16 : index
    %c0_38 = arith.constant 0 : index
    %c0_39 = arith.constant 0 : index
    %71 = vector.load %arg6[%c16, %c0_38, %c0_39] : memref<20x2x48xf32, #tpu.memory_space<vmem>>, vector<1x2x48xf32>
    %72 = vector.shape_cast %71 : vector<1x2x48xf32> to vector<2x48xf32>
    %73 = vector.shape_cast %70 : vector<2x48xf32> to vector<1x2x48xf32>
    tpu.vector_store %arg6[%c16, %c0_38, %c0_39], %73 {strides = array<i32>} : memref<20x2x48xf32, #tpu.memory_space<vmem>>, vector<1x2x48xf32>,
    %74 = vector.extract_strided_slice %5 {offsets = [34, 0], sizes = [2, 48], strides = [1, 1]} : vector<40x48xf32> to vector<2x48xf32>
    %c17 = arith.constant 17 : index
    %c0_40 = arith.constant 0 : index
    %c0_41 = arith.constant 0 : index
    %75 = vector.load %arg6[%c17, %c0_40, %c0_41] : memref<20x2x48xf32, #tpu.memory_space<vmem>>, vector<1x2x48xf32>
    %76 = vector.shape_cast %75 : vector<1x2x48xf32> to vector<2x48xf32>
    %77 = vector.shape_cast %74 : vector<2x48xf32> to vector<1x2x48xf32>
    tpu.vector_store %arg6[%c17, %c0_40, %c0_41], %77 {strides = array<i32>} : memref<20x2x48xf32, #tpu.memory_space<vmem>>, vector<1x2x48xf32>,
    %78 = vector.extract_strided_slice %5 {offsets = [36, 0], sizes = [2, 48], strides = [1, 1]} : vector<40x48xf32> to vector<2x48xf32>
    %c18 = arith.constant 18 : index
    %c0_42 = arith.constant 0 : index
    %c0_43 = arith.constant 0 : index
    %79 = vector.load %arg6[%c18, %c0_42, %c0_43] : memref<20x2x48xf32, #tpu.memory_space<vmem>>, vector<1x2x48xf32>
    %80 = vector.shape_cast %79 : vector<1x2x48xf32> to vector<2x48xf32>
    %81 = vector.shape_cast %78 : vector<2x48xf32> to vector<1x2x48xf32>
    tpu.vector_store %arg6[%c18, %c0_42, %c0_43], %81 {strides = array<i32>} : memref<20x2x48xf32, #tpu.memory_space<vmem>>, vector<1x2x48xf32>,
    %82 = vector.extract_strided_slice %5 {offsets = [38, 0], sizes = [2, 48], strides = [1, 1]} : vector<40x48xf32> to vector<2x48xf32>
    %c19 = arith.constant 19 : index
    %c0_44 = arith.constant 0 : index
    %c0_45 = arith.constant 0 : index
    %83 = vector.load %arg6[%c19, %c0_44, %c0_45] : memref<20x2x48xf32, #tpu.memory_space<vmem>>, vector<1x2x48xf32>
    %84 = vector.shape_cast %83 : vector<1x2x48xf32> to vector<2x48xf32>
    %85 = vector.shape_cast %82 : vector<2x48xf32> to vector<1x2x48xf32>
    tpu.vector_store %arg6[%c19, %c0_44, %c0_45], %85 {strides = array<i32>} : memref<20x2x48xf32, #tpu.memory_space<vmem>>, vector<1x2x48xf32>,
    %cst_46 = arith.constant 0.000000e+00 : f32
    %86 = vector.broadcast %cst_46 : f32 to vector<2x16xf32>
    %c0_47 = arith.constant 0 : index
    %c0_48 = arith.constant 0 : index
    %87 = vector.load %arg7[%c0_47, %c0_48] : memref<2x16xf32, #tpu.memory_space<vmem>>, vector<2x16xf32>
    tpu.vector_store %arg7[%c0_47, %c0_48], %86 {strides = array<i32>} : memref<2x16xf32, #tpu.memory_space<vmem>>, vector<2x16xf32>,
    %c0_i32 = arith.constant 0 : i32
    %c20_i32 = arith.constant 20 : i32
    %88 = arith.addi %c0_i32, %c20_i32 : i32
    %c1_i32 = arith.constant 1 : i32
    scf.for %arg8 = %c0_i32 to %88 step %c1_i32  : i32 {
      %c0_50 = arith.constant 0 : index
      %c0_51 = arith.constant 0 : index
      %89 = vector.load %arg7[%c0_50, %c0_51] : memref<2x16xf32, #tpu.memory_space<vmem>>, vector<2x16xf32>
      %c0_52 = arith.constant 0 : index
      %c0_53 = arith.constant 0 : index
      %90 = vector.load %arg2[%c0_52, %c0_53] : memref<16x48xf32, #tpu.memory_space<vmem>>, vector<16x48xf32>
      %cst_54 = arith.constant dense<0.000000e+00> : vector<2x48xf32>
      %91 = tpu.matmul %89, %90, %cst_54 {dimension_numbers = #tpu.dot_dimension_numbers<[1], [0], [0], [1], [0, 0, 1, 1], [], []>} : vector<2x16xf32>, vector<16x48xf32>, vector<2x48xf32> -> vector<2x48xf32>
      %c0_55 = arith.constant 0 : index
      %c0_56 = arith.constant 0 : index
      %92 = vector.load %arg4[%c0_55, %c0_56] : memref<1x48xf32, #tpu.memory_space<vmem>>, vector<1x48xf32>
      %93 = vector.broadcast %92 : vector<1x48xf32> to vector<2x48xf32>
      %94 = arith.addf %91, %93 : vector<2x48xf32>
      %95 = arith.index_cast %arg8 : i32 to index
      %c0_57 = arith.constant 0 : index
      %c0_58 = arith.constant 0 : index
      %96 = vector.load %arg6[%95, %c0_57, %c0_58] : memref<20x2x48xf32, #tpu.memory_space<vmem>>, vector<1x2x48xf32>
      %97 = vector.shape_cast %96 : vector<1x2x48xf32> to vector<2x48xf32>
      %98 = vector.extract_strided_slice %97 {offsets = [0, 0], sizes = [2, 16], strides = [1, 1]} : vector<2x48xf32> to vector<2x16xf32>
      %99 = vector.extract_strided_slice %94 {offsets = [0, 0], sizes = [2, 16], strides = [1, 1]} : vector<2x48xf32> to vector<2x16xf32>
      %100 = arith.addf %98, %99 : vector<2x16xf32>
      %101 = arith.negf %100 : vector<2x16xf32>
      %102 = math.exp %101 : vector<2x16xf32>
      %cst_59 = arith.constant 1.000000e+00 : f32
      %103 = vector.broadcast %cst_59 : f32 to vector<2x16xf32>
      %104 = arith.addf %103, %102 : vector<2x16xf32>
      %105 = arith.divf %103, %104 : vector<2x16xf32>
      %106 = vector.extract_strided_slice %97 {offsets = [0, 16], sizes = [2, 16], strides = [1, 1]} : vector<2x48xf32> to vector<2x16xf32>
      %107 = vector.extract_strided_slice %94 {offsets = [0, 16], sizes = [2, 16], strides = [1, 1]} : vector<2x48xf32> to vector<2x16xf32>
      %108 = arith.addf %106, %107 : vector<2x16xf32>
      %109 = arith.negf %108 : vector<2x16xf32>
      %110 = math.exp %109 : vector<2x16xf32>
      %cst_60 = arith.constant 1.000000e+00 : f32
      %111 = vector.broadcast %cst_60 : f32 to vector<2x16xf32>
      %112 = arith.addf %111, %110 : vector<2x16xf32>
      %113 = arith.divf %111, %112 : vector<2x16xf32>
      %114 = vector.extract_strided_slice %97 {offsets = [0, 32], sizes = [2, 16], strides = [1, 1]} : vector<2x48xf32> to vector<2x16xf32>
      %115 = vector.extract_strided_slice %94 {offsets = [0, 32], sizes = [2, 16], strides = [1, 1]} : vector<2x48xf32> to vector<2x16xf32>
      %116 = arith.mulf %105, %115 : vector<2x16xf32>
      %117 = arith.addf %114, %116 : vector<2x16xf32>
      %118 = math.tanh %117 : vector<2x16xf32>
      %cst_61 = arith.constant 1.000000e+00 : f32
      %119 = vector.broadcast %cst_61 : f32 to vector<2x16xf32>
      %120 = arith.subf %119, %113 : vector<2x16xf32>
      %121 = arith.mulf %120, %118 : vector<2x16xf32>
      %122 = arith.mulf %113, %89 : vector<2x16xf32>
      %123 = arith.addf %121, %122 : vector<2x16xf32>
      %c0_62 = arith.constant 0 : index
      %c0_63 = arith.constant 0 : index
      %124 = vector.load %arg7[%c0_62, %c0_63] : memref<2x16xf32, #tpu.memory_space<vmem>>, vector<2x16xf32>
      tpu.vector_store %arg7[%c0_62, %c0_63], %123 {strides = array<i32>} : memref<2x16xf32, #tpu.memory_space<vmem>>, vector<2x16xf32>,
      %125 = arith.index_cast %arg8 : i32 to index
      %c0_64 = arith.constant 0 : index
      %c0_65 = arith.constant 0 : index
      %126 = vector.load %arg5[%125, %c0_64, %c0_65] : memref<20x2x16xf32, #tpu.memory_space<vmem>>, vector<1x2x16xf32>
      %127 = vector.shape_cast %126 : vector<1x2x16xf32> to vector<2x16xf32>
      %128 = vector.shape_cast %123 : vector<2x16xf32> to vector<1x2x16xf32>
      tpu.vector_store %arg5[%125, %c0_64, %c0_65], %128 {strides = array<i32>} : memref<20x2x16xf32, #tpu.memory_space<vmem>>, vector<1x2x16xf32>,
    }
    %c20_i32_49 = arith.constant 20 : i32
    return
  }
}

module attributes {stable_mosaic.version = 11 : i64} {
  func.func @_gru_layer_kernel(%arg0: memref<64x12xf32, #tpu.memory_space<vmem>>, %arg1: memref<12x24xf32, #tpu.memory_space<vmem>>, %arg2: memref<8x24xf32, #tpu.memory_space<vmem>>, %arg3: memref<1x24xf32, #tpu.memory_space<vmem>>, %arg4: memref<1x24xf32, #tpu.memory_space<vmem>>, %arg5: memref<2x32x8xf32, #tpu.memory_space<vmem>>, %arg6: memref<2x32x24xf32, #tpu.memory_space<vmem>>, %arg7: memref<32x8xf32, #tpu.memory_space<vmem>>) attributes {dimension_semantics = [], scalar_prefetch = 0 : i64, scratch_operands = 2 : i64, tpu.core_type = #tpu.core_type<tc>} {
    %c0 = arith.constant 0 : index
    %c0_0 = arith.constant 0 : index
    %0 = vector.load %arg0[%c0, %c0_0] : memref<64x12xf32, #tpu.memory_space<vmem>>, vector<64x12xf32>
    %c0_1 = arith.constant 0 : index
    %c0_2 = arith.constant 0 : index
    %1 = vector.load %arg1[%c0_1, %c0_2] : memref<12x24xf32, #tpu.memory_space<vmem>>, vector<12x24xf32>
    %cst = arith.constant dense<0.000000e+00> : vector<64x24xf32>
    %2 = tpu.matmul %0, %1, %cst {dimension_numbers = #tpu.dot_dimension_numbers<[1], [0], [0], [1], [0, 0, 1, 1], [], []>} : vector<64x12xf32>, vector<12x24xf32>, vector<64x24xf32> -> vector<64x24xf32>
    %c0_3 = arith.constant 0 : index
    %c0_4 = arith.constant 0 : index
    %3 = vector.load %arg3[%c0_3, %c0_4] : memref<1x24xf32, #tpu.memory_space<vmem>>, vector<1x24xf32>
    %4 = vector.broadcast %3 : vector<1x24xf32> to vector<64x24xf32>
    %5 = arith.addf %2, %4 : vector<64x24xf32>
    %6 = vector.extract_strided_slice %5 {offsets = [0, 0], sizes = [32, 24], strides = [1, 1]} : vector<64x24xf32> to vector<32x24xf32>
    %c0_5 = arith.constant 0 : index
    %c0_6 = arith.constant 0 : index
    %c0_7 = arith.constant 0 : index
    %7 = vector.load %arg6[%c0_5, %c0_6, %c0_7] : memref<2x32x24xf32, #tpu.memory_space<vmem>>, vector<1x32x24xf32>
    %8 = vector.shape_cast %7 : vector<1x32x24xf32> to vector<32x24xf32>
    %9 = vector.shape_cast %6 : vector<32x24xf32> to vector<1x32x24xf32>
    tpu.vector_store %arg6[%c0_5, %c0_6, %c0_7], %9 {strides = array<i32>} : memref<2x32x24xf32, #tpu.memory_space<vmem>>, vector<1x32x24xf32>,
    %10 = vector.extract_strided_slice %5 {offsets = [32, 0], sizes = [32, 24], strides = [1, 1]} : vector<64x24xf32> to vector<32x24xf32>
    %c1 = arith.constant 1 : index
    %c0_8 = arith.constant 0 : index
    %c0_9 = arith.constant 0 : index
    %11 = vector.load %arg6[%c1, %c0_8, %c0_9] : memref<2x32x24xf32, #tpu.memory_space<vmem>>, vector<1x32x24xf32>
    %12 = vector.shape_cast %11 : vector<1x32x24xf32> to vector<32x24xf32>
    %13 = vector.shape_cast %10 : vector<32x24xf32> to vector<1x32x24xf32>
    tpu.vector_store %arg6[%c1, %c0_8, %c0_9], %13 {strides = array<i32>} : memref<2x32x24xf32, #tpu.memory_space<vmem>>, vector<1x32x24xf32>,
    %cst_10 = arith.constant 0.000000e+00 : f32
    %14 = vector.broadcast %cst_10 : f32 to vector<32x8xf32>
    %c0_11 = arith.constant 0 : index
    %c0_12 = arith.constant 0 : index
    %15 = vector.load %arg7[%c0_11, %c0_12] : memref<32x8xf32, #tpu.memory_space<vmem>>, vector<32x8xf32>
    tpu.vector_store %arg7[%c0_11, %c0_12], %14 {strides = array<i32>} : memref<32x8xf32, #tpu.memory_space<vmem>>, vector<32x8xf32>,
    %c0_i32 = arith.constant 0 : i32
    %c2_i32 = arith.constant 2 : i32
    %16 = arith.addi %c0_i32, %c2_i32 : i32
    %c1_i32 = arith.constant 1 : i32
    scf.for %arg8 = %c0_i32 to %16 step %c1_i32  : i32 {
      %c0_14 = arith.constant 0 : index
      %c0_15 = arith.constant 0 : index
      %17 = vector.load %arg7[%c0_14, %c0_15] : memref<32x8xf32, #tpu.memory_space<vmem>>, vector<32x8xf32>
      %c0_16 = arith.constant 0 : index
      %c0_17 = arith.constant 0 : index
      %18 = vector.load %arg2[%c0_16, %c0_17] : memref<8x24xf32, #tpu.memory_space<vmem>>, vector<8x24xf32>
      %cst_18 = arith.constant dense<0.000000e+00> : vector<32x24xf32>
      %19 = tpu.matmul %17, %18, %cst_18 {dimension_numbers = #tpu.dot_dimension_numbers<[1], [0], [0], [1], [0, 0, 1, 1], [], []>} : vector<32x8xf32>, vector<8x24xf32>, vector<32x24xf32> -> vector<32x24xf32>
      %c0_19 = arith.constant 0 : index
      %c0_20 = arith.constant 0 : index
      %20 = vector.load %arg4[%c0_19, %c0_20] : memref<1x24xf32, #tpu.memory_space<vmem>>, vector<1x24xf32>
      %21 = vector.broadcast %20 : vector<1x24xf32> to vector<32x24xf32>
      %22 = arith.addf %19, %21 : vector<32x24xf32>
      %23 = arith.index_cast %arg8 : i32 to index
      %c0_21 = arith.constant 0 : index
      %c0_22 = arith.constant 0 : index
      %24 = vector.load %arg6[%23, %c0_21, %c0_22] : memref<2x32x24xf32, #tpu.memory_space<vmem>>, vector<1x32x24xf32>
      %25 = vector.shape_cast %24 : vector<1x32x24xf32> to vector<32x24xf32>
      %26 = vector.extract_strided_slice %25 {offsets = [0, 0], sizes = [32, 8], strides = [1, 1]} : vector<32x24xf32> to vector<32x8xf32>
      %27 = vector.extract_strided_slice %22 {offsets = [0, 0], sizes = [32, 8], strides = [1, 1]} : vector<32x24xf32> to vector<32x8xf32>
      %28 = arith.addf %26, %27 : vector<32x8xf32>
      %29 = arith.negf %28 : vector<32x8xf32>
      %30 = math.exp %29 : vector<32x8xf32>
      %cst_23 = arith.constant 1.000000e+00 : f32
      %31 = vector.broadcast %cst_23 : f32 to vector<32x8xf32>
      %32 = arith.addf %31, %30 : vector<32x8xf32>
      %33 = arith.divf %31, %32 : vector<32x8xf32>
      %34 = vector.extract_strided_slice %25 {offsets = [0, 8], sizes = [32, 8], strides = [1, 1]} : vector<32x24xf32> to vector<32x8xf32>
      %35 = vector.extract_strided_slice %22 {offsets = [0, 8], sizes = [32, 8], strides = [1, 1]} : vector<32x24xf32> to vector<32x8xf32>
      %36 = arith.addf %34, %35 : vector<32x8xf32>
      %37 = arith.negf %36 : vector<32x8xf32>
      %38 = math.exp %37 : vector<32x8xf32>
      %cst_24 = arith.constant 1.000000e+00 : f32
      %39 = vector.broadcast %cst_24 : f32 to vector<32x8xf32>
      %40 = arith.addf %39, %38 : vector<32x8xf32>
      %41 = arith.divf %39, %40 : vector<32x8xf32>
      %42 = vector.extract_strided_slice %25 {offsets = [0, 16], sizes = [32, 8], strides = [1, 1]} : vector<32x24xf32> to vector<32x8xf32>
      %43 = vector.extract_strided_slice %22 {offsets = [0, 16], sizes = [32, 8], strides = [1, 1]} : vector<32x24xf32> to vector<32x8xf32>
      %44 = arith.mulf %33, %43 : vector<32x8xf32>
      %45 = arith.addf %42, %44 : vector<32x8xf32>
      %46 = math.tanh %45 : vector<32x8xf32>
      %cst_25 = arith.constant 1.000000e+00 : f32
      %47 = vector.broadcast %cst_25 : f32 to vector<32x8xf32>
      %48 = arith.subf %47, %41 : vector<32x8xf32>
      %49 = arith.mulf %48, %46 : vector<32x8xf32>
      %50 = arith.mulf %41, %17 : vector<32x8xf32>
      %51 = arith.addf %49, %50 : vector<32x8xf32>
      %c0_26 = arith.constant 0 : index
      %c0_27 = arith.constant 0 : index
      %52 = vector.load %arg7[%c0_26, %c0_27] : memref<32x8xf32, #tpu.memory_space<vmem>>, vector<32x8xf32>
      tpu.vector_store %arg7[%c0_26, %c0_27], %51 {strides = array<i32>} : memref<32x8xf32, #tpu.memory_space<vmem>>, vector<32x8xf32>,
      %53 = arith.index_cast %arg8 : i32 to index
      %c0_28 = arith.constant 0 : index
      %c0_29 = arith.constant 0 : index
      %54 = vector.load %arg5[%53, %c0_28, %c0_29] : memref<2x32x8xf32, #tpu.memory_space<vmem>>, vector<1x32x8xf32>
      %55 = vector.shape_cast %54 : vector<1x32x8xf32> to vector<32x8xf32>
      %56 = vector.shape_cast %51 : vector<32x8xf32> to vector<1x32x8xf32>
      tpu.vector_store %arg5[%53, %c0_28, %c0_29], %56 {strides = array<i32>} : memref<2x32x8xf32, #tpu.memory_space<vmem>>, vector<1x32x8xf32>,
    }
    %c2_i32_13 = arith.constant 2 : i32
    return
  }
}

module attributes {stable_mosaic.version = 11 : i64} {
  func.func @_gru_layer_kernel(%arg0: memref<40x8xf32, #tpu.memory_space<vmem>>, %arg1: memref<8x36xf32, #tpu.memory_space<vmem>>, %arg2: memref<12x36xf32, #tpu.memory_space<vmem>>, %arg3: memref<1x36xf32, #tpu.memory_space<vmem>>, %arg4: memref<1x36xf32, #tpu.memory_space<vmem>>, %arg5: memref<20x2x12xf32, #tpu.memory_space<vmem>>, %arg6: memref<20x2x36xf32, #tpu.memory_space<vmem>>, %arg7: memref<2x12xf32, #tpu.memory_space<vmem>>) attributes {dimension_semantics = [], scalar_prefetch = 0 : i64, scratch_operands = 2 : i64, tpu.core_type = #tpu.core_type<tc>} {
    %c0 = arith.constant 0 : index
    %c0_0 = arith.constant 0 : index
    %0 = vector.load %arg0[%c0, %c0_0] : memref<40x8xf32, #tpu.memory_space<vmem>>, vector<40x8xf32>
    %c0_1 = arith.constant 0 : index
    %c0_2 = arith.constant 0 : index
    %1 = vector.load %arg1[%c0_1, %c0_2] : memref<8x36xf32, #tpu.memory_space<vmem>>, vector<8x36xf32>
    %cst = arith.constant dense<0.000000e+00> : vector<40x36xf32>
    %2 = tpu.matmul %0, %1, %cst {dimension_numbers = #tpu.dot_dimension_numbers<[1], [0], [0], [1], [0, 0, 1, 1], [], []>} : vector<40x8xf32>, vector<8x36xf32>, vector<40x36xf32> -> vector<40x36xf32>
    %c0_3 = arith.constant 0 : index
    %c0_4 = arith.constant 0 : index
    %3 = vector.load %arg3[%c0_3, %c0_4] : memref<1x36xf32, #tpu.memory_space<vmem>>, vector<1x36xf32>
    %4 = vector.broadcast %3 : vector<1x36xf32> to vector<40x36xf32>
    %5 = arith.addf %2, %4 : vector<40x36xf32>
    %6 = vector.extract_strided_slice %5 {offsets = [0, 0], sizes = [2, 36], strides = [1, 1]} : vector<40x36xf32> to vector<2x36xf32>
    %c0_5 = arith.constant 0 : index
    %c0_6 = arith.constant 0 : index
    %c0_7 = arith.constant 0 : index
    %7 = vector.load %arg6[%c0_5, %c0_6, %c0_7] : memref<20x2x36xf32, #tpu.memory_space<vmem>>, vector<1x2x36xf32>
    %8 = vector.shape_cast %7 : vector<1x2x36xf32> to vector<2x36xf32>
    %9 = vector.shape_cast %6 : vector<2x36xf32> to vector<1x2x36xf32>
    tpu.vector_store %arg6[%c0_5, %c0_6, %c0_7], %9 {strides = array<i32>} : memref<20x2x36xf32, #tpu.memory_space<vmem>>, vector<1x2x36xf32>,
    %10 = vector.extract_strided_slice %5 {offsets = [2, 0], sizes = [2, 36], strides = [1, 1]} : vector<40x36xf32> to vector<2x36xf32>
    %c1 = arith.constant 1 : index
    %c0_8 = arith.constant 0 : index
    %c0_9 = arith.constant 0 : index
    %11 = vector.load %arg6[%c1, %c0_8, %c0_9] : memref<20x2x36xf32, #tpu.memory_space<vmem>>, vector<1x2x36xf32>
    %12 = vector.shape_cast %11 : vector<1x2x36xf32> to vector<2x36xf32>
    %13 = vector.shape_cast %10 : vector<2x36xf32> to vector<1x2x36xf32>
    tpu.vector_store %arg6[%c1, %c0_8, %c0_9], %13 {strides = array<i32>} : memref<20x2x36xf32, #tpu.memory_space<vmem>>, vector<1x2x36xf32>,
    %14 = vector.extract_strided_slice %5 {offsets = [4, 0], sizes = [2, 36], strides = [1, 1]} : vector<40x36xf32> to vector<2x36xf32>
    %c2 = arith.constant 2 : index
    %c0_10 = arith.constant 0 : index
    %c0_11 = arith.constant 0 : index
    %15 = vector.load %arg6[%c2, %c0_10, %c0_11] : memref<20x2x36xf32, #tpu.memory_space<vmem>>, vector<1x2x36xf32>
    %16 = vector.shape_cast %15 : vector<1x2x36xf32> to vector<2x36xf32>
    %17 = vector.shape_cast %14 : vector<2x36xf32> to vector<1x2x36xf32>
    tpu.vector_store %arg6[%c2, %c0_10, %c0_11], %17 {strides = array<i32>} : memref<20x2x36xf32, #tpu.memory_space<vmem>>, vector<1x2x36xf32>,
    %18 = vector.extract_strided_slice %5 {offsets = [6, 0], sizes = [2, 36], strides = [1, 1]} : vector<40x36xf32> to vector<2x36xf32>
    %c3 = arith.constant 3 : index
    %c0_12 = arith.constant 0 : index
    %c0_13 = arith.constant 0 : index
    %19 = vector.load %arg6[%c3, %c0_12, %c0_13] : memref<20x2x36xf32, #tpu.memory_space<vmem>>, vector<1x2x36xf32>
    %20 = vector.shape_cast %19 : vector<1x2x36xf32> to vector<2x36xf32>
    %21 = vector.shape_cast %18 : vector<2x36xf32> to vector<1x2x36xf32>
    tpu.vector_store %arg6[%c3, %c0_12, %c0_13], %21 {strides = array<i32>} : memref<20x2x36xf32, #tpu.memory_space<vmem>>, vector<1x2x36xf32>,
    %22 = vector.extract_strided_slice %5 {offsets = [8, 0], sizes = [2, 36], strides = [1, 1]} : vector<40x36xf32> to vector<2x36xf32>
    %c4 = arith.constant 4 : index
    %c0_14 = arith.constant 0 : index
    %c0_15 = arith.constant 0 : index
    %23 = vector.load %arg6[%c4, %c0_14, %c0_15] : memref<20x2x36xf32, #tpu.memory_space<vmem>>, vector<1x2x36xf32>
    %24 = vector.shape_cast %23 : vector<1x2x36xf32> to vector<2x36xf32>
    %25 = vector.shape_cast %22 : vector<2x36xf32> to vector<1x2x36xf32>
    tpu.vector_store %arg6[%c4, %c0_14, %c0_15], %25 {strides = array<i32>} : memref<20x2x36xf32, #tpu.memory_space<vmem>>, vector<1x2x36xf32>,
    %26 = vector.extract_strided_slice %5 {offsets = [10, 0], sizes = [2, 36], strides = [1, 1]} : vector<40x36xf32> to vector<2x36xf32>
    %c5 = arith.constant 5 : index
    %c0_16 = arith.constant 0 : index
    %c0_17 = arith.constant 0 : index
    %27 = vector.load %arg6[%c5, %c0_16, %c0_17] : memref<20x2x36xf32, #tpu.memory_space<vmem>>, vector<1x2x36xf32>
    %28 = vector.shape_cast %27 : vector<1x2x36xf32> to vector<2x36xf32>
    %29 = vector.shape_cast %26 : vector<2x36xf32> to vector<1x2x36xf32>
    tpu.vector_store %arg6[%c5, %c0_16, %c0_17], %29 {strides = array<i32>} : memref<20x2x36xf32, #tpu.memory_space<vmem>>, vector<1x2x36xf32>,
    %30 = vector.extract_strided_slice %5 {offsets = [12, 0], sizes = [2, 36], strides = [1, 1]} : vector<40x36xf32> to vector<2x36xf32>
    %c6 = arith.constant 6 : index
    %c0_18 = arith.constant 0 : index
    %c0_19 = arith.constant 0 : index
    %31 = vector.load %arg6[%c6, %c0_18, %c0_19] : memref<20x2x36xf32, #tpu.memory_space<vmem>>, vector<1x2x36xf32>
    %32 = vector.shape_cast %31 : vector<1x2x36xf32> to vector<2x36xf32>
    %33 = vector.shape_cast %30 : vector<2x36xf32> to vector<1x2x36xf32>
    tpu.vector_store %arg6[%c6, %c0_18, %c0_19], %33 {strides = array<i32>} : memref<20x2x36xf32, #tpu.memory_space<vmem>>, vector<1x2x36xf32>,
    %34 = vector.extract_strided_slice %5 {offsets = [14, 0], sizes = [2, 36], strides = [1, 1]} : vector<40x36xf32> to vector<2x36xf32>
    %c7 = arith.constant 7 : index
    %c0_20 = arith.constant 0 : index
    %c0_21 = arith.constant 0 : index
    %35 = vector.load %arg6[%c7, %c0_20, %c0_21] : memref<20x2x36xf32, #tpu.memory_space<vmem>>, vector<1x2x36xf32>
    %36 = vector.shape_cast %35 : vector<1x2x36xf32> to vector<2x36xf32>
    %37 = vector.shape_cast %34 : vector<2x36xf32> to vector<1x2x36xf32>
    tpu.vector_store %arg6[%c7, %c0_20, %c0_21], %37 {strides = array<i32>} : memref<20x2x36xf32, #tpu.memory_space<vmem>>, vector<1x2x36xf32>,
    %38 = vector.extract_strided_slice %5 {offsets = [16, 0], sizes = [2, 36], strides = [1, 1]} : vector<40x36xf32> to vector<2x36xf32>
    %c8 = arith.constant 8 : index
    %c0_22 = arith.constant 0 : index
    %c0_23 = arith.constant 0 : index
    %39 = vector.load %arg6[%c8, %c0_22, %c0_23] : memref<20x2x36xf32, #tpu.memory_space<vmem>>, vector<1x2x36xf32>
    %40 = vector.shape_cast %39 : vector<1x2x36xf32> to vector<2x36xf32>
    %41 = vector.shape_cast %38 : vector<2x36xf32> to vector<1x2x36xf32>
    tpu.vector_store %arg6[%c8, %c0_22, %c0_23], %41 {strides = array<i32>} : memref<20x2x36xf32, #tpu.memory_space<vmem>>, vector<1x2x36xf32>,
    %42 = vector.extract_strided_slice %5 {offsets = [18, 0], sizes = [2, 36], strides = [1, 1]} : vector<40x36xf32> to vector<2x36xf32>
    %c9 = arith.constant 9 : index
    %c0_24 = arith.constant 0 : index
    %c0_25 = arith.constant 0 : index
    %43 = vector.load %arg6[%c9, %c0_24, %c0_25] : memref<20x2x36xf32, #tpu.memory_space<vmem>>, vector<1x2x36xf32>
    %44 = vector.shape_cast %43 : vector<1x2x36xf32> to vector<2x36xf32>
    %45 = vector.shape_cast %42 : vector<2x36xf32> to vector<1x2x36xf32>
    tpu.vector_store %arg6[%c9, %c0_24, %c0_25], %45 {strides = array<i32>} : memref<20x2x36xf32, #tpu.memory_space<vmem>>, vector<1x2x36xf32>,
    %46 = vector.extract_strided_slice %5 {offsets = [20, 0], sizes = [2, 36], strides = [1, 1]} : vector<40x36xf32> to vector<2x36xf32>
    %c10 = arith.constant 10 : index
    %c0_26 = arith.constant 0 : index
    %c0_27 = arith.constant 0 : index
    %47 = vector.load %arg6[%c10, %c0_26, %c0_27] : memref<20x2x36xf32, #tpu.memory_space<vmem>>, vector<1x2x36xf32>
    %48 = vector.shape_cast %47 : vector<1x2x36xf32> to vector<2x36xf32>
    %49 = vector.shape_cast %46 : vector<2x36xf32> to vector<1x2x36xf32>
    tpu.vector_store %arg6[%c10, %c0_26, %c0_27], %49 {strides = array<i32>} : memref<20x2x36xf32, #tpu.memory_space<vmem>>, vector<1x2x36xf32>,
    %50 = vector.extract_strided_slice %5 {offsets = [22, 0], sizes = [2, 36], strides = [1, 1]} : vector<40x36xf32> to vector<2x36xf32>
    %c11 = arith.constant 11 : index
    %c0_28 = arith.constant 0 : index
    %c0_29 = arith.constant 0 : index
    %51 = vector.load %arg6[%c11, %c0_28, %c0_29] : memref<20x2x36xf32, #tpu.memory_space<vmem>>, vector<1x2x36xf32>
    %52 = vector.shape_cast %51 : vector<1x2x36xf32> to vector<2x36xf32>
    %53 = vector.shape_cast %50 : vector<2x36xf32> to vector<1x2x36xf32>
    tpu.vector_store %arg6[%c11, %c0_28, %c0_29], %53 {strides = array<i32>} : memref<20x2x36xf32, #tpu.memory_space<vmem>>, vector<1x2x36xf32>,
    %54 = vector.extract_strided_slice %5 {offsets = [24, 0], sizes = [2, 36], strides = [1, 1]} : vector<40x36xf32> to vector<2x36xf32>
    %c12 = arith.constant 12 : index
    %c0_30 = arith.constant 0 : index
    %c0_31 = arith.constant 0 : index
    %55 = vector.load %arg6[%c12, %c0_30, %c0_31] : memref<20x2x36xf32, #tpu.memory_space<vmem>>, vector<1x2x36xf32>
    %56 = vector.shape_cast %55 : vector<1x2x36xf32> to vector<2x36xf32>
    %57 = vector.shape_cast %54 : vector<2x36xf32> to vector<1x2x36xf32>
    tpu.vector_store %arg6[%c12, %c0_30, %c0_31], %57 {strides = array<i32>} : memref<20x2x36xf32, #tpu.memory_space<vmem>>, vector<1x2x36xf32>,
    %58 = vector.extract_strided_slice %5 {offsets = [26, 0], sizes = [2, 36], strides = [1, 1]} : vector<40x36xf32> to vector<2x36xf32>
    %c13 = arith.constant 13 : index
    %c0_32 = arith.constant 0 : index
    %c0_33 = arith.constant 0 : index
    %59 = vector.load %arg6[%c13, %c0_32, %c0_33] : memref<20x2x36xf32, #tpu.memory_space<vmem>>, vector<1x2x36xf32>
    %60 = vector.shape_cast %59 : vector<1x2x36xf32> to vector<2x36xf32>
    %61 = vector.shape_cast %58 : vector<2x36xf32> to vector<1x2x36xf32>
    tpu.vector_store %arg6[%c13, %c0_32, %c0_33], %61 {strides = array<i32>} : memref<20x2x36xf32, #tpu.memory_space<vmem>>, vector<1x2x36xf32>,
    %62 = vector.extract_strided_slice %5 {offsets = [28, 0], sizes = [2, 36], strides = [1, 1]} : vector<40x36xf32> to vector<2x36xf32>
    %c14 = arith.constant 14 : index
    %c0_34 = arith.constant 0 : index
    %c0_35 = arith.constant 0 : index
    %63 = vector.load %arg6[%c14, %c0_34, %c0_35] : memref<20x2x36xf32, #tpu.memory_space<vmem>>, vector<1x2x36xf32>
    %64 = vector.shape_cast %63 : vector<1x2x36xf32> to vector<2x36xf32>
    %65 = vector.shape_cast %62 : vector<2x36xf32> to vector<1x2x36xf32>
    tpu.vector_store %arg6[%c14, %c0_34, %c0_35], %65 {strides = array<i32>} : memref<20x2x36xf32, #tpu.memory_space<vmem>>, vector<1x2x36xf32>,
    %66 = vector.extract_strided_slice %5 {offsets = [30, 0], sizes = [2, 36], strides = [1, 1]} : vector<40x36xf32> to vector<2x36xf32>
    %c15 = arith.constant 15 : index
    %c0_36 = arith.constant 0 : index
    %c0_37 = arith.constant 0 : index
    %67 = vector.load %arg6[%c15, %c0_36, %c0_37] : memref<20x2x36xf32, #tpu.memory_space<vmem>>, vector<1x2x36xf32>
    %68 = vector.shape_cast %67 : vector<1x2x36xf32> to vector<2x36xf32>
    %69 = vector.shape_cast %66 : vector<2x36xf32> to vector<1x2x36xf32>
    tpu.vector_store %arg6[%c15, %c0_36, %c0_37], %69 {strides = array<i32>} : memref<20x2x36xf32, #tpu.memory_space<vmem>>, vector<1x2x36xf32>,
    %70 = vector.extract_strided_slice %5 {offsets = [32, 0], sizes = [2, 36], strides = [1, 1]} : vector<40x36xf32> to vector<2x36xf32>
    %c16 = arith.constant 16 : index
    %c0_38 = arith.constant 0 : index
    %c0_39 = arith.constant 0 : index
    %71 = vector.load %arg6[%c16, %c0_38, %c0_39] : memref<20x2x36xf32, #tpu.memory_space<vmem>>, vector<1x2x36xf32>
    %72 = vector.shape_cast %71 : vector<1x2x36xf32> to vector<2x36xf32>
    %73 = vector.shape_cast %70 : vector<2x36xf32> to vector<1x2x36xf32>
    tpu.vector_store %arg6[%c16, %c0_38, %c0_39], %73 {strides = array<i32>} : memref<20x2x36xf32, #tpu.memory_space<vmem>>, vector<1x2x36xf32>,
    %74 = vector.extract_strided_slice %5 {offsets = [34, 0], sizes = [2, 36], strides = [1, 1]} : vector<40x36xf32> to vector<2x36xf32>
    %c17 = arith.constant 17 : index
    %c0_40 = arith.constant 0 : index
    %c0_41 = arith.constant 0 : index
    %75 = vector.load %arg6[%c17, %c0_40, %c0_41] : memref<20x2x36xf32, #tpu.memory_space<vmem>>, vector<1x2x36xf32>
    %76 = vector.shape_cast %75 : vector<1x2x36xf32> to vector<2x36xf32>
    %77 = vector.shape_cast %74 : vector<2x36xf32> to vector<1x2x36xf32>
    tpu.vector_store %arg6[%c17, %c0_40, %c0_41], %77 {strides = array<i32>} : memref<20x2x36xf32, #tpu.memory_space<vmem>>, vector<1x2x36xf32>,
    %78 = vector.extract_strided_slice %5 {offsets = [36, 0], sizes = [2, 36], strides = [1, 1]} : vector<40x36xf32> to vector<2x36xf32>
    %c18 = arith.constant 18 : index
    %c0_42 = arith.constant 0 : index
    %c0_43 = arith.constant 0 : index
    %79 = vector.load %arg6[%c18, %c0_42, %c0_43] : memref<20x2x36xf32, #tpu.memory_space<vmem>>, vector<1x2x36xf32>
    %80 = vector.shape_cast %79 : vector<1x2x36xf32> to vector<2x36xf32>
    %81 = vector.shape_cast %78 : vector<2x36xf32> to vector<1x2x36xf32>
    tpu.vector_store %arg6[%c18, %c0_42, %c0_43], %81 {strides = array<i32>} : memref<20x2x36xf32, #tpu.memory_space<vmem>>, vector<1x2x36xf32>,
    %82 = vector.extract_strided_slice %5 {offsets = [38, 0], sizes = [2, 36], strides = [1, 1]} : vector<40x36xf32> to vector<2x36xf32>
    %c19 = arith.constant 19 : index
    %c0_44 = arith.constant 0 : index
    %c0_45 = arith.constant 0 : index
    %83 = vector.load %arg6[%c19, %c0_44, %c0_45] : memref<20x2x36xf32, #tpu.memory_space<vmem>>, vector<1x2x36xf32>
    %84 = vector.shape_cast %83 : vector<1x2x36xf32> to vector<2x36xf32>
    %85 = vector.shape_cast %82 : vector<2x36xf32> to vector<1x2x36xf32>
    tpu.vector_store %arg6[%c19, %c0_44, %c0_45], %85 {strides = array<i32>} : memref<20x2x36xf32, #tpu.memory_space<vmem>>, vector<1x2x36xf32>,
    %cst_46 = arith.constant 0.000000e+00 : f32
    %86 = vector.broadcast %cst_46 : f32 to vector<2x12xf32>
    %c0_47 = arith.constant 0 : index
    %c0_48 = arith.constant 0 : index
    %87 = vector.load %arg7[%c0_47, %c0_48] : memref<2x12xf32, #tpu.memory_space<vmem>>, vector<2x12xf32>
    tpu.vector_store %arg7[%c0_47, %c0_48], %86 {strides = array<i32>} : memref<2x12xf32, #tpu.memory_space<vmem>>, vector<2x12xf32>,
    %c0_i32 = arith.constant 0 : i32
    %c20_i32 = arith.constant 20 : i32
    %88 = arith.addi %c0_i32, %c20_i32 : i32
    %c1_i32 = arith.constant 1 : i32
    scf.for %arg8 = %c0_i32 to %88 step %c1_i32  : i32 {
      %c0_50 = arith.constant 0 : index
      %c0_51 = arith.constant 0 : index
      %89 = vector.load %arg7[%c0_50, %c0_51] : memref<2x12xf32, #tpu.memory_space<vmem>>, vector<2x12xf32>
      %c0_52 = arith.constant 0 : index
      %c0_53 = arith.constant 0 : index
      %90 = vector.load %arg2[%c0_52, %c0_53] : memref<12x36xf32, #tpu.memory_space<vmem>>, vector<12x36xf32>
      %cst_54 = arith.constant dense<0.000000e+00> : vector<2x36xf32>
      %91 = tpu.matmul %89, %90, %cst_54 {dimension_numbers = #tpu.dot_dimension_numbers<[1], [0], [0], [1], [0, 0, 1, 1], [], []>} : vector<2x12xf32>, vector<12x36xf32>, vector<2x36xf32> -> vector<2x36xf32>
      %c0_55 = arith.constant 0 : index
      %c0_56 = arith.constant 0 : index
      %92 = vector.load %arg4[%c0_55, %c0_56] : memref<1x36xf32, #tpu.memory_space<vmem>>, vector<1x36xf32>
      %93 = vector.broadcast %92 : vector<1x36xf32> to vector<2x36xf32>
      %94 = arith.addf %91, %93 : vector<2x36xf32>
      %95 = arith.index_cast %arg8 : i32 to index
      %c0_57 = arith.constant 0 : index
      %c0_58 = arith.constant 0 : index
      %96 = vector.load %arg6[%95, %c0_57, %c0_58] : memref<20x2x36xf32, #tpu.memory_space<vmem>>, vector<1x2x36xf32>
      %97 = vector.shape_cast %96 : vector<1x2x36xf32> to vector<2x36xf32>
      %98 = vector.extract_strided_slice %97 {offsets = [0, 0], sizes = [2, 12], strides = [1, 1]} : vector<2x36xf32> to vector<2x12xf32>
      %99 = vector.extract_strided_slice %94 {offsets = [0, 0], sizes = [2, 12], strides = [1, 1]} : vector<2x36xf32> to vector<2x12xf32>
      %100 = arith.addf %98, %99 : vector<2x12xf32>
      %101 = arith.negf %100 : vector<2x12xf32>
      %102 = math.exp %101 : vector<2x12xf32>
      %cst_59 = arith.constant 1.000000e+00 : f32
      %103 = vector.broadcast %cst_59 : f32 to vector<2x12xf32>
      %104 = arith.addf %103, %102 : vector<2x12xf32>
      %105 = arith.divf %103, %104 : vector<2x12xf32>
      %106 = vector.extract_strided_slice %97 {offsets = [0, 12], sizes = [2, 12], strides = [1, 1]} : vector<2x36xf32> to vector<2x12xf32>
      %107 = vector.extract_strided_slice %94 {offsets = [0, 12], sizes = [2, 12], strides = [1, 1]} : vector<2x36xf32> to vector<2x12xf32>
      %108 = arith.addf %106, %107 : vector<2x12xf32>
      %109 = arith.negf %108 : vector<2x12xf32>
      %110 = math.exp %109 : vector<2x12xf32>
      %cst_60 = arith.constant 1.000000e+00 : f32
      %111 = vector.broadcast %cst_60 : f32 to vector<2x12xf32>
      %112 = arith.addf %111, %110 : vector<2x12xf32>
      %113 = arith.divf %111, %112 : vector<2x12xf32>
      %114 = vector.extract_strided_slice %97 {offsets = [0, 24], sizes = [2, 12], strides = [1, 1]} : vector<2x36xf32> to vector<2x12xf32>
      %115 = vector.extract_strided_slice %94 {offsets = [0, 24], sizes = [2, 12], strides = [1, 1]} : vector<2x36xf32> to vector<2x12xf32>
      %116 = arith.mulf %105, %115 : vector<2x12xf32>
      %117 = arith.addf %114, %116 : vector<2x12xf32>
      %118 = math.tanh %117 : vector<2x12xf32>
      %cst_61 = arith.constant 1.000000e+00 : f32
      %119 = vector.broadcast %cst_61 : f32 to vector<2x12xf32>
      %120 = arith.subf %119, %113 : vector<2x12xf32>
      %121 = arith.mulf %120, %118 : vector<2x12xf32>
      %122 = arith.mulf %113, %89 : vector<2x12xf32>
      %123 = arith.addf %121, %122 : vector<2x12xf32>
      %c0_62 = arith.constant 0 : index
      %c0_63 = arith.constant 0 : index
      %124 = vector.load %arg7[%c0_62, %c0_63] : memref<2x12xf32, #tpu.memory_space<vmem>>, vector<2x12xf32>
      tpu.vector_store %arg7[%c0_62, %c0_63], %123 {strides = array<i32>} : memref<2x12xf32, #tpu.memory_space<vmem>>, vector<2x12xf32>,
      %125 = arith.index_cast %arg8 : i32 to index
      %c0_64 = arith.constant 0 : index
      %c0_65 = arith.constant 0 : index
      %126 = vector.load %arg5[%125, %c0_64, %c0_65] : memref<20x2x12xf32, #tpu.memory_space<vmem>>, vector<1x2x12xf32>
      %127 = vector.shape_cast %126 : vector<1x2x12xf32> to vector<2x12xf32>
      %128 = vector.shape_cast %123 : vector<2x12xf32> to vector<1x2x12xf32>
      tpu.vector_store %arg5[%125, %c0_64, %c0_65], %128 {strides = array<i32>} : memref<20x2x12xf32, #tpu.memory_space<vmem>>, vector<1x2x12xf32>,
    }
    %c20_i32_49 = arith.constant 20 : i32
    return
  }
}

module attributes {stable_mosaic.version = 11 : i64} {
  func.func @_gru_layer_kernel(%arg0: memref<40x16xf32, #tpu.memory_space<vmem>>, %arg1: memref<16x24xf32, #tpu.memory_space<vmem>>, %arg2: memref<8x24xf32, #tpu.memory_space<vmem>>, %arg3: memref<1x24xf32, #tpu.memory_space<vmem>>, %arg4: memref<1x24xf32, #tpu.memory_space<vmem>>, %arg5: memref<20x2x8xf32, #tpu.memory_space<vmem>>, %arg6: memref<20x2x24xf32, #tpu.memory_space<vmem>>, %arg7: memref<2x8xf32, #tpu.memory_space<vmem>>) attributes {dimension_semantics = [], scalar_prefetch = 0 : i64, scratch_operands = 2 : i64, tpu.core_type = #tpu.core_type<tc>} {
    %c0 = arith.constant 0 : index
    %c0_0 = arith.constant 0 : index
    %0 = vector.load %arg0[%c0, %c0_0] : memref<40x16xf32, #tpu.memory_space<vmem>>, vector<40x16xf32>
    %c0_1 = arith.constant 0 : index
    %c0_2 = arith.constant 0 : index
    %1 = vector.load %arg1[%c0_1, %c0_2] : memref<16x24xf32, #tpu.memory_space<vmem>>, vector<16x24xf32>
    %cst = arith.constant dense<0.000000e+00> : vector<40x24xf32>
    %2 = tpu.matmul %0, %1, %cst {dimension_numbers = #tpu.dot_dimension_numbers<[1], [0], [0], [1], [0, 0, 1, 1], [], []>} : vector<40x16xf32>, vector<16x24xf32>, vector<40x24xf32> -> vector<40x24xf32>
    %c0_3 = arith.constant 0 : index
    %c0_4 = arith.constant 0 : index
    %3 = vector.load %arg3[%c0_3, %c0_4] : memref<1x24xf32, #tpu.memory_space<vmem>>, vector<1x24xf32>
    %4 = vector.broadcast %3 : vector<1x24xf32> to vector<40x24xf32>
    %5 = arith.addf %2, %4 : vector<40x24xf32>
    %6 = vector.extract_strided_slice %5 {offsets = [0, 0], sizes = [2, 24], strides = [1, 1]} : vector<40x24xf32> to vector<2x24xf32>
    %c0_5 = arith.constant 0 : index
    %c0_6 = arith.constant 0 : index
    %c0_7 = arith.constant 0 : index
    %7 = vector.load %arg6[%c0_5, %c0_6, %c0_7] : memref<20x2x24xf32, #tpu.memory_space<vmem>>, vector<1x2x24xf32>
    %8 = vector.shape_cast %7 : vector<1x2x24xf32> to vector<2x24xf32>
    %9 = vector.shape_cast %6 : vector<2x24xf32> to vector<1x2x24xf32>
    tpu.vector_store %arg6[%c0_5, %c0_6, %c0_7], %9 {strides = array<i32>} : memref<20x2x24xf32, #tpu.memory_space<vmem>>, vector<1x2x24xf32>,
    %10 = vector.extract_strided_slice %5 {offsets = [2, 0], sizes = [2, 24], strides = [1, 1]} : vector<40x24xf32> to vector<2x24xf32>
    %c1 = arith.constant 1 : index
    %c0_8 = arith.constant 0 : index
    %c0_9 = arith.constant 0 : index
    %11 = vector.load %arg6[%c1, %c0_8, %c0_9] : memref<20x2x24xf32, #tpu.memory_space<vmem>>, vector<1x2x24xf32>
    %12 = vector.shape_cast %11 : vector<1x2x24xf32> to vector<2x24xf32>
    %13 = vector.shape_cast %10 : vector<2x24xf32> to vector<1x2x24xf32>
    tpu.vector_store %arg6[%c1, %c0_8, %c0_9], %13 {strides = array<i32>} : memref<20x2x24xf32, #tpu.memory_space<vmem>>, vector<1x2x24xf32>,
    %14 = vector.extract_strided_slice %5 {offsets = [4, 0], sizes = [2, 24], strides = [1, 1]} : vector<40x24xf32> to vector<2x24xf32>
    %c2 = arith.constant 2 : index
    %c0_10 = arith.constant 0 : index
    %c0_11 = arith.constant 0 : index
    %15 = vector.load %arg6[%c2, %c0_10, %c0_11] : memref<20x2x24xf32, #tpu.memory_space<vmem>>, vector<1x2x24xf32>
    %16 = vector.shape_cast %15 : vector<1x2x24xf32> to vector<2x24xf32>
    %17 = vector.shape_cast %14 : vector<2x24xf32> to vector<1x2x24xf32>
    tpu.vector_store %arg6[%c2, %c0_10, %c0_11], %17 {strides = array<i32>} : memref<20x2x24xf32, #tpu.memory_space<vmem>>, vector<1x2x24xf32>,
    %18 = vector.extract_strided_slice %5 {offsets = [6, 0], sizes = [2, 24], strides = [1, 1]} : vector<40x24xf32> to vector<2x24xf32>
    %c3 = arith.constant 3 : index
    %c0_12 = arith.constant 0 : index
    %c0_13 = arith.constant 0 : index
    %19 = vector.load %arg6[%c3, %c0_12, %c0_13] : memref<20x2x24xf32, #tpu.memory_space<vmem>>, vector<1x2x24xf32>
    %20 = vector.shape_cast %19 : vector<1x2x24xf32> to vector<2x24xf32>
    %21 = vector.shape_cast %18 : vector<2x24xf32> to vector<1x2x24xf32>
    tpu.vector_store %arg6[%c3, %c0_12, %c0_13], %21 {strides = array<i32>} : memref<20x2x24xf32, #tpu.memory_space<vmem>>, vector<1x2x24xf32>,
    %22 = vector.extract_strided_slice %5 {offsets = [8, 0], sizes = [2, 24], strides = [1, 1]} : vector<40x24xf32> to vector<2x24xf32>
    %c4 = arith.constant 4 : index
    %c0_14 = arith.constant 0 : index
    %c0_15 = arith.constant 0 : index
    %23 = vector.load %arg6[%c4, %c0_14, %c0_15] : memref<20x2x24xf32, #tpu.memory_space<vmem>>, vector<1x2x24xf32>
    %24 = vector.shape_cast %23 : vector<1x2x24xf32> to vector<2x24xf32>
    %25 = vector.shape_cast %22 : vector<2x24xf32> to vector<1x2x24xf32>
    tpu.vector_store %arg6[%c4, %c0_14, %c0_15], %25 {strides = array<i32>} : memref<20x2x24xf32, #tpu.memory_space<vmem>>, vector<1x2x24xf32>,
    %26 = vector.extract_strided_slice %5 {offsets = [10, 0], sizes = [2, 24], strides = [1, 1]} : vector<40x24xf32> to vector<2x24xf32>
    %c5 = arith.constant 5 : index
    %c0_16 = arith.constant 0 : index
    %c0_17 = arith.constant 0 : index
    %27 = vector.load %arg6[%c5, %c0_16, %c0_17] : memref<20x2x24xf32, #tpu.memory_space<vmem>>, vector<1x2x24xf32>
    %28 = vector.shape_cast %27 : vector<1x2x24xf32> to vector<2x24xf32>
    %29 = vector.shape_cast %26 : vector<2x24xf32> to vector<1x2x24xf32>
    tpu.vector_store %arg6[%c5, %c0_16, %c0_17], %29 {strides = array<i32>} : memref<20x2x24xf32, #tpu.memory_space<vmem>>, vector<1x2x24xf32>,
    %30 = vector.extract_strided_slice %5 {offsets = [12, 0], sizes = [2, 24], strides = [1, 1]} : vector<40x24xf32> to vector<2x24xf32>
    %c6 = arith.constant 6 : index
    %c0_18 = arith.constant 0 : index
    %c0_19 = arith.constant 0 : index
    %31 = vector.load %arg6[%c6, %c0_18, %c0_19] : memref<20x2x24xf32, #tpu.memory_space<vmem>>, vector<1x2x24xf32>
    %32 = vector.shape_cast %31 : vector<1x2x24xf32> to vector<2x24xf32>
    %33 = vector.shape_cast %30 : vector<2x24xf32> to vector<1x2x24xf32>
    tpu.vector_store %arg6[%c6, %c0_18, %c0_19], %33 {strides = array<i32>} : memref<20x2x24xf32, #tpu.memory_space<vmem>>, vector<1x2x24xf32>,
    %34 = vector.extract_strided_slice %5 {offsets = [14, 0], sizes = [2, 24], strides = [1, 1]} : vector<40x24xf32> to vector<2x24xf32>
    %c7 = arith.constant 7 : index
    %c0_20 = arith.constant 0 : index
    %c0_21 = arith.constant 0 : index
    %35 = vector.load %arg6[%c7, %c0_20, %c0_21] : memref<20x2x24xf32, #tpu.memory_space<vmem>>, vector<1x2x24xf32>
    %36 = vector.shape_cast %35 : vector<1x2x24xf32> to vector<2x24xf32>
    %37 = vector.shape_cast %34 : vector<2x24xf32> to vector<1x2x24xf32>
    tpu.vector_store %arg6[%c7, %c0_20, %c0_21], %37 {strides = array<i32>} : memref<20x2x24xf32, #tpu.memory_space<vmem>>, vector<1x2x24xf32>,
    %38 = vector.extract_strided_slice %5 {offsets = [16, 0], sizes = [2, 24], strides = [1, 1]} : vector<40x24xf32> to vector<2x24xf32>
    %c8 = arith.constant 8 : index
    %c0_22 = arith.constant 0 : index
    %c0_23 = arith.constant 0 : index
    %39 = vector.load %arg6[%c8, %c0_22, %c0_23] : memref<20x2x24xf32, #tpu.memory_space<vmem>>, vector<1x2x24xf32>
    %40 = vector.shape_cast %39 : vector<1x2x24xf32> to vector<2x24xf32>
    %41 = vector.shape_cast %38 : vector<2x24xf32> to vector<1x2x24xf32>
    tpu.vector_store %arg6[%c8, %c0_22, %c0_23], %41 {strides = array<i32>} : memref<20x2x24xf32, #tpu.memory_space<vmem>>, vector<1x2x24xf32>,
    %42 = vector.extract_strided_slice %5 {offsets = [18, 0], sizes = [2, 24], strides = [1, 1]} : vector<40x24xf32> to vector<2x24xf32>
    %c9 = arith.constant 9 : index
    %c0_24 = arith.constant 0 : index
    %c0_25 = arith.constant 0 : index
    %43 = vector.load %arg6[%c9, %c0_24, %c0_25] : memref<20x2x24xf32, #tpu.memory_space<vmem>>, vector<1x2x24xf32>
    %44 = vector.shape_cast %43 : vector<1x2x24xf32> to vector<2x24xf32>
    %45 = vector.shape_cast %42 : vector<2x24xf32> to vector<1x2x24xf32>
    tpu.vector_store %arg6[%c9, %c0_24, %c0_25], %45 {strides = array<i32>} : memref<20x2x24xf32, #tpu.memory_space<vmem>>, vector<1x2x24xf32>,
    %46 = vector.extract_strided_slice %5 {offsets = [20, 0], sizes = [2, 24], strides = [1, 1]} : vector<40x24xf32> to vector<2x24xf32>
    %c10 = arith.constant 10 : index
    %c0_26 = arith.constant 0 : index
    %c0_27 = arith.constant 0 : index
    %47 = vector.load %arg6[%c10, %c0_26, %c0_27] : memref<20x2x24xf32, #tpu.memory_space<vmem>>, vector<1x2x24xf32>
    %48 = vector.shape_cast %47 : vector<1x2x24xf32> to vector<2x24xf32>
    %49 = vector.shape_cast %46 : vector<2x24xf32> to vector<1x2x24xf32>
    tpu.vector_store %arg6[%c10, %c0_26, %c0_27], %49 {strides = array<i32>} : memref<20x2x24xf32, #tpu.memory_space<vmem>>, vector<1x2x24xf32>,
    %50 = vector.extract_strided_slice %5 {offsets = [22, 0], sizes = [2, 24], strides = [1, 1]} : vector<40x24xf32> to vector<2x24xf32>
    %c11 = arith.constant 11 : index
    %c0_28 = arith.constant 0 : index
    %c0_29 = arith.constant 0 : index
    %51 = vector.load %arg6[%c11, %c0_28, %c0_29] : memref<20x2x24xf32, #tpu.memory_space<vmem>>, vector<1x2x24xf32>
    %52 = vector.shape_cast %51 : vector<1x2x24xf32> to vector<2x24xf32>
    %53 = vector.shape_cast %50 : vector<2x24xf32> to vector<1x2x24xf32>
    tpu.vector_store %arg6[%c11, %c0_28, %c0_29], %53 {strides = array<i32>} : memref<20x2x24xf32, #tpu.memory_space<vmem>>, vector<1x2x24xf32>,
    %54 = vector.extract_strided_slice %5 {offsets = [24, 0], sizes = [2, 24], strides = [1, 1]} : vector<40x24xf32> to vector<2x24xf32>
    %c12 = arith.constant 12 : index
    %c0_30 = arith.constant 0 : index
    %c0_31 = arith.constant 0 : index
    %55 = vector.load %arg6[%c12, %c0_30, %c0_31] : memref<20x2x24xf32, #tpu.memory_space<vmem>>, vector<1x2x24xf32>
    %56 = vector.shape_cast %55 : vector<1x2x24xf32> to vector<2x24xf32>
    %57 = vector.shape_cast %54 : vector<2x24xf32> to vector<1x2x24xf32>
    tpu.vector_store %arg6[%c12, %c0_30, %c0_31], %57 {strides = array<i32>} : memref<20x2x24xf32, #tpu.memory_space<vmem>>, vector<1x2x24xf32>,
    %58 = vector.extract_strided_slice %5 {offsets = [26, 0], sizes = [2, 24], strides = [1, 1]} : vector<40x24xf32> to vector<2x24xf32>
    %c13 = arith.constant 13 : index
    %c0_32 = arith.constant 0 : index
    %c0_33 = arith.constant 0 : index
    %59 = vector.load %arg6[%c13, %c0_32, %c0_33] : memref<20x2x24xf32, #tpu.memory_space<vmem>>, vector<1x2x24xf32>
    %60 = vector.shape_cast %59 : vector<1x2x24xf32> to vector<2x24xf32>
    %61 = vector.shape_cast %58 : vector<2x24xf32> to vector<1x2x24xf32>
    tpu.vector_store %arg6[%c13, %c0_32, %c0_33], %61 {strides = array<i32>} : memref<20x2x24xf32, #tpu.memory_space<vmem>>, vector<1x2x24xf32>,
    %62 = vector.extract_strided_slice %5 {offsets = [28, 0], sizes = [2, 24], strides = [1, 1]} : vector<40x24xf32> to vector<2x24xf32>
    %c14 = arith.constant 14 : index
    %c0_34 = arith.constant 0 : index
    %c0_35 = arith.constant 0 : index
    %63 = vector.load %arg6[%c14, %c0_34, %c0_35] : memref<20x2x24xf32, #tpu.memory_space<vmem>>, vector<1x2x24xf32>
    %64 = vector.shape_cast %63 : vector<1x2x24xf32> to vector<2x24xf32>
    %65 = vector.shape_cast %62 : vector<2x24xf32> to vector<1x2x24xf32>
    tpu.vector_store %arg6[%c14, %c0_34, %c0_35], %65 {strides = array<i32>} : memref<20x2x24xf32, #tpu.memory_space<vmem>>, vector<1x2x24xf32>,
    %66 = vector.extract_strided_slice %5 {offsets = [30, 0], sizes = [2, 24], strides = [1, 1]} : vector<40x24xf32> to vector<2x24xf32>
    %c15 = arith.constant 15 : index
    %c0_36 = arith.constant 0 : index
    %c0_37 = arith.constant 0 : index
    %67 = vector.load %arg6[%c15, %c0_36, %c0_37] : memref<20x2x24xf32, #tpu.memory_space<vmem>>, vector<1x2x24xf32>
    %68 = vector.shape_cast %67 : vector<1x2x24xf32> to vector<2x24xf32>
    %69 = vector.shape_cast %66 : vector<2x24xf32> to vector<1x2x24xf32>
    tpu.vector_store %arg6[%c15, %c0_36, %c0_37], %69 {strides = array<i32>} : memref<20x2x24xf32, #tpu.memory_space<vmem>>, vector<1x2x24xf32>,
    %70 = vector.extract_strided_slice %5 {offsets = [32, 0], sizes = [2, 24], strides = [1, 1]} : vector<40x24xf32> to vector<2x24xf32>
    %c16 = arith.constant 16 : index
    %c0_38 = arith.constant 0 : index
    %c0_39 = arith.constant 0 : index
    %71 = vector.load %arg6[%c16, %c0_38, %c0_39] : memref<20x2x24xf32, #tpu.memory_space<vmem>>, vector<1x2x24xf32>
    %72 = vector.shape_cast %71 : vector<1x2x24xf32> to vector<2x24xf32>
    %73 = vector.shape_cast %70 : vector<2x24xf32> to vector<1x2x24xf32>
    tpu.vector_store %arg6[%c16, %c0_38, %c0_39], %73 {strides = array<i32>} : memref<20x2x24xf32, #tpu.memory_space<vmem>>, vector<1x2x24xf32>,
    %74 = vector.extract_strided_slice %5 {offsets = [34, 0], sizes = [2, 24], strides = [1, 1]} : vector<40x24xf32> to vector<2x24xf32>
    %c17 = arith.constant 17 : index
    %c0_40 = arith.constant 0 : index
    %c0_41 = arith.constant 0 : index
    %75 = vector.load %arg6[%c17, %c0_40, %c0_41] : memref<20x2x24xf32, #tpu.memory_space<vmem>>, vector<1x2x24xf32>
    %76 = vector.shape_cast %75 : vector<1x2x24xf32> to vector<2x24xf32>
    %77 = vector.shape_cast %74 : vector<2x24xf32> to vector<1x2x24xf32>
    tpu.vector_store %arg6[%c17, %c0_40, %c0_41], %77 {strides = array<i32>} : memref<20x2x24xf32, #tpu.memory_space<vmem>>, vector<1x2x24xf32>,
    %78 = vector.extract_strided_slice %5 {offsets = [36, 0], sizes = [2, 24], strides = [1, 1]} : vector<40x24xf32> to vector<2x24xf32>
    %c18 = arith.constant 18 : index
    %c0_42 = arith.constant 0 : index
    %c0_43 = arith.constant 0 : index
    %79 = vector.load %arg6[%c18, %c0_42, %c0_43] : memref<20x2x24xf32, #tpu.memory_space<vmem>>, vector<1x2x24xf32>
    %80 = vector.shape_cast %79 : vector<1x2x24xf32> to vector<2x24xf32>
    %81 = vector.shape_cast %78 : vector<2x24xf32> to vector<1x2x24xf32>
    tpu.vector_store %arg6[%c18, %c0_42, %c0_43], %81 {strides = array<i32>} : memref<20x2x24xf32, #tpu.memory_space<vmem>>, vector<1x2x24xf32>,
    %82 = vector.extract_strided_slice %5 {offsets = [38, 0], sizes = [2, 24], strides = [1, 1]} : vector<40x24xf32> to vector<2x24xf32>
    %c19 = arith.constant 19 : index
    %c0_44 = arith.constant 0 : index
    %c0_45 = arith.constant 0 : index
    %83 = vector.load %arg6[%c19, %c0_44, %c0_45] : memref<20x2x24xf32, #tpu.memory_space<vmem>>, vector<1x2x24xf32>
    %84 = vector.shape_cast %83 : vector<1x2x24xf32> to vector<2x24xf32>
    %85 = vector.shape_cast %82 : vector<2x24xf32> to vector<1x2x24xf32>
    tpu.vector_store %arg6[%c19, %c0_44, %c0_45], %85 {strides = array<i32>} : memref<20x2x24xf32, #tpu.memory_space<vmem>>, vector<1x2x24xf32>,
    %cst_46 = arith.constant 0.000000e+00 : f32
    %86 = vector.broadcast %cst_46 : f32 to vector<2x8xf32>
    %c0_47 = arith.constant 0 : index
    %c0_48 = arith.constant 0 : index
    %87 = vector.load %arg7[%c0_47, %c0_48] : memref<2x8xf32, #tpu.memory_space<vmem>>, vector<2x8xf32>
    tpu.vector_store %arg7[%c0_47, %c0_48], %86 {strides = array<i32>} : memref<2x8xf32, #tpu.memory_space<vmem>>, vector<2x8xf32>,
    %c0_i32 = arith.constant 0 : i32
    %c20_i32 = arith.constant 20 : i32
    %88 = arith.addi %c0_i32, %c20_i32 : i32
    %c1_i32 = arith.constant 1 : i32
    scf.for %arg8 = %c0_i32 to %88 step %c1_i32  : i32 {
      %c0_50 = arith.constant 0 : index
      %c0_51 = arith.constant 0 : index
      %89 = vector.load %arg7[%c0_50, %c0_51] : memref<2x8xf32, #tpu.memory_space<vmem>>, vector<2x8xf32>
      %c0_52 = arith.constant 0 : index
      %c0_53 = arith.constant 0 : index
      %90 = vector.load %arg2[%c0_52, %c0_53] : memref<8x24xf32, #tpu.memory_space<vmem>>, vector<8x24xf32>
      %cst_54 = arith.constant dense<0.000000e+00> : vector<2x24xf32>
      %91 = tpu.matmul %89, %90, %cst_54 {dimension_numbers = #tpu.dot_dimension_numbers<[1], [0], [0], [1], [0, 0, 1, 1], [], []>} : vector<2x8xf32>, vector<8x24xf32>, vector<2x24xf32> -> vector<2x24xf32>
      %c0_55 = arith.constant 0 : index
      %c0_56 = arith.constant 0 : index
      %92 = vector.load %arg4[%c0_55, %c0_56] : memref<1x24xf32, #tpu.memory_space<vmem>>, vector<1x24xf32>
      %93 = vector.broadcast %92 : vector<1x24xf32> to vector<2x24xf32>
      %94 = arith.addf %91, %93 : vector<2x24xf32>
      %95 = arith.index_cast %arg8 : i32 to index
      %c0_57 = arith.constant 0 : index
      %c0_58 = arith.constant 0 : index
      %96 = vector.load %arg6[%95, %c0_57, %c0_58] : memref<20x2x24xf32, #tpu.memory_space<vmem>>, vector<1x2x24xf32>
      %97 = vector.shape_cast %96 : vector<1x2x24xf32> to vector<2x24xf32>
      %98 = vector.extract_strided_slice %97 {offsets = [0, 0], sizes = [2, 8], strides = [1, 1]} : vector<2x24xf32> to vector<2x8xf32>
      %99 = vector.extract_strided_slice %94 {offsets = [0, 0], sizes = [2, 8], strides = [1, 1]} : vector<2x24xf32> to vector<2x8xf32>
      %100 = arith.addf %98, %99 : vector<2x8xf32>
      %101 = arith.negf %100 : vector<2x8xf32>
      %102 = math.exp %101 : vector<2x8xf32>
      %cst_59 = arith.constant 1.000000e+00 : f32
      %103 = vector.broadcast %cst_59 : f32 to vector<2x8xf32>
      %104 = arith.addf %103, %102 : vector<2x8xf32>
      %105 = arith.divf %103, %104 : vector<2x8xf32>
      %106 = vector.extract_strided_slice %97 {offsets = [0, 8], sizes = [2, 8], strides = [1, 1]} : vector<2x24xf32> to vector<2x8xf32>
      %107 = vector.extract_strided_slice %94 {offsets = [0, 8], sizes = [2, 8], strides = [1, 1]} : vector<2x24xf32> to vector<2x8xf32>
      %108 = arith.addf %106, %107 : vector<2x8xf32>
      %109 = arith.negf %108 : vector<2x8xf32>
      %110 = math.exp %109 : vector<2x8xf32>
      %cst_60 = arith.constant 1.000000e+00 : f32
      %111 = vector.broadcast %cst_60 : f32 to vector<2x8xf32>
      %112 = arith.addf %111, %110 : vector<2x8xf32>
      %113 = arith.divf %111, %112 : vector<2x8xf32>
      %114 = vector.extract_strided_slice %97 {offsets = [0, 16], sizes = [2, 8], strides = [1, 1]} : vector<2x24xf32> to vector<2x8xf32>
      %115 = vector.extract_strided_slice %94 {offsets = [0, 16], sizes = [2, 8], strides = [1, 1]} : vector<2x24xf32> to vector<2x8xf32>
      %116 = arith.mulf %105, %115 : vector<2x8xf32>
      %117 = arith.addf %114, %116 : vector<2x8xf32>
      %118 = math.tanh %117 : vector<2x8xf32>
      %cst_61 = arith.constant 1.000000e+00 : f32
      %119 = vector.broadcast %cst_61 : f32 to vector<2x8xf32>
      %120 = arith.subf %119, %113 : vector<2x8xf32>
      %121 = arith.mulf %120, %118 : vector<2x8xf32>
      %122 = arith.mulf %113, %89 : vector<2x8xf32>
      %123 = arith.addf %121, %122 : vector<2x8xf32>
      %c0_62 = arith.constant 0 : index
      %c0_63 = arith.constant 0 : index
      %124 = vector.load %arg7[%c0_62, %c0_63] : memref<2x8xf32, #tpu.memory_space<vmem>>, vector<2x8xf32>
      tpu.vector_store %arg7[%c0_62, %c0_63], %123 {strides = array<i32>} : memref<2x8xf32, #tpu.memory_space<vmem>>, vector<2x8xf32>,
      %125 = arith.index_cast %arg8 : i32 to index
      %c0_64 = arith.constant 0 : index
      %c0_65 = arith.constant 0 : index
      %126 = vector.load %arg5[%125, %c0_64, %c0_65] : memref<20x2x8xf32, #tpu.memory_space<vmem>>, vector<1x2x8xf32>
      %127 = vector.shape_cast %126 : vector<1x2x8xf32> to vector<2x8xf32>
      %128 = vector.shape_cast %123 : vector<2x8xf32> to vector<1x2x8xf32>
      tpu.vector_store %arg5[%125, %c0_64, %c0_65], %128 {strides = array<i32>} : memref<20x2x8xf32, #tpu.memory_space<vmem>>, vector<1x2x8xf32>,
    }
    %c20_i32_49 = arith.constant 20 : i32
    return
  }
}

module attributes {stable_mosaic.version = 11 : i64} {
  func.func @_gru_layer_kernel(%arg0: memref<40x12xf32, #tpu.memory_space<vmem>>, %arg1: memref<12x48xf32, #tpu.memory_space<vmem>>, %arg2: memref<16x48xf32, #tpu.memory_space<vmem>>, %arg3: memref<1x48xf32, #tpu.memory_space<vmem>>, %arg4: memref<1x48xf32, #tpu.memory_space<vmem>>, %arg5: memref<20x2x16xf32, #tpu.memory_space<vmem>>, %arg6: memref<20x2x48xf32, #tpu.memory_space<vmem>>, %arg7: memref<2x16xf32, #tpu.memory_space<vmem>>) attributes {dimension_semantics = [], scalar_prefetch = 0 : i64, scratch_operands = 2 : i64, tpu.core_type = #tpu.core_type<tc>} {
    %c0 = arith.constant 0 : index
    %c0_0 = arith.constant 0 : index
    %0 = vector.load %arg0[%c0, %c0_0] : memref<40x12xf32, #tpu.memory_space<vmem>>, vector<40x12xf32>
    %c0_1 = arith.constant 0 : index
    %c0_2 = arith.constant 0 : index
    %1 = vector.load %arg1[%c0_1, %c0_2] : memref<12x48xf32, #tpu.memory_space<vmem>>, vector<12x48xf32>
    %cst = arith.constant dense<0.000000e+00> : vector<40x48xf32>
    %2 = tpu.matmul %0, %1, %cst {dimension_numbers = #tpu.dot_dimension_numbers<[1], [0], [0], [1], [0, 0, 1, 1], [], []>} : vector<40x12xf32>, vector<12x48xf32>, vector<40x48xf32> -> vector<40x48xf32>
    %c0_3 = arith.constant 0 : index
    %c0_4 = arith.constant 0 : index
    %3 = vector.load %arg3[%c0_3, %c0_4] : memref<1x48xf32, #tpu.memory_space<vmem>>, vector<1x48xf32>
    %4 = vector.broadcast %3 : vector<1x48xf32> to vector<40x48xf32>
    %5 = arith.addf %2, %4 : vector<40x48xf32>
    %6 = vector.extract_strided_slice %5 {offsets = [0, 0], sizes = [2, 48], strides = [1, 1]} : vector<40x48xf32> to vector<2x48xf32>
    %c0_5 = arith.constant 0 : index
    %c0_6 = arith.constant 0 : index
    %c0_7 = arith.constant 0 : index
    %7 = vector.load %arg6[%c0_5, %c0_6, %c0_7] : memref<20x2x48xf32, #tpu.memory_space<vmem>>, vector<1x2x48xf32>
    %8 = vector.shape_cast %7 : vector<1x2x48xf32> to vector<2x48xf32>
    %9 = vector.shape_cast %6 : vector<2x48xf32> to vector<1x2x48xf32>
    tpu.vector_store %arg6[%c0_5, %c0_6, %c0_7], %9 {strides = array<i32>} : memref<20x2x48xf32, #tpu.memory_space<vmem>>, vector<1x2x48xf32>,
    %10 = vector.extract_strided_slice %5 {offsets = [2, 0], sizes = [2, 48], strides = [1, 1]} : vector<40x48xf32> to vector<2x48xf32>
    %c1 = arith.constant 1 : index
    %c0_8 = arith.constant 0 : index
    %c0_9 = arith.constant 0 : index
    %11 = vector.load %arg6[%c1, %c0_8, %c0_9] : memref<20x2x48xf32, #tpu.memory_space<vmem>>, vector<1x2x48xf32>
    %12 = vector.shape_cast %11 : vector<1x2x48xf32> to vector<2x48xf32>
    %13 = vector.shape_cast %10 : vector<2x48xf32> to vector<1x2x48xf32>
    tpu.vector_store %arg6[%c1, %c0_8, %c0_9], %13 {strides = array<i32>} : memref<20x2x48xf32, #tpu.memory_space<vmem>>, vector<1x2x48xf32>,
    %14 = vector.extract_strided_slice %5 {offsets = [4, 0], sizes = [2, 48], strides = [1, 1]} : vector<40x48xf32> to vector<2x48xf32>
    %c2 = arith.constant 2 : index
    %c0_10 = arith.constant 0 : index
    %c0_11 = arith.constant 0 : index
    %15 = vector.load %arg6[%c2, %c0_10, %c0_11] : memref<20x2x48xf32, #tpu.memory_space<vmem>>, vector<1x2x48xf32>
    %16 = vector.shape_cast %15 : vector<1x2x48xf32> to vector<2x48xf32>
    %17 = vector.shape_cast %14 : vector<2x48xf32> to vector<1x2x48xf32>
    tpu.vector_store %arg6[%c2, %c0_10, %c0_11], %17 {strides = array<i32>} : memref<20x2x48xf32, #tpu.memory_space<vmem>>, vector<1x2x48xf32>,
    %18 = vector.extract_strided_slice %5 {offsets = [6, 0], sizes = [2, 48], strides = [1, 1]} : vector<40x48xf32> to vector<2x48xf32>
    %c3 = arith.constant 3 : index
    %c0_12 = arith.constant 0 : index
    %c0_13 = arith.constant 0 : index
    %19 = vector.load %arg6[%c3, %c0_12, %c0_13] : memref<20x2x48xf32, #tpu.memory_space<vmem>>, vector<1x2x48xf32>
    %20 = vector.shape_cast %19 : vector<1x2x48xf32> to vector<2x48xf32>
    %21 = vector.shape_cast %18 : vector<2x48xf32> to vector<1x2x48xf32>
    tpu.vector_store %arg6[%c3, %c0_12, %c0_13], %21 {strides = array<i32>} : memref<20x2x48xf32, #tpu.memory_space<vmem>>, vector<1x2x48xf32>,
    %22 = vector.extract_strided_slice %5 {offsets = [8, 0], sizes = [2, 48], strides = [1, 1]} : vector<40x48xf32> to vector<2x48xf32>
    %c4 = arith.constant 4 : index
    %c0_14 = arith.constant 0 : index
    %c0_15 = arith.constant 0 : index
    %23 = vector.load %arg6[%c4, %c0_14, %c0_15] : memref<20x2x48xf32, #tpu.memory_space<vmem>>, vector<1x2x48xf32>
    %24 = vector.shape_cast %23 : vector<1x2x48xf32> to vector<2x48xf32>
    %25 = vector.shape_cast %22 : vector<2x48xf32> to vector<1x2x48xf32>
    tpu.vector_store %arg6[%c4, %c0_14, %c0_15], %25 {strides = array<i32>} : memref<20x2x48xf32, #tpu.memory_space<vmem>>, vector<1x2x48xf32>,
    %26 = vector.extract_strided_slice %5 {offsets = [10, 0], sizes = [2, 48], strides = [1, 1]} : vector<40x48xf32> to vector<2x48xf32>
    %c5 = arith.constant 5 : index
    %c0_16 = arith.constant 0 : index
    %c0_17 = arith.constant 0 : index
    %27 = vector.load %arg6[%c5, %c0_16, %c0_17] : memref<20x2x48xf32, #tpu.memory_space<vmem>>, vector<1x2x48xf32>
    %28 = vector.shape_cast %27 : vector<1x2x48xf32> to vector<2x48xf32>
    %29 = vector.shape_cast %26 : vector<2x48xf32> to vector<1x2x48xf32>
    tpu.vector_store %arg6[%c5, %c0_16, %c0_17], %29 {strides = array<i32>} : memref<20x2x48xf32, #tpu.memory_space<vmem>>, vector<1x2x48xf32>,
    %30 = vector.extract_strided_slice %5 {offsets = [12, 0], sizes = [2, 48], strides = [1, 1]} : vector<40x48xf32> to vector<2x48xf32>
    %c6 = arith.constant 6 : index
    %c0_18 = arith.constant 0 : index
    %c0_19 = arith.constant 0 : index
    %31 = vector.load %arg6[%c6, %c0_18, %c0_19] : memref<20x2x48xf32, #tpu.memory_space<vmem>>, vector<1x2x48xf32>
    %32 = vector.shape_cast %31 : vector<1x2x48xf32> to vector<2x48xf32>
    %33 = vector.shape_cast %30 : vector<2x48xf32> to vector<1x2x48xf32>
    tpu.vector_store %arg6[%c6, %c0_18, %c0_19], %33 {strides = array<i32>} : memref<20x2x48xf32, #tpu.memory_space<vmem>>, vector<1x2x48xf32>,
    %34 = vector.extract_strided_slice %5 {offsets = [14, 0], sizes = [2, 48], strides = [1, 1]} : vector<40x48xf32> to vector<2x48xf32>
    %c7 = arith.constant 7 : index
    %c0_20 = arith.constant 0 : index
    %c0_21 = arith.constant 0 : index
    %35 = vector.load %arg6[%c7, %c0_20, %c0_21] : memref<20x2x48xf32, #tpu.memory_space<vmem>>, vector<1x2x48xf32>
    %36 = vector.shape_cast %35 : vector<1x2x48xf32> to vector<2x48xf32>
    %37 = vector.shape_cast %34 : vector<2x48xf32> to vector<1x2x48xf32>
    tpu.vector_store %arg6[%c7, %c0_20, %c0_21], %37 {strides = array<i32>} : memref<20x2x48xf32, #tpu.memory_space<vmem>>, vector<1x2x48xf32>,
    %38 = vector.extract_strided_slice %5 {offsets = [16, 0], sizes = [2, 48], strides = [1, 1]} : vector<40x48xf32> to vector<2x48xf32>
    %c8 = arith.constant 8 : index
    %c0_22 = arith.constant 0 : index
    %c0_23 = arith.constant 0 : index
    %39 = vector.load %arg6[%c8, %c0_22, %c0_23] : memref<20x2x48xf32, #tpu.memory_space<vmem>>, vector<1x2x48xf32>
    %40 = vector.shape_cast %39 : vector<1x2x48xf32> to vector<2x48xf32>
    %41 = vector.shape_cast %38 : vector<2x48xf32> to vector<1x2x48xf32>
    tpu.vector_store %arg6[%c8, %c0_22, %c0_23], %41 {strides = array<i32>} : memref<20x2x48xf32, #tpu.memory_space<vmem>>, vector<1x2x48xf32>,
    %42 = vector.extract_strided_slice %5 {offsets = [18, 0], sizes = [2, 48], strides = [1, 1]} : vector<40x48xf32> to vector<2x48xf32>
    %c9 = arith.constant 9 : index
    %c0_24 = arith.constant 0 : index
    %c0_25 = arith.constant 0 : index
    %43 = vector.load %arg6[%c9, %c0_24, %c0_25] : memref<20x2x48xf32, #tpu.memory_space<vmem>>, vector<1x2x48xf32>
    %44 = vector.shape_cast %43 : vector<1x2x48xf32> to vector<2x48xf32>
    %45 = vector.shape_cast %42 : vector<2x48xf32> to vector<1x2x48xf32>
    tpu.vector_store %arg6[%c9, %c0_24, %c0_25], %45 {strides = array<i32>} : memref<20x2x48xf32, #tpu.memory_space<vmem>>, vector<1x2x48xf32>,
    %46 = vector.extract_strided_slice %5 {offsets = [20, 0], sizes = [2, 48], strides = [1, 1]} : vector<40x48xf32> to vector<2x48xf32>
    %c10 = arith.constant 10 : index
    %c0_26 = arith.constant 0 : index
    %c0_27 = arith.constant 0 : index
    %47 = vector.load %arg6[%c10, %c0_26, %c0_27] : memref<20x2x48xf32, #tpu.memory_space<vmem>>, vector<1x2x48xf32>
    %48 = vector.shape_cast %47 : vector<1x2x48xf32> to vector<2x48xf32>
    %49 = vector.shape_cast %46 : vector<2x48xf32> to vector<1x2x48xf32>
    tpu.vector_store %arg6[%c10, %c0_26, %c0_27], %49 {strides = array<i32>} : memref<20x2x48xf32, #tpu.memory_space<vmem>>, vector<1x2x48xf32>,
    %50 = vector.extract_strided_slice %5 {offsets = [22, 0], sizes = [2, 48], strides = [1, 1]} : vector<40x48xf32> to vector<2x48xf32>
    %c11 = arith.constant 11 : index
    %c0_28 = arith.constant 0 : index
    %c0_29 = arith.constant 0 : index
    %51 = vector.load %arg6[%c11, %c0_28, %c0_29] : memref<20x2x48xf32, #tpu.memory_space<vmem>>, vector<1x2x48xf32>
    %52 = vector.shape_cast %51 : vector<1x2x48xf32> to vector<2x48xf32>
    %53 = vector.shape_cast %50 : vector<2x48xf32> to vector<1x2x48xf32>
    tpu.vector_store %arg6[%c11, %c0_28, %c0_29], %53 {strides = array<i32>} : memref<20x2x48xf32, #tpu.memory_space<vmem>>, vector<1x2x48xf32>,
    %54 = vector.extract_strided_slice %5 {offsets = [24, 0], sizes = [2, 48], strides = [1, 1]} : vector<40x48xf32> to vector<2x48xf32>
    %c12 = arith.constant 12 : index
    %c0_30 = arith.constant 0 : index
    %c0_31 = arith.constant 0 : index
    %55 = vector.load %arg6[%c12, %c0_30, %c0_31] : memref<20x2x48xf32, #tpu.memory_space<vmem>>, vector<1x2x48xf32>
    %56 = vector.shape_cast %55 : vector<1x2x48xf32> to vector<2x48xf32>
    %57 = vector.shape_cast %54 : vector<2x48xf32> to vector<1x2x48xf32>
    tpu.vector_store %arg6[%c12, %c0_30, %c0_31], %57 {strides = array<i32>} : memref<20x2x48xf32, #tpu.memory_space<vmem>>, vector<1x2x48xf32>,
    %58 = vector.extract_strided_slice %5 {offsets = [26, 0], sizes = [2, 48], strides = [1, 1]} : vector<40x48xf32> to vector<2x48xf32>
    %c13 = arith.constant 13 : index
    %c0_32 = arith.constant 0 : index
    %c0_33 = arith.constant 0 : index
    %59 = vector.load %arg6[%c13, %c0_32, %c0_33] : memref<20x2x48xf32, #tpu.memory_space<vmem>>, vector<1x2x48xf32>
    %60 = vector.shape_cast %59 : vector<1x2x48xf32> to vector<2x48xf32>
    %61 = vector.shape_cast %58 : vector<2x48xf32> to vector<1x2x48xf32>
    tpu.vector_store %arg6[%c13, %c0_32, %c0_33], %61 {strides = array<i32>} : memref<20x2x48xf32, #tpu.memory_space<vmem>>, vector<1x2x48xf32>,
    %62 = vector.extract_strided_slice %5 {offsets = [28, 0], sizes = [2, 48], strides = [1, 1]} : vector<40x48xf32> to vector<2x48xf32>
    %c14 = arith.constant 14 : index
    %c0_34 = arith.constant 0 : index
    %c0_35 = arith.constant 0 : index
    %63 = vector.load %arg6[%c14, %c0_34, %c0_35] : memref<20x2x48xf32, #tpu.memory_space<vmem>>, vector<1x2x48xf32>
    %64 = vector.shape_cast %63 : vector<1x2x48xf32> to vector<2x48xf32>
    %65 = vector.shape_cast %62 : vector<2x48xf32> to vector<1x2x48xf32>
    tpu.vector_store %arg6[%c14, %c0_34, %c0_35], %65 {strides = array<i32>} : memref<20x2x48xf32, #tpu.memory_space<vmem>>, vector<1x2x48xf32>,
    %66 = vector.extract_strided_slice %5 {offsets = [30, 0], sizes = [2, 48], strides = [1, 1]} : vector<40x48xf32> to vector<2x48xf32>
    %c15 = arith.constant 15 : index
    %c0_36 = arith.constant 0 : index
    %c0_37 = arith.constant 0 : index
    %67 = vector.load %arg6[%c15, %c0_36, %c0_37] : memref<20x2x48xf32, #tpu.memory_space<vmem>>, vector<1x2x48xf32>
    %68 = vector.shape_cast %67 : vector<1x2x48xf32> to vector<2x48xf32>
    %69 = vector.shape_cast %66 : vector<2x48xf32> to vector<1x2x48xf32>
    tpu.vector_store %arg6[%c15, %c0_36, %c0_37], %69 {strides = array<i32>} : memref<20x2x48xf32, #tpu.memory_space<vmem>>, vector<1x2x48xf32>,
    %70 = vector.extract_strided_slice %5 {offsets = [32, 0], sizes = [2, 48], strides = [1, 1]} : vector<40x48xf32> to vector<2x48xf32>
    %c16 = arith.constant 16 : index
    %c0_38 = arith.constant 0 : index
    %c0_39 = arith.constant 0 : index
    %71 = vector.load %arg6[%c16, %c0_38, %c0_39] : memref<20x2x48xf32, #tpu.memory_space<vmem>>, vector<1x2x48xf32>
    %72 = vector.shape_cast %71 : vector<1x2x48xf32> to vector<2x48xf32>
    %73 = vector.shape_cast %70 : vector<2x48xf32> to vector<1x2x48xf32>
    tpu.vector_store %arg6[%c16, %c0_38, %c0_39], %73 {strides = array<i32>} : memref<20x2x48xf32, #tpu.memory_space<vmem>>, vector<1x2x48xf32>,
    %74 = vector.extract_strided_slice %5 {offsets = [34, 0], sizes = [2, 48], strides = [1, 1]} : vector<40x48xf32> to vector<2x48xf32>
    %c17 = arith.constant 17 : index
    %c0_40 = arith.constant 0 : index
    %c0_41 = arith.constant 0 : index
    %75 = vector.load %arg6[%c17, %c0_40, %c0_41] : memref<20x2x48xf32, #tpu.memory_space<vmem>>, vector<1x2x48xf32>
    %76 = vector.shape_cast %75 : vector<1x2x48xf32> to vector<2x48xf32>
    %77 = vector.shape_cast %74 : vector<2x48xf32> to vector<1x2x48xf32>
    tpu.vector_store %arg6[%c17, %c0_40, %c0_41], %77 {strides = array<i32>} : memref<20x2x48xf32, #tpu.memory_space<vmem>>, vector<1x2x48xf32>,
    %78 = vector.extract_strided_slice %5 {offsets = [36, 0], sizes = [2, 48], strides = [1, 1]} : vector<40x48xf32> to vector<2x48xf32>
    %c18 = arith.constant 18 : index
    %c0_42 = arith.constant 0 : index
    %c0_43 = arith.constant 0 : index
    %79 = vector.load %arg6[%c18, %c0_42, %c0_43] : memref<20x2x48xf32, #tpu.memory_space<vmem>>, vector<1x2x48xf32>
    %80 = vector.shape_cast %79 : vector<1x2x48xf32> to vector<2x48xf32>
    %81 = vector.shape_cast %78 : vector<2x48xf32> to vector<1x2x48xf32>
    tpu.vector_store %arg6[%c18, %c0_42, %c0_43], %81 {strides = array<i32>} : memref<20x2x48xf32, #tpu.memory_space<vmem>>, vector<1x2x48xf32>,
    %82 = vector.extract_strided_slice %5 {offsets = [38, 0], sizes = [2, 48], strides = [1, 1]} : vector<40x48xf32> to vector<2x48xf32>
    %c19 = arith.constant 19 : index
    %c0_44 = arith.constant 0 : index
    %c0_45 = arith.constant 0 : index
    %83 = vector.load %arg6[%c19, %c0_44, %c0_45] : memref<20x2x48xf32, #tpu.memory_space<vmem>>, vector<1x2x48xf32>
    %84 = vector.shape_cast %83 : vector<1x2x48xf32> to vector<2x48xf32>
    %85 = vector.shape_cast %82 : vector<2x48xf32> to vector<1x2x48xf32>
    tpu.vector_store %arg6[%c19, %c0_44, %c0_45], %85 {strides = array<i32>} : memref<20x2x48xf32, #tpu.memory_space<vmem>>, vector<1x2x48xf32>,
    %cst_46 = arith.constant 0.000000e+00 : f32
    %86 = vector.broadcast %cst_46 : f32 to vector<2x16xf32>
    %c0_47 = arith.constant 0 : index
    %c0_48 = arith.constant 0 : index
    %87 = vector.load %arg7[%c0_47, %c0_48] : memref<2x16xf32, #tpu.memory_space<vmem>>, vector<2x16xf32>
    tpu.vector_store %arg7[%c0_47, %c0_48], %86 {strides = array<i32>} : memref<2x16xf32, #tpu.memory_space<vmem>>, vector<2x16xf32>,
    %c0_i32 = arith.constant 0 : i32
    %c20_i32 = arith.constant 20 : i32
    %88 = arith.addi %c0_i32, %c20_i32 : i32
    %c1_i32 = arith.constant 1 : i32
    scf.for %arg8 = %c0_i32 to %88 step %c1_i32  : i32 {
      %c0_50 = arith.constant 0 : index
      %c0_51 = arith.constant 0 : index
      %89 = vector.load %arg7[%c0_50, %c0_51] : memref<2x16xf32, #tpu.memory_space<vmem>>, vector<2x16xf32>
      %c0_52 = arith.constant 0 : index
      %c0_53 = arith.constant 0 : index
      %90 = vector.load %arg2[%c0_52, %c0_53] : memref<16x48xf32, #tpu.memory_space<vmem>>, vector<16x48xf32>
      %cst_54 = arith.constant dense<0.000000e+00> : vector<2x48xf32>
      %91 = tpu.matmul %89, %90, %cst_54 {dimension_numbers = #tpu.dot_dimension_numbers<[1], [0], [0], [1], [0, 0, 1, 1], [], []>} : vector<2x16xf32>, vector<16x48xf32>, vector<2x48xf32> -> vector<2x48xf32>
      %c0_55 = arith.constant 0 : index
      %c0_56 = arith.constant 0 : index
      %92 = vector.load %arg4[%c0_55, %c0_56] : memref<1x48xf32, #tpu.memory_space<vmem>>, vector<1x48xf32>
      %93 = vector.broadcast %92 : vector<1x48xf32> to vector<2x48xf32>
      %94 = arith.addf %91, %93 : vector<2x48xf32>
      %95 = arith.index_cast %arg8 : i32 to index
      %c0_57 = arith.constant 0 : index
      %c0_58 = arith.constant 0 : index
      %96 = vector.load %arg6[%95, %c0_57, %c0_58] : memref<20x2x48xf32, #tpu.memory_space<vmem>>, vector<1x2x48xf32>
      %97 = vector.shape_cast %96 : vector<1x2x48xf32> to vector<2x48xf32>
      %98 = vector.extract_strided_slice %97 {offsets = [0, 0], sizes = [2, 16], strides = [1, 1]} : vector<2x48xf32> to vector<2x16xf32>
      %99 = vector.extract_strided_slice %94 {offsets = [0, 0], sizes = [2, 16], strides = [1, 1]} : vector<2x48xf32> to vector<2x16xf32>
      %100 = arith.addf %98, %99 : vector<2x16xf32>
      %101 = arith.negf %100 : vector<2x16xf32>
      %102 = math.exp %101 : vector<2x16xf32>
      %cst_59 = arith.constant 1.000000e+00 : f32
      %103 = vector.broadcast %cst_59 : f32 to vector<2x16xf32>
      %104 = arith.addf %103, %102 : vector<2x16xf32>
      %105 = arith.divf %103, %104 : vector<2x16xf32>
      %106 = vector.extract_strided_slice %97 {offsets = [0, 16], sizes = [2, 16], strides = [1, 1]} : vector<2x48xf32> to vector<2x16xf32>
      %107 = vector.extract_strided_slice %94 {offsets = [0, 16], sizes = [2, 16], strides = [1, 1]} : vector<2x48xf32> to vector<2x16xf32>
      %108 = arith.addf %106, %107 : vector<2x16xf32>
      %109 = arith.negf %108 : vector<2x16xf32>
      %110 = math.exp %109 : vector<2x16xf32>
      %cst_60 = arith.constant 1.000000e+00 : f32
      %111 = vector.broadcast %cst_60 : f32 to vector<2x16xf32>
      %112 = arith.addf %111, %110 : vector<2x16xf32>
      %113 = arith.divf %111, %112 : vector<2x16xf32>
      %114 = vector.extract_strided_slice %97 {offsets = [0, 32], sizes = [2, 16], strides = [1, 1]} : vector<2x48xf32> to vector<2x16xf32>
      %115 = vector.extract_strided_slice %94 {offsets = [0, 32], sizes = [2, 16], strides = [1, 1]} : vector<2x48xf32> to vector<2x16xf32>
      %116 = arith.mulf %105, %115 : vector<2x16xf32>
      %117 = arith.addf %114, %116 : vector<2x16xf32>
      %118 = math.tanh %117 : vector<2x16xf32>
      %cst_61 = arith.constant 1.000000e+00 : f32
      %119 = vector.broadcast %cst_61 : f32 to vector<2x16xf32>
      %120 = arith.subf %119, %113 : vector<2x16xf32>
      %121 = arith.mulf %120, %118 : vector<2x16xf32>
      %122 = arith.mulf %113, %89 : vector<2x16xf32>
      %123 = arith.addf %121, %122 : vector<2x16xf32>
      %c0_62 = arith.constant 0 : index
      %c0_63 = arith.constant 0 : index
      %124 = vector.load %arg7[%c0_62, %c0_63] : memref<2x16xf32, #tpu.memory_space<vmem>>, vector<2x16xf32>
      tpu.vector_store %arg7[%c0_62, %c0_63], %123 {strides = array<i32>} : memref<2x16xf32, #tpu.memory_space<vmem>>, vector<2x16xf32>,
      %125 = arith.index_cast %arg8 : i32 to index
      %c0_64 = arith.constant 0 : index
      %c0_65 = arith.constant 0 : index
      %126 = vector.load %arg5[%125, %c0_64, %c0_65] : memref<20x2x16xf32, #tpu.memory_space<vmem>>, vector<1x2x16xf32>
      %127 = vector.shape_cast %126 : vector<1x2x16xf32> to vector<2x16xf32>
      %128 = vector.shape_cast %123 : vector<2x16xf32> to vector<1x2x16xf32>
      tpu.vector_store %arg5[%125, %c0_64, %c0_65], %128 {strides = array<i32>} : memref<20x2x16xf32, #tpu.memory_space<vmem>>, vector<1x2x16xf32>,
    }
    %c20_i32_49 = arith.constant 20 : i32
    return
  }
}

module attributes {stable_mosaic.version = 11 : i64} {
  func.func @_cluster_stats_kernel(%arg0: memref<40x8xf32, #tpu.memory_space<vmem>>, %arg1: memref<40x4xf32, #tpu.memory_space<vmem>>, %arg2: memref<4x8xf32, #tpu.memory_space<vmem>>, %arg3: memref<1x1xf32, #tpu.memory_space<vmem>>, %arg4: memref<40x4xf32, #tpu.memory_space<vmem>>, %arg5: memref<40x4xf32, #tpu.memory_space<vmem>>) attributes {dimension_semantics = [], scalar_prefetch = 0 : i64, scratch_operands = 0 : i64, tpu.core_type = #tpu.core_type<tc>} {
    %c0 = arith.constant 0 : index
    %c0_0 = arith.constant 0 : index
    %0 = vector.load %arg0[%c0, %c0_0] : memref<40x8xf32, #tpu.memory_space<vmem>>, vector<40x8xf32>
    %c0_1 = arith.constant 0 : index
    %c0_2 = arith.constant 0 : index
    %1 = vector.load %arg1[%c0_1, %c0_2] : memref<40x4xf32, #tpu.memory_space<vmem>>, vector<40x4xf32>
    %c0_3 = arith.constant 0 : index
    %c0_4 = arith.constant 0 : index
    %2 = vector.load %arg2[%c0_3, %c0_4] : memref<4x8xf32, #tpu.memory_space<vmem>>, vector<4x8xf32>
    %cst = arith.constant dense<0.000000e+00> : vector<4x8xf32>
    %3 = tpu.matmul %1, %0, %cst {dimension_numbers = #tpu.dot_dimension_numbers<[0], [0], [1], [1], [0, 1, 1, 1], [], []>} : vector<40x4xf32>, vector<40x8xf32>, vector<4x8xf32> -> vector<4x8xf32>
    %4 = arith.mulf %0, %0 : vector<40x8xf32>
    %5 = vector.shape_cast %4 : vector<40x8xf32> to vector<1x40x8xf32>
    %cst_5 = arith.constant dense<0.000000e+00> : vector<1xf32>
    %6 = vector.multi_reduction <add>, %5, %cst_5 [1, 2] : vector<1x40x8xf32> to vector<1xf32>
    %7 = vector.shape_cast %6 : vector<1xf32> to vector<1x1x1xf32>
    %8 = vector.extract %7[0, 0, 0] : f32 from vector<1x1x1xf32>
    %9 = vector.broadcast %8 : f32 to vector<1x1xf32>
    %10 = arith.mulf %3, %3 : vector<4x8xf32>
    %11 = vector.shape_cast %10 : vector<4x8xf32> to vector<1x4x8xf32>
    %cst_6 = arith.constant dense<0.000000e+00> : vector<1xf32>
    %12 = vector.multi_reduction <add>, %11, %cst_6 [1, 2] : vector<1x4x8xf32> to vector<1xf32>
    %13 = vector.shape_cast %12 : vector<1xf32> to vector<1x1x1xf32>
    %14 = vector.extract %13[0, 0, 0] : f32 from vector<1x1x1xf32>
    %15 = vector.broadcast %14 : f32 to vector<1x1xf32>
    %16 = arith.subf %9, %15 : vector<1x1xf32>
    %c0_7 = arith.constant 0 : index
    %c0_8 = arith.constant 0 : index
    %17 = vector.load %arg3[%c0_7, %c0_8] : memref<1x1xf32, #tpu.memory_space<vmem>>, vector<1x1xf32>
    tpu.vector_store %arg3[%c0_7, %c0_8], %16 {strides = array<i32>} : memref<1x1xf32, #tpu.memory_space<vmem>>, vector<1x1xf32>,
    %cst_9 = arith.constant dense<0.000000e+00> : vector<40x4xf32>
    %18 = tpu.matmul %0, %2, %cst_9 {dimension_numbers = #tpu.dot_dimension_numbers<[1], [1], [0], [0], [0, 0, 1, 0], [], []>} : vector<40x8xf32>, vector<4x8xf32>, vector<40x4xf32> -> vector<40x4xf32>
    %19 = arith.mulf %0, %0 : vector<40x8xf32>
    %cst_10 = arith.constant dense<0.000000e+00> : vector<40xf32>
    %20 = vector.multi_reduction <add>, %19, %cst_10 [1] : vector<40x8xf32> to vector<40xf32>
    %21 = vector.shape_cast %20 : vector<40xf32> to vector<40x1xf32>
    %22 = math.sqrt %21 : vector<40x1xf32>
    %23 = arith.mulf %2, %2 : vector<4x8xf32>
    %cst_11 = arith.constant dense<0.000000e+00> : vector<4xf32>
    %24 = vector.multi_reduction <add>, %23, %cst_11 [1] : vector<4x8xf32> to vector<4xf32>
    %25 = vector.shape_cast %24 : vector<4xf32> to vector<4x1xf32>
    %26 = math.sqrt %25 : vector<4x1xf32>
    %cst_12 = arith.constant dense<0.000000e+00> : vector<40x4xf32>
    %27 = tpu.matmul %22, %26, %cst_12 {dimension_numbers = #tpu.dot_dimension_numbers<[1], [1], [0], [0], [0, 0, 1, 0], [], []>} : vector<40x1xf32>, vector<4x1xf32>, vector<40x4xf32> -> vector<40x4xf32>
    %cst_13 = arith.constant 9.99999993E-9 : f32
    %28 = vector.broadcast %cst_13 : f32 to vector<40x4xf32>
    %29 = arith.maximumf %27, %28 : vector<40x4xf32>
    %30 = arith.divf %18, %29 : vector<40x4xf32>
    %cst_14 = arith.constant 1.000000e+00 : f32
    %31 = vector.broadcast %cst_14 : f32 to vector<40x4xf32>
    %32 = arith.divf %30, %31 : vector<40x4xf32>
    %cst_15 = arith.constant 1.000000e+00 : f32
    %33 = vector.broadcast %cst_15 : f32 to vector<40x4xf32>
    %34 = arith.addf %33, %32 : vector<40x4xf32>
    %cst_16 = arith.constant 1.000000e+00 : f32
    %35 = vector.broadcast %cst_16 : f32 to vector<40x4xf32>
    %36 = arith.divf %35, %34 : vector<40x4xf32>
    %cst_17 = arith.constant dense<0.000000e+00> : vector<40xf32>
    %37 = vector.multi_reduction <add>, %36, %cst_17 [1] : vector<40x4xf32> to vector<40xf32>
    %38 = vector.shape_cast %37 : vector<40xf32> to vector<40x1xf32>
    %39 = vector.broadcast %38 : vector<40x1xf32> to vector<40x4xf32>
    %40 = arith.divf %36, %39 : vector<40x4xf32>
    %41 = arith.mulf %40, %40 : vector<40x4xf32>
    %cst_18 = arith.constant dense<0.000000e+00> : vector<4xf32>
    %42 = vector.multi_reduction <add>, %40, %cst_18 [0] : vector<40x4xf32> to vector<4xf32>
    %43 = vector.shape_cast %42 : vector<4xf32> to vector<1x4xf32>
    %44 = vector.broadcast %43 : vector<1x4xf32> to vector<40x4xf32>
    %45 = arith.divf %41, %44 : vector<40x4xf32>
    %cst_19 = arith.constant dense<0.000000e+00> : vector<40xf32>
    %46 = vector.multi_reduction <add>, %45, %cst_19 [1] : vector<40x4xf32> to vector<40xf32>
    %47 = vector.shape_cast %46 : vector<40xf32> to vector<40x1xf32>
    %48 = vector.broadcast %47 : vector<40x1xf32> to vector<40x4xf32>
    %49 = arith.divf %45, %48 : vector<40x4xf32>
    %c0_20 = arith.constant 0 : index
    %c0_21 = arith.constant 0 : index
    %50 = vector.load %arg4[%c0_20, %c0_21] : memref<40x4xf32, #tpu.memory_space<vmem>>, vector<40x4xf32>
    tpu.vector_store %arg4[%c0_20, %c0_21], %40 {strides = array<i32>} : memref<40x4xf32, #tpu.memory_space<vmem>>, vector<40x4xf32>,
    %c0_22 = arith.constant 0 : index
    %c0_23 = arith.constant 0 : index
    %51 = vector.load %arg5[%c0_22, %c0_23] : memref<40x4xf32, #tpu.memory_space<vmem>>, vector<40x4xf32>
    tpu.vector_store %arg5[%c0_22, %c0_23], %49 {strides = array<i32>} : memref<40x4xf32, #tpu.memory_space<vmem>>, vector<40x4xf32>,
    return
  }
}

</mosaic_0001>

<bundles_post_ra>
// kernel: cluster_net_forward.12
= control target key start
LH: loop header
LB: loop body
LE: loop exit
PB: predicated region body
PF: predicated region fallthrough
CT: control target
= control target key end

     0   :  { %s746_s24 = smov 0   ;;  %s844_s0 = inlined_call_operand.vmem [shape: f32[2,22,8], index: 0, kind: input, shape index: {}]   ;;  %s845_s1 = inlined_call_operand.vmem [shape: f32[3,8,16], index: 1, kind: input, shape index: {}]   ;;  %s846_s2 = inlined_call_operand.vmem [shape: f32[1,16], index: 2, kind: input, shape index: {}]   ;;  %s847_s3 = inlined_call_operand.vmem [shape: f32[3,16,16], index: 3, kind: input, shape index: {}]   ;;  %s848_s4 = inlined_call_operand.vmem [shape: f32[1,16], index: 4, kind: input, shape index: {}]   ;;  %s849_s5 = inlined_call_operand.vmem [shape: f32[8,16], index: 5, kind: input, shape index: {}]   ;;  %s850_s6 = inlined_call_operand.vmem [shape: f32[1,16], index: 6, kind: input, shape index: {}]   ;;  %s851_s7 = inlined_call_operand.vmem [shape: f32[2,20,16], index: 7, kind: output, shape index: {}]  }
   0x1 LB: > { %s647_s25 = sadd.s32 4294967295, %s703_s24   ;;  %p651_p0 = scmp.ge.s32.totalorder %s703_s24, 1  ;;  %s703_s24 = sphi %s746_s24, %s17_s24  }
   0x2   : > { %p237_p1 = scmp.lt.s32.totalorder %s703_s24, 3 }
   0x4   : > { %p238_p2 = pnand %p651_p0, %p237_p1 }
   0x5   : > { %p269_p3 = scmp.lt.s32.totalorder (!%p238_p2), %s647_s25, 1 }
   0x6   : > { %241 = sbr.rel (%p238_p2) target bundleno = 337 (0x151), region = 48 }
   0xb   : > { %v661_v0 = vld [vmem:[%s845_s1 + $0x10] sm:$0xff]  ;;  %v654_v1 = vld [vmem:[%s845_s1 + $0x8] sm:$0xff]  ;;  %v282_v2 = vld [vmem:[%s845_s1] sm:$0xff]  ;;  %s853_s25 = smov (!%p269_p3, %s647_s25), 1  ;;  %vm294_vm0 = vcmask 64512   ;;  %vm361_vm1 = vcmask 1045504  }
   0xc   : > { %388 = vmatpush.msra.mxu2 %v661_v0  ;;  %316 = vmatpush.msra.mxu0 %v654_v1  ;;  %s684_s9 = smul.u32 24, %s853_s25  ;;  %vm288_vm2 = vcmask 1046528   ;;  %vm412_vm3 = vcmask 123904   ;;  %v705_v16 = vmov 0.0   ;;  %v423_v17 = vld [vmem:[%s847_s3 + $0x8] sm:$0xff]  ;;  %v422_v18 = vld [vmem:[%s847_s3] sm:$0xff] }
   0xd   : > { %348 = vmatpush.msra.mxu1 %v282_v2  ;;  %683 = vmatpush.msra.mxu3 %v654_v1  ;;  %413 = vst.msk [vmem:[#allocation2] sm:$0x3] %vm412_vm3, %v705_v16  ;;  %v552_v19 = vld [vmem:[%s849_s5] sm:$0xff]  ;;  %v666_v20 = vld [vmem:[%s847_s3 + $0x18] sm:$0xff]  ;;  %v674_v21 = vld [vmem:[%s847_s3 + $0x28] sm:$0xff]  ;;  %vm414_vm4 = vcmask 130048  }
   0xe   : > { %s273_s12 = scalar_lea.vmem %s844_s0, %s684_s9  ;;  %487 = vmatpush.msrb.mxu0 %v423_v17  ;;  %572 = vmatpush.msrb.mxu2 %v552_v19  ;;  %v665_v23 = vld [vmem:[%s847_s3 + $0x10] sm:$0xff]  ;;  %v673_v24 = vld [vmem:[%s847_s3 + $0x20] sm:$0xff]  ;;  %vm417_vm5 = vcmask 125952   ;;  %s278_s15 = scalar_lea.vmem %s851_s7, %s684_s9 }
   0xf   : > { %v279_v3 = vld [vmem:[%s273_s12] sm:$0xff]  ;;  %v280_v4 = vld [vmem:[%s273_s12 + $0x8] sm:$0xff]  ;;  %v281_v5 = vld [vmem:[%s273_s12 + $0x10] sm:$0x3f]  ;;  %455 = vmatpush.msrb.mxu3 %v666_v20  ;;  %527 = vmatpush.msrb.mxu1 %v674_v21 }
  0x10   : > { %v362_v6 = vrot.slane %v279_v3, 2  ;;  %v363_v7 = vrot.slane %v280_v4, 2  ;;  %v289_v8 = vrot.slane %v279_v3, 1  ;;  %v290_v9 = vrot.slane %v280_v4, 1  ;;  %658 = vmatmul.msk.f32.vlgmr.msra.gmra.mxu1 %vm294_vm0, %v279_v3  ;;  %488 = vmatpush.msrb.mxu0 %v422_v18  ;;  %v694_v27 = vld [vmem:[%s846_s2] ss:$0 sm:$0xff] }
  0x11   : > { %v292_v10 = vrot.slane %v281_v5, 1  ;;  %v365_v14 = vrot.slane %v281_v5, 2  ;;  %456 = vmatpush.msrb.mxu3 %v665_v23  ;;  %528 = vmatpush.msrb.mxu1 %v673_v24  ;;  %v695_v0 = vld [vmem:[%s848_s4] ss:$0 sm:$0xff] }
  0x12   : > { %v364_v11 = vsel %vm361_vm1, %v362_v6, %v363_v7  ;;  %v291_v12 = vsel %vm288_vm2, %v289_v8, %v290_v9  ;;  %v696_v1 = vld [vmem:[%s850_s6] ss:$0 sm:$0xff] }
  0x13   : > { %662 = vmatmul.msk.f32.vlgmr.msra.gmra.mxu2 %vm294_vm0, %v364_v11  ;;  %655 = vmatmul.msk.f32.vlgmr.msra.gmra.mxu0 %vm294_vm0, %v291_v12  ;;  %v293_v13 = vsel %vm288_vm2, %v290_v9, %v292_v10  ;;  %v366_v15 = vsel %vm361_vm1, %v363_v7, %v365_v14 }
  0x14   : > { %656 = vmatmul.msk.f32.vlgmr.msra.gmra.mxu3 %vm294_vm0, %v293_v13 }
  0x18   : > { %659 = vmatmul.msk.f32.gmra.mxu1 %vm294_vm0, %v280_v4 }
  0x1b   : > { %663 = vmatmul.msk.f32.gmra.mxu2 %vm294_vm0, %v366_v15 }
  0x1c   : > { %657 = vmatmul.msk.f32.gmra.mxu3 %vm294_vm0, %v292_v10 }
  0x20   : > { %660 = vmatmul.msk.f32.gmra.mxu1 %vm294_vm0, %v281_v5 }
  0x23   : > { %664 = vmatmul.msk.f32.gmra.mxu2 %vm294_vm0, %v365_v14 }
  0x2b   : > { %678 = vmatmul.msk.f32.vlgmr.msrb.gmra.mxu2 %vm294_vm0, %v364_v11 }
  0x33   : > { %679 = vmatmul.msk.f32.gmra.mxu2 %vm294_vm0, %v366_v15 }
  0x3b   : > { %680 = vmatmul.msk.f32.gmra.mxu2 %vm294_vm0, %v365_v14 }
  0x8d   : > { %v350_v22 = vpop.f32.mrf.mxu1 }
  0x90   : > { %v318_v25 = vpop.f32.mrf.mxu0 }
  0x91   : > { %v351_v26 = vadd.f32 %v350_v22, %v318_v25 }
  0x95   : > { %v353_v29 = vpop.f32.mrf.mxu1 }
  0x96   : > { %v390_v28 = vpop.f32.mrf.mxu2 }
  0x97   : > { %v399_v30 = vadd.f32 %v390_v28, %v351_v26  ;;  %v321_v31 = vpop.f32.mrf.mxu3 }
  0x98   : > { %v354_v34 = vadd.f32 %v353_v29, %v321_v31 }
  0x99   : > { %v406_v32 = vadd.f32 %v694_v27, %v399_v30 }
  0x9b   : > { %v409_v33 = vmax.f32 %v406_v32, 0.0 }
  0x9d   : > { %415 = vst.msk [vmem:[#allocation2 + $0x2] sm:$0xff] %vm414_vm4, %v409_v33  ;;  %v356_v38 = vpop.f32.mrf.mxu1 }
  0x9e   : > { %v393_v35 = vpop.f32.mrf.mxu2 }
  0x9f   : > { %v400_v36 = vadd.f32 %v393_v35, %v354_v34  ;;  %v324_v37 = vpop.f32.mrf.mxu3 }
  0xa0   : > { %v357_v41 = vadd.f32 %v356_v38, %v324_v37 }
  0xa1   : > { %v407_v39 = vadd.f32 %v694_v27, %v400_v36 }
  0xa3   : > { %v410_v40 = vmax.f32 %v407_v39, 0.0 }
  0xa4   : > { %v419_v42 = vld [vmem:[#allocation2] sm:$0xff] }
  0xa5   : > { %416 = vst.msk [vmem:[#allocation2 + $0xa] sm:$0xff] %vm414_vm4, %v410_v40  ;;  %670 = vmatmul.msk.f32.vlgmr.msrb.gmra.mxu0 %vm414_vm4, %v419_v42  ;;  %v430_v48 = vrot.slane %v419_v42, 1  ;;  %v502_v49 = vrot.slane %v419_v42, 2 }
  0xa6   : > { %v396_v43 = vpop.f32.mrf.mxu2 }
  0xa7   : > { %v401_v44 = vadd.f32 %v396_v43, %v357_v41 }
  0xa9   : > { %v408_v45 = vadd.f32 %v694_v27, %v401_v44 }
  0xab   : > { %v411_v46 = vmax.f32 %v408_v45, 0.0 }
  0xac   : > { %v420_v47 = vld [vmem:[#allocation2 + $0x8] sm:$0xff] }
  0xad   : > { %418 = vst.msk [vmem:[#allocation2 + $0x12] sm:$0xf] %vm417_vm5, %v411_v46  ;;  %v431_v50 = vrot.slane %v420_v47, 1  ;;  %671 = vmatmul.msk.f32.gmra.mxu0 %vm414_vm4, %v420_v47  ;;  %v503_v51 = vrot.slane %v420_v47, 2 }
  0xae   : > { %v574_v60 = vpop.f32.mrf.mxu2 }
  0xaf   : > { %v432_v52 = vsel %vm288_vm2, %v430_v48, %v431_v50  ;;  %v504_v53 = vsel %vm361_vm1, %v502_v49, %v503_v51  ;;  %v575_v4 = vadd.f32 %v696_v1, %v574_v60 }
  0xb0   : > { %667 = vmatmul.msk.f32.vlgmr.msrb.gmra.mxu3 %vm414_vm4, %v432_v52  ;;  %675 = vmatmul.msk.f32.vlgmr.msrb.gmra.mxu1 %vm414_vm4, %v504_v53 }
  0xb4   : > { %v421_v54 = vld [vmem:[#allocation2 + $0x10] sm:$0x3f] }
  0xb5   : > { %v433_v55 = vrot.slane %v421_v54, 1  ;;  %672 = vmatmul.msk.f32.gmra.mxu0 %vm414_vm4, %v421_v54  ;;  %v505_v56 = vrot.slane %v421_v54, 2 }
  0xb6   : > { %v577_v7 = vpop.f32.mrf.mxu2 }
  0xb7   : > { %v434_v57 = vsel %vm288_vm2, %v431_v50, %v433_v55  ;;  %v506_v58 = vsel %vm361_vm1, %v503_v51, %v505_v56  ;;  %v578_v15 = vadd.f32 %v696_v1, %v577_v7 }
  0xb8   : > { %668 = vmatmul.msk.f32.gmra.mxu3 %vm414_vm4, %v434_v57  ;;  %676 = vmatmul.msk.f32.gmra.mxu1 %vm414_vm4, %v506_v58 }
  0xbe   : > { %v580_v22 = vpop.f32.mrf.mxu2 }
  0xbf   : > { %v581_v26 = vadd.f32 %v696_v1, %v580_v22 }
  0xc0   : > { %669 = vmatmul.msk.f32.gmra.mxu3 %vm414_vm4, %v433_v55  ;;  %677 = vmatmul.msk.f32.gmra.mxu1 %vm414_vm4, %v505_v56 }
 0x122   : > { %v490_v59 = vpop.f32.mrf.mxu0 }
 0x12a   : > { %v493_v5 = vpop.f32.mrf.mxu0 }
 0x12d   : > { %v530_v61 = vpop.f32.mrf.mxu1 }
 0x132   : > { %v496_v17 = vpop.f32.mrf.mxu0 }
 0x133   : > { %v458_v62 = vpop.f32.mrf.mxu3 }
 0x134   : > { %v491_v63 = vadd.f32 %v490_v59, %v458_v62 }
 0x135   : > { %v533_v8 = vpop.f32.mrf.mxu1 }
 0x136   : > { %v539_v2 = vadd.f32 %v530_v61, %v491_v63 }
 0x138   : > { %v546_v3 = vadd.f32 %v695_v0, %v539_v2 }
 0x13a   : > { %v549_v6 = vmax.f32 %v546_v3, 0.0 }
 0x13b   : > { %v461_v9 = vpop.f32.mrf.mxu3 }
 0x13c   : > { %v583_v10 = vadd.f32 %v575_v4, %v549_v6  ;;  %v494_v11 = vadd.f32 %v493_v5, %v461_v9 }
 0x13d   : > { %v536_v21 = vpop.f32.mrf.mxu1 }
 0x13e   : > { %v586_v12 = vmax.f32 %v583_v10, 0.0  ;;  %v540_v13 = vadd.f32 %v533_v8, %v494_v11 }
 0x140   : > { %589 = vst.msk [vmem:[%s278_s15] sm:$0xff] %vm414_vm4, %v586_v12  ;;  %v547_v14 = vadd.f32 %v695_v0, %v540_v13 }
 0x142   : > { %v550_v16 = vmax.f32 %v547_v14, 0.0 }
 0x143   : > { %v464_v18 = vpop.f32.mrf.mxu3 }
 0x144   : > { %v584_v19 = vadd.f32 %v578_v15, %v550_v16  ;;  %v497_v20 = vadd.f32 %v496_v17, %v464_v18 }
 0x146   : > { %v587_v23 = vmax.f32 %v584_v19, 0.0  ;;  %v541_v24 = vadd.f32 %v536_v21, %v497_v20 }
 0x148   : > { %590 = vst.msk [vmem:[%s278_s15 + $0x8] sm:$0xff] %vm414_vm4, %v587_v23  ;;  %v548_v25 = vadd.f32 %v695_v0, %v541_v24 }
 0x14a   : > { %v551_v27 = vmax.f32 %v548_v25, 0.0 }
 0x14c   : > { %v585_v28 = vadd.f32 %v581_v26, %v551_v27 }
 0x14e   : > { %v588_v29 = vmax.f32 %v585_v28, 0.0 }
 0x150   : > { %591 = vst.msk [vmem:[%s278_s15 + $0x10] sm:$0xf] %vm417_vm5, %v588_v29 }
 0x151 PF: > { %s17_s24 = sadd.s32 1, %s703_s24  }
 0x152   : > { %p14_p4 = scmp.ge.s32.totalorder %s17_s24, 4  }
 0x154   :  { %16 = sbr.rel (!%p14_p4) target bundleno = 1 (0x1), region = 82 }

// kernel: cluster_net_forward.14
= control target key start
LH: loop header
LB: loop body
LE: loop exit
PB: predicated region body
PF: predicated region fallthrough
CT: control target
= control target key end

     0   :  { %s640_s18 = smov 0   ;;  %s748_s0 = inlined_call_operand.vmem [shape: f32[2,28,16], index: 0, kind: input, shape index: {}]   ;;  %s749_s1 = inlined_call_operand.vmem [shape: f32[3,16,16], index: 1, kind: input, shape index: {}]   ;;  %s750_s2 = inlined_call_operand.vmem [shape: f32[1,16], index: 2, kind: input, shape index: {}]   ;;  %s751_s3 = inlined_call_operand.vmem [shape: f32[3,16,16], index: 3, kind: input, shape index: {}]   ;;  %s752_s4 = inlined_call_operand.vmem [shape: f32[1,16], index: 4, kind: input, shape index: {}]   ;;  %s753_s5 = inlined_call_operand.vmem [shape: f32[2,20,16], index: 5, kind: output, shape index: {}]  }
   0x1 LB: > { %s548_s19 = sadd.s32 4294967295, %s607_s18   ;;  %p552_p0 = scmp.ge.s32.totalorder %s607_s18, 1  ;;  %s607_s18 = sphi %s640_s18, %s15_s18  }
   0x2   : > { %p187_p1 = scmp.lt.s32.totalorder %s607_s18, 3 }
   0x4   : > { %p188_p2 = pnand %p552_p0, %p187_p1 }
   0x5   : > { %p215_p3 = scmp.lt.s32.totalorder (!%p188_p2), %s548_s19, 1 }
   0x6   : > { %191 = sbr.rel (%p188_p2) target bundleno = 345 (0x159), region = 40 }
   0xb   : > { %v557_v0 = vld [vmem:[%s749_s1 + $0x18] sm:$0xff]  ;;  %v230_v1 = vld [vmem:[%s749_s1 + $0x8] sm:$0xff]  ;;  %v556_v2 = vld [vmem:[%s749_s1 + $0x10] sm:$0xff]  ;;  %s755_s19 = smov (!%p215_p3, %s548_s19), 1  ;;  %vm243_vm0 = vcmask 130048   ;;  %vm237_vm1 = vcmask 1043456  }
   0xc   : > { %585 = vmatpush.msra.mxu2 %v557_v0  ;;  %587 = vmatpush.msra.mxu3 %v230_v1  ;;  %v229_v3 = vld [vmem:[%s749_s1] sm:$0xff]  ;;  %v565_v4 = vld [vmem:[%s749_s1 + $0x28] sm:$0xff]  ;;  %s584_s7 = sshll.u32 %s755_s19, 5  ;;  %v609_v15 = vmov 0.0   ;;  %v570_v19 = vld [vmem:[%s751_s3 + $0x18] sm:$0xff]  ;;  %vm356_vm2 = vcmask 125952  }
   0xd   : > { %264 = vmatpush.msra.mxu0 %v557_v0  ;;  %296 = vmatpush.msra.mxu1 %v230_v1  ;;  %v564_v5 = vld [vmem:[%s749_s1 + $0x20] sm:$0xff]  ;;  %s219_s10 = scalar_lea.vmem %s748_s0, %s584_s7  ;;  %353 = vst.msk [vmem:[#allocation2] sm:$0xff] %vm243_vm0, %v609_v15  ;;  %v363_v16 = vld [vmem:[%s751_s3 + $0x8] sm:$0xff]  ;;  %v569_v22 = vld [vmem:[%s751_s3 + $0x10] sm:$0xff]  ;;  %s589_s29 = smul.u32 24, %s755_s19 }
   0xe   : > { %586 = vmatpush.msra.mxu2 %v556_v2  ;;  %588 = vmatpush.msra.mxu3 %v229_v3  ;;  %v672_v6 = vld [vmem:[%s219_s10 + $0x8] sm:$0xff]  ;;  %v674_v7 = vld [vmem:[%s219_s10 + $0x10] sm:$0xff]  ;;  %v225_v8 = vld [vmem:[%s219_s10] sm:$0xff] }
   0xf   : > { %265 = vmatpush.msra.mxu0 %v556_v2  ;;  %297 = vmatpush.msra.mxu1 %v229_v3  ;;  %v239_v9 = vrot.slane %v672_v6, 4  ;;  %v241_v10 = vrot.slane %v674_v7, 4  ;;  %v238_v11 = vrot.slane %v225_v8, 4  ;;  %v692_v14 = vld [vmem:[%s219_s10 + $0x18] sm:$0xf]  ;;  %v362_v17 = vld [vmem:[%s751_s3] sm:$0xff]  ;;  %s224_s7 = scalar_lea.vmem %s753_s5, %s589_s29 }
  0x10   : > { %328 = vmatpush.msrb.mxu2 %v565_v4  ;;  %562 = vmatmul.msk.f32.vlgmr.msra.gmra.mxu3 %vm243_vm0, %v672_v6  ;;  %v578_v20 = vld [vmem:[%s751_s3 + $0x28] sm:$0xff]  ;;  %v577_v21 = vld [vmem:[%s751_s3 + $0x20] sm:$0xff] }
  0x11   : > { %561 = vmatmul.msk.f32.vlgmr.msra.gmra.mxu1 %vm243_vm0, %v225_v8  ;;  %v242_v12 = vsel %vm237_vm1, %v239_v9, %v241_v10  ;;  %v240_v13 = vsel %vm237_vm1, %v238_v11, %v239_v9  ;;  %427 = vmatpush.msrb.mxu0 %v363_v16  ;;  %v599_v28 = vld [vmem:[%s750_s2] ss:$0 sm:$0xff] }
  0x12   : > { %329 = vmatpush.msrb.mxu2 %v564_v5  ;;  %558 = vmatmul.msk.f32.vlgmr.msra.gmra.mxu0 %vm243_vm0, %v240_v13  ;;  %v600_v57 = vld [vmem:[%s752_s4] ss:$0 sm:$0xff] }
  0x13   : > { %559 = vmatmul.msk.f32.vlgmr.msra.gmra.mxu2 %vm243_vm0, %v242_v12  ;;  %428 = vmatpush.msrb.mxu0 %v362_v17 }
  0x14   : > { %v358_v18 = vld [vmem:[#allocation2] sm:$0xff]  ;;  %395 = vmatpush.msrb.mxu3 %v570_v19  ;;  %459 = vmatpush.msrb.mxu1 %v578_v20 }
  0x15   : > { %v370_v39 = vrot.slane %v358_v18, 4 }
  0x16   : > { %460 = vmatpush.msrb.mxu1 %v577_v21  ;;  %396 = vmatpush.msrb.mxu3 %v569_v22 }
  0x18   : > { %563 = vmatmul.msk.f32.gmra.mxu3 %vm243_vm0, %v674_v7 }
  0x1a   : > { %574 = vmatmul.msk.f32.vlgmr.msrb.gmra.mxu0 %vm243_vm0, %v358_v18 }
  0x1b   : > { %560 = vmatmul.msk.f32.gmra.mxu2 %vm243_vm0, %v241_v10 }
  0x23   : > { %566 = vmatmul.msk.f32.vlgmr.msrb.gmra.mxu2 %vm243_vm0, %v672_v6 }
  0x2b   : > { %567 = vmatmul.msk.f32.gmra.mxu2 %vm243_vm0, %v674_v7 }
  0x33   : > { %568 = vmatmul.msk.f32.gmra.mxu2 %vm243_vm0, %v692_v14 }
  0x8e   : > { %v299_v26 = vpop.f32.mrf.mxu1 }
  0x8f   : > { %v267_v25 = vpop.f32.mrf.mxu0 }
  0x90   : > { %v300_v27 = vadd.f32 %v299_v26, %v267_v25 }
  0x93   : > { %v302_v31 = vpop.f32.mrf.mxu3 }
  0x96   : > { %v270_v23 = vpop.f32.mrf.mxu2 }
  0x97   : > { %v303_v34 = vadd.f32 %v302_v31, %v270_v23  ;;  %v430_v53 = vpop.f32.mrf.mxu0 }
  0x9b   : > { %v305_v38 = vpop.f32.mrf.mxu3 }
  0x9e   : > { %v273_v24 = vpop.f32.mrf.mxu2 }
  0x9f   : > { %v306_v42 = vadd.f32 %v305_v38, %v273_v24 }
  0xa6   : > { %v331_v29 = vpop.f32.mrf.mxu2 }
  0xa7   : > { %v340_v30 = vadd.f32 %v331_v29, %v300_v27 }
  0xa9   : > { %v347_v32 = vadd.f32 %v599_v28, %v340_v30 }
  0xab   : > { %v350_v33 = vmax.f32 %v347_v32, 0.0 }
  0xad   : > { %354 = vst.msk [vmem:[#allocation2 + $0x8] sm:$0xff] %vm243_vm0, %v350_v33 }
  0xae   : > { %v334_v35 = vpop.f32.mrf.mxu2 }
  0xaf   : > { %v341_v36 = vadd.f32 %v334_v35, %v303_v34 }
  0xb1   : > { %v348_v37 = vadd.f32 %v599_v28, %v341_v36 }
  0xb3   : > { %v351_v40 = vmax.f32 %v348_v37, 0.0 }
  0xb4   : > { %v359_v41 = vld [vmem:[#allocation2 + $0x8] sm:$0xff] }
  0xb5   : > { %355 = vst.msk [vmem:[#allocation2 + $0x10] sm:$0xff] %vm243_vm0, %v351_v40  ;;  %v371_v43 = vrot.slane %v359_v41, 4  ;;  %575 = vmatmul.msk.f32.gmra.mxu0 %vm243_vm0, %v359_v41  ;;  %579 = vmatmul.msk.f32.vlgmr.msrb.gmra.mxu1 %vm243_vm0, %v359_v41 }
  0xb6   : > { %v337_v44 = vpop.f32.mrf.mxu2 }
  0xb7   : > { %v342_v45 = vadd.f32 %v337_v44, %v306_v42  ;;  %v372_v46 = vsel %vm237_vm1, %v370_v39, %v371_v43 }
  0xb8   : > { %571 = vmatmul.msk.f32.vlgmr.msrb.gmra.mxu3 %vm243_vm0, %v372_v46 }
  0xb9   : > { %v349_v47 = vadd.f32 %v599_v28, %v342_v45 }
  0xbb   : > { %v352_v48 = vmax.f32 %v349_v47, 0.0 }
  0xbc   : > { %v360_v49 = vld [vmem:[#allocation2 + $0x10] sm:$0xff] }
  0xbd   : > { %357 = vst.msk [vmem:[#allocation2 + $0x18] sm:$0xf] %vm356_vm2, %v352_v48  ;;  %v373_v50 = vrot.slane %v360_v49, 4  ;;  %576 = vmatmul.msk.f32.gmra.mxu0 %vm243_vm0, %v360_v49  ;;  %580 = vmatmul.msk.f32.gmra.mxu1 %vm243_vm0, %v360_v49 }
  0xbf   : > { %v374_v51 = vsel %vm237_vm1, %v371_v43, %v373_v50 }
  0xc0   : > { %572 = vmatmul.msk.f32.gmra.mxu3 %vm243_vm0, %v374_v51 }
  0xc4   : > { %v361_v52 = vld [vmem:[#allocation2 + $0x18] sm:$0xf] }
  0xc5   : > { %581 = vmatmul.msk.f32.gmra.mxu1 %vm243_vm0, %v361_v52 }
  0xc8   : > { %573 = vmatmul.msk.f32.gmra.mxu3 %vm243_vm0, %v373_v50 }
 0x132   : > { %v462_v54 = vpop.f32.mrf.mxu1  ;;  %v433_v60 = vpop.f32.mrf.mxu0 }
 0x13a   : > { %v465_v62 = vpop.f32.mrf.mxu1  ;;  %v436_v8 = vpop.f32.mrf.mxu0 }
 0x13b   : > { %v398_v55 = vpop.f32.mrf.mxu3 }
 0x13c   : > { %v431_v56 = vadd.f32 %v430_v53, %v398_v55 }
 0x13e   : > { %v471_v58 = vadd.f32 %v462_v54, %v431_v56 }
 0x140   : > { %v478_v59 = vadd.f32 %v600_v57, %v471_v58 }
 0x142   : > { %v481_v61 = vmax.f32 %v478_v59, 0.0  ;;  %v468_v12 = vpop.f32.mrf.mxu1 }
 0x143   : > { %v401_v63 = vpop.f32.mrf.mxu3 }
 0x144   : > { %v484_v0 = vadd.f32 %v481_v61, %v672_v6  ;;  %v434_v1 = vadd.f32 %v433_v60, %v401_v63 }
 0x146   : > { %v487_v2 = vmax.f32 %v484_v0, 0.0  ;;  %v472_v3 = vadd.f32 %v465_v62, %v434_v1 }
 0x148   : > { %490 = vst.msk [vmem:[%s224_s7] sm:$0xff] %vm243_vm0, %v487_v2  ;;  %v479_v4 = vadd.f32 %v600_v57, %v472_v3 }
 0x14a   : > { %v482_v5 = vmax.f32 %v479_v4, 0.0 }
 0x14b   : > { %v404_v9 = vpop.f32.mrf.mxu3 }
 0x14c   : > { %v485_v10 = vadd.f32 %v482_v5, %v674_v7  ;;  %v437_v11 = vadd.f32 %v436_v8, %v404_v9 }
 0x14e   : > { %v488_v13 = vmax.f32 %v485_v10, 0.0  ;;  %v473_v15 = vadd.f32 %v468_v12, %v437_v11 }
 0x150   : > { %491 = vst.msk [vmem:[%s224_s7 + $0x8] sm:$0xff] %vm243_vm0, %v488_v13  ;;  %v480_v6 = vadd.f32 %v600_v57, %v473_v15 }
 0x152   : > { %v483_v16 = vmax.f32 %v480_v6, 0.0 }
 0x154   : > { %v486_v17 = vadd.f32 %v483_v16, %v692_v14 }
 0x156   : > { %v489_v18 = vmax.f32 %v486_v17, 0.0 }
 0x158   : > { %492 = vst.msk [vmem:[%s224_s7 + $0x10] sm:$0xf] %vm356_vm2, %v489_v18 }
 0x159 PF: > { %s15_s18 = sadd.s32 1, %s607_s18  }
 0x15a   : > { %p12_p4 = scmp.ge.s32.totalorder %s15_s18, 4  }
 0x15c   :  { %14 = sbr.rel (!%p12_p4) target bundleno = 1 (0x1), region = 74 }

// kernel: cluster_net_forward.13
= control target key start
LH: loop header
LB: loop body
LE: loop exit
PB: predicated region body
PF: predicated region fallthrough
CT: control target
= control target key end

     0   :  { %s656_s18 = smov 0   ;;  %s768_s0 = inlined_call_operand.vmem [shape: f32[2,24,16], index: 0, kind: input, shape index: {}]   ;;  %s769_s1 = inlined_call_operand.vmem [shape: f32[3,16,16], index: 1, kind: input, shape index: {}]   ;;  %s770_s2 = inlined_call_operand.vmem [shape: f32[1,16], index: 2, kind: input, shape index: {}]   ;;  %s771_s3 = inlined_call_operand.vmem [shape: f32[3,16,16], index: 3, kind: input, shape index: {}]   ;;  %s772_s4 = inlined_call_operand.vmem [shape: f32[1,16], index: 4, kind: input, shape index: {}]   ;;  %s773_s5 = inlined_call_operand.vmem [shape: f32[2,20,16], index: 5, kind: output, shape index: {}]  }
   0x1 LB: > { %s566_s19 = sadd.s32 4294967295, %s623_s18   ;;  %p570_p0 = scmp.ge.s32.totalorder %s623_s18, 1  ;;  %s623_s18 = sphi %s656_s18, %s15_s18  }
   0x2   : > { %p187_p1 = scmp.lt.s32.totalorder %s623_s18, 3 }
   0x4   : > { %p188_p2 = pnand %p570_p0, %p187_p1 }
   0x5   : > { %p215_p3 = scmp.lt.s32.totalorder (!%p188_p2), %s566_s19, 1 }
   0x6   : > { %191 = sbr.rel (%p188_p2) target bundleno = 353 (0x161), region = 40 }
   0xb   : > { %v574_v0 = vld [vmem:[%s769_s1 + $0x18] sm:$0xff]  ;;  %v229_v1 = vld [vmem:[%s769_s1 + $0x8] sm:$0xff]  ;;  %v573_v2 = vld [vmem:[%s769_s1 + $0x10] sm:$0xff]  ;;  %s775_s19 = smov (!%p215_p3, %s566_s19), 1  ;;  %vm242_vm0 = vcmask 130048   ;;  %vm236_vm1 = vcmask 1045504  }
   0xc   : > { %601 = vmatpush.msra.mxu2 %v574_v0  ;;  %603 = vmatpush.msra.mxu3 %v229_v1  ;;  %v228_v3 = vld [vmem:[%s769_s1] sm:$0xff]  ;;  %v582_v4 = vld [vmem:[%s769_s1 + $0x28] sm:$0xff]  ;;  %s605_s7 = smul.u32 24, %s775_s19  ;;  %vm310_vm2 = vcmask 1043456   ;;  %vm361_vm3 = vcmask 125952   ;;  %v625_v19 = vmov 0.0  }
   0xd   : > { %263 = vmatpush.msra.mxu0 %v574_v0  ;;  %295 = vmatpush.msra.mxu1 %v229_v1  ;;  %v581_v5 = vld [vmem:[%s769_s1 + $0x20] sm:$0xff]  ;;  %362 = vst.msk [vmem:[#allocation2] sm:$0xf] %vm361_vm3, %v625_v19  ;;  %v370_v20 = vld [vmem:[%s771_s3 + $0x8] sm:$0xff]  ;;  %v587_v22 = vld [vmem:[%s771_s3 + $0x18] sm:$0xff] }
   0xe   : > { %602 = vmatpush.msra.mxu2 %v573_v2  ;;  %604 = vmatpush.msra.mxu3 %v228_v3  ;;  %s219_s10 = scalar_lea.vmem %s768_s0, %s605_s7  ;;  %v369_v21 = vld [vmem:[%s771_s3] sm:$0xff]  ;;  %v595_v24 = vld [vmem:[%s771_s3 + $0x28] sm:$0xff]  ;;  %v586_v25 = vld [vmem:[%s771_s3 + $0x10] sm:$0xff]  ;;  %s224_s6 = scalar_lea.vmem %s773_s5, %s605_s7 }
   0xf   : > { %264 = vmatpush.msra.mxu0 %v573_v2  ;;  %296 = vmatpush.msra.mxu1 %v228_v3  ;;  %v226_v6 = vld [vmem:[%s219_s10 + $0x8] sm:$0xff]  ;;  %v227_v7 = vld [vmem:[%s219_s10 + $0x10] sm:$0xff]  ;;  %v225_v8 = vld [vmem:[%s219_s10] sm:$0xff] }
  0x10   : > { %336 = vmatpush.msrb.mxu2 %v582_v4  ;;  %v238_v9 = vrot.slane %v226_v6, 2  ;;  %v240_v10 = vrot.slane %v227_v7, 2  ;;  %579 = vmatmul.msk.f32.vlgmr.msra.gmra.mxu3 %vm242_vm0, %v226_v6  ;;  %v237_v11 = vrot.slane %v225_v8, 2  ;;  %v311_v14 = vrot.slane %v225_v8, 4  ;;  %v594_v26 = vld [vmem:[%s771_s3 + $0x20] sm:$0xff] }
  0x11   : > { %578 = vmatmul.msk.f32.vlgmr.msra.gmra.mxu1 %vm242_vm0, %v225_v8  ;;  %v312_v15 = vrot.slane %v226_v6, 4  ;;  %v703_v17 = vrot.slane %v227_v7, 4  ;;  %434 = vmatpush.msrb.mxu0 %v370_v20  ;;  %v615_v31 = vld [vmem:[%s770_s2] ss:$0 sm:$0xff] }
  0x12   : > { %337 = vmatpush.msrb.mxu2 %v581_v5  ;;  %v241_v12 = vsel %vm236_vm1, %v238_v9, %v240_v10  ;;  %v239_v13 = vsel %vm236_vm1, %v237_v11, %v238_v9  ;;  %402 = vmatpush.msrb.mxu3 %v587_v22  ;;  %v616_v1 = vld [vmem:[%s772_s4] ss:$0 sm:$0xff] }
  0x13   : > { %576 = vmatmul.msk.f32.vlgmr.msra.gmra.mxu2 %vm242_vm0, %v241_v12  ;;  %575 = vmatmul.msk.f32.vlgmr.msra.gmra.mxu0 %vm242_vm0, %v239_v13  ;;  %v699_v16 = vsel %vm310_vm2, %v311_v14, %v312_v15  ;;  %v707_v18 = vsel %vm310_vm2, %v312_v15, %v703_v17 }
  0x14   : > { %435 = vmatpush.msrb.mxu0 %v369_v21  ;;  %474 = vmatpush.msrb.mxu1 %v595_v24 }
  0x15   : > { %403 = vmatpush.msrb.mxu3 %v586_v25 }
  0x16   : > { %475 = vmatpush.msrb.mxu1 %v594_v26 }
  0x18   : > { %580 = vmatmul.msk.f32.gmra.mxu3 %vm242_vm0, %v227_v7 }
  0x1b   : > { %577 = vmatmul.msk.f32.gmra.mxu2 %vm242_vm0, %v240_v10 }
  0x23   : > { %583 = vmatmul.msk.f32.vlgmr.msrb.gmra.mxu2 %vm242_vm0, %v699_v16 }
  0x2b   : > { %584 = vmatmul.msk.f32.gmra.mxu2 %vm242_vm0, %v707_v18 }
  0x33   : > { %585 = vmatmul.msk.f32.gmra.mxu2 %vm242_vm0, %v703_v17 }
  0x8e   : > { %v298_v29 = vpop.f32.mrf.mxu1 }
  0x90   : > { %v266_v28 = vpop.f32.mrf.mxu0 }
  0x91   : > { %v299_v30 = vadd.f32 %v298_v29, %v266_v28 }
  0x93   : > { %v301_v34 = vpop.f32.mrf.mxu3 }
  0x96   : > { %v269_v23 = vpop.f32.mrf.mxu2 }
  0x97   : > { %v302_v37 = vadd.f32 %v301_v34, %v269_v23 }
  0x9b   : > { %v304_v41 = vpop.f32.mrf.mxu3 }
  0x9e   : > { %v272_v27 = vpop.f32.mrf.mxu2 }
  0x9f   : > { %v305_v44 = vadd.f32 %v304_v41, %v272_v27 }
  0xa6   : > { %v339_v32 = vpop.f32.mrf.mxu2 }
  0xa7   : > { %v348_v33 = vadd.f32 %v339_v32, %v299_v30 }
  0xa9   : > { %v355_v35 = vadd.f32 %v615_v31, %v348_v33 }
  0xab   : > { %v358_v36 = vmax.f32 %v355_v35, 0.0 }
  0xad   : > { %363 = vst.msk [vmem:[#allocation2 + $0x4] sm:$0xff] %vm242_vm0, %v358_v36 }
  0xae   : > { %v342_v38 = vpop.f32.mrf.mxu2 }
  0xaf   : > { %v349_v39 = vadd.f32 %v342_v38, %v302_v37 }
  0xb1   : > { %v356_v40 = vadd.f32 %v615_v31, %v349_v39 }
  0xb3   : > { %v359_v42 = vmax.f32 %v356_v40, 0.0 }
  0xb4   : > { %v366_v43 = vld [vmem:[#allocation2] sm:$0xff] }
  0xb5   : > { %364 = vst.msk [vmem:[#allocation2 + $0xc] sm:$0xff] %vm242_vm0, %v359_v42  ;;  %591 = vmatmul.msk.f32.vlgmr.msrb.gmra.mxu0 %vm242_vm0, %v366_v43  ;;  %v377_v50 = vrot.slane %v366_v43, 2  ;;  %v449_v51 = vrot.slane %v366_v43, 4 }
  0xb6   : > { %v345_v45 = vpop.f32.mrf.mxu2 }
  0xb7   : > { %v350_v46 = vadd.f32 %v345_v45, %v305_v44 }
  0xb9   : > { %v357_v47 = vadd.f32 %v615_v31, %v350_v46 }
  0xbb   : > { %v360_v48 = vmax.f32 %v357_v47, 0.0 }
  0xbc   : > { %v367_v49 = vld [vmem:[#allocation2 + $0x8] sm:$0xff] }
  0xbd   : > { %365 = vst.msk [vmem:[#allocation2 + $0x14] sm:$0xf] %vm361_vm3, %v360_v48  ;;  %v378_v52 = vrot.slane %v367_v49, 2  ;;  %592 = vmatmul.msk.f32.gmra.mxu0 %vm242_vm0, %v367_v49  ;;  %v450_v53 = vrot.slane %v367_v49, 4 }
  0xbf   : > { %v379_v54 = vsel %vm236_vm1, %v377_v50, %v378_v52  ;;  %v451_v55 = vsel %vm310_vm2, %v449_v51, %v450_v53 }
  0xc0   : > { %588 = vmatmul.msk.f32.vlgmr.msrb.gmra.mxu3 %vm242_vm0, %v379_v54  ;;  %596 = vmatmul.msk.f32.vlgmr.msrb.gmra.mxu1 %vm242_vm0, %v451_v55 }
  0xc4   : > { %v368_v56 = vld [vmem:[#allocation2 + $0x10] sm:$0xff] }
  0xc5   : > { %v380_v57 = vrot.slane %v368_v56, 2  ;;  %593 = vmatmul.msk.f32.gmra.mxu0 %vm242_vm0, %v368_v56  ;;  %v452_v58 = vrot.slane %v368_v56, 4 }
  0xc7   : > { %v381_v59 = vsel %vm236_vm1, %v378_v52, %v380_v57  ;;  %v453_v60 = vsel %vm310_vm2, %v450_v53, %v452_v58 }
  0xc8   : > { %589 = vmatmul.msk.f32.gmra.mxu3 %vm242_vm0, %v381_v59  ;;  %597 = vmatmul.msk.f32.gmra.mxu1 %vm242_vm0, %v453_v60 }
  0xd0   : > { %590 = vmatmul.msk.f32.gmra.mxu3 %vm242_vm0, %v380_v57  ;;  %598 = vmatmul.msk.f32.gmra.mxu1 %vm242_vm0, %v452_v58 }
 0x132   : > { %v437_v61 = vpop.f32.mrf.mxu0 }
 0x13a   : > { %v440_v4 = vpop.f32.mrf.mxu0 }
 0x13d   : > { %v477_v62 = vpop.f32.mrf.mxu1 }
 0x142   : > { %v443_v14 = vpop.f32.mrf.mxu0 }
 0x143   : > { %v405_v63 = vpop.f32.mrf.mxu3 }
 0x144   : > { %v438_v0 = vadd.f32 %v437_v61, %v405_v63 }
 0x145   : > { %v480_v6 = vpop.f32.mrf.mxu1 }
 0x146   : > { %v486_v2 = vadd.f32 %v477_v62, %v438_v0 }
 0x148   : > { %v493_v3 = vadd.f32 %v616_v1, %v486_v2 }
 0x14a   : > { %v496_v5 = vmax.f32 %v493_v3, 0.0 }
 0x14b   : > { %v408_v7 = vpop.f32.mrf.mxu3 }
 0x14c   : > { %v502_v8 = vadd.f32 %v496_v5, %v699_v16  ;;  %v441_v9 = vadd.f32 %v440_v4, %v408_v7 }
 0x14d   : > { %v483_v21 = vpop.f32.mrf.mxu1 }
 0x14e   : > { %v505_v10 = vmax.f32 %v502_v8, 0.0  ;;  %v487_v11 = vadd.f32 %v480_v6, %v441_v9 }
 0x150   : > { %508 = vst.msk [vmem:[%s224_s6] sm:$0xff] %vm242_vm0, %v505_v10  ;;  %v494_v12 = vadd.f32 %v616_v1, %v487_v11 }
 0x152   : > { %v497_v13 = vmax.f32 %v494_v12, 0.0 }
 0x153   : > { %v411_v15 = vpop.f32.mrf.mxu3 }
 0x154   : > { %v503_v19 = vadd.f32 %v497_v13, %v707_v18  ;;  %v444_v20 = vadd.f32 %v443_v14, %v411_v15 }
 0x156   : > { %v506_v22 = vmax.f32 %v503_v19, 0.0  ;;  %v488_v16 = vadd.f32 %v483_v21, %v444_v20 }
 0x158   : > { %509 = vst.msk [vmem:[%s224_s6 + $0x8] sm:$0xff] %vm242_vm0, %v506_v22  ;;  %v495_v23 = vadd.f32 %v616_v1, %v488_v16 }
 0x15a   : > { %v498_v24 = vmax.f32 %v495_v23, 0.0 }
 0x15c   : > { %v504_v25 = vadd.f32 %v498_v24, %v703_v17 }
 0x15e   : > { %v507_v26 = vmax.f32 %v504_v25, 0.0 }
 0x160   : > { %510 = vst.msk [vmem:[%s224_s6 + $0x10] sm:$0xf] %vm361_vm3, %v507_v26 }
 0x161 PF: > { %s15_s18 = sadd.s32 1, %s623_s18  }
 0x162   : > { %p12_p4 = scmp.ge.s32.totalorder %s15_s18, 4  }
 0x164   :  { %14 = sbr.rel (!%p12_p4) target bundleno = 1 (0x1), region = 74 }

// kernel: cluster_net_forward.15
= control target key start
LH: loop header
LB: loop body
LE: loop exit
PB: predicated region body
PF: predicated region fallthrough
CT: control target
= control target key end

     0   :  { %s625_s18 = smov 0   ;;  %s729_s0 = inlined_call_operand.vmem [shape: f32[2,36,16], index: 0, kind: input, shape index: {}]   ;;  %s730_s1 = inlined_call_operand.vmem [shape: f32[3,16,16], index: 1, kind: input, shape index: {}]   ;;  %s731_s2 = inlined_call_operand.vmem [shape: f32[1,16], index: 2, kind: input, shape index: {}]   ;;  %s732_s3 = inlined_call_operand.vmem [shape: f32[3,16,16], index: 3, kind: input, shape index: {}]   ;;  %s733_s4 = inlined_call_operand.vmem [shape: f32[1,16], index: 4, kind: input, shape index: {}]   ;;  %s734_s5 = inlined_call_operand.vmem [shape: f32[2,20,16], index: 5, kind: output, shape index: {}]  }
   0x1 LB: > { %s534_s19 = sadd.s32 4294967295, %s592_s18   ;;  %p538_p0 = scmp.ge.s32.totalorder %s592_s18, 1  ;;  %s592_s18 = sphi %s625_s18, %s15_s18  }
   0x2   : > { %p187_p1 = scmp.lt.s32.totalorder %s592_s18, 3 }
   0x4   : > { %p188_p2 = pnand %p538_p0, %p187_p1 }
   0x5   : > { %p215_p3 = scmp.lt.s32.totalorder (!%p188_p2), %s534_s19, 1 }
   0x6   : > { %191 = sbr.rel (%p188_p2) target bundleno = 333 (0x14d), region = 40 }
   0xb   : > { %v542_v0 = vld [vmem:[%s730_s1 + $0x18] sm:$0xff]  ;;  %v231_v1 = vld [vmem:[%s730_s1 + $0x8] sm:$0xff]  ;;  %v541_v2 = vld [vmem:[%s730_s1 + $0x10] sm:$0xff]  ;;  %s736_s19 = smov (!%p215_p3, %s534_s19), 1  ;;  %vm235_vm0 = vcmask 130048   ;;  %v594_v12 = vmov 0.0  }
   0xc   : > { %569 = vmatpush.msra.mxu2 %v542_v0  ;;  %571 = vmatpush.msra.mxu3 %v231_v1  ;;  %v230_v3 = vld [vmem:[%s730_s1] sm:$0xff]  ;;  %v550_v4 = vld [vmem:[%s730_s1 + $0x28] sm:$0xff]  ;;  %s573_s7 = smul.u32 40, %s736_s19  ;;  %v555_v11 = vld [vmem:[%s732_s3 + $0x18] sm:$0xff]  ;;  %345 = vst.msk [vmem:[#allocation2] sm:$0xff] %vm235_vm0, %v594_v12  ;;  %vm349_vm1 = vcmask 125952  }
   0xd   : > { %259 = vmatpush.msra.mxu0 %v542_v0  ;;  %288 = vmatpush.msra.mxu1 %v231_v1  ;;  %v549_v5 = vld [vmem:[%s730_s1 + $0x20] sm:$0xff]  ;;  %346 = vst.msk [vmem:[#allocation2 + $0x8] sm:$0xff] %vm235_vm0, %v594_v12  ;;  %v357_v13 = vld [vmem:[%s732_s3 + $0x8] sm:$0xff]  ;;  %v554_v15 = vld [vmem:[%s732_s3 + $0x10] sm:$0xff]  ;;  %s574_s29 = smul.u32 24, %s736_s19 }
   0xe   : > { %570 = vmatpush.msra.mxu2 %v541_v2  ;;  %572 = vmatpush.msra.mxu3 %v230_v3  ;;  %s219_s10 = scalar_lea.vmem %s729_s0, %s573_s7  ;;  %v356_v14 = vld [vmem:[%s732_s3] sm:$0xff]  ;;  %v563_v18 = vld [vmem:[%s732_s3 + $0x28] sm:$0xff] }
   0xf   : > { %260 = vmatpush.msra.mxu0 %v541_v2  ;;  %289 = vmatpush.msra.mxu1 %v230_v3  ;;  %v657_v6 = vld [vmem:[%s219_s10 + $0x10] sm:$0xff]  ;;  %v226_v7 = vld [vmem:[%s219_s10 + $0x8] sm:$0xff]  ;;  %v225_v8 = vld [vmem:[%s219_s10] sm:$0xff]  ;;  %s224_s7 = scalar_lea.vmem %s734_s5, %s574_s29 }
  0x10   : > { %320 = vmatpush.msrb.mxu2 %v550_v4  ;;  %547 = vmatmul.msk.f32.vlgmr.msra.gmra.mxu3 %vm235_vm0, %v226_v7  ;;  %v664_v9 = vld [vmem:[%s219_s10 + $0x18] sm:$0xff]  ;;  %v674_v10 = vld [vmem:[%s219_s10 + $0x20] sm:$0xf] }
  0x11   : > { %544 = vmatmul.msk.f32.vlgmr.msra.gmra.mxu2 %vm235_vm0, %v657_v6  ;;  %543 = vmatmul.msk.f32.vlgmr.msra.gmra.mxu0 %vm235_vm0, %v226_v7  ;;  %v562_v19 = vld [vmem:[%s732_s3 + $0x20] sm:$0xff] }
  0x12   : > { %321 = vmatpush.msrb.mxu2 %v549_v5  ;;  %546 = vmatmul.msk.f32.vlgmr.msra.gmra.mxu1 %vm235_vm0, %v225_v8  ;;  %v584_v25 = vld [vmem:[%s731_s2] ss:$0 sm:$0xff] }
  0x13   : > { %384 = vmatpush.msrb.mxu3 %v555_v11  ;;  %413 = vmatpush.msrb.mxu0 %v357_v13  ;;  %v351_v16 = vld [vmem:[#allocation2] sm:$0xff] }
  0x14   : > { %v352_v17 = vld [vmem:[#allocation2 + $0x8] sm:$0xff]  ;;  %445 = vmatpush.msrb.mxu1 %v563_v18  ;;  %v585_v48 = vld [vmem:[%s733_s4] ss:$0 sm:$0xff] }
  0x15   : > { %385 = vmatpush.msrb.mxu3 %v554_v15  ;;  %414 = vmatpush.msrb.mxu0 %v356_v14 }
  0x16   : > { %446 = vmatpush.msrb.mxu1 %v562_v19 }
  0x18   : > { %548 = vmatmul.msk.f32.gmra.mxu3 %vm235_vm0, %v657_v6 }
  0x19   : > { %545 = vmatmul.msk.f32.gmra.mxu2 %vm235_vm0, %v664_v9  ;;  %559 = vmatmul.msk.f32.vlgmr.msrb.gmra.mxu0 %vm235_vm0, %v351_v16 }
  0x20   : > { %556 = vmatmul.msk.f32.vlgmr.msrb.gmra.mxu3 %vm235_vm0, %v352_v17 }
  0x21   : > { %551 = vmatmul.msk.f32.vlgmr.msrb.gmra.mxu2 %vm235_vm0, %v657_v6  ;;  %560 = vmatmul.msk.f32.gmra.mxu0 %vm235_vm0, %v352_v17 }
  0x29   : > { %552 = vmatmul.msk.f32.gmra.mxu2 %vm235_vm0, %v664_v9 }
  0x31   : > { %553 = vmatmul.msk.f32.gmra.mxu2 %vm235_vm0, %v674_v10 }
  0x8e   : > { %v262_v22 = vpop.f32.mrf.mxu0 }
  0x8f   : > { %v291_v23 = vpop.f32.mrf.mxu1 }
  0x90   : > { %v292_v24 = vadd.f32 %v291_v23, %v262_v22 }
  0x93   : > { %v294_v28 = vpop.f32.mrf.mxu3 }
  0x94   : > { %v265_v20 = vpop.f32.mrf.mxu2 }
  0x95   : > { %v295_v31 = vadd.f32 %v294_v28, %v265_v20 }
  0x96   : > { %v416_v45 = vpop.f32.mrf.mxu0 }
  0x9b   : > { %v297_v35 = vpop.f32.mrf.mxu3 }
  0x9c   : > { %v268_v21 = vpop.f32.mrf.mxu2 }
  0x9d   : > { %v298_v38 = vadd.f32 %v297_v35, %v268_v21 }
  0x9e   : > { %v419_v51 = vpop.f32.mrf.mxu0 }
  0xa3   : > { %v387_v46 = vpop.f32.mrf.mxu3 }
  0xa4   : > { %v323_v26 = vpop.f32.mrf.mxu2  ;;  %v417_v47 = vadd.f32 %v416_v45, %v387_v46 }
  0xa5   : > { %v332_v27 = vadd.f32 %v323_v26, %v292_v24 }
  0xa7   : > { %v339_v29 = vadd.f32 %v584_v25, %v332_v27 }
  0xa9   : > { %v342_v30 = vmax.f32 %v339_v29, 0.0 }
  0xab   : > { %347 = vst.msk [vmem:[#allocation2 + $0x10] sm:$0xff] %vm235_vm0, %v342_v30 }
  0xac   : > { %v326_v32 = vpop.f32.mrf.mxu2 }
  0xad   : > { %v333_v33 = vadd.f32 %v326_v32, %v295_v31 }
  0xaf   : > { %v340_v34 = vadd.f32 %v584_v25, %v333_v33 }
  0xb1   : > { %v343_v36 = vmax.f32 %v340_v34, 0.0 }
  0xb2   : > { %v353_v37 = vld [vmem:[#allocation2 + $0x10] sm:$0xff] }
  0xb3   : > { %348 = vst.msk [vmem:[#allocation2 + $0x18] sm:$0xff] %vm235_vm0, %v343_v36  ;;  %557 = vmatmul.msk.f32.gmra.mxu3 %vm235_vm0, %v353_v37  ;;  %561 = vmatmul.msk.f32.gmra.mxu0 %vm235_vm0, %v353_v37 }
  0xb4   : > { %564 = vmatmul.msk.f32.vlgmr.msrb.gmra.mxu1 %vm235_vm0, %v353_v37  ;;  %v329_v39 = vpop.f32.mrf.mxu2 }
  0xb5   : > { %v334_v40 = vadd.f32 %v329_v39, %v298_v38 }
  0xb7   : > { %v341_v41 = vadd.f32 %v584_v25, %v334_v40 }
  0xb9   : > { %v344_v42 = vmax.f32 %v341_v41, 0.0 }
  0xba   : > { %v354_v43 = vld [vmem:[#allocation2 + $0x18] sm:$0xff] }
  0xbb   : > { %350 = vst.msk [vmem:[#allocation2 + $0x20] sm:$0xf] %vm349_vm1, %v344_v42  ;;  %558 = vmatmul.msk.f32.gmra.mxu3 %vm235_vm0, %v354_v43 }
  0xbc   : > { %565 = vmatmul.msk.f32.gmra.mxu1 %vm235_vm0, %v354_v43 }
  0xc2   : > { %v355_v44 = vld [vmem:[#allocation2 + $0x20] sm:$0xf] }
  0xc4   : > { %566 = vmatmul.msk.f32.gmra.mxu1 %vm235_vm0, %v355_v44 }
 0x130   : > { %v422_v61 = vpop.f32.mrf.mxu0 }
 0x131   : > { %v448_v49 = vpop.f32.mrf.mxu1 }
 0x132   : > { %v457_v50 = vadd.f32 %v448_v49, %v417_v47 }
 0x134   : > { %v464_v52 = vadd.f32 %v585_v48, %v457_v50 }
 0x136   : > { %v467_v53 = vmax.f32 %v464_v52, 0.0  ;;  %v390_v54 = vpop.f32.mrf.mxu3 }
 0x137   : > { %v420_v55 = vadd.f32 %v419_v51, %v390_v54 }
 0x138   : > { %v470_v56 = vadd.f32 %v467_v53, %v657_v6 }
 0x139   : > { %v451_v57 = vpop.f32.mrf.mxu1 }
 0x13a   : > { %v473_v58 = vmax.f32 %v470_v56, 0.0  ;;  %v458_v59 = vadd.f32 %v451_v57, %v420_v55 }
 0x13c   : > { %476 = vst.msk [vmem:[%s224_s7] sm:$0xff] %vm235_vm0, %v473_v58  ;;  %v465_v60 = vadd.f32 %v585_v48, %v458_v59 }
 0x13e   : > { %v468_v62 = vmax.f32 %v465_v60, 0.0  ;;  %v393_v63 = vpop.f32.mrf.mxu3 }
 0x13f   : > { %v423_v0 = vadd.f32 %v422_v61, %v393_v63 }
 0x140   : > { %v471_v1 = vadd.f32 %v468_v62, %v664_v9 }
 0x141   : > { %v454_v2 = vpop.f32.mrf.mxu1 }
 0x142   : > { %v474_v3 = vmax.f32 %v471_v1, 0.0  ;;  %v459_v4 = vadd.f32 %v454_v2, %v423_v0 }
 0x144   : > { %477 = vst.msk [vmem:[%s224_s7 + $0x8] sm:$0xff] %vm235_vm0, %v474_v3  ;;  %v466_v5 = vadd.f32 %v585_v48, %v459_v4 }
 0x146   : > { %v469_v6 = vmax.f32 %v466_v5, 0.0 }
 0x148   : > { %v472_v7 = vadd.f32 %v469_v6, %v674_v10 }
 0x14a   : > { %v475_v8 = vmax.f32 %v472_v7, 0.0 }
 0x14c   : > { %478 = vst.msk [vmem:[%s224_s7 + $0x10] sm:$0xf] %vm349_vm1, %v475_v8 }
 0x14d PF: > { %s15_s18 = sadd.s32 1, %s592_s18  }
 0x14e   : > { %p12_p4 = scmp.ge.s32.totalorder %s15_s18, 4  }
 0x150   :  { %14 = sbr.rel (!%p12_p4) target bundleno = 1 (0x1), region = 74 }

// kernel: cluster_net_forward.16
= control target key start
LH: loop header
LB: loop body
LE: loop exit
PB: predicated region body
PF: predicated region fallthrough
CT: control target
= control target key end

     0   :  { %s643_s18 = smov 0   ;;  %s747_s0 = inlined_call_operand.vmem [shape: f32[2,52,16], index: 0, kind: input, shape index: {}]   ;;  %s748_s1 = inlined_call_operand.vmem [shape: f32[3,16,16], index: 1, kind: input, shape index: {}]   ;;  %s749_s2 = inlined_call_operand.vmem [shape: f32[1,16], index: 2, kind: input, shape index: {}]   ;;  %s750_s3 = inlined_call_operand.vmem [shape: f32[3,16,16], index: 3, kind: input, shape index: {}]   ;;  %s751_s4 = inlined_call_operand.vmem [shape: f32[1,16], index: 4, kind: input, shape index: {}]   ;;  %s752_s5 = inlined_call_operand.vmem [shape: f32[2,20,16], index: 5, kind: output, shape index: {}]  }
   0x1 LB: > { %s552_s19 = sadd.s32 4294967295, %s610_s18   ;;  %p556_p0 = scmp.ge.s32.totalorder %s610_s18, 1  ;;  %s610_s18 = sphi %s643_s18, %s15_s18  }
   0x2   : > { %p187_p1 = scmp.lt.s32.totalorder %s610_s18, 3 }
   0x4   : > { %p188_p2 = pnand %p556_p0, %p187_p1 }
   0x5   : > { %p215_p3 = scmp.lt.s32.totalorder (!%p188_p2), %s552_s19, 1 }
   0x6   : > { %191 = sbr.rel (%p188_p2) target bundleno = 332 (0x14c), region = 40 }
   0xb   : > { %v560_v0 = vld [vmem:[%s748_s1 + $0x18] sm:$0xff]  ;;  %v233_v1 = vld [vmem:[%s748_s1 + $0x8] sm:$0xff]  ;;  %v559_v2 = vld [vmem:[%s748_s1 + $0x10] sm:$0xff]  ;;  %s754_s19 = smov (!%p215_p3, %s552_s19), 1  ;;  %vm237_vm0 = vcmask 130048   ;;  %v612_v14 = vmov 0.0  }
   0xc   : > { %587 = vmatpush.msra.mxu2 %v560_v0  ;;  %589 = vmatpush.msra.mxu3 %v233_v1  ;;  %v232_v3 = vld [vmem:[%s748_s1] sm:$0xff]  ;;  %v568_v4 = vld [vmem:[%s748_s1 + $0x28] sm:$0xff]  ;;  %s591_s7 = smul.u32 56, %s754_s19  ;;  %v573_v13 = vld [vmem:[%s750_s3 + $0x18] sm:$0xff]  ;;  %355 = vst.msk [vmem:[#allocation2 + $0x10] sm:$0xff] %vm237_vm0, %v612_v14  ;;  %vm359_vm1 = vcmask 125952  }
   0xd   : > { %261 = vmatpush.msra.mxu0 %v560_v0  ;;  %293 = vmatpush.msra.mxu1 %v233_v1  ;;  %v567_v5 = vld [vmem:[%s748_s1 + $0x20] sm:$0xff]  ;;  %353 = vst.msk [vmem:[#allocation2] sm:$0xff] %vm237_vm0, %v612_v14  ;;  %v572_v15 = vld [vmem:[%s750_s3 + $0x10] sm:$0xff]  ;;  %v369_v17 = vld [vmem:[%s750_s3 + $0x8] sm:$0xff]  ;;  %s592_s29 = smul.u32 24, %s754_s19 }
   0xe   : > { %588 = vmatpush.msra.mxu2 %v559_v2  ;;  %590 = vmatpush.msra.mxu3 %v232_v3  ;;  %s219_s10 = scalar_lea.vmem %s747_s0, %s591_s7  ;;  %354 = vst.msk [vmem:[#allocation2 + $0x8] sm:$0xff] %vm237_vm0, %v612_v14  ;;  %v368_v18 = vld [vmem:[%s750_s3] sm:$0xff]  ;;  %v581_v21 = vld [vmem:[%s750_s3 + $0x28] sm:$0xff] }
   0xf   : > { %262 = vmatpush.msra.mxu0 %v559_v2  ;;  %294 = vmatpush.msra.mxu1 %v232_v3  ;;  %v228_v6 = vld [vmem:[%s219_s10 + $0x18] sm:$0xff]  ;;  %v226_v7 = vld [vmem:[%s219_s10 + $0x8] sm:$0xff]  ;;  %v227_v8 = vld [vmem:[%s219_s10 + $0x10] sm:$0xff]  ;;  %356 = vst.msk [vmem:[#allocation2 + $0x18] sm:$0xff] %vm237_vm0, %v612_v14  ;;  %s224_s7 = scalar_lea.vmem %s752_s5, %s592_s29 }
  0x10   : > { %328 = vmatpush.msrb.mxu2 %v568_v4  ;;  %565 = vmatmul.msk.f32.vlgmr.msra.gmra.mxu3 %vm237_vm0, %v226_v7  ;;  %v225_v9 = vld [vmem:[%s219_s10] sm:$0xff]  ;;  %v686_v11 = vld [vmem:[%s219_s10 + $0x28] sm:$0xff]  ;;  %v690_v12 = vld [vmem:[%s219_s10 + $0x30] sm:$0xf] }
  0x11   : > { %562 = vmatmul.msk.f32.vlgmr.msra.gmra.mxu2 %vm237_vm0, %v228_v6  ;;  %561 = vmatmul.msk.f32.vlgmr.msra.gmra.mxu0 %vm237_vm0, %v227_v8  ;;  %v679_v10 = vld [vmem:[%s219_s10 + $0x20] sm:$0xff] }
  0x12   : > { %329 = vmatpush.msrb.mxu2 %v567_v5  ;;  %564 = vmatmul.msk.f32.vlgmr.msra.gmra.mxu1 %vm237_vm0, %v225_v9  ;;  %v580_v23 = vld [vmem:[%s750_s3 + $0x20] sm:$0xff] }
  0x13   : > { %396 = vmatpush.msrb.mxu3 %v573_v13  ;;  %v363_v16 = vld [vmem:[#allocation2 + $0x10] sm:$0xff]  ;;  %428 = vmatpush.msrb.mxu0 %v369_v17  ;;  %v602_v29 = vld [vmem:[%s749_s2] ss:$0 sm:$0xff] }
  0x14   : > { %v361_v19 = vld [vmem:[#allocation2] sm:$0xff]  ;;  %463 = vmatpush.msrb.mxu1 %v581_v21 }
  0x15   : > { %397 = vmatpush.msrb.mxu3 %v572_v15  ;;  %429 = vmatpush.msrb.mxu0 %v368_v18  ;;  %v362_v22 = vld [vmem:[#allocation2 + $0x8] sm:$0xff]  ;;  %v603_v52 = vld [vmem:[%s751_s4] ss:$0 sm:$0xff] }
  0x16   : > { %v364_v20 = vld [vmem:[#allocation2 + $0x18] sm:$0xff]  ;;  %464 = vmatpush.msrb.mxu1 %v580_v23 }
  0x18   : > { %566 = vmatmul.msk.f32.gmra.mxu3 %vm237_vm0, %v227_v8 }
  0x19   : > { %563 = vmatmul.msk.f32.gmra.mxu2 %vm237_vm0, %v679_v10  ;;  %577 = vmatmul.msk.f32.vlgmr.msrb.gmra.mxu0 %vm237_vm0, %v361_v19 }
  0x20   : > { %574 = vmatmul.msk.f32.vlgmr.msrb.gmra.mxu3 %vm237_vm0, %v363_v16 }
  0x21   : > { %569 = vmatmul.msk.f32.vlgmr.msrb.gmra.mxu2 %vm237_vm0, %v679_v10  ;;  %578 = vmatmul.msk.f32.gmra.mxu0 %vm237_vm0, %v362_v22 }
  0x28   : > { %575 = vmatmul.msk.f32.gmra.mxu3 %vm237_vm0, %v364_v20 }
  0x29   : > { %570 = vmatmul.msk.f32.gmra.mxu2 %vm237_vm0, %v686_v11  ;;  %579 = vmatmul.msk.f32.gmra.mxu0 %vm237_vm0, %v363_v16 }
  0x31   : > { %571 = vmatmul.msk.f32.gmra.mxu2 %vm237_vm0, %v690_v12 }
  0x8e   : > { %v264_v26 = vpop.f32.mrf.mxu0 }
  0x8f   : > { %v296_v27 = vpop.f32.mrf.mxu1 }
  0x90   : > { %v297_v28 = vadd.f32 %v296_v27, %v264_v26 }
  0x93   : > { %v299_v32 = vpop.f32.mrf.mxu3 }
  0x94   : > { %v267_v24 = vpop.f32.mrf.mxu2 }
  0x95   : > { %v300_v35 = vadd.f32 %v299_v32, %v267_v24 }
  0x96   : > { %v431_v50 = vpop.f32.mrf.mxu0 }
  0x9b   : > { %v302_v39 = vpop.f32.mrf.mxu3 }
  0x9c   : > { %v270_v25 = vpop.f32.mrf.mxu2 }
  0x9d   : > { %v303_v42 = vadd.f32 %v302_v39, %v270_v25 }
  0x9e   : > { %v434_v56 = vpop.f32.mrf.mxu0 }
  0xa3   : > { %v399_v49 = vpop.f32.mrf.mxu3 }
  0xa4   : > { %v331_v30 = vpop.f32.mrf.mxu2  ;;  %v432_v51 = vadd.f32 %v431_v50, %v399_v49 }
  0xa5   : > { %v340_v31 = vadd.f32 %v331_v30, %v297_v28 }
  0xa6   : > { %v437_v2 = vpop.f32.mrf.mxu0 }
  0xa7   : > { %v347_v33 = vadd.f32 %v602_v29, %v340_v31 }
  0xa9   : > { %v350_v34 = vmax.f32 %v347_v33, 0.0 }
  0xab   : > { %357 = vst.msk [vmem:[#allocation2 + $0x20] sm:$0xff] %vm237_vm0, %v350_v34  ;;  %v402_v55 = vpop.f32.mrf.mxu3 }
  0xac   : > { %v334_v36 = vpop.f32.mrf.mxu2  ;;  %v435_v58 = vadd.f32 %v434_v56, %v402_v55 }
  0xad   : > { %v341_v37 = vadd.f32 %v334_v36, %v300_v35 }
  0xaf   : > { %v348_v38 = vadd.f32 %v602_v29, %v341_v37 }
  0xb1   : > { %v351_v40 = vmax.f32 %v348_v38, 0.0 }
  0xb2   : > { %v365_v41 = vld [vmem:[#allocation2 + $0x20] sm:$0xff] }
  0xb3   : > { %358 = vst.msk [vmem:[#allocation2 + $0x28] sm:$0xff] %vm237_vm0, %v351_v40  ;;  %576 = vmatmul.msk.f32.gmra.mxu3 %vm237_vm0, %v365_v41  ;;  %582 = vmatmul.msk.f32.vlgmr.msrb.gmra.mxu1 %vm237_vm0, %v365_v41 }
  0xb4   : > { %v337_v43 = vpop.f32.mrf.mxu2 }
  0xb5   : > { %v342_v44 = vadd.f32 %v337_v43, %v303_v42 }
  0xb7   : > { %v349_v45 = vadd.f32 %v602_v29, %v342_v44 }
  0xb9   : > { %v352_v46 = vmax.f32 %v349_v45, 0.0 }
  0xba   : > { %v366_v47 = vld [vmem:[#allocation2 + $0x28] sm:$0xff] }
  0xbb   : > { %360 = vst.msk [vmem:[#allocation2 + $0x30] sm:$0xf] %vm359_vm1, %v352_v46  ;;  %583 = vmatmul.msk.f32.gmra.mxu1 %vm237_vm0, %v366_v47 }
  0xc2   : > { %v367_v48 = vld [vmem:[#allocation2 + $0x30] sm:$0xf] }
  0xc3   : > { %584 = vmatmul.msk.f32.gmra.mxu1 %vm237_vm0, %v367_v48 }
 0x130   : > { %v466_v53 = vpop.f32.mrf.mxu1 }
 0x131   : > { %v475_v54 = vadd.f32 %v466_v53, %v432_v51 }
 0x133   : > { %v482_v57 = vadd.f32 %v603_v52, %v475_v54 }
 0x135   : > { %v485_v59 = vmax.f32 %v482_v57, 0.0 }
 0x136   : > { %v405_v1 = vpop.f32.mrf.mxu3 }
 0x137   : > { %v488_v60 = vadd.f32 %v485_v59, %v679_v10  ;;  %v438_v4 = vadd.f32 %v437_v2, %v405_v1 }
 0x138   : > { %v469_v61 = vpop.f32.mrf.mxu1 }
 0x139   : > { %v491_v62 = vmax.f32 %v488_v60, 0.0  ;;  %v476_v63 = vadd.f32 %v469_v61, %v435_v58 }
 0x13b   : > { %494 = vst.msk [vmem:[%s224_s7] sm:$0xff] %vm237_vm0, %v491_v62  ;;  %v483_v0 = vadd.f32 %v603_v52, %v476_v63 }
 0x13d   : > { %v486_v3 = vmax.f32 %v483_v0, 0.0 }
 0x13f   : > { %v489_v5 = vadd.f32 %v486_v3, %v686_v11 }
 0x140   : > { %v472_v6 = vpop.f32.mrf.mxu1 }
 0x141   : > { %v492_v7 = vmax.f32 %v489_v5, 0.0  ;;  %v477_v8 = vadd.f32 %v472_v6, %v438_v4 }
 0x143   : > { %495 = vst.msk [vmem:[%s224_s7 + $0x8] sm:$0xff] %vm237_vm0, %v492_v7  ;;  %v484_v9 = vadd.f32 %v603_v52, %v477_v8 }
 0x145   : > { %v487_v10 = vmax.f32 %v484_v9, 0.0 }
 0x147   : > { %v490_v13 = vadd.f32 %v487_v10, %v690_v12 }
 0x149   : > { %v493_v14 = vmax.f32 %v490_v13, 0.0 }
 0x14b   : > { %496 = vst.msk [vmem:[%s224_s7 + $0x10] sm:$0xf] %vm359_vm1, %v493_v14 }
 0x14c PF: > { %s15_s18 = sadd.s32 1, %s610_s18  }
 0x14d   : > { %p12_p4 = scmp.ge.s32.totalorder %s15_s18, 4  }
 0x14f   :  { %14 = sbr.rel (!%p12_p4) target bundleno = 1 (0x1), region = 74 }

// kernel: cluster_net_forward.18
= control target key start
LH: loop header
LB: loop body
LE: loop exit
PB: predicated region body
PF: predicated region fallthrough
CT: control target
= control target key end

     0   :  { %vm31_vm0 = vcmask 130048   ;;  %vm89_vm1 = vcmask 97280   ;;  %v240_v7 = vmov 0.0   ;;  %vm79_vm2 = vcmask 293888   ;;  %s333_s1 = inlined_call_operand.vmem [shape: f32[16,36], index: 1, kind: input, shape index: {}]   ;;  %s334_s0 = inlined_call_operand.vmem [shape: f32[40,16], index: 0, kind: input, shape index: {}]   ;;  %s335_s2 = inlined_call_operand.vmem [shape: f32[12,36], index: 2, kind: input, shape index: {}]   ;;  %s336_s4 = inlined_call_operand.vmem [shape: f32[1,36], index: 4, kind: input, shape index: {}]   ;;  %s337_s5 = inlined_call_operand.vmem [shape: f32[5,8,12], index: 5, kind: output, shape index: {}]   ;;  %s338_s3 = inlined_call_operand.vmem [shape: f32[1,36], index: 3, kind: input, shape index: {}]  }
   0x1   :  { %v26_v0 = vld [vmem:[%s333_s1 + $0x8] sm:$0xff]  ;;  %v25_v1 = vld [vmem:[%s333_s1] sm:$0xff]  ;;  %v22_v2 = vld [vmem:[%s334_s0 + $0x10] sm:$0xff]  ;;  %90 = vst.msk [vmem:[#allocation3] sm:$0xff] %vm89_vm1, %v240_v7 }
   0x2   :  { %206 = vmatpush.msra.mxu2 %v26_v0  ;;  %207 = vmatpush.msra.mxu3 %v26_v0  ;;  %v24_v3 = vld [vmem:[%s334_s0 + $0x20] sm:$0xff]  ;;  %v21_v5 = vld [vmem:[%s334_s0 + $0x8] sm:$0xff]  ;;  %v23_v6 = vld [vmem:[%s334_s0 + $0x18] sm:$0xff] }
   0x3   :  { %61 = vmatpush.msra.mxu0 %v26_v0  ;;  %205 = vmatpush.msra.mxu1 %v26_v0  ;;  %v20_v4 = vld [vmem:[%s334_s0] sm:$0xff]  ;;  %s305_s0 = smov 0  }
   0x4   :  { %209 = vmatpush.msra.mxu2 %v25_v1  ;;  %210 = vmatpush.msra.mxu3 %v25_v1  ;;  %v224_v8 = vld [vmem:[%s338_s3] ss:$0 sm:$0xff] }
   0x5   :  { %198 = vmatmul.msk.f32.vlgmr.msra.gmra.mxu2 %vm31_vm0, %v22_v2  ;;  %200 = vmatmul.msk.f32.vlgmr.msra.gmra.mxu3 %vm31_vm0, %v24_v3 }
   0x6   :  { %62 = vmatpush.msra.mxu0 %v25_v1  ;;  %208 = vmatpush.msra.mxu1 %v25_v1 }
   0x7   :  { %196 = vmatmul.msk.f32.vlgmr.msra.gmra.mxu0 %vm31_vm0, %v20_v4  ;;  %197 = vmatmul.msk.f32.vlgmr.msra.gmra.mxu1 %vm31_vm0, %v21_v5 }
   0xd   :  { %199 = vmatmul.msk.f32.gmra.mxu2 %vm31_vm0, %v23_v6 }
  0x84   :  { %v64_v9 = vpop.f32.mrf.mxu0  ;;  %v67_v10 = vpop.f32.mrf.mxu1 }
  0x85   :  { %v65_v11 = vadd.f32 %v224_v8, %v64_v9  ;;  %v68_v12 = vadd.f32 %v224_v8, %v67_v10 }
  0x87   :  { %80 = vst.msk [vmem:[#allocation2] sm:$0xff] %vm79_vm2, %v65_v11 }
  0x88   :  { %v70_v13 = vpop.f32.mrf.mxu2  ;;  %82 = vst.msk [vmem:[#allocation2 + $0x8] sm:$0xff] %vm79_vm2, %v68_v12  ;;  %v76_v14 = vpop.f32.mrf.mxu3 }
  0x89   :  { %v71_v15 = vadd.f32 %v224_v8, %v70_v13  ;;  %v77_v16 = vadd.f32 %v224_v8, %v76_v14 }
  0x8b   :  { %84 = vst.msk [vmem:[#allocation2 + $0x10] sm:$0xff] %vm79_vm2, %v71_v15 }
  0x8c   :  { %88 = vst.msk [vmem:[#allocation2 + $0x20] sm:$0xff] %vm79_vm2, %v77_v16 }
  0x90   :  { %v73_v17 = vpop.f32.mrf.mxu2 }
  0x91   :  { %v74_v18 = vadd.f32 %v224_v8, %v73_v17 }
  0x93   :  { %86 = vst.msk [vmem:[#allocation2 + $0x18] sm:$0xff] %vm79_vm2, %v74_v18 }
  0x94 LB: > { %v99_v19 = vld [vmem:[%s335_s2 + $0x8] sm:$0xf]  ;;  %vm107_vm3 = vcmask 1043456   ;;  %v98_v20 = vld [vmem:[%s335_s2] sm:$0xff]  ;;  %s241_s13 = smov 104   ;;  %s203_s14 = sshll.u32 %s238_s0, 3  ;;  %s238_s0 = sphi %s305_s0, %s96_s0  }
  0x95   : > { %201 = vmatpush.msk.msra.mxu0 %vm107_vm3, %v99_v19  ;;  %v97_v21 = vld [vmem:[#allocation3] sm:$0xff]  ;;  %v225_v22 = vld [vmem:[%s336_s4] ss:$0 sm:$0xff]  ;;  %s132_s15 = scalar_lea.vmem [#allocation2], %s203_s14  ;;  %s242_s16 = smov 24  }
  0x96   : > { %s243_s17 = smov 116   ;;  %s244_s18 = smov 12  }
  0x97   : > { %126 = vmatpush.msra.mxu0 %v98_v20  ;;  %s181_s21 = scalar_lea.vmem %s337_s5, %s203_s14  ;;  %s96_s0 = sadd.s32 1, %s238_s0  }
  0x98   : > { %202 = vmatmul.msk.f32.vlgmr.msra.gmra.mxu0 %vm89_vm1, %v97_v21  ;;  %p93_p0 = scmp.ge.s32.totalorder %s96_s0, 5  }
  0x9a   : > { %v133_v25 = vld [vmem:[%s132_s15] sm:$0xff] }
 0x115   : > { %v128_v23 = vpop.f32.mrf.mxu0 }
 0x116   : > { %v129_v24 = vadd.f32 %v225_v22, %v128_v23 }
 0x118   : > { %155 = vrot.lane.b32.xlu0 %v129_v24, %s241_s13  ;;  %v134_v26 = vadd.f32 %v133_v25, %v129_v24 }
 0x11a   : > { %v204_v27 = vmul.f32 -1.442695, %v134_v26 }
 0x11c   : > { %226 = vpow2.f32 %v204_v27 }
 0x122   : > { %v227_v28 = vpop.eup %226 }
 0x123   : > { %v138_v29 = vadd.f32 1.0, %v227_v28 }
 0x125   : > { %228 = vrcp.f32 %v138_v29  ;;  %v150_v35 = vand.u32 2147483648, %v138_v29  ;;  %vm144_vm5 = vweird.f32 %v138_v29  ;;  %v148_v36 = vand.u32 2147483647, %v138_v29 }
 0x127   : > { %v151_v38 = vor.u32 1.1754944e-38, %v150_v35  ;;  %vm149_vm7 = vcmp.eq.f32.partialorder %v148_v36, 8.507059e+37 }
 0x12b   : > { %v229_v30 = vpop.eup %228 }
 0x12c   : > { %v140_v31 = vmul.f32 %v229_v30, %v138_v29  ;;  %vm145_vm4 = vweird.f32 %v229_v30 }
 0x12d   : > { %vm146_vm6 = vmor %vm144_vm5, %vm145_vm4 }
 0x12e   : > { %v141_v32 = vsub.f32 1.0, %v140_v31 }
 0x130   : > { %v142_v33 = vmul.f32 %v229_v30, %v141_v32 }
 0x132   : > { %v143_v34 = vadd.f32 %v229_v30, %v142_v33 }
 0x134   : > { %v147_v37 = vsel %vm146_vm6, %v229_v30, %v143_v34 }
 0x135   : > { %v152_v40 = vsel %vm149_vm7, %v151_v38, %v147_v37 }
 0x136   : > { %v165_v46 = vsub.f32 1.0, %v152_v40 }
 0x18a   : > { %v156_v39 = vpop.permute.xlu0 %155 }
 0x18b   : > { %v158_v41 = vmul.f32 %v156_v39, %v152_v40 }
 0x18d   : > { %160 = vrot.lane.b32.xlu0 %v158_v41, %s242_s16 }
 0x1ff   : > { %v161_v42 = vpop.permute.xlu0 %160 }
 0x200   : > { %v163_v43 = vadd.f32 %v161_v42, %v133_v25 }
 0x202   : > { %230 = vtanh.f32 %v163_v43 }
 0x208   : > { %v231_v44 = vpop.eup %230 }
 0x209   : > { %167 = vrot.lane.b32.xlu1 %v231_v44, %s243_s17 }
 0x211   : > { %171 = vrot.lane.b32.xlu1 %v97_v21, %s244_s18 }
 0x27b   : > { %v168_v45 = vpop.permute.xlu1 %167 }
 0x27c   : > { %v170_v48 = vmul.f32 %v168_v45, %v165_v46 }
 0x283   : > { %v172_v47 = vpop.permute.xlu1 %171 }
 0x284   : > { %v174_v49 = vmul.f32 %v172_v47, %v152_v40 }
 0x286   : > { %v175_v50 = vadd.f32 %v174_v49, %v170_v48 }
 0x288   : > { %177 = vrot.lane.b32.xlu2 %v175_v50, %s243_s17 }
 0x2e0   :  { %95 = sbr.rel (!%p93_p0) target bundleno = 148 (0x94), region = 53 }
 0x2e2   : > { %v178_v51 = vpop.permute.xlu2 %177 }
 0x2e3   : > { %180 = vst.msk [vmem:[#allocation3] sm:$0xff] %vm89_vm1, %v178_v51 }
 0x2e4   : > { %182 = vst.msk [vmem:[%s181_s21] sm:$0xff] %vm89_vm1, %v178_v51 }

// kernel: cluster_net_forward.17
= control target key start
LH: loop header
LB: loop body
LE: loop exit
PB: predicated region body
PF: predicated region fallthrough
CT: control target
= control target key end

     0   :  { %vm31_vm0 = vcmask 130048   ;;  %vm122_vm1 = vcmask 123904   ;;  %v268_v7 = vmov 0.0   ;;  %vm79_vm2 = vcmask 386048   ;;  %s381_s1 = inlined_call_operand.vmem [shape: f32[16,48], index: 1, kind: input, shape index: {}]   ;;  %s382_s0 = inlined_call_operand.vmem [shape: f32[40,16], index: 0, kind: input, shape index: {}]   ;;  %s383_s2 = inlined_call_operand.vmem [shape: f32[16,48], index: 2, kind: input, shape index: {}]   ;;  %s384_s4 = inlined_call_operand.vmem [shape: f32[1,48], index: 4, kind: input, shape index: {}]   ;;  %s385_s5 = inlined_call_operand.vmem [shape: f32[20,2,16], index: 5, kind: output, shape index: {}]   ;;  %s386_s3 = inlined_call_operand.vmem [shape: f32[1,48], index: 3, kind: input, shape index: {}]  }
   0x1   :  { %v26_v0 = vld [vmem:[%s381_s1 + $0x8] sm:$0xff]  ;;  %v25_v1 = vld [vmem:[%s381_s1] sm:$0xff]  ;;  %v22_v2 = vld [vmem:[%s382_s0 + $0x10] sm:$0xff]  ;;  %123 = vst.msk [vmem:[#allocation3] sm:$0x3] %vm122_vm1, %v268_v7  ;;  %vm82_vm3 = vcmask 388098  }
   0x2   :  { %234 = vmatpush.msra.mxu2 %v26_v0  ;;  %235 = vmatpush.msra.mxu3 %v26_v0  ;;  %v24_v3 = vld [vmem:[%s382_s0 + $0x20] sm:$0xff]  ;;  %v21_v5 = vld [vmem:[%s382_s0 + $0x8] sm:$0xff]  ;;  %v23_v6 = vld [vmem:[%s382_s0 + $0x18] sm:$0xff]  ;;  %vm85_vm4 = vcmask 390148   ;;  %vm88_vm5 = vcmask 392198  }
   0x3   :  { %61 = vmatpush.msra.mxu0 %v26_v0  ;;  %233 = vmatpush.msra.mxu1 %v26_v0  ;;  %v20_v4 = vld [vmem:[%s382_s0] sm:$0xff]  ;;  %s353_s0 = smov 0  }
   0x4   :  { %237 = vmatpush.msra.mxu2 %v25_v1  ;;  %238 = vmatpush.msra.mxu3 %v25_v1  ;;  %v252_v8 = vld [vmem:[%s386_s3] ss:$0 sm:$0xff] }
   0x5   :  { %227 = vmatmul.msk.f32.vlgmr.msra.gmra.mxu2 %vm31_vm0, %v22_v2  ;;  %229 = vmatmul.msk.f32.vlgmr.msra.gmra.mxu3 %vm31_vm0, %v24_v3 }
   0x6   :  { %62 = vmatpush.msra.mxu0 %v25_v1  ;;  %236 = vmatpush.msra.mxu1 %v25_v1 }
   0x7   :  { %225 = vmatmul.msk.f32.vlgmr.msra.gmra.mxu0 %vm31_vm0, %v20_v4  ;;  %226 = vmatmul.msk.f32.vlgmr.msra.gmra.mxu1 %vm31_vm0, %v21_v5 }
   0xd   :  { %228 = vmatmul.msk.f32.gmra.mxu2 %vm31_vm0, %v23_v6 }
  0x84   :  { %v64_v9 = vpop.f32.mrf.mxu0  ;;  %v67_v12 = vpop.f32.mrf.mxu1 }
  0x85   :  { %v65_v10 = vadd.f32 %v252_v8, %v64_v9  ;;  %v68_v14 = vadd.f32 %v252_v8, %v67_v12 }
  0x87   :  { %80 = vst.msk [vmem:[#allocation2] sm:$0x3] %vm79_vm2, %v65_v10 }
  0x88   :  { %v70_v11 = vpop.f32.mrf.mxu2  ;;  %83 = vst.msk [vmem:[#allocation2] sm:$0xc] %vm82_vm3, %v65_v10  ;;  %v76_v16 = vpop.f32.mrf.mxu3 }
  0x89   :  { %v71_v13 = vadd.f32 %v252_v8, %v70_v11  ;;  %86 = vst.msk [vmem:[#allocation2] sm:$0x30] %vm85_vm4, %v65_v10  ;;  %v77_v18 = vadd.f32 %v252_v8, %v76_v16 }
  0x8a   :  { %89 = vst.msk [vmem:[#allocation2] sm:$0xc0] %vm88_vm5, %v65_v10 }
  0x8b   :  { %99 = vst.msk [vmem:[#allocation2 + $0x10] sm:$0x3] %vm79_vm2, %v71_v13 }
  0x8c   :  { %101 = vst.msk [vmem:[#allocation2 + $0x10] sm:$0xc] %vm82_vm3, %v71_v13 }
  0x8d   :  { %103 = vst.msk [vmem:[#allocation2 + $0x10] sm:$0x30] %vm85_vm4, %v71_v13 }
  0x8e   :  { %105 = vst.msk [vmem:[#allocation2 + $0x10] sm:$0xc0] %vm88_vm5, %v71_v13 }
  0x8f   :  { %91 = vst.msk [vmem:[#allocation2 + $0x8] sm:$0x3] %vm79_vm2, %v68_v14 }
  0x90   :  { %93 = vst.msk [vmem:[#allocation2 + $0x8] sm:$0xc] %vm82_vm3, %v68_v14  ;;  %v73_v15 = vpop.f32.mrf.mxu2 }
  0x91   :  { %95 = vst.msk [vmem:[#allocation2 + $0x8] sm:$0x30] %vm85_vm4, %v68_v14  ;;  %v74_v17 = vadd.f32 %v252_v8, %v73_v15 }
  0x92   :  { %97 = vst.msk [vmem:[#allocation2 + $0x8] sm:$0xc0] %vm88_vm5, %v68_v14 }
  0x93   :  { %107 = vst.msk [vmem:[#allocation2 + $0x18] sm:$0x3] %vm79_vm2, %v74_v17 }
  0x94   :  { %109 = vst.msk [vmem:[#allocation2 + $0x18] sm:$0xc] %vm82_vm3, %v74_v17 }
  0x95   :  { %111 = vst.msk [vmem:[#allocation2 + $0x18] sm:$0x30] %vm85_vm4, %v74_v17 }
  0x96   :  { %113 = vst.msk [vmem:[#allocation2 + $0x18] sm:$0xc0] %vm88_vm5, %v74_v17 }
  0x97   :  { %115 = vst.msk [vmem:[#allocation2 + $0x20] sm:$0x3] %vm79_vm2, %v77_v18 }
  0x98   :  { %117 = vst.msk [vmem:[#allocation2 + $0x20] sm:$0xc] %vm82_vm3, %v77_v18 }
  0x99   :  { %119 = vst.msk [vmem:[#allocation2 + $0x20] sm:$0x30] %vm85_vm4, %v77_v18 }
  0x9a   :  { %121 = vst.msk [vmem:[#allocation2 + $0x20] sm:$0xc0] %vm88_vm5, %v77_v18 }
  0x9b LB: > { %v132_v19 = vld [vmem:[%s383_s2 + $0x8] sm:$0xff]  ;;  %v131_v20 = vld [vmem:[%s383_s2] sm:$0xff]  ;;  %s269_s13 = smov 96   ;;  %s231_s14 = sshll.u32 %s266_s0, 1  ;;  %s266_s0 = sphi %s353_s0, %s129_s0  }
  0x9c   : > { %154 = vmatpush.msra.mxu0 %v132_v19  ;;  %v130_v21 = vld [vmem:[#allocation3] sm:$0x3]  ;;  %v253_v22 = vld [vmem:[%s384_s4] ss:$0 sm:$0xff]  ;;  %s161_s15 = scalar_lea.vmem [#allocation2], %s231_s14  ;;  %s270_s16 = smov 32  }
  0x9d   : > { %s271_s17 = smov 112   ;;  %s272_s18 = smov 16  }
  0x9e   : > { %155 = vmatpush.msra.mxu0 %v131_v20  ;;  %s210_s21 = scalar_lea.vmem %s385_s5, %s231_s14  ;;  %s129_s0 = sadd.s32 1, %s266_s0  }
  0x9f   : > { %230 = vmatmul.msk.f32.vlgmr.msra.gmra.mxu0 %vm31_vm0, %v130_v21  ;;  %p126_p0 = scmp.ge.s32.totalorder %s129_s0, 20  }
  0xa1   : > { %v162_v25 = vld [vmem:[%s161_s15] sm:$0x3] }
 0x11c   : > { %v157_v23 = vpop.f32.mrf.mxu0 }
 0x11d   : > { %v158_v24 = vadd.f32 %v253_v22, %v157_v23 }
 0x11f   : > { %184 = vrot.lane.b32.xlu0 %v158_v24, %s269_s13  ;;  %v163_v26 = vadd.f32 %v162_v25, %v158_v24 }
 0x121   : > { %v232_v27 = vmul.f32 -1.442695, %v163_v26 }
 0x123   : > { %254 = vpow2.f32 %v232_v27 }
 0x129   : > { %v255_v28 = vpop.eup %254 }
 0x12a   : > { %v167_v29 = vadd.f32 1.0, %v255_v28 }
 0x12c   : > { %256 = vrcp.f32 %v167_v29  ;;  %v179_v35 = vand.u32 2147483648, %v167_v29  ;;  %vm173_vm7 = vweird.f32 %v167_v29  ;;  %v177_v36 = vand.u32 2147483647, %v167_v29 }
 0x12e   : > { %v180_v38 = vor.u32 1.1754944e-38, %v179_v35  ;;  %vm178_vm9 = vcmp.eq.f32.partialorder %v177_v36, 8.507059e+37 }
 0x132   : > { %v257_v30 = vpop.eup %256 }
 0x133   : > { %v169_v31 = vmul.f32 %v257_v30, %v167_v29  ;;  %vm174_vm6 = vweird.f32 %v257_v30 }
 0x134   : > { %vm175_vm8 = vmor %vm173_vm7, %vm174_vm6 }
 0x135   : > { %v170_v32 = vsub.f32 1.0, %v169_v31 }
 0x137   : > { %v171_v33 = vmul.f32 %v257_v30, %v170_v32 }
 0x139   : > { %v172_v34 = vadd.f32 %v257_v30, %v171_v33 }
 0x13b   : > { %v176_v37 = vsel %vm175_vm8, %v257_v30, %v172_v34 }
 0x13c   : > { %v181_v40 = vsel %vm178_vm9, %v180_v38, %v176_v37 }
 0x13d   : > { %v194_v46 = vsub.f32 1.0, %v181_v40 }
 0x191   : > { %v185_v39 = vpop.permute.xlu0 %184 }
 0x192   : > { %v187_v41 = vmul.f32 %v185_v39, %v181_v40 }
 0x194   : > { %189 = vrot.lane.b32.xlu0 %v187_v41, %s270_s16 }
 0x206   : > { %v190_v42 = vpop.permute.xlu0 %189 }
 0x207   : > { %v192_v43 = vadd.f32 %v190_v42, %v162_v25 }
 0x209   : > { %258 = vtanh.f32 %v192_v43 }
 0x20f   : > { %v259_v44 = vpop.eup %258 }
 0x210   : > { %196 = vrot.lane.b32.xlu1 %v259_v44, %s271_s17 }
 0x218   : > { %200 = vrot.lane.b32.xlu1 %v130_v21, %s272_s18 }
 0x282   : > { %v197_v45 = vpop.permute.xlu1 %196 }
 0x283   : > { %v199_v48 = vmul.f32 %v197_v45, %v194_v46 }
 0x28a   : > { %v201_v47 = vpop.permute.xlu1 %200 }
 0x28b   : > { %v203_v49 = vmul.f32 %v201_v47, %v181_v40 }
 0x28d   : > { %v204_v50 = vadd.f32 %v203_v49, %v199_v48 }
 0x28f   : > { %206 = vrot.lane.b32.xlu2 %v204_v50, %s271_s17 }
 0x2e7   :  { %128 = sbr.rel (!%p126_p0) target bundleno = 155 (0x9b), region = 68 }
 0x2e9   : > { %v207_v51 = vpop.permute.xlu2 %206 }
 0x2ea   : > { %209 = vst.msk [vmem:[#allocation3] sm:$0x3] %vm122_vm1, %v207_v51 }
 0x2eb   : > { %211 = vst.msk [vmem:[%s210_s21] sm:$0x3] %vm122_vm1, %v207_v51 }

// kernel: cluster_net_forward.19
= control target key start
LH: loop header
LB: loop body
LE: loop exit
PB: predicated region body
PF: predicated region fallthrough
CT: control target
= control target key end

     0   :  { %vm59_vm0 = vcmask 1043456   ;;  %vm34_vm1 = vcmask 97280   ;;  %vm114_vm2 = vcmask 64512   ;;  %v461_v10 = vmov 0.0   ;;  %s651_s1 = inlined_call_operand.vmem [shape: f32[12,24], index: 1, kind: input, shape index: {}]   ;;  %s652_s0 = inlined_call_operand.vmem [shape: f32[64,12], index: 0, kind: input, shape index: {}]   ;;  %s653_s2 = inlined_call_operand.vmem [shape: f32[8,24], index: 2, kind: input, shape index: {}]   ;;  %s654_s4 = inlined_call_operand.vmem [shape: f32[1,24], index: 4, kind: input, shape index: {}]   ;;  %s655_s5 = inlined_call_operand.vmem [shape: f32[2,32,8], index: 5, kind: output, shape index: {}]   ;;  %s656_s3 = inlined_call_operand.vmem [shape: f32[1,24], index: 3, kind: input, shape index: {}]  }
   0x1   :  { %v29_v0 = vld [vmem:[%s651_s1 + $0x8] sm:$0xf]  ;;  %v28_v1 = vld [vmem:[%s651_s1] sm:$0xff]  ;;  %v26_v3 = vld [vmem:[%s652_s0 + $0x30] sm:$0xff]  ;;  %115 = vst.msk [vmem:[#allocation3] sm:$0xff] %vm114_vm2, %v461_v10  ;;  %vm104_vm3 = vcmask 195584  }
   0x2   :  { %406 = vmatpush.msk.msra.mxu2 %vm59_vm0, %v29_v0  ;;  %407 = vmatpush.msk.msra.mxu3 %vm59_vm0, %v29_v0  ;;  %v24_v2 = vld [vmem:[%s652_s0 + $0x20] sm:$0xff]  ;;  %v22_v5 = vld [vmem:[%s652_s0 + $0x10] sm:$0xff]  ;;  %v25_v6 = vld [vmem:[%s652_s0 + $0x28] sm:$0xff]  ;;  %116 = vst.msk [vmem:[#allocation3 + $0x8] sm:$0xff] %vm114_vm2, %v461_v10 }
   0x3   :  { %387 = vmatpush.msk.msra.mxu0 %vm59_vm0, %v29_v0  ;;  %405 = vmatpush.msk.msra.mxu1 %vm59_vm0, %v29_v0  ;;  %v20_v4 = vld [vmem:[%s652_s0] sm:$0xff]  ;;  %v27_v7 = vld [vmem:[%s652_s0 + $0x38] sm:$0xff]  ;;  %v21_v8 = vld [vmem:[%s652_s0 + $0x8] sm:$0xff]  ;;  %117 = vst.msk [vmem:[#allocation3 + $0x10] sm:$0xff] %vm114_vm2, %v461_v10 }
   0x4   :  { %409 = vmatpush.msra.mxu2 %v28_v1  ;;  %410 = vmatpush.msra.mxu3 %v28_v1  ;;  %v23_v9 = vld [vmem:[%s652_s0 + $0x18] sm:$0xff]  ;;  %118 = vst.msk [vmem:[#allocation3 + $0x18] sm:$0xff] %vm114_vm2, %v461_v10  ;;  %v427_v11 = vld [vmem:[%s656_s3] ss:$0 sm:$0xff]  ;;  %s549_s3 = smov 0  }
   0x5   :  { %392 = vmatmul.msk.f32.vlgmr.msra.gmra.mxu2 %vm34_vm1, %v24_v2  ;;  %394 = vmatmul.msk.f32.vlgmr.msra.gmra.mxu3 %vm34_vm1, %v26_v3 }
   0x6   :  { %78 = vmatpush.msra.mxu0 %v28_v1  ;;  %408 = vmatpush.msra.mxu1 %v28_v1 }
   0x7   :  { %388 = vmatmul.msk.f32.vlgmr.msra.gmra.mxu0 %vm34_vm1, %v20_v4  ;;  %390 = vmatmul.msk.f32.vlgmr.msra.gmra.mxu1 %vm34_vm1, %v22_v5 }
   0xd   :  { %393 = vmatmul.msk.f32.gmra.mxu2 %vm34_vm1, %v25_v6  ;;  %395 = vmatmul.msk.f32.gmra.mxu3 %vm34_vm1, %v27_v7 }
   0xf   :  { %389 = vmatmul.msk.f32.gmra.mxu0 %vm34_vm1, %v21_v8  ;;  %391 = vmatmul.msk.f32.gmra.mxu1 %vm34_vm1, %v23_v9 }
  0x84   :  { %v80_v12 = vpop.f32.mrf.mxu0  ;;  %v86_v13 = vpop.f32.mrf.mxu1 }
  0x85   :  { %v81_v14 = vadd.f32 %v427_v11, %v80_v12  ;;  %v87_v15 = vadd.f32 %v427_v11, %v86_v13 }
  0x87   :  { %105 = vst.msk [vmem:[#allocation2] sm:$0xff] %vm104_vm3, %v81_v14 }
  0x88   :  { %107 = vst.msk [vmem:[#allocation2 + $0x10] sm:$0xff] %vm104_vm3, %v87_v15  ;;  %v92_v16 = vpop.f32.mrf.mxu2  ;;  %v98_v17 = vpop.f32.mrf.mxu3 }
  0x89   :  { %v93_v18 = vadd.f32 %v427_v11, %v92_v16  ;;  %v99_v19 = vadd.f32 %v427_v11, %v98_v17 }
  0x8b   :  { %110 = vst.msk [vmem:[#allocation2 + $0x20] sm:$0xff] %vm104_vm3, %v93_v18 }
  0x8c   :  { %112 = vst.msk [vmem:[#allocation2 + $0x30] sm:$0xff] %vm104_vm3, %v99_v19  ;;  %v83_v20 = vpop.f32.mrf.mxu0  ;;  %v89_v21 = vpop.f32.mrf.mxu1 }
  0x8d   :  { %v84_v22 = vadd.f32 %v427_v11, %v83_v20  ;;  %v90_v23 = vadd.f32 %v427_v11, %v89_v21 }
  0x8f   :  { %106 = vst.msk [vmem:[#allocation2 + $0x8] sm:$0xff] %vm104_vm3, %v84_v22 }
  0x90   :  { %108 = vst.msk [vmem:[#allocation2 + $0x18] sm:$0xff] %vm104_vm3, %v90_v23  ;;  %v95_v24 = vpop.f32.mrf.mxu2  ;;  %v101_v25 = vpop.f32.mrf.mxu3 }
  0x91   :  { %v96_v26 = vadd.f32 %v427_v11, %v95_v24  ;;  %v102_v27 = vadd.f32 %v427_v11, %v101_v25 }
  0x93   :  { %111 = vst.msk [vmem:[#allocation2 + $0x28] sm:$0xff] %vm104_vm3, %v96_v26 }
  0x94   :  { %113 = vst.msk [vmem:[#allocation2 + $0x38] sm:$0xff] %vm104_vm3, %v102_v27 }
  0x95 LB: > { %v129_v28 = vld [vmem:[%s653_s2] sm:$0xff]  ;;  %v559_v30 = vld [vmem:[#allocation3 + $0x10] sm:$0xff]  ;;  %v561_v31 = vld [vmem:[#allocation3 + $0x18] sm:$0xff]  ;;  %s462_s17 = smov 112   ;;  %s400_s18 = sshll.u32 %s459_s3, 5  ;;  %s459_s3 = sphi %s549_s3, %s124_s3  }
  0x96   : > { %v557_v29 = vld [vmem:[#allocation3] sm:$0xff]  ;;  %161 = vmatpush.msra.mxu0 %v129_v28  ;;  %412 = vmatpush.msra.mxu2 %v129_v28  ;;  %v563_v32 = vld [vmem:[#allocation3 + $0x8] sm:$0xff]  ;;  %s176_s19 = scalar_lea.vmem [#allocation2], %s400_s18  ;;  %s463_s20 = smov 16  }
  0x97   : > { %396 = vmatmul.msk.f32.vlgmr.msra.gmra.mxu0 %vm114_vm2, %v557_v29  ;;  %398 = vmatmul.msk.f32.vlgmr.msra.gmra.mxu2 %vm114_vm2, %v559_v30  ;;  %v428_v33 = vld [vmem:[%s654_s4] ss:$0 sm:$0xff]  ;;  %s464_s21 = smov 8   ;;  %s465_s22 = smov 120  }
  0x98   : > { %413 = vmatpush.msra.mxu3 %v129_v28  ;;  %411 = vmatpush.msra.mxu1 %v129_v28  ;;  %s369_s25 = scalar_lea.vmem %s655_s5, %s400_s18  ;;  %s124_s3 = sadd.s32 1, %s459_s3  }
  0x99   : > { %399 = vmatmul.msk.f32.vlgmr.msra.gmra.mxu3 %vm114_vm2, %v561_v31  ;;  %397 = vmatmul.msk.f32.vlgmr.msra.gmra.mxu1 %vm114_vm2, %v563_v32  ;;  %p121_p0 = scmp.ge.s32.totalorder %s124_s3, 2  }
  0x9b   : > { %v579_v42 = vld [vmem:[%s176_s19] sm:$0xff]  ;;  %v582_v44 = vld [vmem:[%s176_s19 + $0x10] sm:$0xff]  ;;  %v584_v46 = vld [vmem:[%s176_s19 + $0x8] sm:$0xff] }
  0x9c   : > { %v588_v50 = vld [vmem:[%s176_s19 + $0x18] sm:$0xff] }
 0x114   : > { %v163_v34 = vpop.f32.mrf.mxu0 }
 0x115   : > { %v164_v35 = vadd.f32 %v428_v33, %v163_v34 }
 0x116   : > { %v166_v36 = vpop.f32.mrf.mxu1 }
 0x117   : > { %265 = vrot.lane.b32.xlu0 %v164_v35, %s462_s17  ;;  %v167_v39 = vadd.f32 %v428_v33, %v166_v36  ;;  %v181_v43 = vadd.f32 %v579_v42, %v164_v35 }
 0x119   : > { %v401_v45 = vmul.f32 -1.442695, %v181_v43  ;;  %v182_v48 = vadd.f32 %v584_v46, %v167_v39 }
 0x11a   : > { %v169_v37 = vpop.f32.mrf.mxu2 }
 0x11b   : > { %v170_v38 = vadd.f32 %v428_v33, %v169_v37  ;;  %429 = vpow2.f32 %v401_v45  ;;  %v402_v51 = vmul.f32 -1.442695, %v182_v48 }
 0x11c   : > { %v172_v40 = vpop.f32.mrf.mxu3 }
 0x11d   : > { %269 = vrot.lane.b32.xlu1 %v170_v38, %s462_s17  ;;  %v173_v41 = vadd.f32 %v428_v33, %v172_v40  ;;  %v183_v47 = vadd.f32 %v582_v44, %v170_v38 }
 0x11f   : > { %267 = vrot.lane.b32.xlu0 %v167_v39, %s462_s17  ;;  %v403_v49 = vmul.f32 -1.442695, %v183_v47  ;;  %v184_v53 = vadd.f32 %v588_v50, %v173_v41 }
 0x121   : > { %v430_v52 = vpop.eup %429  ;;  %431 = vpow2.f32 %v403_v49  ;;  %v404_v55 = vmul.f32 -1.442695, %v184_v53 }
 0x122   : > { %433 = vpow2.f32 %v402_v51  ;;  %v197_v54 = vadd.f32 1.0, %v430_v52 }
 0x124   : > { %435 = vrcp.f32 %v197_v54  ;;  %vm206_vm4 = vweird.f32 %v197_v54  ;;  %v212_v8 = vand.u32 2147483648, %v197_v54  ;;  %v210_v10 = vand.u32 2147483647, %v197_v54 }
 0x125   : > { %271 = vrot.lane.b32.xlu1 %v173_v41, %s462_s17  ;;  %437 = vpow2.f32 %v404_v55 }
 0x126   : > { %v213_v14 = vor.u32 1.1754944e-38, %v212_v8  ;;  %vm211_vm7 = vcmp.eq.f32.partialorder %v210_v10, 8.507059e+37 }
 0x127   : > { %v432_v56 = vpop.eup %431 }
 0x128   : > { %v434_v57 = vpop.eup %433  ;;  %v199_v58 = vadd.f32 1.0, %v432_v56 }
 0x129   : > { %v198_v59 = vadd.f32 1.0, %v434_v57 }
 0x12a   : > { %v436_v60 = vpop.eup %435  ;;  %439 = vrcp.f32 %v199_v58  ;;  %v242_v21 = vand.u32 2147483648, %v199_v58  ;;  %vm236_vm11 = vweird.f32 %v199_v58  ;;  %v240_v25 = vand.u32 2147483647, %v199_v58 }
 0x12b   : > { %v438_v61 = vpop.eup %437  ;;  %441 = vrcp.f32 %v198_v59  ;;  %v202_v62 = vmul.f32 %v436_v60, %v197_v54  ;;  %vm207_vm5 = vweird.f32 %v436_v60  ;;  %vm221_vm8 = vweird.f32 %v198_v59 }
 0x12c   : > { %v591_v63 = vadd.f32 1.0, %v438_v61  ;;  %vm208_vm6 = vmor %vm206_vm4, %vm207_vm5  ;;  %v225_v22 = vand.u32 2147483647, %v198_v59  ;;  %v227_v23 = vand.u32 2147483648, %v198_v59  ;;  %v243_v34 = vor.u32 1.1754944e-38, %v242_v21 }
 0x12d   : > { %v203_v1 = vsub.f32 1.0, %v202_v62  ;;  %vm241_vm15 = vcmp.eq.f32.partialorder %v240_v25, 8.507059e+37 }
 0x12e   : > { %443 = vrcp.f32 %v591_v63  ;;  %vm226_vm14 = vcmp.eq.f32.partialorder %v225_v22, 8.507059e+37  ;;  %v228_v35 = vor.u32 1.1754944e-38, %v227_v23  ;;  %vm251_vm0 = vweird.f32 %v591_v63 }
 0x12f   : > { %v204_v4 = vmul.f32 %v436_v60, %v203_v1  ;;  %v257_v39 = vand.u32 2147483648, %v591_v63  ;;  %v255_v43 = vand.u32 2147483647, %v591_v63 }
 0x130   : > { %v440_v0 = vpop.eup %439 }
 0x131   : > { %v442_v2 = vpop.eup %441  ;;  %v232_v3 = vmul.f32 %v440_v0, %v199_v58  ;;  %v205_v9 = vadd.f32 %v436_v60, %v204_v4  ;;  %vm237_vm10 = vweird.f32 %v440_v0  ;;  %v258_v49 = vor.u32 1.1754944e-38, %v257_v39 }
 0x132   : > { %v217_v5 = vmul.f32 %v442_v2, %v198_v59  ;;  %vm222_vm9 = vweird.f32 %v442_v2  ;;  %vm238_vm13 = vmor %vm236_vm11, %vm237_vm10  ;;  %vm256_vm4 = vcmp.eq.f32.partialorder %v255_v43, 8.507059e+37 }
 0x133   : > { %v233_v6 = vsub.f32 1.0, %v232_v3  ;;  %v209_v15 = vsel %vm208_vm6, %v436_v60, %v205_v9  ;;  %vm598_vm12 = vmor %vm221_vm8, %vm222_vm9 }
 0x134   : > { %v444_v7 = vpop.eup %443  ;;  %v218_v11 = vsub.f32 1.0, %v217_v5  ;;  %v595_v20 = vsel %vm211_vm7, %v213_v14, %v209_v15 }
 0x135   : > { %v234_v12 = vmul.f32 %v440_v0, %v233_v6  ;;  %v247_v13 = vmul.f32 %v444_v7, %v591_v63  ;;  %vm252_vm1 = vweird.f32 %v444_v7 }
 0x136   : > { %v219_v16 = vmul.f32 %v442_v2, %v218_v11  ;;  %vm253_vm3 = vmor %vm251_vm0, %vm252_vm1 }
 0x137   : > { %v235_v17 = vadd.f32 %v440_v0, %v234_v12  ;;  %v248_v18 = vsub.f32 1.0, %v247_v13 }
 0x138   : > { %v220_v26 = vadd.f32 %v442_v2, %v219_v16 }
 0x139   : > { %v239_v28 = vsel %vm238_vm13, %v440_v0, %v235_v17  ;;  %v249_v33 = vmul.f32 %v444_v7, %v248_v18 }
 0x13a   : > { %v224_v36 = vsel %vm598_vm12, %v442_v2, %v220_v26  ;;  %v605_v38 = vsel %vm241_vm15, %v243_v34, %v239_v28 }
 0x13b   : > { %v250_v41 = vadd.f32 %v444_v7, %v249_v33  ;;  %v610_v47 = vsel %vm226_vm14, %v228_v35, %v224_v36  ;;  %v307_v9 = vsub.f32 1.0, %v605_v38 }
 0x13c   : > { %v306_v14 = vsub.f32 1.0, %v610_v47 }
 0x13d   : > { %v254_v51 = vsel %vm253_vm3, %v444_v7, %v250_v41 }
 0x13e   : > { %v259_v53 = vsel %vm256_vm4, %v258_v49, %v254_v51 }
 0x13f   : > { %v308_v5 = vsub.f32 1.0, %v259_v53 }
 0x189   : > { %v266_v19 = vpop.permute.xlu0 %265 }
 0x18a   : > { %v277_v24 = vmul.f32 %v266_v19, %v595_v20 }
 0x18c   : > { %285 = vrot.lane.b32.xlu2 %v277_v24, %s463_s20 }
 0x18f   : > { %v270_v37 = vpop.permute.xlu1 %269 }
 0x190   : > { %v279_v40 = vmul.f32 %v270_v37, %v605_v38 }
 0x191   : > { %v268_v45 = vpop.permute.xlu0 %267 }
 0x192   : > { %v278_v48 = vmul.f32 %v268_v45, %v610_v47  ;;  %289 = vrot.lane.b32.xlu0 %v279_v40, %s463_s20 }
 0x194   : > { %287 = vrot.lane.b32.xlu2 %v278_v48, %s463_s20 }
 0x197   : > { %v272_v52 = vpop.permute.xlu1 %271 }
 0x198   : > { %v280_v54 = vmul.f32 %v272_v52, %v259_v53 }
 0x19a   : > { %291 = vrot.lane.b32.xlu1 %v280_v54, %s463_s20  ;;  %329 = vrot.lane.b32.xlu0 %v557_v29, %s464_s21 }
 0x1e6   : > { %v286_v55 = vpop.permute.xlu2 %285 }
 0x1e7   : > { %v297_v56 = vadd.f32 %v286_v55, %v579_v42 }
 0x1e9   : > { %445 = vtanh.f32 %v297_v56 }
 0x1ee   : > { %v288_v57 = vpop.permute.xlu2 %287 }
 0x1ef   : > { %v446_v58 = vpop.eup %445  ;;  %v298_v59 = vadd.f32 %v288_v57, %v584_v46 }
 0x1f0   : > { %313 = vrot.lane.b32.xlu2 %v446_v58, %s465_s22 }
 0x1f1   : > { %447 = vtanh.f32 %v298_v59 }
 0x1f7   : > { %v448_v60 = vpop.eup %447 }
 0x1f8   : > { %315 = vrot.lane.b32.xlu0 %v448_v60, %s465_s22 }
 0x200   : > { %335 = vrot.lane.b32.xlu0 %v561_v31, %s464_s21  ;;  %v305_v31 = vsub.f32 1.0, %v595_v20 }
 0x204   : > { %v290_v61 = vpop.permute.xlu0 %289 }
 0x205   : > { %v299_v29 = vadd.f32 %v290_v61, %v582_v44 }
 0x207   : > { %449 = vtanh.f32 %v299_v29 }
 0x20c   : > { %v292_v62 = vpop.permute.xlu1 %291  ;;  %v330_v0 = vpop.permute.xlu0 %329 }
 0x20d   : > { %v450_v42 = vpop.eup %449  ;;  %v300_v63 = vadd.f32 %v292_v62, %v588_v50  ;;  %v341_v44 = vmul.f32 %v330_v0, %v595_v20 }
 0x20e   : > { %317 = vrot.lane.b32.xlu1 %v450_v42, %s465_s22 }
 0x20f   : > { %451 = vtanh.f32 %v300_v63 }
 0x215   : > { %v452_v46 = vpop.eup %451 }
 0x216   : > { %331 = vrot.lane.b32.xlu1 %v563_v32, %s464_s21  ;;  %319 = vrot.lane.b32.xlu2 %v452_v46, %s465_s22 }
 0x21e   : > { %333 = vrot.lane.b32.xlu2 %v559_v30, %s464_s21 }
 0x24a   : > { %v314_v1 = vpop.permute.xlu2 %313 }
 0x24b   : > { %v325_v2 = vmul.f32 %v314_v1, %v305_v31 }
 0x24d   : > { %v345_v3 = vadd.f32 %v341_v44, %v325_v2 }
 0x24f   : > { %353 = vrot.lane.b32.xlu1 %v345_v3, %s465_s22 }
 0x26a   : > { %v316_v50 = vpop.permute.xlu0 %315 }
 0x26b   : > { %v326_v16 = vmul.f32 %v316_v50, %v306_v14 }
 0x270   : > { %v320_v4 = vpop.permute.xlu2 %319 }
 0x271   : > { %v328_v7 = vmul.f32 %v320_v4, %v308_v5 }
 0x272   : > { %v336_v6 = vpop.permute.xlu0 %335 }
 0x273   : > { %v344_v32 = vmul.f32 %v336_v6, %v259_v53 }
 0x275   : > { %v348_v8 = vadd.f32 %v344_v32, %v328_v7 }
 0x277   : > { %359 = vrot.lane.b32.xlu1 %v348_v8, %s465_s22 }
 0x278   : > { %v334_v30 = vpop.permute.xlu2 %333 }
 0x279   : > { %v343_v11 = vmul.f32 %v334_v30, %v605_v38 }
 0x280   : > { %v318_v10 = vpop.permute.xlu1 %317 }
 0x281   : > { %v327_v12 = vmul.f32 %v318_v10, %v307_v9 }
 0x283   : > { %v347_v13 = vadd.f32 %v343_v11, %v327_v12 }
 0x285   : > { %357 = vrot.lane.b32.xlu0 %v347_v13, %s465_s22 }
 0x288   : > { %v332_v15 = vpop.permute.xlu1 %331 }
 0x289   : > { %v342_v17 = vmul.f32 %v332_v15, %v610_v47 }
 0x28b   : > { %v346_v18 = vadd.f32 %v342_v17, %v326_v16 }
 0x28d   : > { %355 = vrot.lane.b32.xlu2 %v346_v18, %s465_s22 }
 0x2c1   : > { %v354_v19 = vpop.permute.xlu1 %353 }
 0x2c2   : > { %365 = vst.msk [vmem:[#allocation3] sm:$0xff] %vm114_vm2, %v354_v19 }
 0x2c3   : > { %370 = vst.msk [vmem:[%s369_s25] sm:$0xff] %vm114_vm2, %v354_v19 }
 0x2e7   : > { %v356_v20 = vpop.permute.xlu2 %355 }
 0x2e8   : > { %366 = vst.msk [vmem:[#allocation3 + $0x8] sm:$0xff] %vm114_vm2, %v356_v20 }
 0x2e9   : > { %371 = vst.msk [vmem:[%s369_s25 + $0x8] sm:$0xff] %vm114_vm2, %v356_v20  ;;  %v360_v21 = vpop.permute.xlu1 %359 }
 0x2ea   : > { %368 = vst.msk [vmem:[#allocation3 + $0x18] sm:$0xff] %vm114_vm2, %v360_v21 }
 0x2eb   : > { %373 = vst.msk [vmem:[%s369_s25 + $0x18] sm:$0xff] %vm114_vm2, %v360_v21 }
 0x2f5   :  { %123 = sbr.rel (!%p121_p0) target bundleno = 149 (0x95), region = 50 }
 0x2f7   : > { %v358_v22 = vpop.permute.xlu0 %357 }
 0x2f8   : > { %367 = vst.msk [vmem:[#allocation3 + $0x10] sm:$0xff] %vm114_vm2, %v358_v22 }
 0x2f9   : > { %372 = vst.msk [vmem:[%s369_s25 + $0x10] sm:$0xff] %vm114_vm2, %v358_v22 }

// kernel: cluster_net_forward.20
= control target key start
LH: loop header
LB: loop body
LE: loop exit
PB: predicated region body
PF: predicated region fallthrough
CT: control target
= control target key end

     0   :  { %vm30_vm0 = vcmask 64512   ;;  %vm121_vm1 = vcmask 91136   ;;  %v270_v6 = vmov 0.0   ;;  %vm78_vm2 = vcmask 287744   ;;  %s379_s1 = inlined_call_operand.vmem [shape: f32[8,36], index: 1, kind: input, shape index: {}]   ;;  %s380_s0 = inlined_call_operand.vmem [shape: f32[40,8], index: 0, kind: input, shape index: {}]   ;;  %s381_s2 = inlined_call_operand.vmem [shape: f32[12,36], index: 2, kind: input, shape index: {}]   ;;  %s382_s4 = inlined_call_operand.vmem [shape: f32[1,36], index: 4, kind: input, shape index: {}]   ;;  %s383_s5 = inlined_call_operand.vmem [shape: f32[20,2,12], index: 5, kind: output, shape index: {}]   ;;  %s384_s3 = inlined_call_operand.vmem [shape: f32[1,36], index: 3, kind: input, shape index: {}]  }
   0x1   :  { %v25_v0 = vld [vmem:[%s379_s1] sm:$0xff]  ;;  %v22_v1 = vld [vmem:[%s380_s0 + $0x10] sm:$0xff]  ;;  %v21_v4 = vld [vmem:[%s380_s0 + $0x8] sm:$0xff]  ;;  %122 = vst.msk [vmem:[#allocation3] sm:$0x3] %vm121_vm1, %v270_v6  ;;  %vm81_vm3 = vcmask 289794  }
   0x2   :  { %239 = vmatpush.msra.mxu2 %v25_v0  ;;  %240 = vmatpush.msra.mxu3 %v25_v0  ;;  %v24_v2 = vld [vmem:[%s380_s0 + $0x20] sm:$0xff]  ;;  %v23_v5 = vld [vmem:[%s380_s0 + $0x18] sm:$0xff]  ;;  %vm84_vm4 = vcmask 291844   ;;  %vm87_vm5 = vcmask 293894  }
   0x3   :  { %v20_v3 = vld [vmem:[%s380_s0] sm:$0xff]  ;;  %231 = vmatmul.msk.f32.vlgmr.msra.gmra.mxu2 %vm30_vm0, %v22_v1  ;;  %233 = vmatmul.msk.f32.vlgmr.msra.gmra.mxu3 %vm30_vm0, %v24_v2  ;;  %s352_s0 = smov 0  }
   0x4   :  { %61 = vmatpush.msra.mxu0 %v25_v0  ;;  %238 = vmatpush.msra.mxu1 %v25_v0  ;;  %v254_v7 = vld [vmem:[%s384_s3] ss:$0 sm:$0xff] }
   0x5   :  { %229 = vmatmul.msk.f32.vlgmr.msra.gmra.mxu0 %vm30_vm0, %v20_v3  ;;  %230 = vmatmul.msk.f32.vlgmr.msra.gmra.mxu1 %vm30_vm0, %v21_v4 }
   0xb   :  { %232 = vmatmul.msk.f32.gmra.mxu2 %vm30_vm0, %v23_v5 }
  0x82   :  { %v63_v8 = vpop.f32.mrf.mxu0  ;;  %v66_v11 = vpop.f32.mrf.mxu1 }
  0x83   :  { %v64_v9 = vadd.f32 %v254_v7, %v63_v8  ;;  %v67_v13 = vadd.f32 %v254_v7, %v66_v11 }
  0x85   :  { %79 = vst.msk [vmem:[#allocation2] sm:$0x3] %vm78_vm2, %v64_v9 }
  0x86   :  { %v69_v10 = vpop.f32.mrf.mxu2  ;;  %82 = vst.msk [vmem:[#allocation2] sm:$0xc] %vm81_vm3, %v64_v9  ;;  %v75_v15 = vpop.f32.mrf.mxu3 }
  0x87   :  { %v70_v12 = vadd.f32 %v254_v7, %v69_v10  ;;  %85 = vst.msk [vmem:[#allocation2] sm:$0x30] %vm84_vm4, %v64_v9  ;;  %v76_v17 = vadd.f32 %v254_v7, %v75_v15 }
  0x88   :  { %88 = vst.msk [vmem:[#allocation2] sm:$0xc0] %vm87_vm5, %v64_v9 }
  0x89   :  { %98 = vst.msk [vmem:[#allocation2 + $0x10] sm:$0x3] %vm78_vm2, %v70_v12 }
  0x8a   :  { %100 = vst.msk [vmem:[#allocation2 + $0x10] sm:$0xc] %vm81_vm3, %v70_v12 }
  0x8b   :  { %102 = vst.msk [vmem:[#allocation2 + $0x10] sm:$0x30] %vm84_vm4, %v70_v12 }
  0x8c   :  { %104 = vst.msk [vmem:[#allocation2 + $0x10] sm:$0xc0] %vm87_vm5, %v70_v12 }
  0x8d   :  { %90 = vst.msk [vmem:[#allocation2 + $0x8] sm:$0x3] %vm78_vm2, %v67_v13 }
  0x8e   :  { %92 = vst.msk [vmem:[#allocation2 + $0x8] sm:$0xc] %vm81_vm3, %v67_v13  ;;  %v72_v14 = vpop.f32.mrf.mxu2 }
  0x8f   :  { %94 = vst.msk [vmem:[#allocation2 + $0x8] sm:$0x30] %vm84_vm4, %v67_v13  ;;  %v73_v16 = vadd.f32 %v254_v7, %v72_v14 }
  0x90   :  { %96 = vst.msk [vmem:[#allocation2 + $0x8] sm:$0xc0] %vm87_vm5, %v67_v13 }
  0x91   :  { %106 = vst.msk [vmem:[#allocation2 + $0x18] sm:$0x3] %vm78_vm2, %v73_v16 }
  0x92   :  { %108 = vst.msk [vmem:[#allocation2 + $0x18] sm:$0xc] %vm81_vm3, %v73_v16 }
  0x93   :  { %110 = vst.msk [vmem:[#allocation2 + $0x18] sm:$0x30] %vm84_vm4, %v73_v16 }
  0x94   :  { %112 = vst.msk [vmem:[#allocation2 + $0x18] sm:$0xc0] %vm87_vm5, %v73_v16 }
  0x95   :  { %114 = vst.msk [vmem:[#allocation2 + $0x20] sm:$0x3] %vm78_vm2, %v76_v17 }
  0x96   :  { %116 = vst.msk [vmem:[#allocation2 + $0x20] sm:$0xc] %vm81_vm3, %v76_v17 }
  0x97   :  { %118 = vst.msk [vmem:[#allocation2 + $0x20] sm:$0x30] %vm84_vm4, %v76_v17 }
  0x98   :  { %120 = vst.msk [vmem:[#allocation2 + $0x20] sm:$0xc0] %vm87_vm5, %v76_v17 }
  0x99 LB: > { %v131_v18 = vld [vmem:[%s381_s2 + $0x8] sm:$0xf]  ;;  %vm140_vm6 = vcmask 1043456   ;;  %v130_v19 = vld [vmem:[%s381_s2] sm:$0xff]  ;;  %vm136_vm7 = vcmask 97280   ;;  %s271_s11 = smov 104   ;;  %s268_s0 = sphi %s352_s0, %s128_s0  }
  0x9a   : > { %234 = vmatpush.msk.msra.mxu0 %vm140_vm6, %v131_v18  ;;  %v129_v20 = vld [vmem:[#allocation3] sm:$0x3]  ;;  %v255_v21 = vld [vmem:[%s382_s4] ss:$0 sm:$0xff]  ;;  %s236_s12 = sshll.u32 %s268_s0, 1  ;;  %s272_s14 = smov 24  }
  0x9b   : > { %s165_s13 = scalar_lea.vmem [#allocation2], %s236_s12  ;;  %s273_s15 = smov 116  }
  0x9c   : > { %159 = vmatpush.msra.mxu0 %v130_v19  ;;  %s274_s16 = smov 12   ;;  %s214_s19 = scalar_lea.vmem %s383_s5, %s236_s12 }
  0x9d   : > { %235 = vmatmul.msk.f32.vlgmr.msra.gmra.mxu0 %vm136_vm7, %v129_v20  ;;  %s128_s0 = sadd.s32 1, %s268_s0  }
  0x9e   : > { %p125_p0 = scmp.ge.s32.totalorder %s128_s0, 20  }
  0x9f   : > { %v166_v24 = vld [vmem:[%s165_s13] sm:$0x3] }
 0x11a   : > { %v161_v22 = vpop.f32.mrf.mxu0 }
 0x11b   : > { %v162_v23 = vadd.f32 %v255_v21, %v161_v22 }
 0x11d   : > { %188 = vrot.lane.b32.xlu0 %v162_v23, %s271_s11  ;;  %v167_v25 = vadd.f32 %v166_v24, %v162_v23 }
 0x11f   : > { %v237_v26 = vmul.f32 -1.442695, %v167_v25 }
 0x121   : > { %256 = vpow2.f32 %v237_v26 }
 0x127   : > { %v257_v27 = vpop.eup %256 }
 0x128   : > { %v171_v28 = vadd.f32 1.0, %v257_v27 }
 0x12a   : > { %258 = vrcp.f32 %v171_v28  ;;  %v183_v34 = vand.u32 2147483648, %v171_v28  ;;  %vm177_vm9 = vweird.f32 %v171_v28  ;;  %v181_v35 = vand.u32 2147483647, %v171_v28 }
 0x12c   : > { %v184_v37 = vor.u32 1.1754944e-38, %v183_v34  ;;  %vm182_vm11 = vcmp.eq.f32.partialorder %v181_v35, 8.507059e+37 }
 0x130   : > { %v259_v29 = vpop.eup %258 }
 0x131   : > { %v173_v30 = vmul.f32 %v259_v29, %v171_v28  ;;  %vm178_vm8 = vweird.f32 %v259_v29 }
 0x132   : > { %vm179_vm10 = vmor %vm177_vm9, %vm178_vm8 }
 0x133   : > { %v174_v31 = vsub.f32 1.0, %v173_v30 }
 0x135   : > { %v175_v32 = vmul.f32 %v259_v29, %v174_v31 }
 0x137   : > { %v176_v33 = vadd.f32 %v259_v29, %v175_v32 }
 0x139   : > { %v180_v36 = vsel %vm179_vm10, %v259_v29, %v176_v33 }
 0x13a   : > { %v185_v39 = vsel %vm182_vm11, %v184_v37, %v180_v36 }
 0x13b   : > { %v198_v45 = vsub.f32 1.0, %v185_v39 }
 0x18f   : > { %v189_v38 = vpop.permute.xlu0 %188 }
 0x190   : > { %v191_v40 = vmul.f32 %v189_v38, %v185_v39 }
 0x192   : > { %193 = vrot.lane.b32.xlu0 %v191_v40, %s272_s14 }
 0x204   : > { %v194_v41 = vpop.permute.xlu0 %193 }
 0x205   : > { %v196_v42 = vadd.f32 %v194_v41, %v166_v24 }
 0x207   : > { %260 = vtanh.f32 %v196_v42 }
 0x20d   : > { %v261_v43 = vpop.eup %260 }
 0x20e   : > { %200 = vrot.lane.b32.xlu1 %v261_v43, %s273_s15 }
 0x216   : > { %204 = vrot.lane.b32.xlu1 %v129_v20, %s274_s16 }
 0x280   : > { %v201_v44 = vpop.permute.xlu1 %200 }
 0x281   : > { %v203_v47 = vmul.f32 %v201_v44, %v198_v45 }
 0x288   : > { %v205_v46 = vpop.permute.xlu1 %204 }
 0x289   : > { %v207_v48 = vmul.f32 %v205_v46, %v185_v39 }
 0x28b   : > { %v208_v49 = vadd.f32 %v207_v48, %v203_v47 }
 0x28d   : > { %210 = vrot.lane.b32.xlu2 %v208_v49, %s273_s15 }
 0x2e5   :  { %127 = sbr.rel (!%p125_p0) target bundleno = 153 (0x99), region = 68 }
 0x2e7   : > { %v211_v50 = vpop.permute.xlu2 %210 }
 0x2e8   : > { %213 = vst.msk [vmem:[#allocation3] sm:$0x3] %vm121_vm1, %v211_v50 }
 0x2e9   : > { %215 = vst.msk [vmem:[%s214_s19] sm:$0x3] %vm121_vm1, %v211_v50 }

// kernel: cluster_net_forward.22
= control target key start
LH: loop header
LB: loop body
LE: loop exit
PB: predicated region body
PF: predicated region fallthrough
CT: control target
= control target key end

     0   :  { %vm31_vm0 = vcmask 130048   ;;  %vm122_vm1 = vcmask 58368   ;;  %v268_v7 = vmov 0.0   ;;  %vm79_vm2 = vcmask 189440   ;;  %s377_s1 = inlined_call_operand.vmem [shape: f32[16,24], index: 1, kind: input, shape index: {}]   ;;  %s378_s0 = inlined_call_operand.vmem [shape: f32[40,16], index: 0, kind: input, shape index: {}]   ;;  %s379_s2 = inlined_call_operand.vmem [shape: f32[8,24], index: 2, kind: input, shape index: {}]   ;;  %s380_s4 = inlined_call_operand.vmem [shape: f32[1,24], index: 4, kind: input, shape index: {}]   ;;  %s381_s5 = inlined_call_operand.vmem [shape: f32[20,2,8], index: 5, kind: output, shape index: {}]   ;;  %s382_s3 = inlined_call_operand.vmem [shape: f32[1,24], index: 3, kind: input, shape index: {}]  }
   0x1   :  { %v26_v0 = vld [vmem:[%s377_s1 + $0x8] sm:$0xff]  ;;  %v25_v1 = vld [vmem:[%s377_s1] sm:$0xff]  ;;  %v22_v2 = vld [vmem:[%s378_s0 + $0x10] sm:$0xff]  ;;  %123 = vst.msk [vmem:[#allocation3] sm:$0x3] %vm122_vm1, %v268_v7  ;;  %vm82_vm3 = vcmask 191490  }
   0x2   :  { %234 = vmatpush.msra.mxu2 %v26_v0  ;;  %235 = vmatpush.msra.mxu3 %v26_v0  ;;  %v24_v3 = vld [vmem:[%s378_s0 + $0x20] sm:$0xff]  ;;  %v21_v5 = vld [vmem:[%s378_s0 + $0x8] sm:$0xff]  ;;  %v23_v6 = vld [vmem:[%s378_s0 + $0x18] sm:$0xff]  ;;  %vm85_vm4 = vcmask 193540   ;;  %vm88_vm5 = vcmask 195590  }
   0x3   :  { %61 = vmatpush.msra.mxu0 %v26_v0  ;;  %233 = vmatpush.msra.mxu1 %v26_v0  ;;  %v20_v4 = vld [vmem:[%s378_s0] sm:$0xff]  ;;  %s353_s0 = smov 0  }
   0x4   :  { %237 = vmatpush.msra.mxu2 %v25_v1  ;;  %238 = vmatpush.msra.mxu3 %v25_v1  ;;  %v252_v8 = vld [vmem:[%s382_s3] ss:$0 sm:$0xff] }
   0x5   :  { %227 = vmatmul.msk.f32.vlgmr.msra.gmra.mxu2 %vm31_vm0, %v22_v2  ;;  %229 = vmatmul.msk.f32.vlgmr.msra.gmra.mxu3 %vm31_vm0, %v24_v3 }
   0x6   :  { %62 = vmatpush.msra.mxu0 %v25_v1  ;;  %236 = vmatpush.msra.mxu1 %v25_v1 }
   0x7   :  { %225 = vmatmul.msk.f32.vlgmr.msra.gmra.mxu0 %vm31_vm0, %v20_v4  ;;  %226 = vmatmul.msk.f32.vlgmr.msra.gmra.mxu1 %vm31_vm0, %v21_v5 }
   0xd   :  { %228 = vmatmul.msk.f32.gmra.mxu2 %vm31_vm0, %v23_v6 }
  0x84   :  { %v64_v9 = vpop.f32.mrf.mxu0  ;;  %v67_v12 = vpop.f32.mrf.mxu1 }
  0x85   :  { %v65_v10 = vadd.f32 %v252_v8, %v64_v9  ;;  %v68_v14 = vadd.f32 %v252_v8, %v67_v12 }
  0x87   :  { %80 = vst.msk [vmem:[#allocation2] sm:$0x3] %vm79_vm2, %v65_v10 }
  0x88   :  { %v70_v11 = vpop.f32.mrf.mxu2  ;;  %83 = vst.msk [vmem:[#allocation2] sm:$0xc] %vm82_vm3, %v65_v10  ;;  %v76_v16 = vpop.f32.mrf.mxu3 }
  0x89   :  { %v71_v13 = vadd.f32 %v252_v8, %v70_v11  ;;  %86 = vst.msk [vmem:[#allocation2] sm:$0x30] %vm85_vm4, %v65_v10  ;;  %v77_v18 = vadd.f32 %v252_v8, %v76_v16 }
  0x8a   :  { %89 = vst.msk [vmem:[#allocation2] sm:$0xc0] %vm88_vm5, %v65_v10 }
  0x8b   :  { %99 = vst.msk [vmem:[#allocation2 + $0x10] sm:$0x3] %vm79_vm2, %v71_v13 }
  0x8c   :  { %101 = vst.msk [vmem:[#allocation2 + $0x10] sm:$0xc] %vm82_vm3, %v71_v13 }
  0x8d   :  { %103 = vst.msk [vmem:[#allocation2 + $0x10] sm:$0x30] %vm85_vm4, %v71_v13 }
  0x8e   :  { %105 = vst.msk [vmem:[#allocation2 + $0x10] sm:$0xc0] %vm88_vm5, %v71_v13 }
  0x8f   :  { %91 = vst.msk [vmem:[#allocation2 + $0x8] sm:$0x3] %vm79_vm2, %v68_v14 }
  0x90   :  { %93 = vst.msk [vmem:[#allocation2 + $0x8] sm:$0xc] %vm82_vm3, %v68_v14  ;;  %v73_v15 = vpop.f32.mrf.mxu2 }
  0x91   :  { %95 = vst.msk [vmem:[#allocation2 + $0x8] sm:$0x30] %vm85_vm4, %v68_v14  ;;  %v74_v17 = vadd.f32 %v252_v8, %v73_v15 }
  0x92   :  { %97 = vst.msk [vmem:[#allocation2 + $0x8] sm:$0xc0] %vm88_vm5, %v68_v14 }
  0x93   :  { %107 = vst.msk [vmem:[#allocation2 + $0x18] sm:$0x3] %vm79_vm2, %v74_v17 }
  0x94   :  { %109 = vst.msk [vmem:[#allocation2 + $0x18] sm:$0xc] %vm82_vm3, %v74_v17 }
  0x95   :  { %111 = vst.msk [vmem:[#allocation2 + $0x18] sm:$0x30] %vm85_vm4, %v74_v17 }
  0x96   :  { %113 = vst.msk [vmem:[#allocation2 + $0x18] sm:$0xc0] %vm88_vm5, %v74_v17 }
  0x97   :  { %115 = vst.msk [vmem:[#allocation2 + $0x20] sm:$0x3] %vm79_vm2, %v77_v18 }
  0x98   :  { %117 = vst.msk [vmem:[#allocation2 + $0x20] sm:$0xc] %vm82_vm3, %v77_v18 }
  0x99   :  { %119 = vst.msk [vmem:[#allocation2 + $0x20] sm:$0x30] %vm85_vm4, %v77_v18 }
  0x9a   :  { %121 = vst.msk [vmem:[#allocation2 + $0x20] sm:$0xc0] %vm88_vm5, %v77_v18 }
  0x9b LB: > { %v131_v19 = vld [vmem:[%s379_s2] sm:$0xff]  ;;  %v130_v20 = vld [vmem:[#allocation3] sm:$0x3]  ;;  %vm136_vm6 = vcmask 64512   ;;  %s269_s11 = smov 112   ;;  %s231_s12 = sshll.u32 %s266_s0, 1  ;;  %s266_s0 = sphi %s353_s0, %s129_s0  }
  0x9c   : > { %155 = vmatpush.msra.mxu0 %v131_v19  ;;  %v253_v21 = vld [vmem:[%s380_s4] ss:$0 sm:$0xff]  ;;  %s161_s13 = scalar_lea.vmem [#allocation2], %s231_s12  ;;  %s270_s14 = smov 16  }
  0x9d   : > { %230 = vmatmul.msk.f32.vlgmr.msra.gmra.mxu0 %vm136_vm6, %v130_v20  ;;  %s271_s15 = smov 120   ;;  %s272_s16 = smov 8  }
  0x9e   : > { %s210_s19 = scalar_lea.vmem %s381_s5, %s231_s12  ;;  %s129_s0 = sadd.s32 1, %s266_s0  }
  0x9f   : > { %p126_p0 = scmp.ge.s32.totalorder %s129_s0, 20  }
  0xa1   : > { %v162_v24 = vld [vmem:[%s161_s13] sm:$0x3] }
 0x11a   : > { %v157_v22 = vpop.f32.mrf.mxu0 }
 0x11b   : > { %v158_v23 = vadd.f32 %v253_v21, %v157_v22 }
 0x11d   : > { %184 = vrot.lane.b32.xlu0 %v158_v23, %s269_s11  ;;  %v163_v25 = vadd.f32 %v162_v24, %v158_v23 }
 0x11f   : > { %v232_v26 = vmul.f32 -1.442695, %v163_v25 }
 0x121   : > { %254 = vpow2.f32 %v232_v26 }
 0x127   : > { %v255_v27 = vpop.eup %254 }
 0x128   : > { %v167_v28 = vadd.f32 1.0, %v255_v27 }
 0x12a   : > { %256 = vrcp.f32 %v167_v28  ;;  %v179_v34 = vand.u32 2147483648, %v167_v28  ;;  %vm173_vm8 = vweird.f32 %v167_v28  ;;  %v177_v35 = vand.u32 2147483647, %v167_v28 }
 0x12c   : > { %v180_v37 = vor.u32 1.1754944e-38, %v179_v34  ;;  %vm178_vm10 = vcmp.eq.f32.partialorder %v177_v35, 8.507059e+37 }
 0x130   : > { %v257_v29 = vpop.eup %256 }
 0x131   : > { %v169_v30 = vmul.f32 %v257_v29, %v167_v28  ;;  %vm174_vm7 = vweird.f32 %v257_v29 }
 0x132   : > { %vm175_vm9 = vmor %vm173_vm8, %vm174_vm7 }
 0x133   : > { %v170_v31 = vsub.f32 1.0, %v169_v30 }
 0x135   : > { %v171_v32 = vmul.f32 %v257_v29, %v170_v31 }
 0x137   : > { %v172_v33 = vadd.f32 %v257_v29, %v171_v32 }
 0x139   : > { %v176_v36 = vsel %vm175_vm9, %v257_v29, %v172_v33 }
 0x13a   : > { %v181_v39 = vsel %vm178_vm10, %v180_v37, %v176_v36 }
 0x13b   : > { %v194_v45 = vsub.f32 1.0, %v181_v39 }
 0x18f   : > { %v185_v38 = vpop.permute.xlu0 %184 }
 0x190   : > { %v187_v40 = vmul.f32 %v185_v38, %v181_v39 }
 0x192   : > { %189 = vrot.lane.b32.xlu0 %v187_v40, %s270_s14 }
 0x204   : > { %v190_v41 = vpop.permute.xlu0 %189 }
 0x205   : > { %v192_v42 = vadd.f32 %v190_v41, %v162_v24 }
 0x207   : > { %258 = vtanh.f32 %v192_v42 }
 0x20d   : > { %v259_v43 = vpop.eup %258 }
 0x20e   : > { %196 = vrot.lane.b32.xlu1 %v259_v43, %s271_s15 }
 0x216   : > { %200 = vrot.lane.b32.xlu1 %v130_v20, %s272_s16 }
 0x280   : > { %v197_v44 = vpop.permute.xlu1 %196 }
 0x281   : > { %v199_v47 = vmul.f32 %v197_v44, %v194_v45 }
 0x288   : > { %v201_v46 = vpop.permute.xlu1 %200 }
 0x289   : > { %v203_v48 = vmul.f32 %v201_v46, %v181_v39 }
 0x28b   : > { %v204_v49 = vadd.f32 %v203_v48, %v199_v47 }
 0x28d   : > { %206 = vrot.lane.b32.xlu2 %v204_v49, %s271_s15 }
 0x2e5   :  { %128 = sbr.rel (!%p126_p0) target bundleno = 155 (0x9b), region = 68 }
 0x2e7   : > { %v207_v50 = vpop.permute.xlu2 %206 }
 0x2e8   : > { %209 = vst.msk [vmem:[#allocation3] sm:$0x3] %vm122_vm1, %v207_v50 }
 0x2e9   : > { %211 = vst.msk [vmem:[%s210_s19] sm:$0x3] %vm122_vm1, %v207_v50 }

// kernel: cluster_net_forward.21
= control target key start
LH: loop header
LB: loop body
LE: loop exit
PB: predicated region body
PF: predicated region fallthrough
CT: control target
= control target key end

     0   :  { %vm47_vm0 = vcmask 1043456   ;;  %vm31_vm1 = vcmask 97280   ;;  %vm126_vm2 = vcmask 123904   ;;  %v274_v7 = vmov 0.0   ;;  %s386_s1 = inlined_call_operand.vmem [shape: f32[12,48], index: 1, kind: input, shape index: {}]   ;;  %s387_s0 = inlined_call_operand.vmem [shape: f32[40,12], index: 0, kind: input, shape index: {}]   ;;  %s388_s2 = inlined_call_operand.vmem [shape: f32[16,48], index: 2, kind: input, shape index: {}]   ;;  %s389_s4 = inlined_call_operand.vmem [shape: f32[1,48], index: 4, kind: input, shape index: {}]   ;;  %s390_s5 = inlined_call_operand.vmem [shape: f32[20,2,16], index: 5, kind: output, shape index: {}]   ;;  %s391_s3 = inlined_call_operand.vmem [shape: f32[1,48], index: 3, kind: input, shape index: {}]  }
   0x1   :  { %v26_v0 = vld [vmem:[%s386_s1 + $0x8] sm:$0xf]  ;;  %v25_v1 = vld [vmem:[%s386_s1] sm:$0xff]  ;;  %v22_v2 = vld [vmem:[%s387_s0 + $0x10] sm:$0xff]  ;;  %127 = vst.msk [vmem:[#allocation3] sm:$0x3] %vm126_vm2, %v274_v7 }
   0x2   :  { %240 = vmatpush.msk.msra.mxu2 %vm47_vm0, %v26_v0  ;;  %241 = vmatpush.msk.msra.mxu3 %vm47_vm0, %v26_v0  ;;  %v24_v3 = vld [vmem:[%s387_s0 + $0x20] sm:$0xff]  ;;  %v21_v5 = vld [vmem:[%s387_s0 + $0x8] sm:$0xff]  ;;  %v23_v6 = vld [vmem:[%s387_s0 + $0x18] sm:$0xff]  ;;  %vm83_vm3 = vcmask 386048   ;;  %vm86_vm4 = vcmask 388098   ;;  %vm89_vm5 = vcmask 390148  }
   0x3   :  { %230 = vmatpush.msk.msra.mxu0 %vm47_vm0, %v26_v0  ;;  %239 = vmatpush.msk.msra.mxu1 %vm47_vm0, %v26_v0  ;;  %v20_v4 = vld [vmem:[%s387_s0] sm:$0xff]  ;;  %vm92_vm6 = vcmask 392198   ;;  %s359_s0 = smov 0  }
   0x4   :  { %243 = vmatpush.msra.mxu2 %v25_v1  ;;  %244 = vmatpush.msra.mxu3 %v25_v1  ;;  %v258_v8 = vld [vmem:[%s391_s3] ss:$0 sm:$0xff] }
   0x5   :  { %233 = vmatmul.msk.f32.vlgmr.msra.gmra.mxu2 %vm31_vm1, %v22_v2  ;;  %235 = vmatmul.msk.f32.vlgmr.msra.gmra.mxu3 %vm31_vm1, %v24_v3 }
   0x6   :  { %66 = vmatpush.msra.mxu0 %v25_v1  ;;  %242 = vmatpush.msra.mxu1 %v25_v1 }
   0x7   :  { %231 = vmatmul.msk.f32.vlgmr.msra.gmra.mxu0 %vm31_vm1, %v20_v4  ;;  %232 = vmatmul.msk.f32.vlgmr.msra.gmra.mxu1 %vm31_vm1, %v21_v5 }
   0xd   :  { %234 = vmatmul.msk.f32.gmra.mxu2 %vm31_vm1, %v23_v6 }
  0x84   :  { %v68_v9 = vpop.f32.mrf.mxu0  ;;  %v71_v12 = vpop.f32.mrf.mxu1 }
  0x85   :  { %v69_v10 = vadd.f32 %v258_v8, %v68_v9  ;;  %v72_v14 = vadd.f32 %v258_v8, %v71_v12 }
  0x87   :  { %84 = vst.msk [vmem:[#allocation2] sm:$0x3] %vm83_vm3, %v69_v10 }
  0x88   :  { %v74_v11 = vpop.f32.mrf.mxu2  ;;  %87 = vst.msk [vmem:[#allocation2] sm:$0xc] %vm86_vm4, %v69_v10  ;;  %v80_v16 = vpop.f32.mrf.mxu3 }
  0x89   :  { %v75_v13 = vadd.f32 %v258_v8, %v74_v11  ;;  %90 = vst.msk [vmem:[#allocation2] sm:$0x30] %vm89_vm5, %v69_v10  ;;  %v81_v18 = vadd.f32 %v258_v8, %v80_v16 }
  0x8a   :  { %93 = vst.msk [vmem:[#allocation2] sm:$0xc0] %vm92_vm6, %v69_v10 }
  0x8b   :  { %103 = vst.msk [vmem:[#allocation2 + $0x10] sm:$0x3] %vm83_vm3, %v75_v13 }
  0x8c   :  { %105 = vst.msk [vmem:[#allocation2 + $0x10] sm:$0xc] %vm86_vm4, %v75_v13 }
  0x8d   :  { %107 = vst.msk [vmem:[#allocation2 + $0x10] sm:$0x30] %vm89_vm5, %v75_v13 }
  0x8e   :  { %109 = vst.msk [vmem:[#allocation2 + $0x10] sm:$0xc0] %vm92_vm6, %v75_v13 }
  0x8f   :  { %95 = vst.msk [vmem:[#allocation2 + $0x8] sm:$0x3] %vm83_vm3, %v72_v14 }
  0x90   :  { %97 = vst.msk [vmem:[#allocation2 + $0x8] sm:$0xc] %vm86_vm4, %v72_v14  ;;  %v77_v15 = vpop.f32.mrf.mxu2 }
  0x91   :  { %99 = vst.msk [vmem:[#allocation2 + $0x8] sm:$0x30] %vm89_vm5, %v72_v14  ;;  %v78_v17 = vadd.f32 %v258_v8, %v77_v15 }
  0x92   :  { %101 = vst.msk [vmem:[#allocation2 + $0x8] sm:$0xc0] %vm92_vm6, %v72_v14 }
  0x93   :  { %111 = vst.msk [vmem:[#allocation2 + $0x18] sm:$0x3] %vm83_vm3, %v78_v17 }
  0x94   :  { %113 = vst.msk [vmem:[#allocation2 + $0x18] sm:$0xc] %vm86_vm4, %v78_v17 }
  0x95   :  { %115 = vst.msk [vmem:[#allocation2 + $0x18] sm:$0x30] %vm89_vm5, %v78_v17 }
  0x96   :  { %117 = vst.msk [vmem:[#allocation2 + $0x18] sm:$0xc0] %vm92_vm6, %v78_v17 }
  0x97   :  { %119 = vst.msk [vmem:[#allocation2 + $0x20] sm:$0x3] %vm83_vm3, %v81_v18 }
  0x98   :  { %121 = vst.msk [vmem:[#allocation2 + $0x20] sm:$0xc] %vm86_vm4, %v81_v18 }
  0x99   :  { %123 = vst.msk [vmem:[#allocation2 + $0x20] sm:$0x30] %vm89_vm5, %v81_v18 }
  0x9a   :  { %125 = vst.msk [vmem:[#allocation2 + $0x20] sm:$0xc0] %vm92_vm6, %v81_v18 }
  0x9b LB: > { %v136_v19 = vld [vmem:[%s388_s2 + $0x8] sm:$0xff]  ;;  %v135_v20 = vld [vmem:[%s388_s2] sm:$0xff]  ;;  %vm141_vm7 = vcmask 130048   ;;  %s275_s13 = smov 96   ;;  %s237_s14 = sshll.u32 %s272_s0, 1  ;;  %s272_s0 = sphi %s359_s0, %s133_s0  }
  0x9c   : > { %159 = vmatpush.msra.mxu0 %v136_v19  ;;  %v134_v21 = vld [vmem:[#allocation3] sm:$0x3]  ;;  %v259_v22 = vld [vmem:[%s389_s4] ss:$0 sm:$0xff]  ;;  %s166_s15 = scalar_lea.vmem [#allocation2], %s237_s14  ;;  %s276_s16 = smov 32  }
  0x9d   : > { %s277_s17 = smov 112   ;;  %s278_s18 = smov 16  }
  0x9e   : > { %160 = vmatpush.msra.mxu0 %v135_v20  ;;  %s215_s21 = scalar_lea.vmem %s390_s5, %s237_s14  ;;  %s133_s0 = sadd.s32 1, %s272_s0  }
  0x9f   : > { %236 = vmatmul.msk.f32.vlgmr.msra.gmra.mxu0 %vm141_vm7, %v134_v21  ;;  %p130_p0 = scmp.ge.s32.totalorder %s133_s0, 20  }
  0xa1   : > { %v167_v25 = vld [vmem:[%s166_s15] sm:$0x3] }
 0x11c   : > { %v162_v23 = vpop.f32.mrf.mxu0 }
 0x11d   : > { %v163_v24 = vadd.f32 %v259_v22, %v162_v23 }
 0x11f   : > { %189 = vrot.lane.b32.xlu0 %v163_v24, %s275_s13  ;;  %v168_v26 = vadd.f32 %v167_v25, %v163_v24 }
 0x121   : > { %v238_v27 = vmul.f32 -1.442695, %v168_v26 }
 0x123   : > { %260 = vpow2.f32 %v238_v27 }
 0x129   : > { %v261_v28 = vpop.eup %260 }
 0x12a   : > { %v172_v29 = vadd.f32 1.0, %v261_v28 }
 0x12c   : > { %262 = vrcp.f32 %v172_v29  ;;  %v184_v35 = vand.u32 2147483648, %v172_v29  ;;  %vm178_vm9 = vweird.f32 %v172_v29  ;;  %v182_v36 = vand.u32 2147483647, %v172_v29 }
 0x12e   : > { %v185_v38 = vor.u32 1.1754944e-38, %v184_v35  ;;  %vm183_vm11 = vcmp.eq.f32.partialorder %v182_v36, 8.507059e+37 }
 0x132   : > { %v263_v30 = vpop.eup %262 }
 0x133   : > { %v174_v31 = vmul.f32 %v263_v30, %v172_v29  ;;  %vm179_vm8 = vweird.f32 %v263_v30 }
 0x134   : > { %vm180_vm10 = vmor %vm178_vm9, %vm179_vm8 }
 0x135   : > { %v175_v32 = vsub.f32 1.0, %v174_v31 }
 0x137   : > { %v176_v33 = vmul.f32 %v263_v30, %v175_v32 }
 0x139   : > { %v177_v34 = vadd.f32 %v263_v30, %v176_v33 }
 0x13b   : > { %v181_v37 = vsel %vm180_vm10, %v263_v30, %v177_v34 }
 0x13c   : > { %v186_v40 = vsel %vm183_vm11, %v185_v38, %v181_v37 }
 0x13d   : > { %v199_v46 = vsub.f32 1.0, %v186_v40 }
 0x191   : > { %v190_v39 = vpop.permute.xlu0 %189 }
 0x192   : > { %v192_v41 = vmul.f32 %v190_v39, %v186_v40 }
 0x194   : > { %194 = vrot.lane.b32.xlu0 %v192_v41, %s276_s16 }
 0x206   : > { %v195_v42 = vpop.permute.xlu0 %194 }
 0x207   : > { %v197_v43 = vadd.f32 %v195_v42, %v167_v25 }
 0x209   : > { %264 = vtanh.f32 %v197_v43 }
 0x20f   : > { %v265_v44 = vpop.eup %264 }
 0x210   : > { %201 = vrot.lane.b32.xlu1 %v265_v44, %s277_s17 }
 0x218   : > { %205 = vrot.lane.b32.xlu1 %v134_v21, %s278_s18 }
 0x282   : > { %v202_v45 = vpop.permute.xlu1 %201 }
 0x283   : > { %v204_v48 = vmul.f32 %v202_v45, %v199_v46 }
 0x28a   : > { %v206_v47 = vpop.permute.xlu1 %205 }
 0x28b   : > { %v208_v49 = vmul.f32 %v206_v47, %v186_v40 }
 0x28d   : > { %v209_v50 = vadd.f32 %v208_v49, %v204_v48 }
 0x28f   : > { %211 = vrot.lane.b32.xlu2 %v209_v50, %s277_s17 }
 0x2e7   :  { %132 = sbr.rel (!%p130_p0) target bundleno = 155 (0x9b), region = 68 }
 0x2e9   : > { %v212_v51 = vpop.permute.xlu2 %211 }
 0x2ea   : > { %214 = vst.msk [vmem:[#allocation3] sm:$0x3] %vm126_vm2, %v212_v51 }
 0x2eb   : > { %216 = vst.msk [vmem:[%s215_s21] sm:$0x3] %vm126_vm2, %v212_v51 }

// kernel: cluster_net_forward.23
= control target key start
LH: loop header
LB: loop body
LE: loop exit
PB: predicated region body
PF: predicated region fallthrough
CT: control target
= control target key end

     0   :  { %vm111_vm0 = vcmask 60416   ;;  %vm90_vm1 = vcmask 64512   ;;  %s1079_s0 = inlined_call_operand.vmem [shape: f32[40,8], index: 0, kind: input, shape index: {}]   ;;  %s1080_s1 = inlined_call_operand.vmem [shape: f32[40,4], index: 1, kind: input, shape index: {}]   ;;  %s1081_s2 = inlined_call_operand.vmem [shape: f32[4,8], index: 2, kind: input, shape index: {}]   ;;  %s1082_s3 = inlined_call_operand.hbm [shape: f32[1,1], index: 3, kind: output, shape index: {0}]   ;;  %s1083_s4 = inlined_call_operand.vmem [shape: f32[40,4], index: 4, kind: output, shape index: {1}]   ;;  %s1084_s5 = inlined_call_operand.vmem [shape: f32[40,4], index: 5, kind: output, shape index: {2}]  }
   0x1   :  { %v28_v0 = vld [vmem:[%s1081_s2] sm:$0xf]  ;;  %v19_v1 = vld [vmem:[%s1079_s0 + $0x8] sm:$0xff]  ;;  %v20_v2 = vld [vmem:[%s1079_s0 + $0x10] sm:$0xff] }
   0x2   :  { %v246_v3 = vmul.f32 %v28_v0, %v28_v0  ;;  %v86_v4 = vmul.f32 %v19_v1, %v19_v1  ;;  %v87_v5 = vmul.f32 %v20_v2, %v20_v2  ;;  %v18_v6 = vld [vmem:[%s1079_s0] sm:$0xff]  ;;  %740 = vmatpush.xpose.msk.msra.mxu3 %vm90_vm1, %v28_v0  ;;  %728 = vmatpush.xpose.msk.msra.mxu1 %vm90_vm1, %v28_v0  ;;  %v21_v7 = vld [vmem:[%s1079_s0 + $0x18] sm:$0xff] }
   0x3   :  { %v85_v8 = vmul.f32 %v18_v6, %v18_v6 }
   0x4   :  { %11 = vsyncpa [#allocation3], 0  ;;  %v247_v9 = vsel %vm111_vm0, %v246_v3, 0.0  ;;  %v94_v10 = vsel %vm90_vm1, %v87_v5, 0.0  ;;  %v92_v11 = vsel %vm90_vm1, %v86_v4, 0.0  ;;  %v88_v13 = vmul.f32 %v21_v7, %v21_v7  ;;  %v22_v17 = vld [vmem:[%s1079_s0 + $0x20] sm:$0xff] }
   0x5   :  { %248 = vadd.xlane.f32.xlu0 %v247_v9  ;;  %180 = vadd.xlane.f32.xlu1 %v94_v10  ;;  %v91_v12 = vsel %vm90_vm1, %v85_v8, 0.0  ;;  %v89_v18 = vmul.f32 %v22_v17, %v22_v17  ;;  %v23_v20 = vld [vmem:[%s1080_s1] sm:$0xff]  ;;  %v24_v21 = vld [vmem:[%s1080_s1 + $0x8] sm:$0xff]  ;;  %v25_v22 = vld [vmem:[%s1080_s1 + $0x10] sm:$0xff]  ;;  %vm262_vm2 = vcmask 7168   ;;  %vm61_vm13 = vcmask 326656  }
   0x6   :  { %176 = vadd.xlane.f32.xlu2 %v91_v12  ;;  %v93_v14 = vadd.f32 %v92_v11, %v91_v12  ;;  %729 = vmatmul.msk.f32.vlgmr.msra.gmra.mxu1 %vm90_vm1, %v18_v6  ;;  %v886_v16 = vsel %vm90_vm1, %v88_v13, 0.0  ;;  %v26_v23 = vld [vmem:[%s1080_s1 + $0x18] sm:$0xff]  ;;  %v27_v24 = vld [vmem:[%s1080_s1 + $0x20] sm:$0xff]  ;;  %s829_s23 = smov [#allocation2]   ;;  %s710_s26 = sshll.u32 %s1082_s3, 4  ;;  %s711_s26 = int_to_ptr.hbm [resolvable:$true] %s710_s26 }
   0x7   :  { %732 = vmatmul.msk.f32.vlgmr.msra.gmra.mxu3 %vm90_vm1, %v21_v7  ;;  %76 = vmatpush.msra.mxu0 %v22_v17  ;;  %v895_v19 = vsel %vm90_vm1, %v89_v18, 0.0  ;;  %s708_s24 = sshll.u32 %s829_s23, 4  ;;  %s709_s24 = int_to_ptr.vmem [resolvable:$true] %s708_s24 }
   0x8   :  { %v883_v15 = vadd.f32 %v94_v10, %v93_v14 }
   0x9   :  { %77 = vmatpush.msra.mxu0 %v21_v7 }
   0xb   :  { %78 = vmatpush.msra.mxu0 %v20_v2 }
   0xd   :  { %178 = vadd.xlane.f32.xlu0 %v92_v11  ;;  %182 = vadd.xlane.f32.xlu1 %v886_v16 }
   0xe   :  { %730 = vmatmul.msk.f32.gmra.mxu1 %vm90_vm1, %v19_v1  ;;  %184 = vadd.xlane.f32.xlu2 %v895_v19 }
   0xf   :  { %733 = vmatmul.msk.f32.gmra.mxu3 %vm90_vm1, %v22_v17  ;;  %79 = vmatpush.msra.mxu0 %v19_v1 }
  0x11   :  { %80 = vmatpush.msra.mxu0 %v18_v6 }
  0x16   :  { %731 = vmatmul.msk.f32.gmra.mxu1 %vm90_vm1, %v20_v2 }
  0x36   :  { %29 = vxpose.xlu0.b32.start [1/5] (short) (narrow) %v23_v20, 8 }
  0x3e   :  { %30 = vxpose.xlu0.b32.cont [2/5] (short) (narrow) %v24_v21, 8 }
  0x46   :  { %31 = vxpose.xlu0.b32.cont [3/5] (short) (narrow) %v25_v22, 8 }
  0x4e   :  { %32 = vxpose.xlu0.b32.cont [4/5] (short) (narrow) %v26_v23, 8 }
  0x56   :  { %33 = vxpose.xlu0.b32.end [5/5] (short) (narrow) %v27_v24, 8 }
  0x78   :  { %v249_v25 = vpop.xlane.xlu0 %248  ;;  %v914_v26 = vpop.xlane.xlu1 %180 }
  0x79   :  { %749 = vrsqrt.f32 %v249_v25  ;;  %v917_v28 = vpop.xlane.xlu2 %176  ;;  %vm257_vm3 = vcmp.eq.f32.partialorder %v249_v25, inf  ;;  %vm259_vm4 = vcmp.eq.f32.partialorder %v249_v25, 0.0  ;;  %v260_v47 = vand.u32 2147483648, %v249_v25 }
  0x7a   :  { %751 = vrsqrt.f32 %v914_v26  ;;  %vm217_vm7 = vcmp.eq.f32.partialorder %v914_v26, inf  ;;  %v220_v3 = vand.u32 2147483648, %v914_v26  ;;  %vm219_vm8 = vcmp.eq.f32.partialorder %v914_v26, 0.0 }
  0x7b   :  { %vm193_vm14 = vcmp.eq.f32.partialorder %v917_v28, inf  ;;  %vm195_vm15 = vcmp.eq.f32.partialorder %v917_v28, 0.0 }
  0x7f   :  { %v750_v27 = vpop.eup %749 }
  0x80   :  { %v752_v29 = vpop.eup %751  ;;  %v179_v30 = vpop.xlane.xlu0 %178  ;;  %v251_v31 = vmul.f32 %v750_v27, %v249_v25 }
  0x81   :  { %v919_v32 = vpop.xlane.xlu1 %182  ;;  %753 = vrsqrt.f32 %v179_v30  ;;  %v211_v34 = vmul.f32 %v752_v29, %v914_v26  ;;  %v185_v46 = vpop.xlane.xlu2 %184  ;;  %vm205_vm5 = vcmp.eq.f32.partialorder %v179_v30, inf  ;;  %vm207_vm6 = vcmp.eq.f32.partialorder %v179_v30, 0.0 }
  0x82   :  { %v252_v33 = vmul.f32 %v750_v27, %v251_v31  ;;  %755 = vrsqrt.f32 %v919_v32  ;;  %v208_v60 = vand.u32 2147483648, %v179_v30  ;;  %vm241_vm9 = vcmp.eq.f32.partialorder %v185_v46, inf }
  0x83   :  { %v212_v36 = vmul.f32 %v752_v29, %v211_v34  ;;  %757 = vrsqrt.f32 %v185_v46  ;;  %v244_v9 = vand.u32 2147483648, %v185_v46  ;;  %vm243_vm10 = vcmp.eq.f32.partialorder %v185_v46, 0.0  ;;  %v949_v34 = vpop.f32.mrf.mxu1 }
  0x84   :  { %v253_v35 = vmul.f32 0.5, %v252_v33  ;;  %vm229_vm11 = vcmp.eq.f32.partialorder %v919_v32, inf  ;;  %v232_v13 = vand.u32 2147483648, %v919_v32  ;;  %vm231_vm12 = vcmp.eq.f32.partialorder %v919_v32, 0.0 }
  0x85   :  { %v213_v42 = vmul.f32 0.5, %v212_v36  ;;  %759 = vrsqrt.f32 %v917_v28 }
  0x86   :  { %v254_v37 = vsub.f32 1.5, %v253_v35 }
  0x87   :  { %v754_v38 = vpop.eup %753  ;;  %v214_v50 = vsub.f32 1.5, %v213_v42 }
  0x88   :  { %v756_v39 = vpop.eup %755  ;;  %v255_v40 = vmul.f32 %v750_v27, %v254_v37  ;;  %v199_v41 = vmul.f32 %v754_v38, %v179_v30 }
  0x89   :  { %v223_v43 = vmul.f32 %v756_v39, %v919_v32  ;;  %v215_v55 = vmul.f32 %v752_v29, %v214_v50  ;;  %v758_v57 = vpop.eup %757  ;;  %v196_v29 = vand.u32 2147483648, %v917_v28 }
  0x8a   :  { %v256_v44 = vmul.f32 %v255_v40, %v249_v25  ;;  %v200_v45 = vmul.f32 %v754_v38, %v199_v41  ;;  %v235_v59 = vmul.f32 %v758_v57, %v185_v46 }
  0x8b   :  { %v224_v51 = vmul.f32 %v756_v39, %v223_v43  ;;  %v216_v62 = vmul.f32 %v215_v55, %v914_v26  ;;  %v760_v20 = vpop.eup %759  ;;  %v170_v55 = vpop.f32.mrf.mxu3 }
  0x8c   :  { %v258_v48 = vsel %vm257_vm3, %v249_v25, %v256_v44  ;;  %v201_v49 = vmul.f32 0.5, %v200_v45  ;;  %v236_v0 = vmul.f32 %v758_v57, %v235_v59  ;;  %v187_v21 = vmul.f32 %v760_v20, %v917_v28  ;;  %v164_v44 = vpop.f32.mrf.mxu1 }
  0x8d   :  { %v261_v52 = vsel %vm259_vm4, %v260_v47, %v258_v48  ;;  %v225_v56 = vmul.f32 0.5, %v224_v51  ;;  %v218_v4 = vsel %vm217_vm7, %v914_v26, %v216_v62 }
  0x8e   :  { %734 = vmatpush.xpose.msk.msrb.mxu0 %vm262_vm2, %v261_v52  ;;  %741 = vmatpush.xpose.msk.msra.mxu2 %vm262_vm2, %v261_v52  ;;  %v202_v53 = vsub.f32 1.5, %v201_v49  ;;  %v237_v2 = vmul.f32 0.5, %v236_v0  ;;  %v221_v8 = vsel %vm219_vm8, %v220_v3, %v218_v4  ;;  %v188_v22 = vmul.f32 %v760_v20, %v187_v21 }
  0x8f   :  { %742 = vmatpush.xpose.msk.msrb.mxu3 %vm262_vm2, %v261_v52  ;;  %v226_v63 = vsub.f32 1.5, %v225_v56 }
  0x90   :  { %v203_v54 = vmul.f32 %v754_v38, %v202_v53  ;;  %v238_v6 = vsub.f32 1.5, %v237_v2  ;;  %v189_v23 = vmul.f32 0.5, %v188_v22 }
  0x91   :  { %v227_v5 = vmul.f32 %v756_v39, %v226_v63 }
  0x92   :  { %v204_v58 = vmul.f32 %v203_v54, %v179_v30  ;;  %v239_v7 = vmul.f32 %v758_v57, %v238_v6  ;;  %v190_v24 = vsub.f32 1.5, %v189_v23 }
  0x93   :  { %v228_v10 = vmul.f32 %v227_v5, %v919_v32 }
  0x94   :  { %v206_v61 = vsel %vm205_vm5, %v179_v30, %v204_v58  ;;  %v240_v11 = vmul.f32 %v239_v7, %v185_v46  ;;  %v191_v25 = vmul.f32 %v760_v20, %v190_v24  ;;  %v951_v7 = vpop.f32.mrf.mxu3 }
  0x95   :  { %v209_v1 = vsel %vm207_vm6, %v208_v60, %v206_v61  ;;  %v230_v17 = vsel %vm229_vm11, %v919_v32, %v228_v10 }
  0x96   :  { %736 = vmatmul.msk.f32.vlgmr.msra.gmra.mxu2 %vm262_vm2, %v209_v1  ;;  %v242_v12 = vsel %vm241_vm9, %v185_v46, %v240_v11  ;;  %v233_v18 = vsel %vm231_vm12, %v232_v13, %v230_v17  ;;  %v192_v27 = vmul.f32 %v191_v25, %v917_v28  ;;  %vm473_vm12 = vcmask 31744  }
  0x97   :  { %v245_v14 = vsel %vm243_vm10, %v244_v9, %v242_v12 }
  0x98   :  { %739 = vmatmul.msk.f32.vlgmr.msrb.gmra.mxu3 %vm262_vm2, %v245_v14  ;;  %v194_v30 = vsel %vm193_vm14, %v917_v28, %v192_v27 }
  0x99   :  { %v197_v31 = vsel %vm195_vm15, %v196_v29, %v194_v30 }
  0x9e   :  { %737 = vmatmul.msk.f32.gmra.mxu2 %vm262_vm2, %v221_v8 }
  0xa6   :  { %738 = vmatmul.msk.f32.gmra.mxu2 %vm262_vm2, %v233_v18 }
  0xda   :  { %v45_v26 = vpop.trf.xlu0 }
  0xdb   :  { %727 = vmatmul.msk.f32.vlgmr.msra.gmra.mxu0 %vm61_vm13, %v45_v26 }
  0xe3   :  { %735 = vmatmul.msk.f32.vlgmr.msrb.gmra.mxu0 %vm262_vm2, %v197_v31 }
 0x119   :  { %v301_v32 = vpop.f32.mrf.mxu2 }
 0x11a   :  { %v314_v33 = vmax.f32 %v301_v32, 1e-08 }
 0x11b   :  { %v310_v17 = vpop.f32.mrf.mxu3 }
 0x11c   :  { %761 = vrcp.f32 %v314_v33  ;;  %v344_v39 = vand.u32 2147483648, %v314_v33  ;;  %v342_v41 = vand.u32 2147483647, %v314_v33  ;;  %vm338_vm3 = vweird.f32 %v314_v33 }
 0x11d   :  { %v317_v22 = vmax.f32 %v310_v17, 1e-08 }
 0x11e   :  { %v345_v45 = vor.u32 1.1754944e-38, %v344_v39  ;;  %vm343_vm2 = vcmp.eq.f32.partialorder %v342_v41, 8.507059e+37 }
 0x121   :  { %v304_v35 = vpop.f32.mrf.mxu2 }
 0x122   :  { %v762_v36 = vpop.eup %761  ;;  %v315_v12 = vmax.f32 %v304_v35, 1e-08 }
 0x123   :  { %v334_v37 = vmul.f32 %v762_v36, %v314_v33  ;;  %vm339_vm1 = vweird.f32 %v762_v36 }
 0x124   :  { %vm340_vm4 = vmor %vm338_vm3, %vm339_vm1 }
 0x125   :  { %v335_v38 = vsub.f32 1.0, %v334_v37 }
 0x127   :  { %v336_v40 = vmul.f32 %v762_v36, %v335_v38  ;;  %v359_v38 = vand.u32 2147483648, %v315_v12 }
 0x129   :  { %v307_v42 = vpop.f32.mrf.mxu2  ;;  %v337_v43 = vadd.f32 %v762_v36, %v336_v40  ;;  %v357_v40 = vand.u32 2147483647, %v315_v12 }
 0x12a   :  { %v316_v28 = vmax.f32 %v307_v42, 1e-08 }
 0x12b   :  { %v341_v46 = vsel %vm340_vm4, %v762_v36, %v337_v43  ;;  %vm353_vm4 = vweird.f32 %v315_v12 }
 0x12c   :  { %763 = vrcp.f32 %v316_v28  ;;  %v346_v47 = vsel %vm343_vm2, %v345_v45, %v341_v46  ;;  %v374_v52 = vand.u32 2147483648, %v316_v28  ;;  %vm368_vm5 = vweird.f32 %v316_v28 }
 0x12d   :  { %v347_v48 = vmul.f32 %v346_v47, %v164_v44  ;;  %v372_v54 = vand.u32 2147483647, %v316_v28  ;;  %v389_v45 = vand.u32 2147483648, %v317_v22  ;;  %v387_v47 = vand.u32 2147483647, %v317_v22 }
 0x12e   :  { %v375_v58 = vor.u32 1.1754944e-38, %v374_v52 }
 0x12f   :  { %v394_v49 = vadd.f32 1.0, %v347_v48  ;;  %vm373_vm8 = vcmp.eq.f32.partialorder %v372_v54, 8.507059e+37  ;;  %v167_v48 = vpop.f32.mrf.mxu1 }
 0x131   :  { %765 = vrcp.f32 %v394_v49  ;;  %v424_v63 = vand.u32 2147483648, %v394_v49  ;;  %v422_v2 = vand.u32 2147483647, %v394_v49  ;;  %vm418_vm10 = vweird.f32 %v394_v49 }
 0x132   :  { %v764_v50 = vpop.eup %763 }
 0x133   :  { %v364_v51 = vmul.f32 %v764_v50, %v316_v28  ;;  %vm369_vm6 = vweird.f32 %v764_v50  ;;  %v425_v6 = vor.u32 1.1754944e-38, %v424_v63  ;;  %vm423_vm13 = vcmp.eq.f32.partialorder %v422_v2, 8.507059e+37 }
 0x134   :  { %vm370_vm7 = vmor %vm368_vm5, %vm369_vm6  ;;  %v360_v28 = vor.u32 1.1754944e-38, %v359_v38  ;;  %vm383_vm6 = vweird.f32 %v317_v22 }
 0x135   :  { %v365_v53 = vsub.f32 1.0, %v364_v51  ;;  %v390_v51 = vor.u32 1.1754944e-38, %v389_v45 }
 0x137   :  { %v766_v56 = vpop.eup %765  ;;  %v366_v57 = vmul.f32 %v764_v50, %v365_v53 }
 0x138   :  { %v414_v59 = vmul.f32 %v766_v56, %v394_v49  ;;  %vm419_vm9 = vweird.f32 %v766_v56 }
 0x139   :  { %v367_v60 = vadd.f32 %v764_v50, %v366_v57  ;;  %vm420_vm11 = vmor %vm418_vm10, %vm419_vm9  ;;  %vm388_vm10 = vcmp.eq.f32.partialorder %v387_v47, 8.507059e+37 }
 0x13a   :  { %v415_v61 = vsub.f32 1.0, %v414_v59 }
 0x13b   :  { %v371_v62 = vsel %vm370_vm7, %v764_v50, %v367_v60 }
 0x13c   :  { %v376_v0 = vsel %vm373_vm8, %v375_v58, %v371_v62  ;;  %v416_v1 = vmul.f32 %v766_v56, %v415_v61  ;;  %vm358_vm8 = vcmp.eq.f32.partialorder %v357_v40, 8.507059e+37 }
 0x13d   :  { %v377_v3 = vmul.f32 %v376_v0, %v170_v55 }
 0x13e   :  { %v417_v4 = vadd.f32 %v766_v56, %v416_v1 }
 0x13f   :  { %v396_v5 = vadd.f32 1.0, %v377_v3 }
 0x140   :  { %v421_v8 = vsel %vm420_vm11, %v766_v56, %v417_v4 }
 0x141   :  { %767 = vrcp.f32 %v396_v5  ;;  %v953_v9 = vsel %vm423_vm13, %v425_v6, %v421_v8  ;;  %v454_v14 = vand.u32 2147483648, %v396_v5  ;;  %vm448_vm14 = vweird.f32 %v396_v5 }
 0x142   :  { %v477_v10 = vsel %vm473_vm12, %v953_v9, 0.0  ;;  %v452_v20 = vand.u32 2147483647, %v396_v5  ;;  %769 = vrcp.f32 %v315_v12  ;;  %v97_v6 = vadd.f32 %v886_v16, %v883_v15 }
 0x143   :  { %478 = vadd.xlane.f32.xlu2 %v477_v10  ;;  %v455_v23 = vor.u32 1.1754944e-38, %v454_v14  ;;  %771 = vrcp.f32 %v317_v22 }
 0x144   :  { %vm453_vm3 = vcmp.eq.f32.partialorder %v452_v20, 8.507059e+37  ;;  %v99_v10 = vadd.f32 %v895_v19, %v97_v6 }
 0x147   :  { %v768_v11 = vpop.eup %767 }
 0x148   :  { %v444_v13 = vmul.f32 %v768_v11, %v396_v5  ;;  %vm449_vm15 = vweird.f32 %v768_v11  ;;  %v770_v26 = vpop.eup %769 }
 0x149   :  { %vm450_vm1 = vmor %vm448_vm14, %vm449_vm15  ;;  %v349_v30 = vmul.f32 %v770_v26, %v315_v12  ;;  %v772_v31 = vpop.eup %771  ;;  %vm354_vm2 = vweird.f32 %v770_v26 }
 0x14a   :  { %v445_v18 = vsub.f32 1.0, %v444_v13  ;;  %v379_v35 = vmul.f32 %v772_v31, %v317_v22  ;;  %vm355_vm5 = vmor %vm353_vm4, %vm354_vm2  ;;  %vm384_vm7 = vweird.f32 %v772_v31 }
 0x14b   :  { %v350_v32 = vsub.f32 1.0, %v349_v30  ;;  %vm385_vm9 = vmor %vm383_vm6, %vm384_vm7 }
 0x14c   :  { %v446_v21 = vmul.f32 %v768_v11, %v445_v18  ;;  %v380_v37 = vsub.f32 1.0, %v379_v35 }
 0x14d   :  { %v351_v36 = vmul.f32 %v770_v26, %v350_v32 }
 0x14e   :  { %v447_v24 = vadd.f32 %v768_v11, %v446_v21  ;;  %v381_v43 = vmul.f32 %v772_v31, %v380_v37 }
 0x14f   :  { %v352_v39 = vadd.f32 %v770_v26, %v351_v36 }
 0x150   :  { %v451_v25 = vsel %vm450_vm1, %v768_v11, %v447_v24  ;;  %v382_v46 = vadd.f32 %v772_v31, %v381_v43 }
 0x151   :  { %v957_v27 = vsel %vm453_vm3, %v455_v23, %v451_v25  ;;  %v356_v44 = vsel %vm355_vm5, %v770_v26, %v352_v39 }
 0x152   :  { %v483_v29 = vsel %vm473_vm12, %v957_v27, 0.0  ;;  %v361_v49 = vsel %vm358_vm8, %v360_v28, %v356_v44  ;;  %v386_v52 = vsel %vm385_vm9, %v772_v31, %v382_v46 }
 0x153   :  { %484 = vadd.xlane.f32.xlu2 %v483_v29  ;;  %v362_v53 = vmul.f32 %v361_v49, %v167_v48  ;;  %v391_v56 = vsel %vm388_vm10, %v390_v51, %v386_v52 }
 0x154   :  { %v392_v62 = vmul.f32 %v391_v56, %v951_v7 }
 0x155   :  { %v395_v58 = vadd.f32 1.0, %v362_v53 }
 0x156   :  { %v397_v3 = vadd.f32 1.0, %v392_v62 }
 0x157   :  { %vm433_vm4 = vweird.f32 %v395_v58  ;;  %v437_v16 = vand.u32 2147483647, %v395_v58  ;;  %v439_v19 = vand.u32 2147483648, %v395_v58 }
 0x158   :  { %v961_v33 = vpop.f32.mrf.mxu0  ;;  %vm463_vm9 = vweird.f32 %v397_v3  ;;  %v469_v36 = vand.u32 2147483648, %v397_v3  ;;  %v467_v38 = vand.u32 2147483647, %v397_v3 }
 0x159   :  { %v440_v30 = vor.u32 1.1754944e-38, %v439_v19  ;;  %vm438_vm8 = vcmp.eq.f32.partialorder %v437_v16, 8.507059e+37  ;;  %v110_v28 = vmul.f32 %v961_v33, %v961_v33 }
 0x15a   :  { %v470_v40 = vor.u32 1.1754944e-38, %v469_v36 }
 0x15b   :  { %100 = vadd.xlane.f32.xlu2 %v99_v10  ;;  %v112_v44 = vsel %vm111_vm0, %v110_v28, 0.0 }
 0x160   :  { %v298_v41 = vpop.f32.mrf.mxu0 }
 0x161   :  { %v313_v42 = vmax.f32 %v298_v41, 1e-08 }
 0x163   :  { %773 = vrcp.f32 %v313_v42  ;;  %v329_v57 = vand.u32 2147483648, %v313_v42  ;;  %v327_v60 = vand.u32 2147483647, %v313_v42  ;;  %vm323_vm13 = vweird.f32 %v313_v42 }
 0x164   :  { %775 = vrcp.f32 %v395_v58 }
 0x165   :  { %v330_v63 = vor.u32 1.1754944e-38, %v329_v57  ;;  %vm328_vm15 = vcmp.eq.f32.partialorder %v327_v60, 8.507059e+37 }
 0x169   :  { %v774_v50 = vpop.eup %773 }
 0x16a   :  { %v319_v54 = vmul.f32 %v774_v50, %v313_v42  ;;  %vm324_vm11 = vweird.f32 %v774_v50  ;;  %v776_v5 = vpop.eup %775 }
 0x16b   :  { %vm325_vm14 = vmor %vm323_vm13, %vm324_vm11  ;;  %v429_v8 = vmul.f32 %v776_v5, %v395_v58  ;;  %vm434_vm2 = vweird.f32 %v776_v5  ;;  %vm468_vm13 = vcmp.eq.f32.partialorder %v467_v38, 8.507059e+37 }
 0x16c   :  { %v320_v55 = vsub.f32 1.0, %v319_v54  ;;  %vm435_vm7 = vmor %vm433_vm4, %vm434_vm2 }
 0x16d   :  { %v430_v13 = vsub.f32 1.0, %v429_v8 }
 0x16e   :  { %v321_v59 = vmul.f32 %v774_v50, %v320_v55 }
 0x16f   :  { %v431_v21 = vmul.f32 %v776_v5, %v430_v13 }
 0x170   :  { %v322_v61 = vadd.f32 %v774_v50, %v321_v59 }
 0x171   :  { %v432_v24 = vadd.f32 %v776_v5, %v431_v21 }
 0x172   :  { %v326_v0 = vsel %vm325_vm14, %v774_v50, %v322_v61 }
 0x173   :  { %v331_v1 = vsel %vm328_vm15, %v330_v63, %v326_v0  ;;  %v436_v31 = vsel %vm435_vm7, %v776_v5, %v432_v24 }
 0x174   :  { %v332_v2 = vmul.f32 %v331_v1, %v949_v34  ;;  %v972_v35 = vsel %vm438_vm8, %v440_v30, %v436_v31 }
 0x175   :  { %v480_v39 = vsel %vm473_vm12, %v972_v35, 0.0 }
 0x176   :  { %v393_v4 = vadd.f32 1.0, %v332_v2 }
 0x178   :  { %777 = vrcp.f32 %v393_v4  ;;  %v409_v17 = vand.u32 2147483648, %v393_v4  ;;  %v407_v20 = vand.u32 2147483647, %v393_v4  ;;  %vm403_vm3 = vweird.f32 %v393_v4 }
 0x179   :  { %779 = vrcp.f32 %v397_v3 }
 0x17a   :  { %v410_v15 = vor.u32 1.1754944e-38, %v409_v17  ;;  %vm408_vm6 = vcmp.eq.f32.partialorder %v407_v20, 8.507059e+37 }
 0x17e   :  { %v778_v7 = vpop.eup %777 }
 0x17f   :  { %v780_v11 = vpop.eup %779  ;;  %v399_v12 = vmul.f32 %v778_v7, %v393_v4  ;;  %vm404_vm1 = vweird.f32 %v778_v7 }
 0x180   :  { %v459_v18 = vmul.f32 %v780_v11, %v397_v3  ;;  %vm405_vm5 = vmor %vm403_vm3, %vm404_vm1  ;;  %vm464_vm10 = vweird.f32 %v780_v11 }
 0x181   :  { %v400_v14 = vsub.f32 1.0, %v399_v12  ;;  %vm465_vm11 = vmor %vm463_vm9, %vm464_vm10 }
 0x182   :  { %v460_v25 = vsub.f32 1.0, %v459_v18 }
 0x183   :  { %v401_v34 = vmul.f32 %v778_v7, %v400_v14 }
 0x184   :  { %v461_v32 = vmul.f32 %v780_v11, %v460_v25 }
 0x185   :  { %v402_v22 = vadd.f32 %v778_v7, %v401_v34 }
 0x186   :  { %v462_v37 = vadd.f32 %v780_v11, %v461_v32 }
 0x187   :  { %v406_v23 = vsel %vm405_vm5, %v778_v7, %v402_v22 }
 0x188   :  { %v968_v26 = vsel %vm408_vm6, %v410_v15, %v406_v23  ;;  %v466_v41 = vsel %vm465_vm11, %v780_v11, %v462_v37 }
 0x189   :  { %v474_v29 = vsel %vm473_vm12, %v968_v26, 0.0  ;;  %v976_v42 = vsel %vm468_vm13, %v470_v40, %v466_v41 }
 0x18a   :  { %475 = vadd.xlane.f32.xlu1 %v474_v29  ;;  %v486_v43 = vsel %vm473_vm12, %v976_v42, 0.0 }
 0x192   :  { %481 = vadd.xlane.f32.xlu1 %v480_v39 }
 0x19a   :  { %487 = vadd.xlane.f32.xlu1 %v486_v43 }
 0x1a2   :  { %113 = vadd.xlane.f32.xlu1 %v112_v44 }
 0x1b6   :  { %v479_v45 = vpop.xlane.xlu2 %478 }
 0x1b7   :  { %781 = vrcp.f32 %v479_v45  ;;  %v515_v49 = vand.u32 2147483648, %v479_v45  ;;  %v513_v51 = vand.u32 2147483647, %v479_v45  ;;  %vm509_vm15 = vweird.f32 %v479_v45 }
 0x1b9   :  { %v516_v53 = vor.u32 1.1754944e-38, %v515_v49  ;;  %vm514_vm3 = vcmp.eq.f32.partialorder %v513_v51, 8.507059e+37 }
 0x1bd   :  { %v782_v46 = vpop.eup %781 }
 0x1be   :  { %v505_v47 = vmul.f32 %v782_v46, %v479_v45  ;;  %vm510_vm14 = vweird.f32 %v782_v46 }
 0x1bf   :  { %vm511_vm1 = vmor %vm509_vm15, %vm510_vm14 }
 0x1c0   :  { %v506_v48 = vsub.f32 1.0, %v505_v47 }
 0x1c2   :  { %v507_v50 = vmul.f32 %v782_v46, %v506_v48 }
 0x1c4   :  { %v508_v52 = vadd.f32 %v782_v46, %v507_v50 }
 0x1c6   :  { %v512_v54 = vsel %vm511_vm1, %v782_v46, %v508_v52  ;;  %v485_v55 = vpop.xlane.xlu2 %484 }
 0x1c7   :  { %v517_v33 = vsel %vm514_vm3, %v516_v53, %v512_v54  ;;  %783 = vrcp.f32 %v485_v55  ;;  %v545_v59 = vand.u32 2147483648, %v485_v55  ;;  %vm539_vm0 = vweird.f32 %v485_v55 }
 0x1c8   :  { %v984_v56 = vmul.f32 %v517_v33, %v953_v9  ;;  %v543_v61 = vand.u32 2147483647, %v485_v55 }
 0x1c9   :  { %v546_v63 = vor.u32 1.1754944e-38, %v545_v59 }
 0x1ca   :  { %694 = vst.msk [vmem:[%s1083_s4 + $0x8] sm:$0xff] %vm473_vm12, %v984_v56  ;;  %vm544_vm5 = vcmp.eq.f32.partialorder %v543_v61, 8.507059e+37  ;;  %v570_v45 = vsel %vm473_vm12, %v984_v56, 0.0 }
 0x1cd   :  { %v784_v57 = vpop.eup %783 }
 0x1ce   :  { %v535_v58 = vmul.f32 %v784_v57, %v485_v55  ;;  %vm540_vm4 = vweird.f32 %v784_v57  ;;  %v101_v3 = vpop.xlane.xlu2 %100 }
 0x1cf   :  { %vm541_vm2 = vmor %vm539_vm0, %vm540_vm4  ;;  %v102_v4 = vrot.slane %v101_v3, 4 }
 0x1d0   :  { %v536_v60 = vsub.f32 1.0, %v535_v58 }
 0x1d1   :  { %v103_v5 = vadd.f32 %v102_v4, %v101_v3 }
 0x1d2   :  { %v537_v62 = vmul.f32 %v784_v57, %v536_v60 }
 0x1d3   :  { %v104_v6 = vrot.slane %v103_v5, 2 }
 0x1d4   :  { %v538_v0 = vadd.f32 %v784_v57, %v537_v62 }
 0x1d5   :  { %v105_v10 = vadd.f32 %v104_v6, %v103_v5 }
 0x1d6   :  { %v542_v9 = vsel %vm541_vm2, %v784_v57, %v538_v0 }
 0x1d7   :  { %v547_v1 = vsel %vm544_vm5, %v546_v63, %v542_v9  ;;  %v106_v7 = vrot.slane %v105_v10, 1 }
 0x1d8   :  { %v992_v2 = vmul.f32 %v547_v1, %v957_v27 }
 0x1d9   :  { %v107_v11 = vadd.f32 %v106_v7, %v105_v10 }
 0x1da   :  { %696 = vst.msk [vmem:[%s1083_s4 + $0x18] sm:$0xff] %vm473_vm12, %v992_v2 }
 0x1db   :  { %743 = vpush %v107_v11 }
 0x1fd   :  { %v476_v8 = vpop.xlane.xlu1 %475 }
 0x1fe   :  { %785 = vrcp.f32 %v476_v8  ;;  %v500_v18 = vand.u32 2147483648, %v476_v8  ;;  %v498_v34 = vand.u32 2147483647, %v476_v8  ;;  %vm494_vm7 = vweird.f32 %v476_v8 }
 0x200   :  { %v501_v15 = vor.u32 1.1754944e-38, %v500_v18  ;;  %vm499_vm9 = vcmp.eq.f32.partialorder %v498_v34, 8.507059e+37  ;;  %v567_v34 = vmul.f32 %v992_v2, %v992_v2 }
 0x204   :  { %v786_v12 = vpop.eup %785 }
 0x205   :  { %v490_v13 = vmul.f32 %v786_v12, %v476_v8  ;;  %v482_v27 = vpop.xlane.xlu1 %481  ;;  %vm495_vm6 = vweird.f32 %v786_v12 }
 0x206   :  { %787 = vrcp.f32 %v482_v27  ;;  %vm496_vm8 = vmor %vm494_vm7, %vm495_vm6  ;;  %v530_v25 = vand.u32 2147483648, %v482_v27  ;;  %v528_v31 = vand.u32 2147483647, %v482_v27  ;;  %vm524_vm11 = vweird.f32 %v482_v27 }
 0x207   :  { %v491_v14 = vsub.f32 1.0, %v490_v13  ;;  %vm124_vm7 = vcmask 0  }
 0x208   :  { %v531_v37 = vor.u32 1.1754944e-38, %v530_v25  ;;  %vm529_vm14 = vcmp.eq.f32.partialorder %v528_v31, 8.507059e+37 }
 0x209   :  { %v492_v17 = vmul.f32 %v786_v12, %v491_v14  ;;  %v565_v14 = vmul.f32 %v984_v56, %v984_v56 }
 0x20b   :  { %v493_v20 = vadd.f32 %v786_v12, %v492_v17 }
 0x20c   :  { %v788_v21 = vpop.eup %787 }
 0x20d   :  { %v497_v22 = vsel %vm496_vm8, %v786_v12, %v493_v20  ;;  %v520_v16 = vmul.f32 %v788_v21, %v482_v27  ;;  %v488_v19 = vpop.xlane.xlu1 %487  ;;  %vm525_vm10 = vweird.f32 %v788_v21 }
 0x20e   :  { %789 = vrcp.f32 %v488_v19  ;;  %v502_v24 = vsel %vm499_vm9, %v501_v15, %v497_v22  ;;  %vm526_vm13 = vmor %vm524_vm11, %vm525_vm10  ;;  %v560_v46 = vand.u32 2147483648, %v488_v19  ;;  %v558_v51 = vand.u32 2147483647, %v488_v19 }
 0x20f   :  { %v521_v23 = vsub.f32 1.0, %v520_v16  ;;  %v1000_v29 = vmul.f32 %v502_v24, %v968_v26  ;;  %vm554_vm1 = vweird.f32 %v488_v19 }
 0x210   :  { %v561_v55 = vor.u32 1.1754944e-38, %v560_v46  ;;  %vm559_vm0 = vcmp.eq.f32.partialorder %v558_v51, 8.507059e+37 }
 0x211   :  { %v522_v30 = vmul.f32 %v788_v21, %v521_v23  ;;  %693 = vst.msk [vmem:[%s1083_s4] sm:$0xff] %vm473_vm12, %v1000_v29  ;;  %v569_v26 = vsel %vm473_vm12, %v1000_v29, 0.0  ;;  %v564_v17 = vmul.f32 %v1000_v29, %v1000_v29 }
 0x212   :  { %v571_v48 = vadd.f32 %v570_v45, %v569_v26 }
 0x213   :  { %v523_v32 = vadd.f32 %v788_v21, %v522_v30 }
 0x214   :  { %v790_v36 = vpop.eup %789 }
 0x215   :  { %v527_v38 = vsel %vm526_vm13, %v788_v21, %v523_v32  ;;  %v550_v39 = vmul.f32 %v790_v36, %v488_v19  ;;  %v114_v40 = vpop.xlane.xlu1 %113  ;;  %vm555_vm15 = vweird.f32 %v790_v36 }
 0x216   :  { %v532_v41 = vsel %vm529_vm14, %v531_v37, %v527_v38  ;;  %v115_v43 = vrot.slane %v114_v40, 4  ;;  %vm556_vm3 = vmor %vm554_vm1, %vm555_vm15 }
 0x217   :  { %v533_v28 = vmul.f32 %v532_v41, %v972_v35  ;;  %v551_v44 = vsub.f32 1.0, %v550_v39  ;;  %v574_v35 = vsel %vm473_vm12, %v992_v2, 0.0 }
 0x218   :  { %v116_v47 = vadd.f32 %v115_v43, %v114_v40 }
 0x219   :  { %v572_v49 = vsel %vm473_vm12, %v533_v28, 0.0  ;;  %695 = vst.msk [vmem:[%s1083_s4 + $0x10] sm:$0xff] %vm473_vm12, %v533_v28  ;;  %v552_v50 = vmul.f32 %v790_v36, %v551_v44  ;;  %v566_v19 = vmul.f32 %v533_v28, %v533_v28 }
 0x21a   :  { %v117_v52 = vrot.slane %v116_v47, 2  ;;  %v573_v53 = vadd.f32 %v572_v49, %v571_v48 }
 0x21b   :  { %v553_v54 = vadd.f32 %v790_v36, %v552_v50 }
 0x21c   :  { %v118_v33 = vadd.f32 %v117_v52, %v116_v47  ;;  %v575_v57 = vadd.f32 %v574_v35, %v573_v53 }
 0x21d   :  { %v557_v58 = vsel %vm556_vm3, %v790_v36, %v553_v54 }
 0x21e   :  { %v562_v59 = vsel %vm559_vm0, %v561_v55, %v557_v58  ;;  %v119_v60 = vrot.slane %v118_v33, 1 }
 0x21f   :  { %v563_v61 = vmul.f32 %v562_v59, %v976_v42 }
 0x220   :  { %v120_v62 = vadd.f32 %v119_v60, %v118_v33 }
 0x221   :  { %v576_v63 = vsel %vm473_vm12, %v563_v61, 0.0  ;;  %697 = vst.msk [vmem:[%s1083_s4 + $0x20] sm:$0xff] %vm473_vm12, %v563_v61  ;;  %v568_v25 = vmul.f32 %v563_v61, %v563_v61  ;;  %s744_s4 = spop %743 }
 0x222   :  { %745 = vpush %v120_v62  ;;  %v577_v0 = vadd.f32 %v576_v63, %v575_v57  ;;  %v109_v30 = vstv %s744_s4 }
 0x224   :  { %v578_v9 = vrot.slane %v577_v0, 4 }
 0x226   :  { %v579_v1 = vadd.f32 %v578_v9, %v577_v0 }
 0x228   :  { %v580_v3 = vrot.slane %v579_v1, 2 }
 0x22a   :  { %v581_v4 = vadd.f32 %v580_v3, %v579_v1 }
 0x22c   :  { %v582_v5 = vrot.slane %v581_v4, 1 }
 0x22e   :  { %v583_v6 = vadd.f32 %v582_v5, %v581_v4 }
 0x230   :  { %791 = vrcp.f32 %v583_v6  ;;  %v595_v7 = vand.u32 2147483648, %v583_v6  ;;  %v593_v12 = vand.u32 2147483647, %v583_v6  ;;  %vm589_vm2 = vweird.f32 %v583_v6 }
 0x232   :  { %v596_v27 = vor.u32 1.1754944e-38, %v595_v7  ;;  %vm594_vm6 = vcmp.eq.f32.partialorder %v593_v12, 8.507059e+37 }
 0x236   :  { %v792_v8 = vpop.eup %791 }
 0x237   :  { %v585_v10 = vmul.f32 %v792_v8, %v583_v6  ;;  %vm590_vm4 = vweird.f32 %v792_v8 }
 0x238   :  { %vm591_vm5 = vmor %vm589_vm2, %vm590_vm4 }
 0x239   :  { %v586_v42 = vsub.f32 1.0, %v585_v10 }
 0x23b   :  { %v587_v11 = vmul.f32 %v792_v8, %v586_v42 }
 0x23d   :  { %v588_v13 = vadd.f32 %v792_v8, %v587_v11 }
 0x23f   :  { %v592_v18 = vsel %vm591_vm5, %v792_v8, %v588_v13 }
 0x240   :  { %v597_v20 = vsel %vm594_vm6, %v596_v27, %v592_v18 }
 0x241   :  { %v1031_v21 = vmul.f32 %v597_v20, %v564_v17  ;;  %v1033_v22 = vmul.f32 %v597_v20, %v565_v14  ;;  %v1035_v15 = vmul.f32 %v597_v20, %v567_v34  ;;  %v1041_v23 = vmul.f32 %v597_v20, %v566_v19 }
 0x242   :  { %v1047_v29 = vmul.f32 %v597_v20, %v568_v25 }
 0x243   :  { %v603_v16 = vsel %vm473_vm12, %v1031_v21, 0.0  ;;  %v606_v56 = vsel %vm473_vm12, %v1033_v22, 0.0  ;;  %v609_v2 = vsel %vm473_vm12, %v1041_v23, 0.0  ;;  %v612_v24 = vsel %vm473_vm12, %v1035_v15, 0.0 }
 0x244   :  { %604 = vadd.xlane.f32.xlu2 %v603_v16  ;;  %607 = vadd.xlane.f32.xlu1 %v606_v56  ;;  %v615_v31 = vsel %vm473_vm12, %v1047_v29, 0.0 }
 0x24c   :  { %610 = vadd.xlane.f32.xlu2 %v609_v2  ;;  %613 = vadd.xlane.f32.xlu1 %v612_v24 }
 0x253   :  { %s746_s22 = spop %745 }
 0x254   :  { %v122_v32 = vstv %s746_s22  ;;  %616 = vadd.xlane.f32.xlu2 %v615_v31 }
 0x255   :  { %v123_v36 = vsub.f32 %v109_v30, %v122_v32 }
 0x257   :  { %125 = vst.msk [vmem:[#allocation2] sm:$0x1] %vm124_vm7, %v123_v36 }
 0x258   :  { %713 = dma.vmem_to_hbm [thread:$0]  %s709_s24, 16, %s711_s26, [#allocation3]  }
 0x2b7   :  { %v605_v37 = vpop.xlane.xlu2 %604  ;;  %v608_v38 = vpop.xlane.xlu1 %607 }
 0x2b8   :  { %793 = vrcp.f32 %v605_v37  ;;  %v629_v45 = vand.u32 2147483648, %v605_v37  ;;  %v627_v48 = vand.u32 2147483647, %v605_v37  ;;  %v644_v49 = vand.u32 2147483648, %v608_v38 }
 0x2b9   :  { %795 = vrcp.f32 %v608_v38  ;;  %v642_v51 = vand.u32 2147483647, %v608_v38  ;;  %vm623_vm10 = vweird.f32 %v605_v37  ;;  %vm638_vm13 = vweird.f32 %v608_v38 }
 0x2ba   :  { %v630_v35 = vor.u32 1.1754944e-38, %v629_v45  ;;  %vm628_vm14 = vcmp.eq.f32.partialorder %v627_v48, 8.507059e+37  ;;  %v645_v57 = vor.u32 1.1754944e-38, %v644_v49 }
 0x2bb   :  { %vm643_vm1 = vcmp.eq.f32.partialorder %v642_v51, 8.507059e+37 }
 0x2be   :  { %v794_v39 = vpop.eup %793 }
 0x2bf   :  { %v796_v40 = vpop.eup %795  ;;  %v619_v26 = vmul.f32 %v794_v39, %v605_v37  ;;  %v611_v41 = vpop.xlane.xlu2 %610  ;;  %vm624_vm8 = vweird.f32 %v794_v39 }
 0x2c0   :  { %v614_v43 = vpop.xlane.xlu1 %613  ;;  %v634_v28 = vmul.f32 %v796_v40, %v608_v38  ;;  %797 = vrcp.f32 %v611_v41  ;;  %vm639_vm9 = vweird.f32 %v796_v40  ;;  %vm625_vm11 = vmor %vm623_vm10, %vm624_vm8  ;;  %v659_v3 = vand.u32 2147483648, %v611_v41 }
 0x2c1   :  { %v620_v44 = vsub.f32 1.0, %v619_v26  ;;  %799 = vrcp.f32 %v614_v43  ;;  %vm640_vm15 = vmor %vm638_vm13, %vm639_vm9  ;;  %v657_v6 = vand.u32 2147483647, %v611_v41  ;;  %v674_v8 = vand.u32 2147483648, %v614_v43 }
 0x2c2   :  { %v635_v46 = vsub.f32 1.0, %v634_v28  ;;  %v672_v42 = vand.u32 2147483647, %v614_v43  ;;  %vm653_vm4 = vweird.f32 %v611_v41  ;;  %v660_v11 = vor.u32 1.1754944e-38, %v659_v3 }
 0x2c3   :  { %v621_v47 = vmul.f32 %v794_v39, %v620_v44  ;;  %vm668_vm5 = vweird.f32 %v614_v43  ;;  %vm658_vm6 = vcmp.eq.f32.partialorder %v657_v6, 8.507059e+37  ;;  %v675_v14 = vor.u32 1.1754944e-38, %v674_v8 }
 0x2c4   :  { %v636_v50 = vmul.f32 %v796_v40, %v635_v46  ;;  %vm673_vm8 = vcmp.eq.f32.partialorder %v672_v42, 8.507059e+37 }
 0x2c5   :  { %v622_v52 = vadd.f32 %v794_v39, %v621_v47 }
 0x2c6   :  { %v798_v53 = vpop.eup %797  ;;  %v637_v54 = vadd.f32 %v796_v40, %v636_v50 }
 0x2c7   :  { %v800_v55 = vpop.eup %799  ;;  %v626_v33 = vsel %vm625_vm11, %v794_v39, %v622_v52  ;;  %v649_v58 = vmul.f32 %v798_v53, %v611_v41  ;;  %v617_v59 = vpop.xlane.xlu2 %616  ;;  %vm654_vm3 = vweird.f32 %v798_v53 }
 0x2c8   :  { %v631_v60 = vsel %vm628_vm14, %v630_v35, %v626_v33  ;;  %v641_v61 = vsel %vm640_vm15, %v796_v40, %v637_v54  ;;  %v664_v62 = vmul.f32 %v800_v55, %v614_v43  ;;  %801 = vrcp.f32 %v617_v59  ;;  %vm655_vm2 = vmor %vm653_vm4, %vm654_vm3 }
 0x2c9   :  { %v632_v63 = vmul.f32 %v631_v60, %v1031_v21  ;;  %v646_v0 = vsel %vm643_vm1, %v645_v57, %v641_v61  ;;  %v650_v9 = vsub.f32 1.0, %v649_v58  ;;  %vm669_vm0 = vweird.f32 %v800_v55 }
 0x2ca   :  { %v647_v1 = vmul.f32 %v646_v0, %v1033_v22  ;;  %v665_v4 = vsub.f32 1.0, %v664_v62  ;;  %vm670_vm7 = vmor %vm668_vm5, %vm669_vm0  ;;  %v689_v56 = vand.u32 2147483648, %v617_v59  ;;  %v687_v2 = vand.u32 2147483647, %v617_v59 }
 0x2cb   :  { %698 = vst.msk [vmem:[%s1084_s5] sm:$0xff] %vm473_vm12, %v632_v63  ;;  %v651_v5 = vmul.f32 %v798_v53, %v650_v9  ;;  %vm683_vm10 = vweird.f32 %v617_v59 }
 0x2cc   :  { %699 = vst.msk [vmem:[%s1084_s5 + $0x8] sm:$0xff] %vm473_vm12, %v647_v1  ;;  %v666_v10 = vmul.f32 %v800_v55, %v665_v4  ;;  %vm688_vm13 = vcmp.eq.f32.partialorder %v687_v2, 8.507059e+37 }
 0x2cd   :  { %v652_v7 = vadd.f32 %v798_v53, %v651_v5 }
 0x2ce   :  { %v667_v12 = vadd.f32 %v800_v55, %v666_v10  ;;  %v802_v13 = vpop.eup %801 }
 0x2cf   :  { %v656_v27 = vsel %vm655_vm2, %v798_v53, %v652_v7  ;;  %v679_v34 = vmul.f32 %v802_v13, %v617_v59  ;;  %vm684_vm9 = vweird.f32 %v802_v13 }
 0x2d0   :  { %v661_v17 = vsel %vm658_vm6, %v660_v11, %v656_v27  ;;  %v671_v18 = vsel %vm670_vm7, %v800_v55, %v667_v12  ;;  %vm685_vm11 = vmor %vm683_vm10, %vm684_vm9 }
 0x2d1   :  { %v662_v20 = vmul.f32 %v661_v17, %v1041_v23  ;;  %v676_v21 = vsel %vm673_vm8, %v675_v14, %v671_v18  ;;  %v680_v16 = vsub.f32 1.0, %v679_v34  ;;  %v690_v23 = vor.u32 1.1754944e-38, %v689_v56 }
 0x2d2   :  { %v677_v22 = vmul.f32 %v676_v21, %v1035_v15 }
 0x2d3   :  { %700 = vst.msk [vmem:[%s1084_s5 + $0x10] sm:$0xff] %vm473_vm12, %v662_v20  ;;  %v681_v19 = vmul.f32 %v802_v13, %v680_v16 }
 0x2d4   :  { %701 = vst.msk [vmem:[%s1084_s5 + $0x18] sm:$0xff] %vm473_vm12, %v677_v22 }
 0x2d5   :  { %v682_v24 = vadd.f32 %v802_v13, %v681_v19 }
 0x2d7   :  { %v686_v15 = vsel %vm685_vm11, %v802_v13, %v682_v24 }
 0x2d8   :  { %v691_v25 = vsel %vm688_vm13, %v690_v23, %v686_v15 }
 0x2d9   :  { %v692_v30 = vmul.f32 %v691_v25, %v1047_v29 }
 0x2db   :  { %702 = vst.msk [vmem:[%s1084_s5 + $0x20] sm:$0xff] %vm473_vm12, %v692_v30 }
 0x2dc   :  { %827 = dma.done.wait [#allocation3], 16  }
 0x2dd   :  { %828 = vsyncadd [#allocation3], 4294967280 }
 0x2de   :  { %726 = vsyncpa [#allocation3], 1 }

</bundles_post_ra>
